<compile_context>
chip_gen: v6e
topology: v6e:2x2x1
jax: 0.10.0
libtpu: 0.0.40
codegen_flags: <defaults>
</compile_context>

<pallas_src>
import functools

import jax
import jax.numpy as jnp
from jax.experimental import pallas as pl
from jax.experimental.pallas import tpu as pltpu

# Logical layer sizes of the PyTorch module Net.
DIMS = [784, 520, 320, 240, 120, 10]
# Lane-padded sizes (multiples of 128) actually used inside the kernel.
PDIMS = [896, 640, 384, 256, 128, 128]


def _mlp_kernel(x_ref,
                w1_ref, b1_ref,
                w2_ref, b2_ref,
                w3_ref, b3_ref,
                w4_ref, b4_ref,
                w5_ref, b5_ref,
                out_ref):
    """Whole forward fused: 4x (bf16 matmul -> f32 bias+relu) + final matmul+bias."""

    def layer(h_bf16, w_ref, b_ref, relu):
        acc = jnp.dot(h_bf16, w_ref[...], preferred_element_type=jnp.float32)
        acc = acc + b_ref[...]          # bias add in f32
        if relu:
            acc = jnp.maximum(acc, 0.0)
        return acc

    h = x_ref[...]                                           # (TB, 896) bf16
    h = layer(h, w1_ref, b1_ref, True).astype(jnp.bfloat16)  # (TB, 640)
    h = layer(h, w2_ref, b2_ref, True).astype(jnp.bfloat16)  # (TB, 384)
    h = layer(h, w3_ref, b3_ref, True).astype(jnp.bfloat16)  # (TB, 256)
    h = layer(h, w4_ref, b4_ref, True).astype(jnp.bfloat16)  # (TB, 128)
    # l5: no activation (logits), lane-dense 128-wide f32 store.
    out_ref[...] = layer(h, w5_ref, b5_ref, False).astype(out_ref.dtype)


def _pad_params(params):
    """Zero-pad weights/biases to PDIMS; weights -> bf16, biases stay f32."""
    padded = []
    for li, (W, b) in enumerate(params):
        d_in, d_out = DIMS[li], DIMS[li + 1]
        p_in, p_out = PDIMS[li], PDIMS[li + 1]
        Wp = jnp.zeros((p_in, p_out), jnp.float32).at[:d_in, :d_out].set(W)
        bp = jnp.zeros((1, p_out), jnp.float32).at[:, :d_out].set(b)
        padded.append((Wp.astype(jnp.bfloat16), bp))
    return padded


@functools.partial(jax.jit, static_argnames=("batch_tile",))
def net_forward(x, params, batch_tile=256):
    """params: list of (W, b) with W shaped (in, out) f32, b shaped (1, out) f32.

    For real training loops, pre-pad/cast params once outside; padding here is
    cheap and keeps the call signature identical to the PyTorch module.
    On v7x, pick a batch so the grid has >= 2 steps to use both TensorCores.
    """
    B = x.shape[0]
    x2d = x.reshape(B, DIMS[0]).astype(jnp.float32)      # == x.view(-1, 784)

    # Pad batch to a multiple of batch_tile and features 784 -> 896 (zeros).
    n_tiles = pl.cdiv(B, batch_tile)
    Bp = n_tiles * batch_tile
    xp = jnp.zeros((Bp, PDIMS[0]), jnp.bfloat16)
    xp = xp.at[:B, :DIMS[0]].set(x2d.astype(jnp.bfloat16))

    padded_params = _pad_params(params)

    # x / out are tiled over batch; every weight & bias is a full (untiled)
    # block with a constant index_map, so it stays VMEM-resident across steps.
    in_specs = [pl.BlockSpec((batch_tile, PDIMS[0]), lambda i: (i, 0))]
    flat_args = [xp]
    for li, (W, b) in enumerate(padded_params):
        p_in, p_out = PDIMS[li], PDIMS[li + 1]
        in_specs.append(pl.BlockSpec((p_in, p_out), lambda i: (0, 0)))
        in_specs.append(pl.BlockSpec((1, p_out), lambda i: (0, 0)))
        flat_args.append(W)
        flat_args.append(b)

    out_padded = pl.pallas_call(
        _mlp_kernel,
        out_shape=jax.ShapeDtypeStruct((Bp, PDIMS[-1]), jnp.float32),
        grid_spec=pltpu.PrefetchScalarGridSpec(
            num_scalar_prefetch=0,
            grid=(n_tiles,),
            in_specs=in_specs,
            out_specs=pl.BlockSpec((batch_tile, PDIMS[-1]), lambda i: (i, 0)),
        ),
        compiler_params=pltpu.CompilerParams(
            dimension_semantics=("parallel",),
            vmem_limit_bytes=32 * 1024 * 1024,
        ),
    )(*flat_args)

    # Strip batch + lane padding: real logits are the first 10 columns.
    return out_padded[:B, :DIMS[-1]]


def init_params(key):
    """Deterministic init mimicking nn.Linear default: U(-1/sqrt(in), 1/sqrt(in))."""
    params = []
    for li in range(len(DIMS) - 1):
        d_in, d_out = DIMS[li], DIMS[li + 1]
        key, kw, kb = jax.random.split(key, 3)
        bound = 1.0 / jnp.sqrt(jnp.float32(d_in))
        # Stored transposed (in, out) so the kernel does x @ W + b.
        W = jax.random.uniform(kw, (d_in, d_out), jnp.float32, -bound, bound)
        b = jax.random.uniform(kb, (1, d_out), jnp.float32, -bound, bound)
        params.append((W, b))
    return params


def reference_forward_f32(x, params):
    """Pure-JAX f32 reference matching the PyTorch forward exactly."""
    h = x.reshape(x.shape[0], DIMS[0]).astype(jnp.float32)
    for li, (W, b) in enumerate(params):
        h = h @ W + b
        if li < len(params) - 1:
            h = jnp.maximum(h, 0.0)
    return h


def reference_forward_bf16(x, params):
    """Pure-JAX reference with the same bf16-operand / f32-accumulation math."""
    h = x.reshape(x.shape[0], DIMS[0]).astype(jnp.bfloat16)
    for li, (W, b) in enumerate(params):
        acc = jnp.dot(h, W.astype(jnp.bfloat16),
                      preferred_element_type=jnp.float32) + b
        if li < len(params) - 1:
            h = jnp.maximum(acc, 0.0).astype(jnp.bfloat16)
        else:
            h = acc
    return h


if __name__ == "__main__":
    key = jax.random.PRNGKey(0)
    key, kx = jax.random.split(key)

    # MNIST-like NCHW input at small batch: (8, 1, 28, 28) -> view(-1, 784).
    x = jax.random.normal(kx, (8, 1, 28, 28), dtype=jnp.float32)
    params = init_params(key)

    out = net_forward(x, params)
    out = jax.block_until_ready(out)
    assert out.shape == (8, 10), out.shape

    # Tight check vs. a reference using identical bf16/f32 numerics.
    ref_bf16 = reference_forward_bf16(x, params)
    assert jnp.allclose(out, ref_bf16, atol=2e-2, rtol=2e-2), \
        "mismatch vs bf16 reference"

    # Loose sanity check vs. the exact f32 PyTorch-equivalent forward
    # (bf16 MXU operands introduce small quantization error).
    ref_f32 = reference_forward_f32(x, params)
    assert jnp.allclose(out, ref_f32, atol=5e-2, rtol=5e-2), \
        "mismatch vs f32 reference"

    print("KERNEL_OK")
</pallas_src>

<mosaic_0001>
module attributes {stable_mosaic.version = 11 : i64} {
  func.func @_mlp_kernel(%arg0: i32, %arg1: memref<256x896xbf16, #tpu.memory_space<vmem>>, %arg2: memref<896x640xbf16, #tpu.memory_space<vmem>>, %arg3: memref<1x640xf32, #tpu.memory_space<vmem>>, %arg4: memref<640x384xbf16, #tpu.memory_space<vmem>>, %arg5: memref<1x384xf32, #tpu.memory_space<vmem>>, %arg6: memref<384x256xbf16, #tpu.memory_space<vmem>>, %arg7: memref<1x256xf32, #tpu.memory_space<vmem>>, %arg8: memref<256x128xbf16, #tpu.memory_space<vmem>>, %arg9: memref<1x128xf32, #tpu.memory_space<vmem>>, %arg10: memref<128x128xbf16, #tpu.memory_space<vmem>>, %arg11: memref<1x128xf32, #tpu.memory_space<vmem>>, %arg12: memref<256x128xf32, #tpu.memory_space<vmem>>) attributes {dimension_semantics = [#tpu.dimension_semantics<parallel>], iteration_bounds = array<i64: 1>, scalar_prefetch = 0 : i64, scratch_operands = 0 : i64, tpu.core_type = #tpu.core_type<tc>, window_params = [{transform_indices = @transform_0, window_bounds = array<i64: 256, 896>}, {pipeline_mode = #tpu.pipeline_mode<synchronous>, transform_indices = @transform_1, window_bounds = array<i64: 896, 640>}, {pipeline_mode = #tpu.pipeline_mode<synchronous>, transform_indices = @transform_2, window_bounds = array<i64: 1, 640>}, {pipeline_mode = #tpu.pipeline_mode<synchronous>, transform_indices = @transform_3, window_bounds = array<i64: 640, 384>}, {pipeline_mode = #tpu.pipeline_mode<synchronous>, transform_indices = @transform_4, window_bounds = array<i64: 1, 384>}, {pipeline_mode = #tpu.pipeline_mode<synchronous>, transform_indices = @transform_5, window_bounds = array<i64: 384, 256>}, {pipeline_mode = #tpu.pipeline_mode<synchronous>, transform_indices = @transform_6, window_bounds = array<i64: 1, 256>}, {pipeline_mode = #tpu.pipeline_mode<synchronous>, transform_indices = @transform_7, window_bounds = array<i64: 256, 128>}, {pipeline_mode = #tpu.pipeline_mode<synchronous>, transform_indices = @transform_8, window_bounds = array<i64: 1, 128>}, {pipeline_mode = #tpu.pipeline_mode<synchronous>, transform_indices = @transform_9, window_bounds = array<i64: 128, 128>}, {pipeline_mode = #tpu.pipeline_mode<synchronous>, transform_indices = @transform_10, window_bounds = array<i64: 1, 128>}, {transform_indices = @transform_11, window_bounds = array<i64: 256, 128>}]} {
    %c0 = arith.constant 0 : index
    %c0_0 = arith.constant 0 : index
    %0 = vector.load %arg1[%c0, %c0_0] : memref<256x896xbf16, #tpu.memory_space<vmem>>, vector<256x896xbf16>
    %c0_1 = arith.constant 0 : index
    %c0_2 = arith.constant 0 : index
    %1 = vector.load %arg2[%c0_1, %c0_2] : memref<896x640xbf16, #tpu.memory_space<vmem>>, vector<896x640xbf16>
    %cst = arith.constant dense<0.000000e+00> : vector<256x640xf32>
    %2 = tpu.matmul %0, %1, %cst {dimension_numbers = #tpu.dot_dimension_numbers<[1], [0], [0], [1], [0, 0, 1, 1], [], []>} : vector<256x896xbf16>, vector<896x640xbf16>, vector<256x640xf32> -> vector<256x640xf32>
    %c0_3 = arith.constant 0 : index
    %c0_4 = arith.constant 0 : index
    %3 = vector.load %arg3[%c0_3, %c0_4] : memref<1x640xf32, #tpu.memory_space<vmem>>, vector<1x640xf32>
    %4 = vector.broadcast %3 : vector<1x640xf32> to vector<256x640xf32>
    %5 = arith.addf %2, %4 : vector<256x640xf32>
    %cst_5 = arith.constant 0.000000e+00 : f32
    %6 = vector.broadcast %cst_5 : f32 to vector<256x640xf32>
    %7 = arith.maximumf %5, %6 : vector<256x640xf32>
    %8 = arith.truncf %7 : vector<256x640xf32> to vector<256x640xbf16>
    %c0_6 = arith.constant 0 : index
    %c0_7 = arith.constant 0 : index
    %9 = vector.load %arg4[%c0_6, %c0_7] : memref<640x384xbf16, #tpu.memory_space<vmem>>, vector<640x384xbf16>
    %cst_8 = arith.constant dense<0.000000e+00> : vector<256x384xf32>
    %10 = tpu.matmul %8, %9, %cst_8 {dimension_numbers = #tpu.dot_dimension_numbers<[1], [0], [0], [1], [0, 0, 1, 1], [], []>} : vector<256x640xbf16>, vector<640x384xbf16>, vector<256x384xf32> -> vector<256x384xf32>
    %c0_9 = arith.constant 0 : index
    %c0_10 = arith.constant 0 : index
    %11 = vector.load %arg5[%c0_9, %c0_10] : memref<1x384xf32, #tpu.memory_space<vmem>>, vector<1x384xf32>
    %12 = vector.broadcast %11 : vector<1x384xf32> to vector<256x384xf32>
    %13 = arith.addf %10, %12 : vector<256x384xf32>
    %cst_11 = arith.constant 0.000000e+00 : f32
    %14 = vector.broadcast %cst_11 : f32 to vector<256x384xf32>
    %15 = arith.maximumf %13, %14 : vector<256x384xf32>
    %16 = arith.truncf %15 : vector<256x384xf32> to vector<256x384xbf16>
    %c0_12 = arith.constant 0 : index
    %c0_13 = arith.constant 0 : index
    %17 = vector.load %arg6[%c0_12, %c0_13] : memref<384x256xbf16, #tpu.memory_space<vmem>>, vector<384x256xbf16>
    %cst_14 = arith.constant dense<0.000000e+00> : vector<256x256xf32>
    %18 = tpu.matmul %16, %17, %cst_14 {dimension_numbers = #tpu.dot_dimension_numbers<[1], [0], [0], [1], [0, 0, 1, 1], [], []>} : vector<256x384xbf16>, vector<384x256xbf16>, vector<256x256xf32> -> vector<256x256xf32>
    %c0_15 = arith.constant 0 : index
    %c0_16 = arith.constant 0 : index
    %19 = vector.load %arg7[%c0_15, %c0_16] : memref<1x256xf32, #tpu.memory_space<vmem>>, vector<1x256xf32>
    %20 = vector.broadcast %19 : vector<1x256xf32> to vector<256x256xf32>
    %21 = arith.addf %18, %20 : vector<256x256xf32>
    %cst_17 = arith.constant 0.000000e+00 : f32
    %22 = vector.broadcast %cst_17 : f32 to vector<256x256xf32>
    %23 = arith.maximumf %21, %22 : vector<256x256xf32>
    %24 = arith.truncf %23 : vector<256x256xf32> to vector<256x256xbf16>
    %c0_18 = arith.constant 0 : index
    %c0_19 = arith.constant 0 : index
    %25 = vector.load %arg8[%c0_18, %c0_19] : memref<256x128xbf16, #tpu.memory_space<vmem>>, vector<256x128xbf16>
    %cst_20 = arith.constant dense<0.000000e+00> : vector<256x128xf32>
    %26 = tpu.matmul %24, %25, %cst_20 {dimension_numbers = #tpu.dot_dimension_numbers<[1], [0], [0], [1], [0, 0, 1, 1], [], []>} : vector<256x256xbf16>, vector<256x128xbf16>, vector<256x128xf32> -> vector<256x128xf32>
    %c0_21 = arith.constant 0 : index
    %c0_22 = arith.constant 0 : index
    %27 = vector.load %arg9[%c0_21, %c0_22] : memref<1x128xf32, #tpu.memory_space<vmem>>, vector<1x128xf32>
    %28 = vector.broadcast %27 : vector<1x128xf32> to vector<256x128xf32>
    %29 = arith.addf %26, %28 : vector<256x128xf32>
    %cst_23 = arith.constant 0.000000e+00 : f32
    %30 = vector.broadcast %cst_23 : f32 to vector<256x128xf32>
    %31 = arith.maximumf %29, %30 : vector<256x128xf32>
    %32 = arith.truncf %31 : vector<256x128xf32> to vector<256x128xbf16>
    %c0_24 = arith.constant 0 : index
    %c0_25 = arith.constant 0 : index
    %33 = vector.load %arg10[%c0_24, %c0_25] : memref<128x128xbf16, #tpu.memory_space<vmem>>, vector<128x128xbf16>
    %cst_26 = arith.constant dense<0.000000e+00> : vector<256x128xf32>
    %34 = tpu.matmul %32, %33, %cst_26 {dimension_numbers = #tpu.dot_dimension_numbers<[1], [0], [0], [1], [0, 0, 1, 1], [], []>} : vector<256x128xbf16>, vector<128x128xbf16>, vector<256x128xf32> -> vector<256x128xf32>
    %c0_27 = arith.constant 0 : index
    %c0_28 = arith.constant 0 : index
    %35 = vector.load %arg11[%c0_27, %c0_28] : memref<1x128xf32, #tpu.memory_space<vmem>>, vector<1x128xf32>
    %36 = vector.broadcast %35 : vector<1x128xf32> to vector<256x128xf32>
    %37 = arith.addf %34, %36 : vector<256x128xf32>
    %c0_29 = arith.constant 0 : index
    %c0_30 = arith.constant 0 : index
    %38 = vector.load %arg12[%c0_29, %c0_30] : memref<256x128xf32, #tpu.memory_space<vmem>>, vector<256x128xf32>
    tpu.vector_store %arg12[%c0_29, %c0_30], %37 {strides = array<i32>} : memref<256x128xf32, #tpu.memory_space<vmem>>, vector<256x128xf32>,
    return
  }
  func.func @transform_0(%arg0: i32) -> (i32, i32) {
    %c0_i32 = arith.constant 0 : i32
    %c0_i32_0 = arith.constant 0 : i32
    return %arg0, %c0_i32 : i32, i32
  }
  func.func @transform_1(%arg0: i32) -> (i32, i32) {
    %c0_i32 = arith.constant 0 : i32
    %c0_i32_0 = arith.constant 0 : i32
    %c0_i32_1 = arith.constant 0 : i32
    return %c0_i32, %c0_i32_0 : i32, i32
  }
  func.func @transform_2(%arg0: i32) -> (i32, i32) {
    %c0_i32 = arith.constant 0 : i32
    %c0_i32_0 = arith.constant 0 : i32
    %c0_i32_1 = arith.constant 0 : i32
    return %c0_i32, %c0_i32_0 : i32, i32
  }
  func.func @transform_3(%arg0: i32) -> (i32, i32) {
    %c0_i32 = arith.constant 0 : i32
    %c0_i32_0 = arith.constant 0 : i32
    %c0_i32_1 = arith.constant 0 : i32
    return %c0_i32, %c0_i32_0 : i32, i32
  }
  func.func @transform_4(%arg0: i32) -> (i32, i32) {
    %c0_i32 = arith.constant 0 : i32
    %c0_i32_0 = arith.constant 0 : i32
    %c0_i32_1 = arith.constant 0 : i32
    return %c0_i32, %c0_i32_0 : i32, i32
  }
  func.func @transform_5(%arg0: i32) -> (i32, i32) {
    %c0_i32 = arith.constant 0 : i32
    %c0_i32_0 = arith.constant 0 : i32
    %c0_i32_1 = arith.constant 0 : i32
    return %c0_i32, %c0_i32_0 : i32, i32
  }
  func.func @transform_6(%arg0: i32) -> (i32, i32) {
    %c0_i32 = arith.constant 0 : i32
    %c0_i32_0 = arith.constant 0 : i32
    %c0_i32_1 = arith.constant 0 : i32
    return %c0_i32, %c0_i32_0 : i32, i32
  }
  func.func @transform_7(%arg0: i32) -> (i32, i32) {
    %c0_i32 = arith.constant 0 : i32
    %c0_i32_0 = arith.constant 0 : i32
    %c0_i32_1 = arith.constant 0 : i32
    return %c0_i32, %c0_i32_0 : i32, i32
  }
  func.func @transform_8(%arg0: i32) -> (i32, i32) {
    %c0_i32 = arith.constant 0 : i32
    %c0_i32_0 = arith.constant 0 : i32
    %c0_i32_1 = arith.constant 0 : i32
    return %c0_i32, %c0_i32_0 : i32, i32
  }
  func.func @transform_9(%arg0: i32) -> (i32, i32) {
    %c0_i32 = arith.constant 0 : i32
    %c0_i32_0 = arith.constant 0 : i32
    %c0_i32_1 = arith.constant 0 : i32
    return %c0_i32, %c0_i32_0 : i32, i32
  }
  func.func @transform_10(%arg0: i32) -> (i32, i32) {
    %c0_i32 = arith.constant 0 : i32
    %c0_i32_0 = arith.constant 0 : i32
    %c0_i32_1 = arith.constant 0 : i32
    return %c0_i32, %c0_i32_0 : i32, i32
  }
  func.func @transform_11(%arg0: i32) -> (i32, i32) {
    %c0_i32 = arith.constant 0 : i32
    %c0_i32_0 = arith.constant 0 : i32
    return %arg0, %c0_i32 : i32, i32
  }
}

</mosaic_0001>

<bundles_post_ra>
// kernel: net_forward.1
= control target key start
LH: loop header
LB: loop body
LE: loop exit
PB: predicated region body
PF: predicated region fallthrough
CT: control target
= control target key end

     0   :  { %s16220_s1 = inlined_call_operand.vmem [shape: bf16[896,640], index: 1, kind: input, shape index: {}]   ;;  %s16221_s0 = inlined_call_operand.vmem [shape: bf16[256,896], index: 0, kind: input, shape index: {}]   ;;  %s16222_s2 = inlined_call_operand.vmem [shape: f32[1,640], index: 2, kind: input, shape index: {}]   ;;  %s16223_s3 = inlined_call_operand.vmem [shape: bf16[640,384], index: 3, kind: input, shape index: {}]   ;;  %s16224_s5 = inlined_call_operand.vmem [shape: bf16[384,256], index: 5, kind: input, shape index: {}]   ;;  %s16225_s4 = inlined_call_operand.vmem [shape: f32[1,384], index: 4, kind: input, shape index: {}]   ;;  %s16226_s7 = inlined_call_operand.vmem [shape: bf16[256,128], index: 7, kind: input, shape index: {}]   ;;  %s16227_s6 = inlined_call_operand.vmem [shape: f32[1,256], index: 6, kind: input, shape index: {}]   ;;  %s16228_s9 = inlined_call_operand.vmem [shape: bf16[128,128], index: 9, kind: input, shape index: {}]   ;;  %s16229_s8 = inlined_call_operand.vmem [shape: f32[1,128], index: 8, kind: input, shape index: {}]   ;;  %s16230_s10 = inlined_call_operand.vmem [shape: f32[1,128], index: 10, kind: input, shape index: {}]   ;;  %s16231_s11 = inlined_call_operand.vmem [shape: f32[256,128], index: 11, kind: output, shape index: {}]  }
   0x1   :  { %v9914_v0 = vld [vmem:[%s16220_s1 + $0x11c] ss:$20 sps:$4 sm:$0xff]   ;;  %v9918_v2 = vld [vmem:[%s16220_s1 + $0x118] ss:$20 sps:$4 sm:$0xff]   ;;  %v9920_v4 = vld [vmem:[%s16220_s1 + $0xf4] ss:$20 sps:$4 sm:$0xff]  }
   0x2   :  { %v9916_v1 = vld [vmem:[%s16220_s1 + $0x39c] ss:$20 sps:$4 sm:$0xff]   ;;  %2562 = vmatprep.subr.bf16.mxu0 %v9914_v0  ;;  %v9919_v3 = vld [vmem:[%s16220_s1 + $0x398] ss:$20 sps:$4 sm:$0xff]   ;;  %v9922_v5 = vld [vmem:[%s16220_s1 + $0x374] ss:$20 sps:$4 sm:$0xff]  }
   0x3   :  { %2755 = vmatprep.subr.bf16.mxu1 %v9916_v1  ;;  %2563 = vmatpush1.bf16.msra.mxu0 %v9918_v2  ;;  %v9924_v6 = vld [vmem:[%s16220_s1 + $0xf0] ss:$20 sps:$4 sm:$0xff]   ;;  %v9926_v8 = vld [vmem:[%s16220_s1 + $0xcc] ss:$20 sps:$4 sm:$0xff]   ;;  %v9930_v10 = vld [vmem:[%s16220_s1 + $0xc8] ss:$20 sps:$4 sm:$0xff]  }
   0x4   :  { %2756 = vmatpush1.bf16.msra.mxu1 %v9919_v3  ;;  %2564 = vmatprep.subr.bf16.mxu0 %v9920_v4  ;;  %v9925_v7 = vld [vmem:[%s16220_s1 + $0x370] ss:$20 sps:$4 sm:$0xff]   ;;  %v9928_v9 = vld [vmem:[%s16220_s1 + $0x34c] ss:$20 sps:$4 sm:$0xff]   ;;  %v9931_v11 = vld [vmem:[%s16220_s1 + $0x348] ss:$20 sps:$4 sm:$0xff]  }
   0x5   :  { %2757 = vmatprep.subr.bf16.mxu1 %v9922_v5  ;;  %v9932_v12 = vld [vmem:[%s16220_s1 + $0xa4] ss:$20 sps:$4 sm:$0xff]   ;;  %v9936_v14 = vld [vmem:[%s16220_s1 + $0xa0] ss:$20 sps:$4 sm:$0xff]   ;;  %v9938_v16 = vld [vmem:[%s16220_s1 + $0x7c] ss:$20 sps:$4 sm:$0xff]  }
   0x6   :  { %v9934_v13 = vld [vmem:[%s16220_s1 + $0x324] ss:$20 sps:$4 sm:$0xff]   ;;  %v9937_v15 = vld [vmem:[%s16220_s1 + $0x320] ss:$20 sps:$4 sm:$0xff]   ;;  %v9940_v17 = vld [vmem:[%s16220_s1 + $0x2fc] ss:$20 sps:$4 sm:$0xff]  }
   0x7   :  { %2565 = vmatpush1.bf16.msra.mxu0 %v9924_v6  ;;  %v9942_v18 = vld [vmem:[%s16220_s1 + $0x78] ss:$20 sps:$4 sm:$0xff]   ;;  %v9944_v20 = vld [vmem:[%s16220_s1 + $0x54] ss:$20 sps:$4 sm:$0xff]   ;;  %v9948_v22 = vld [vmem:[%s16220_s1 + $0x50] ss:$20 sps:$4 sm:$0xff]  }
   0x8   :  { %2758 = vmatpush1.bf16.msra.mxu1 %v9925_v7  ;;  %2566 = vmatprep.subr.bf16.mxu0 %v9926_v8  ;;  %v9943_v19 = vld [vmem:[%s16220_s1 + $0x2f8] ss:$20 sps:$4 sm:$0xff]   ;;  %v9946_v21 = vld [vmem:[%s16220_s1 + $0x2d4] ss:$20 sps:$4 sm:$0xff]   ;;  %v9949_v23 = vld [vmem:[%s16220_s1 + $0x2d0] ss:$20 sps:$4 sm:$0xff]  }
   0x9   :  { %2759 = vmatprep.subr.bf16.mxu1 %v9928_v9  ;;  %v9950_v24 = vld [vmem:[%s16220_s1 + $0x2c] ss:$20 sps:$4 sm:$0xff]   ;;  %v9954_v26 = vld [vmem:[%s16220_s1 + $0x28] ss:$20 sps:$4 sm:$0xff]   ;;  %v9956_v28 = vld [vmem:[%s16220_s1 + $0x4] ss:$20 sps:$4 sm:$0xff]  }
   0xa   :  { %v9952_v25 = vld [vmem:[%s16220_s1 + $0x2ac] ss:$20 sps:$4 sm:$0xff]   ;;  %v9955_v27 = vld [vmem:[%s16220_s1 + $0x2a8] ss:$20 sps:$4 sm:$0xff]   ;;  %v9958_v29 = vld [vmem:[%s16220_s1 + $0x284] ss:$20 sps:$4 sm:$0xff]  }
   0xb   :  { %2567 = vmatpush1.bf16.msra.mxu0 %v9930_v10  ;;  %v9960_v30 = vld [vmem:[%s16220_s1] ss:$20 sps:$4 sm:$0xff]   ;;  %v9962_v32 = vld [vmem:[%s16220_s1 + $0x25c] ss:$20 sps:$4 sm:$0xff]   ;;  %v9966_v34 = vld [vmem:[%s16220_s1 + $0x258] ss:$20 sps:$4 sm:$0xff]  }
   0xc   :  { %2760 = vmatpush1.bf16.msra.mxu1 %v9931_v11  ;;  %2568 = vmatprep.subr.bf16.mxu0 %v9932_v12  ;;  %v9961_v31 = vld [vmem:[%s16220_s1 + $0x280] ss:$20 sps:$4 sm:$0xff]   ;;  %v9964_v33 = vld [vmem:[%s16220_s1 + $0x4dc] ss:$20 sps:$4 sm:$0xff]   ;;  %v9967_v35 = vld [vmem:[%s16220_s1 + $0x4d8] ss:$20 sps:$4 sm:$0xff]  }
   0xd   :  { %2761 = vmatprep.subr.bf16.mxu1 %v9934_v13  ;;  %v9968_v36 = vld [vmem:[%s16220_s1 + $0x234] ss:$20 sps:$4 sm:$0xff]   ;;  %v9972_v38 = vld [vmem:[%s16220_s1 + $0x230] ss:$20 sps:$4 sm:$0xff]   ;;  %v9974_v40 = vld [vmem:[%s16220_s1 + $0x20c] ss:$20 sps:$4 sm:$0xff]  }
   0xe   :  { %v9970_v37 = vld [vmem:[%s16220_s1 + $0x4b4] ss:$20 sps:$4 sm:$0xff]   ;;  %v9973_v39 = vld [vmem:[%s16220_s1 + $0x4b0] ss:$20 sps:$4 sm:$0xff]   ;;  %v9976_v41 = vld [vmem:[%s16220_s1 + $0x48c] ss:$20 sps:$4 sm:$0xff]  }
   0xf   :  { %2569 = vmatpush1.bf16.msra.mxu0 %v9936_v14  ;;  %v9978_v42 = vld [vmem:[%s16220_s1 + $0x208] ss:$20 sps:$4 sm:$0xff]   ;;  %v9980_v44 = vld [vmem:[%s16220_s1 + $0x1e4] ss:$20 sps:$4 sm:$0xff]   ;;  %v9984_v46 = vld [vmem:[%s16220_s1 + $0x1e0] ss:$20 sps:$4 sm:$0xff]  }
  0x10   :  { %2762 = vmatpush1.bf16.msra.mxu1 %v9937_v15  ;;  %2570 = vmatprep.subr.bf16.mxu0 %v9938_v16  ;;  %v9979_v43 = vld [vmem:[%s16220_s1 + $0x488] ss:$20 sps:$4 sm:$0xff]   ;;  %v9982_v45 = vld [vmem:[%s16220_s1 + $0x464] ss:$20 sps:$4 sm:$0xff]   ;;  %v9985_v47 = vld [vmem:[%s16220_s1 + $0x460] ss:$20 sps:$4 sm:$0xff]  }
  0x11   :  { %2763 = vmatprep.subr.bf16.mxu1 %v9940_v17  ;;  %v10010_v48 = vld [vmem:[%s16221_s0 + $0x4] ss:$28 sps:$4 sm:$0xff]   ;;  %v9986_v49 = vld [vmem:[%s16220_s1 + $0x1bc] ss:$20 sps:$4 sm:$0xff]   ;;  %v10012_v50 = vld [vmem:[%s16221_s0 + $0xc] ss:$28 sps:$4 sm:$0xff]  }
  0x12   :  { %v9988_v51 = vld [vmem:[%s16220_s1 + $0x43c] ss:$20 sps:$4 sm:$0xff]   ;;  %2594 = vmatprep.mubr.bf16.mxu0 %v10010_v48  ;;  %2787 = vmatprep.mubr.bf16.mxu1 %v10012_v50  ;;  %v9990_v52 = vld [vmem:[%s16220_s1 + $0x1b8] ss:$20 sps:$4 sm:$0xff]   ;;  %v9992_v54 = vld [vmem:[%s16220_s1 + $0x194] ss:$20 sps:$4 sm:$0xff]  }
  0x13   :  { %2571 = vmatpush1.bf16.msra.mxu0 %v9942_v18  ;;  %v9991_v53 = vld [vmem:[%s16220_s1 + $0x438] ss:$20 sps:$4 sm:$0xff]   ;;  %v9994_v55 = vld [vmem:[%s16220_s1 + $0x414] ss:$20 sps:$4 sm:$0xff]   ;;  %v9996_v56 = vld [vmem:[%s16220_s1 + $0x190] ss:$20 sps:$4 sm:$0xff]  }
  0x14   :  { %2764 = vmatpush1.bf16.msra.mxu1 %v9943_v19  ;;  %2572 = vmatprep.subr.bf16.mxu0 %v9944_v20  ;;  %v9997_v57 = vld [vmem:[%s16220_s1 + $0x410] ss:$20 sps:$4 sm:$0xff]   ;;  %v9998_v58 = vld [vmem:[%s16220_s1 + $0x16c] ss:$20 sps:$4 sm:$0xff]   ;;  %v10002_v60 = vld [vmem:[%s16220_s1 + $0x168] ss:$20 sps:$4 sm:$0xff]  }
  0x15   :  { %2765 = vmatprep.subr.bf16.mxu1 %v9946_v21  ;;  %v10000_v59 = vld [vmem:[%s16220_s1 + $0x3ec] ss:$20 sps:$4 sm:$0xff]   ;;  %v10003_v61 = vld [vmem:[%s16220_s1 + $0x3e8] ss:$20 sps:$4 sm:$0xff]   ;;  %v10004_v62 = vld [vmem:[%s16220_s1 + $0x144] ss:$20 sps:$4 sm:$0xff]  }
  0x16   :  { %v10006_v63 = vld [vmem:[%s16220_s1 + $0x3c4] ss:$20 sps:$4 sm:$0xff]   ;;  %v10008_v0 = vld [vmem:[%s16220_s1 + $0x140] ss:$20 sps:$4 sm:$0xff]   ;;  %v10018_v2 = vld [vmem:[%s16220_s1 + $0x61c] ss:$20 sps:$4 sm:$0xff]  }
  0x17   :  { %2573 = vmatpush1.bf16.msra.mxu0 %v9948_v22  ;;  %v10009_v1 = vld [vmem:[%s16220_s1 + $0x3c0] ss:$20 sps:$4 sm:$0xff]   ;;  %v10015_v4 = vld [vmem:[%s16221_s0 + $0x8] ss:$28 sps:$4 sm:$0xff]   ;;  %v10016_v5 = vld [vmem:[%s16220_s1 + $0x618] ss:$20 sps:$4 sm:$0xff]  }
  0x18   :  { %2766 = vmatpush1.bf16.msra.mxu1 %v9949_v23  ;;  %2574 = vmatprep.subr.bf16.mxu0 %v9950_v24  ;;  %v10014_v3 = vld [vmem:[%s16221_s0] ss:$28 sps:$4 sm:$0xff]   ;;  %v10027_v8 = vld [vmem:[%s16220_s1 + $0x5f4] ss:$20 sps:$4 sm:$0xff]   ;;  %v10025_v9 = vld [vmem:[%s16220_s1 + $0x5f0] ss:$20 sps:$4 sm:$0xff]  }
  0x19   :  { %2767 = vmatprep.subr.bf16.mxu1 %v9952_v25  ;;  %v10019_v6 = vld [vmem:[%s16221_s0 + $0x3c] ss:$28 sps:$4 sm:$0xff]   ;;  %v10021_v7 = vld [vmem:[%s16221_s0 + $0x44] ss:$28 sps:$4 sm:$0xff]   ;;  %v10028_v13 = vld [vmem:[%s16221_s0 + $0x74] ss:$28 sps:$4 sm:$0xff]  }
  0x1a   :  { %v10036_v10 = vld [vmem:[%s16220_s1 + $0x5cc] ss:$20 sps:$4 sm:$0xff]   ;;  %v10023_v11 = vld [vmem:[%s16221_s0 + $0x38] ss:$28 sps:$4 sm:$0xff]   ;;  %v10034_v15 = vld [vmem:[%s16220_s1 + $0x5c8] ss:$20 sps:$4 sm:$0xff]  }
  0x1b   :  { %2575 = vmatpush1.bf16.msra.mxu0 %v9954_v26  ;;  %v10024_v12 = vld [vmem:[%s16221_s0 + $0x40] ss:$28 sps:$4 sm:$0xff]   ;;  %v10045_v16 = vld [vmem:[%s16220_s1 + $0x5a4] ss:$20 sps:$4 sm:$0xff]   ;;  %v10032_v18 = vld [vmem:[%s16221_s0 + $0x70] ss:$28 sps:$4 sm:$0xff]  }
  0x1c   :  { %2768 = vmatpush1.bf16.msra.mxu1 %v9955_v27  ;;  %2576 = vmatprep.subr.bf16.mxu0 %v9956_v28  ;;  %v10030_v14 = vld [vmem:[%s16221_s0 + $0x7c] ss:$28 sps:$4 sm:$0xff]   ;;  %v10043_v17 = vld [vmem:[%s16220_s1 + $0x5a0] ss:$20 sps:$4 sm:$0xff]   ;;  %v10037_v21 = vld [vmem:[%s16221_s0 + $0xac] ss:$28 sps:$4 sm:$0xff]  }
  0x1d   :  { %2769 = vmatprep.subr.bf16.mxu1 %v9958_v29  ;;  %v10054_v19 = vld [vmem:[%s16220_s1 + $0x57c] ss:$20 sps:$4 sm:$0xff]   ;;  %v10033_v20 = vld [vmem:[%s16221_s0 + $0x78] ss:$28 sps:$4 sm:$0xff]   ;;  %v10041_v26 = vld [vmem:[%s16221_s0 + $0xa8] ss:$28 sps:$4 sm:$0xff]  }
  0x1e   :  { %v10039_v22 = vld [vmem:[%s16221_s0 + $0xb4] ss:$28 sps:$4 sm:$0xff]   ;;  %v10052_v23 = vld [vmem:[%s16220_s1 + $0x578] ss:$20 sps:$4 sm:$0xff]   ;;  %v10046_v29 = vld [vmem:[%s16221_s0 + $0xe4] ss:$28 sps:$4 sm:$0xff]  }
  0x1f   :  { %2577 = vmatpush1.bf16.msra.mxu0 %v9960_v30  ;;  %v10063_v24 = vld [vmem:[%s16220_s1 + $0x554] ss:$20 sps:$4 sm:$0xff]   ;;  %v10061_v25 = vld [vmem:[%s16220_s1 + $0x550] ss:$20 sps:$4 sm:$0xff]   ;;  %v10072_v27 = vld [vmem:[%s16220_s1 + $0x52c] ss:$20 sps:$4 sm:$0xff]  }
  0x20   :  { %2770 = vmatpush1.bf16.msra.mxu1 %v9961_v31  ;;  %2578 = vmatprep.subr.bf16.mxu0 %v9962_v32  ;;  %v10042_v28 = vld [vmem:[%s16221_s0 + $0xb0] ss:$28 sps:$4 sm:$0xff]   ;;  %v10070_v31 = vld [vmem:[%s16220_s1 + $0x528] ss:$20 sps:$4 sm:$0xff]   ;;  %v10081_v32 = vld [vmem:[%s16220_s1 + $0x504] ss:$20 sps:$4 sm:$0xff]  }
  0x21   :  { %2771 = vmatprep.subr.bf16.mxu1 %v9964_v33  ;;  %v10048_v30 = vld [vmem:[%s16221_s0 + $0xec] ss:$28 sps:$4 sm:$0xff]   ;;  %v10079_v33 = vld [vmem:[%s16220_s1 + $0x500] ss:$20 sps:$4 sm:$0xff]   ;;  %v10117_v48 = vld [vmem:[%s16220_s1 + $0x6e4] ss:$20 sps:$4 sm:$0xff]  }
  0x22   :  { %v10068_v50 = vld [vmem:[%s16221_s0 + $0x150] ss:$28 sps:$4 sm:$0xff]  }
  0x23   :  { %2579 = vmatpush2.bf16.msra.mxu0 %v9966_v34  ;;  %v10050_v34 = vld [vmem:[%s16221_s0 + $0xe0] ss:$28 sps:$4 sm:$0xff]  }
  0x24   :  { %2772 = vmatpush2.bf16.msra.mxu1 %v9967_v35  ;;  %2580 = vmatprep.subr.bf16.mxu0 %v9968_v36  ;;  %v10090_v35 = vld [vmem:[%s16220_s1 + $0x75c] ss:$20 sps:$4 sm:$0xff]   ;;  %v10051_v36 = vld [vmem:[%s16221_s0 + $0xe8] ss:$28 sps:$4 sm:$0xff]  }
  0x25   :  { %2773 = vmatprep.subr.bf16.mxu1 %v9970_v37  ;;  %v10055_v37 = vld [vmem:[%s16221_s0 + $0x11c] ss:$28 sps:$4 sm:$0xff]  }
  0x27   :  { %2581 = vmatpush2.bf16.msra.mxu0 %v9972_v38  ;;  %v10057_v38 = vld [vmem:[%s16221_s0 + $0x124] ss:$28 sps:$4 sm:$0xff]  }
  0x28   :  { %2774 = vmatpush2.bf16.msra.mxu1 %v9973_v39  ;;  %2582 = vmatprep.subr.bf16.mxu0 %v9974_v40  ;;  %v10088_v39 = vld [vmem:[%s16220_s1 + $0x758] ss:$20 sps:$4 sm:$0xff]   ;;  %v10099_v40 = vld [vmem:[%s16220_s1 + $0x734] ss:$20 sps:$4 sm:$0xff]  }
  0x29   :  { %2775 = vmatprep.subr.bf16.mxu1 %v9976_v41  ;;  %v10097_v41 = vld [vmem:[%s16220_s1 + $0x730] ss:$20 sps:$4 sm:$0xff]  }
  0x2b   :  { %2583 = vmatpush2.bf16.msra.mxu0 %v9978_v42  ;;  %v10059_v42 = vld [vmem:[%s16221_s0 + $0x118] ss:$28 sps:$4 sm:$0xff]  }
  0x2c   :  { %2776 = vmatpush2.bf16.msra.mxu1 %v9979_v43  ;;  %2584 = vmatprep.subr.bf16.mxu0 %v9980_v44  ;;  %v10108_v43 = vld [vmem:[%s16220_s1 + $0x70c] ss:$20 sps:$4 sm:$0xff]  }
  0x2d   :  { %2777 = vmatprep.subr.bf16.mxu1 %v9982_v45  ;;  %v10060_v44 = vld [vmem:[%s16221_s0 + $0x120] ss:$28 sps:$4 sm:$0xff]   ;;  %v10064_v45 = vld [vmem:[%s16221_s0 + $0x154] ss:$28 sps:$4 sm:$0xff]  }
  0x2f   :  { %2585 = vmatpush2.bf16.msra.mxu0 %v9984_v46  ;;  %v10066_v46 = vld [vmem:[%s16221_s0 + $0x15c] ss:$28 sps:$4 sm:$0xff]  }
  0x30   :  { %2778 = vmatpush2.bf16.msra.mxu1 %v9985_v47  ;;  %2586 = vmatprep.subr.bf16.mxu0 %v9986_v49  ;;  %v10106_v47 = vld [vmem:[%s16220_s1 + $0x708] ss:$20 sps:$4 sm:$0xff]   ;;  %v10115_v49 = vld [vmem:[%s16220_s1 + $0x6e0] ss:$20 sps:$4 sm:$0xff]  }
  0x31   :  { %2779 = vmatprep.subr.bf16.mxu1 %v9988_v51  ;;  %v10126_v51 = vld [vmem:[%s16220_s1 + $0x6bc] ss:$20 sps:$4 sm:$0xff]  }
  0x33   :  { %2587 = vmatpush2.bf16.msra.mxu0 %v9990_v52  ;;  %v10069_v52 = vld [vmem:[%s16221_s0 + $0x158] ss:$28 sps:$4 sm:$0xff]  }
  0x34   :  { %2780 = vmatpush2.bf16.msra.mxu1 %v9991_v53  ;;  %2588 = vmatprep.subr.bf16.mxu0 %v9992_v54  ;;  %v10073_v53 = vld [vmem:[%s16221_s0 + $0x18c] ss:$28 sps:$4 sm:$0xff]   ;;  %v10075_v54 = vld [vmem:[%s16221_s0 + $0x194] ss:$28 sps:$4 sm:$0xff]  }
  0x35   :  { %2781 = vmatprep.subr.bf16.mxu1 %v9994_v55  ;;  %v10124_v55 = vld [vmem:[%s16220_s1 + $0x6b8] ss:$20 sps:$4 sm:$0xff]  }
  0x37   :  { %2589 = vmatpush2.bf16.msra.mxu0 %v9996_v56  ;;  %v10135_v56 = vld [vmem:[%s16220_s1 + $0x694] ss:$20 sps:$4 sm:$0xff]  }
  0x38   :  { %2782 = vmatpush2.bf16.msra.mxu1 %v9997_v57  ;;  %2590 = vmatprep.subr.bf16.mxu0 %v9998_v58  ;;  %v10133_v57 = vld [vmem:[%s16220_s1 + $0x690] ss:$20 sps:$4 sm:$0xff]   ;;  %v10144_v58 = vld [vmem:[%s16220_s1 + $0x66c] ss:$20 sps:$4 sm:$0xff]  }
  0x39   :  { %2783 = vmatprep.subr.bf16.mxu1 %v10000_v59  ;;  %v10077_v59 = vld [vmem:[%s16221_s0 + $0x188] ss:$28 sps:$4 sm:$0xff]  }
  0x3b   :  { %2591 = vmatpush2.bf16.msra.mxu0 %v10002_v60  ;;  %v10078_v60 = vld [vmem:[%s16221_s0 + $0x190] ss:$28 sps:$4 sm:$0xff]  }
  0x3c   :  { %2784 = vmatpush2.bf16.msra.mxu1 %v10003_v61  ;;  %2592 = vmatprep.subr.bf16.mxu0 %v10004_v62  ;;  %v10082_v61 = vld [vmem:[%s16221_s0 + $0x1c4] ss:$28 sps:$4 sm:$0xff]   ;;  %v10084_v62 = vld [vmem:[%s16221_s0 + $0x1cc] ss:$28 sps:$4 sm:$0xff]  }
  0x3d   :  { %2785 = vmatprep.subr.bf16.mxu1 %v10006_v63  ;;  %v10142_v63 = vld [vmem:[%s16220_s1 + $0x668] ss:$20 sps:$4 sm:$0xff]  }
  0x3f   :  { %2593 = vmatpush2.bf16.msra.mxu0 %v10008_v0  ;;  %v10153_v0 = vld [vmem:[%s16220_s1 + $0x644] ss:$20 sps:$4 sm:$0xff]  }
  0x40   :  { %2786 = vmatpush2.bf16.msra.mxu1 %v10009_v1  ;;  %2948 = vmatprep.subr.bf16.mxu0 %v10018_v2  ;;  %v10151_v1 = vld [vmem:[%s16220_s1 + $0x640] ss:$20 sps:$4 sm:$0xff]  }
  0x41   :  { %9881 = vmatprep.subr.bf16.mxu1 %v10018_v2  ;;  %v10162_v2 = vld [vmem:[%s16220_s1 + $0x89c] ss:$20 sps:$4 sm:$0xff]  }
  0x42   :  { %2595 = vmatmul.mubr.bf16.vlgmr.msra.gmra.mxu0 %v10014_v3  ;;  %v10086_v3 = vld [vmem:[%s16221_s0 + $0x1c0] ss:$28 sps:$4 sm:$0xff]  }
  0x43   :  { %2788 = vmatmul.mubr.bf16.vlgmr.msra.gmra.mxu1 %v10015_v4  ;;  %2604 = vmatprep.mubr.bf16.mxu0 %v10019_v6  ;;  %v10087_v4 = vld [vmem:[%s16221_s0 + $0x1c8] ss:$28 sps:$4 sm:$0xff]  }
  0x44   :  { %9897 = vmatpush1.bf16.msra.mxu1 %v10016_v5  ;;  %2797 = vmatprep.mubr.bf16.mxu1 %v10021_v7  ;;  %v10093_v6 = vld [vmem:[%s16221_s0 + $0x204] ss:$28 sps:$4 sm:$0xff]  }
  0x45   :  { %9882 = vmatprep.subr.bf16.mxu1 %v10027_v8  ;;  %2949 = vmatpush1.bf16.msra.mxu0 %v10016_v5  ;;  %v10091_v5 = vld [vmem:[%s16221_s0 + $0x1fc] ss:$28 sps:$4 sm:$0xff]  }
  0x46   :  { %2950 = vmatprep.subr.bf16.mxu0 %v10027_v8  ;;  %v10189_v7 = vld [vmem:[%s16220_s1 + $0x124] ss:$20 sps:$4 sm:$0xff]  }
  0x47   :  { %v10095_v8 = vld [vmem:[%s16221_s0 + $0x1f8] ss:$28 sps:$4 sm:$0xff]  }
  0x48   :  { %9898 = vmatpush1.bf16.msra.mxu1 %v10025_v9 }
  0x49   :  { %9883 = vmatprep.subr.bf16.mxu1 %v10036_v10  ;;  %2951 = vmatpush1.bf16.msra.mxu0 %v10025_v9  ;;  %v10096_v9 = vld [vmem:[%s16221_s0 + $0x200] ss:$28 sps:$4 sm:$0xff]  }
  0x4a   :  { %2605 = vmatmul.mubr.bf16.gmra.mxu0 %v10023_v11  ;;  %2952 = vmatprep.subr.bf16.mxu0 %v10036_v10  ;;  %v10100_v10 = vld [vmem:[%s16221_s0 + $0x234] ss:$28 sps:$4 sm:$0xff]   ;;  %v10102_v11 = vld [vmem:[%s16221_s0 + $0x23c] ss:$28 sps:$4 sm:$0xff]  }
  0x4b   :  { %2798 = vmatmul.mubr.bf16.gmra.mxu1 %v10024_v12  ;;  %2614 = vmatprep.mubr.bf16.mxu0 %v10028_v13  ;;  %v10104_v12 = vld [vmem:[%s16221_s0 + $0x230] ss:$28 sps:$4 sm:$0xff]   ;;  %v10105_v13 = vld [vmem:[%s16221_s0 + $0x238] ss:$28 sps:$4 sm:$0xff]  }
  0x4c   :  { %2807 = vmatprep.mubr.bf16.mxu1 %v10030_v14  ;;  %9899 = vmatpush1.bf16.msra.mxu1 %v10034_v15  ;;  %v10109_v14 = vld [vmem:[%s16221_s0 + $0x26c] ss:$28 sps:$4 sm:$0xff]  }
  0x4d   :  { %9884 = vmatprep.subr.bf16.mxu1 %v10045_v16  ;;  %2953 = vmatpush1.bf16.msra.mxu0 %v10034_v15  ;;  %v10111_v15 = vld [vmem:[%s16221_s0 + $0x274] ss:$28 sps:$4 sm:$0xff]  }
  0x4e   :  { %2954 = vmatprep.subr.bf16.mxu0 %v10045_v16  ;;  %v10113_v16 = vld [vmem:[%s16221_s0 + $0x268] ss:$28 sps:$4 sm:$0xff]  }
  0x50   :  { %9900 = vmatpush1.bf16.msra.mxu1 %v10043_v17 }
  0x51   :  { %9885 = vmatprep.subr.bf16.mxu1 %v10054_v19  ;;  %2955 = vmatpush1.bf16.msra.mxu0 %v10043_v17  ;;  %v10114_v17 = vld [vmem:[%s16221_s0 + $0x270] ss:$28 sps:$4 sm:$0xff]  }
  0x52   :  { %2615 = vmatmul.mubr.bf16.gmra.mxu0 %v10032_v18  ;;  %2956 = vmatprep.subr.bf16.mxu0 %v10054_v19  ;;  %v10118_v18 = vld [vmem:[%s16221_s0 + $0x2a4] ss:$28 sps:$4 sm:$0xff]   ;;  %v10120_v19 = vld [vmem:[%s16221_s0 + $0x2ac] ss:$28 sps:$4 sm:$0xff]  }
  0x53   :  { %2808 = vmatmul.mubr.bf16.gmra.mxu1 %v10033_v20  ;;  %2624 = vmatprep.mubr.bf16.mxu0 %v10037_v21  ;;  %v10122_v20 = vld [vmem:[%s16221_s0 + $0x2a0] ss:$28 sps:$4 sm:$0xff]   ;;  %v10123_v21 = vld [vmem:[%s16221_s0 + $0x2a8] ss:$28 sps:$4 sm:$0xff]  }
  0x54   :  { %2817 = vmatprep.mubr.bf16.mxu1 %v10039_v22  ;;  %9901 = vmatpush1.bf16.msra.mxu1 %v10052_v23  ;;  %v10127_v22 = vld [vmem:[%s16221_s0 + $0x2dc] ss:$28 sps:$4 sm:$0xff]  }
  0x55   :  { %9886 = vmatprep.subr.bf16.mxu1 %v10063_v24  ;;  %2957 = vmatpush1.bf16.msra.mxu0 %v10052_v23  ;;  %v10129_v23 = vld [vmem:[%s16221_s0 + $0x2e4] ss:$28 sps:$4 sm:$0xff]  }
  0x56   :  { %2958 = vmatprep.subr.bf16.mxu0 %v10063_v24  ;;  %v10131_v24 = vld [vmem:[%s16221_s0 + $0x2d8] ss:$28 sps:$4 sm:$0xff]  }
  0x58   :  { %9902 = vmatpush1.bf16.msra.mxu1 %v10061_v25 }
  0x59   :  { %9887 = vmatprep.subr.bf16.mxu1 %v10072_v27  ;;  %2959 = vmatpush1.bf16.msra.mxu0 %v10061_v25  ;;  %v10132_v25 = vld [vmem:[%s16221_s0 + $0x2e0] ss:$28 sps:$4 sm:$0xff]  }
  0x5a   :  { %2625 = vmatmul.mubr.bf16.gmra.mxu0 %v10041_v26  ;;  %2960 = vmatprep.subr.bf16.mxu0 %v10072_v27  ;;  %v10136_v26 = vld [vmem:[%s16221_s0 + $0x314] ss:$28 sps:$4 sm:$0xff]   ;;  %v10138_v27 = vld [vmem:[%s16221_s0 + $0x31c] ss:$28 sps:$4 sm:$0xff]  }
  0x5b   :  { %2818 = vmatmul.mubr.bf16.gmra.mxu1 %v10042_v28  ;;  %2634 = vmatprep.mubr.bf16.mxu0 %v10046_v29  ;;  %v10140_v28 = vld [vmem:[%s16221_s0 + $0x310] ss:$28 sps:$4 sm:$0xff]   ;;  %v10141_v29 = vld [vmem:[%s16221_s0 + $0x318] ss:$28 sps:$4 sm:$0xff]  }
  0x5c   :  { %2827 = vmatprep.mubr.bf16.mxu1 %v10048_v30  ;;  %9903 = vmatpush1.bf16.msra.mxu1 %v10070_v31  ;;  %v10145_v30 = vld [vmem:[%s16221_s0 + $0x34c] ss:$28 sps:$4 sm:$0xff]  }
  0x5d   :  { %9888 = vmatprep.subr.bf16.mxu1 %v10081_v32  ;;  %2961 = vmatpush1.bf16.msra.mxu0 %v10070_v31  ;;  %v10147_v31 = vld [vmem:[%s16221_s0 + $0x354] ss:$28 sps:$4 sm:$0xff]  }
  0x5e   :  { %2962 = vmatprep.subr.bf16.mxu0 %v10081_v32  ;;  %v10149_v32 = vld [vmem:[%s16221_s0 + $0x348] ss:$28 sps:$4 sm:$0xff]  }
  0x60   :  { %9904 = vmatpush1.bf16.msra.mxu1 %v10079_v33 }
  0x61   :  { %9889 = vmatprep.subr.bf16.mxu1 %v10090_v35  ;;  %2963 = vmatpush1.bf16.msra.mxu0 %v10079_v33  ;;  %v10150_v33 = vld [vmem:[%s16221_s0 + $0x350] ss:$28 sps:$4 sm:$0xff]  }
  0x62   :  { %2635 = vmatmul.mubr.bf16.gmra.mxu0 %v10050_v34  ;;  %2964 = vmatprep.subr.bf16.mxu0 %v10090_v35  ;;  %v10156_v34 = vld [vmem:[%s16221_s0 + $0x14] ss:$28 sps:$4 sm:$0xff]  }
  0x63   :  { %2828 = vmatmul.mubr.bf16.gmra.mxu1 %v10051_v36  ;;  %2644 = vmatprep.mubr.bf16.mxu0 %v10055_v37  ;;  %v10159_v35 = vld [vmem:[%s16221_s0 + $0x2b4] ss:$28 sps:$4 sm:$0xff]  }
  0x64   :  { %2837 = vmatprep.mubr.bf16.mxu1 %v10057_v38  ;;  %9905 = vmatpush2.bf16.msra.mxu1 %v10088_v39  ;;  %v10154_v36 = vld [vmem:[%s16221_s0 + $0x10] ss:$28 sps:$4 sm:$0xff]  }
  0x65   :  { %9890 = vmatprep.subr.bf16.mxu1 %v10099_v40  ;;  %2965 = vmatpush2.bf16.msra.mxu0 %v10088_v39  ;;  %v10157_v37 = vld [vmem:[%s16221_s0 + $0x2b0] ss:$28 sps:$4 sm:$0xff]  }
  0x66   :  { %2966 = vmatprep.subr.bf16.mxu0 %v10099_v40  ;;  %v10160_v38 = vld [vmem:[%s16220_s1 + $0x898] ss:$20 sps:$4 sm:$0xff]   ;;  %v10165_v40 = vld [vmem:[%s16220_s1 + $0x874] ss:$20 sps:$4 sm:$0xff]  }
  0x67   :  { %v10166_v39 = vld [vmem:[%s16221_s0 + $0x4c] ss:$28 sps:$4 sm:$0xff]  }
  0x68   :  { %9906 = vmatpush2.bf16.msra.mxu1 %v10097_v41 }
  0x69   :  { %9891 = vmatprep.subr.bf16.mxu1 %v10108_v43  ;;  %2967 = vmatpush2.bf16.msra.mxu0 %v10097_v41  ;;  %v10168_v41 = vld [vmem:[%s16221_s0 + $0x2ec] ss:$28 sps:$4 sm:$0xff]  }
  0x6a   :  { %2645 = vmatmul.mubr.bf16.gmra.mxu0 %v10059_v42  ;;  %2968 = vmatprep.subr.bf16.mxu0 %v10108_v43  ;;  %v10187_v42 = vld [vmem:[%s16220_s1 + $0x120] ss:$20 sps:$4 sm:$0xff]   ;;  %v10199_v43 = vld [vmem:[%s16220_s1 + $0xfc] ss:$20 sps:$4 sm:$0xff]  }
  0x6b   :  { %2838 = vmatmul.mubr.bf16.gmra.mxu1 %v10060_v44  ;;  %2654 = vmatprep.mubr.bf16.mxu0 %v10064_v45  ;;  %v10163_v44 = vld [vmem:[%s16220_s1 + $0x870] ss:$20 sps:$4 sm:$0xff]   ;;  %v10174_v45 = vld [vmem:[%s16220_s1 + $0x84c] ss:$20 sps:$4 sm:$0xff]  }
  0x6c   :  { %2847 = vmatprep.mubr.bf16.mxu1 %v10066_v46  ;;  %9907 = vmatpush2.bf16.msra.mxu1 %v10106_v47  ;;  %v10170_v46 = vld [vmem:[%s16221_s0 + $0x48] ss:$28 sps:$4 sm:$0xff]  }
  0x6d   :  { %9892 = vmatprep.subr.bf16.mxu1 %v10117_v48  ;;  %2969 = vmatpush2.bf16.msra.mxu0 %v10106_v47  ;;  %v10171_v47 = vld [vmem:[%s16221_s0 + $0x2e8] ss:$28 sps:$4 sm:$0xff]  }
  0x6e   :  { %2970 = vmatprep.subr.bf16.mxu0 %v10117_v48  ;;  %v10172_v48 = vld [vmem:[%s16220_s1 + $0x848] ss:$20 sps:$4 sm:$0xff]  }
  0x70   :  { %9908 = vmatpush2.bf16.msra.mxu1 %v10115_v49 }
  0x71   :  { %9893 = vmatprep.subr.bf16.mxu1 %v10126_v51  ;;  %2971 = vmatpush2.bf16.msra.mxu0 %v10115_v49  ;;  %v10178_v49 = vld [vmem:[%s16221_s0 + $0x84] ss:$28 sps:$4 sm:$0xff]  }
  0x72   :  { %2655 = vmatmul.mubr.bf16.gmra.mxu0 %v10068_v50  ;;  %2972 = vmatprep.subr.bf16.mxu0 %v10126_v51  ;;  %v10197_v50 = vld [vmem:[%s16220_s1 + $0xf8] ss:$20 sps:$4 sm:$0xff]  }
  0x73   :  { %2848 = vmatmul.mubr.bf16.gmra.mxu1 %v10069_v52  ;;  %2664 = vmatprep.mubr.bf16.mxu0 %v10073_v53  ;;  %v10177_v51 = vld [vmem:[%s16220_s1 + $0x824] ss:$20 sps:$4 sm:$0xff]  }
  0x74   :  { %2857 = vmatprep.mubr.bf16.mxu1 %v10075_v54  ;;  %9909 = vmatpush2.bf16.msra.mxu1 %v10124_v55  ;;  %v10180_v52 = vld [vmem:[%s16221_s0 + $0x324] ss:$28 sps:$4 sm:$0xff]   ;;  %v10210_v54 = vld [vmem:[%s16220_s1 + $0xd4] ss:$20 sps:$4 sm:$0xff]  }
  0x75   :  { %9894 = vmatprep.subr.bf16.mxu1 %v10135_v56  ;;  %2973 = vmatpush2.bf16.msra.mxu0 %v10124_v55  ;;  %v10208_v53 = vld [vmem:[%s16220_s1 + $0xd0] ss:$20 sps:$4 sm:$0xff]   ;;  %v10175_v55 = vld [vmem:[%s16220_s1 + $0x820] ss:$20 sps:$4 sm:$0xff]  }
  0x76   :  { %2974 = vmatprep.subr.bf16.mxu0 %v10135_v56  ;;  %v10220_v56 = vld [vmem:[%s16220_s1 + $0xac] ss:$20 sps:$4 sm:$0xff]  }
  0x78   :  { %9910 = vmatpush2.bf16.msra.mxu1 %v10133_v57 }
  0x79   :  { %9895 = vmatprep.subr.bf16.mxu1 %v10144_v58  ;;  %2975 = vmatpush2.bf16.msra.mxu0 %v10133_v57  ;;  %v10186_v57 = vld [vmem:[%s16220_s1 + $0x7fc] ss:$20 sps:$4 sm:$0xff]  }
  0x7a   :  { %2665 = vmatmul.mubr.bf16.gmra.mxu0 %v10077_v59  ;;  %2976 = vmatprep.subr.bf16.mxu0 %v10144_v58  ;;  %v10182_v58 = vld [vmem:[%s16221_s0 + $0x80] ss:$28 sps:$4 sm:$0xff]  }
  0x7b   :  { %2858 = vmatmul.mubr.bf16.gmra.mxu1 %v10078_v60  ;;  %2674 = vmatprep.mubr.bf16.mxu0 %v10082_v61  ;;  %v10183_v59 = vld [vmem:[%s16221_s0 + $0x320] ss:$28 sps:$4 sm:$0xff]   ;;  %v10184_v60 = vld [vmem:[%s16220_s1 + $0x7f8] ss:$20 sps:$4 sm:$0xff]  }
  0x7c   :  { %2867 = vmatprep.mubr.bf16.mxu1 %v10084_v62  ;;  %9911 = vmatpush2.bf16.msra.mxu1 %v10142_v63  ;;  %v10193_v61 = vld [vmem:[%s16221_s0 + $0xbc] ss:$28 sps:$4 sm:$0xff]   ;;  %v10192_v62 = vld [vmem:[%s16220_s1 + $0x7d4] ss:$20 sps:$4 sm:$0xff]  }
  0x7d   :  { %9896 = vmatprep.subr.bf16.mxu1 %v10153_v0  ;;  %2977 = vmatpush2.bf16.msra.mxu0 %v10142_v63  ;;  %v10195_v63 = vld [vmem:[%s16221_s0 + $0x35c] ss:$28 sps:$4 sm:$0xff]  }
  0x7e   :  { %2978 = vmatprep.subr.bf16.mxu0 %v10153_v0  ;;  %v10218_v0 = vld [vmem:[%s16220_s1 + $0xa8] ss:$20 sps:$4 sm:$0xff]  }
  0x80   :  { %9912 = vmatpush2.bf16.msra.mxu1 %v10151_v1 }
  0x81   :  { %2979 = vmatpush2.bf16.msra.mxu0 %v10151_v1  ;;  %3141 = vmatprep.subr.bf16.mxu1 %v10162_v2  ;;  %v10230_v1 = vld [vmem:[%s16220_s1 + $0x84] ss:$20 sps:$4 sm:$0xff]   ;;  %v505_v2 = vlaneseq }
  0x82   :  { %2675 = vmatmul.mubr.bf16.gmra.mxu0 %v10086_v3  ;;  %3334 = vmatprep.subr.bf16.mxu0 %v10189_v7  ;;  %v10190_v3 = vld [vmem:[%s16220_s1 + $0x7d0] ss:$20 sps:$4 sm:$0xff]   ;;  %v10201_v7 = vld [vmem:[%s16221_s0 + $0x358] ss:$28 sps:$4 sm:$0xff]  }
  0x83   :  { %2868 = vmatmul.mubr.bf16.gmra.mxu1 %v10087_v4  ;;  %2684 = vmatprep.mubr.bf16.mxu0 %v10091_v5  ;;  %v10204_v4 = vld [vmem:[%s16220_s1 + $0x7ac] ss:$20 sps:$4 sm:$0xff]   ;;  %v10200_v5 = vld [vmem:[%s16221_s0 + $0xb8] ss:$28 sps:$4 sm:$0xff]  }
  0x84   :  { %2877 = vmatprep.mubr.bf16.mxu1 %v10093_v6  ;;  %v11601_v6 = vshrl.u32 %v505_v2, 7  ;;  %v10309_v2 = vld [vmem:[%s16220_s1 + $0x4e4] ss:$20 sps:$4 sm:$0xff]  }
  0x86   :  { %16307 = vst [vmem:[#allocation2_spill] sm:$0xff] %v11601_v6 }
  0x8a   :  { %2685 = vmatmul.mubr.bf16.gmra.mxu0 %v10095_v8  ;;  %v10202_v8 = vld [vmem:[%s16220_s1 + $0x7a8] ss:$20 sps:$4 sm:$0xff]  }
  0x8b   :  { %2878 = vmatmul.mubr.bf16.gmra.mxu1 %v10096_v9  ;;  %2694 = vmatprep.mubr.bf16.mxu0 %v10100_v10  ;;  %v10228_v9 = vld [vmem:[%s16220_s1 + $0x80] ss:$20 sps:$4 sm:$0xff]   ;;  %v10207_v10 = vld [vmem:[%s16220_s1 + $0x784] ss:$20 sps:$4 sm:$0xff]  }
  0x8c   :  { %2887 = vmatprep.mubr.bf16.mxu1 %v10102_v11  ;;  %v10211_v11 = vld [vmem:[%s16221_s0 + $0xf4] ss:$28 sps:$4 sm:$0xff]  }
  0x92   :  { %2695 = vmatmul.mubr.bf16.gmra.mxu0 %v10104_v12  ;;  %v10233_v12 = vld [vmem:[%s16220_s1 + $0x58] ss:$20 sps:$4 sm:$0xff]  }
  0x93   :  { %2888 = vmatmul.mubr.bf16.gmra.mxu1 %v10105_v13  ;;  %2704 = vmatprep.mubr.bf16.mxu0 %v10109_v14  ;;  %v10235_v13 = vld [vmem:[%s16220_s1 + $0x5c] ss:$20 sps:$4 sm:$0xff]   ;;  %v10205_v14 = vld [vmem:[%s16220_s1 + $0x780] ss:$20 sps:$4 sm:$0xff]  }
  0x94   :  { %2897 = vmatprep.mubr.bf16.mxu1 %v10111_v15  ;;  %v10243_v15 = vld [vmem:[%s16220_s1 + $0x34] ss:$20 sps:$4 sm:$0xff]  }
  0x9a   :  { %2705 = vmatmul.mubr.bf16.gmra.mxu0 %v10113_v16  ;;  %v11631_v16 = vsub.s32 0, %v11601_v6 }
  0x9b   :  { %2898 = vmatmul.mubr.bf16.gmra.mxu1 %v10114_v17  ;;  %2714 = vmatprep.mubr.bf16.mxu0 %v10118_v18  ;;  %v11634_v17 = vsub.s32 1, %v11601_v6  ;;  %v16232_v18 = vmov 0  }
  0x9c   :  { %2907 = vmatprep.mubr.bf16.mxu1 %v10120_v19  ;;  %16308 = vst [vmem:[#allocation3_spill] sm:$0xff] %v11631_v16  ;;  %v10213_v19 = vld [vmem:[%s16221_s0 + $0xf0] ss:$28 sps:$4 sm:$0xff]  }
  0x9d   :  { %16309 = vst [vmem:[#allocation4_spill] sm:$0xff] %v11634_v17 }
  0xa2   :  { %2715 = vmatmul.mubr.bf16.gmra.mxu0 %v10122_v20  ;;  %v10217_v20 = vld [vmem:[%s16220_s1 + $0x3a4] ss:$20 sps:$4 sm:$0xff]  }
  0xa3   :  { %2908 = vmatmul.mubr.bf16.gmra.mxu1 %v10123_v21  ;;  %2724 = vmatprep.mubr.bf16.mxu0 %v10127_v22  ;;  %v10214_v21 = vld [vmem:[%s16221_s0 + $0x18] ss:$28 sps:$4 sm:$0xff]  }
  0xa4   :  { %2917 = vmatprep.mubr.bf16.mxu1 %v10129_v23  ;;  %v10215_v22 = vld [vmem:[%s16220_s1 + $0x3a0] ss:$20 sps:$4 sm:$0xff]   ;;  %v10221_v23 = vld [vmem:[%s16221_s0 + $0x12c] ss:$28 sps:$4 sm:$0xff]  }
  0xaa   :  { %2725 = vmatmul.mubr.bf16.gmra.mxu0 %v10131_v24  ;;  %v10227_v24 = vld [vmem:[%s16220_s1 + $0x37c] ss:$20 sps:$4 sm:$0xff]  }
  0xab   :  { %2918 = vmatmul.mubr.bf16.gmra.mxu1 %v10132_v25  ;;  %2734 = vmatprep.mubr.bf16.mxu0 %v10136_v26  ;;  %v10241_v25 = vld [vmem:[%s16220_s1 + $0x30] ss:$20 sps:$4 sm:$0xff]   ;;  %v10253_v26 = vld [vmem:[%s16220_s1 + $0xc] ss:$20 sps:$4 sm:$0xff]  }
  0xac   :  { %2927 = vmatprep.mubr.bf16.mxu1 %v10138_v27  ;;  %v10225_v27 = vld [vmem:[%s16220_s1 + $0x378] ss:$20 sps:$4 sm:$0xff]  }
  0xb2   :  { %2735 = vmatmul.mubr.bf16.gmra.mxu0 %v10140_v28  ;;  %v10240_v28 = vld [vmem:[%s16220_s1 + $0x354] ss:$20 sps:$4 sm:$0xff]  }
  0xb3   :  { %2928 = vmatmul.mubr.bf16.gmra.mxu1 %v10141_v29  ;;  %2744 = vmatprep.mubr.bf16.mxu0 %v10145_v30  ;;  %v10223_v29 = vld [vmem:[%s16221_s0 + $0x128] ss:$28 sps:$4 sm:$0xff]   ;;  %v10224_v30 = vld [vmem:[%s16221_s0 + $0x50] ss:$28 sps:$4 sm:$0xff]  }
  0xb4   :  { %2937 = vmatprep.mubr.bf16.mxu1 %v10147_v31  ;;  %v10231_v31 = vld [vmem:[%s16221_s0 + $0x164] ss:$28 sps:$4 sm:$0xff]  }
  0xba   :  { %2745 = vmatmul.mubr.bf16.gmra.mxu0 %v10149_v32  ;;  %v10251_v32 = vld [vmem:[%s16220_s1 + $0x8] ss:$20 sps:$4 sm:$0xff]  }
  0xbb   :  { %2938 = vmatmul.mubr.bf16.gmra.mxu1 %v10150_v33  ;;  %2980 = vmatprep.mubr.bf16.mxu0 %v10156_v34  ;;  %v10238_v33 = vld [vmem:[%s16220_s1 + $0x350] ss:$20 sps:$4 sm:$0xff]  }
  0xbc   :  { %3100 = vmatprep.mubr.bf16.mxu1 %v10159_v35  ;;  %v10260_v34 = vld [vmem:[%s16220_s1 + $0x264] ss:$20 sps:$4 sm:$0xff]   ;;  %v10250_v35 = vld [vmem:[%s16220_s1 + $0x32c] ss:$20 sps:$4 sm:$0xff]  }
  0xc2   :  { %2981 = vmatmul.mubr.bf16.vlgmr.msra.gmra.mxu0 %v10154_v36  ;;  %v10258_v36 = vld [vmem:[%s16220_s1 + $0x260] ss:$20 sps:$4 sm:$0xff]  }
  0xc3   :  { %3101 = vmatmul.mubr.bf16.vlgmr.msra.gmra.mxu1 %v10157_v37  ;;  %2990 = vmatprep.mubr.bf16.mxu0 %v10166_v39  ;;  %v10266_v37 = vld [vmem:[%s16220_s1 + $0x23c] ss:$20 sps:$4 sm:$0xff]  }
  0xc4   :  { %3142 = vmatpush1.bf16.msra.mxu1 %v10160_v38  ;;  %3110 = vmatprep.mubr.bf16.mxu1 %v10168_v41  ;;  %v10248_v38 = vld [vmem:[%s16220_s1 + $0x328] ss:$20 sps:$4 sm:$0xff]  }
  0xc5   :  { %3143 = vmatprep.subr.bf16.mxu1 %v10165_v40  ;;  %3335 = vmatpush1.bf16.msra.mxu0 %v10187_v42  ;;  %v10236_v39 = vld [vmem:[%s16221_s0 + $0x160] ss:$28 sps:$4 sm:$0xff]   ;;  %v10237_v40 = vld [vmem:[%s16221_s0 + $0x88] ss:$28 sps:$4 sm:$0xff]  }
  0xc6   :  { %3336 = vmatprep.subr.bf16.mxu0 %v10199_v43  ;;  %v10244_v41 = vld [vmem:[%s16221_s0 + $0x19c] ss:$28 sps:$4 sm:$0xff]  }
  0xc7   :  { %v10263_v42 = vld [vmem:[%s16220_s1 + $0x304] ss:$20 sps:$4 sm:$0xff]  }
  0xc8   :  { %3144 = vmatpush1.bf16.msra.mxu1 %v10163_v44  ;;  %v10264_v43 = vld [vmem:[%s16220_s1 + $0x238] ss:$20 sps:$4 sm:$0xff]   ;;  %v10261_v44 = vld [vmem:[%s16220_s1 + $0x300] ss:$20 sps:$4 sm:$0xff]  }
  0xc9   :  { %3145 = vmatprep.subr.bf16.mxu1 %v10174_v45  ;;  %3337 = vmatpush1.bf16.msra.mxu0 %v10197_v50  ;;  %v10273_v45 = vld [vmem:[%s16220_s1 + $0x214] ss:$20 sps:$4 sm:$0xff]  }
  0xca   :  { %2991 = vmatmul.mubr.bf16.gmra.mxu0 %v10170_v46  ;;  %3338 = vmatprep.subr.bf16.mxu0 %v10210_v54  ;;  %v10271_v46 = vld [vmem:[%s16220_s1 + $0x210] ss:$20 sps:$4 sm:$0xff]   ;;  %v10246_v50 = vld [vmem:[%s16221_s0 + $0x198] ss:$28 sps:$4 sm:$0xff]  }
  0xcb   :  { %3111 = vmatmul.mubr.bf16.gmra.mxu1 %v10171_v47  ;;  %3000 = vmatprep.mubr.bf16.mxu0 %v10178_v49  ;;  %v10276_v47 = vld [vmem:[%s16220_s1 + $0x2dc] ss:$20 sps:$4 sm:$0xff]   ;;  %v10274_v49 = vld [vmem:[%s16220_s1 + $0x2d8] ss:$20 sps:$4 sm:$0xff]   ;;  %v10289_v54 = vld [vmem:[%s16220_s1 + $0x2b4] ss:$20 sps:$4 sm:$0xff]  }
  0xcc   :  { %3146 = vmatpush1.bf16.msra.mxu1 %v10172_v48  ;;  %3120 = vmatprep.mubr.bf16.mxu1 %v10180_v52  ;;  %v10279_v48 = vld [vmem:[%s16220_s1 + $0x1ec] ss:$20 sps:$4 sm:$0xff]   ;;  %v10254_v52 = vld [vmem:[%s16221_s0 + $0x1d4] ss:$28 sps:$4 sm:$0xff]  }
  0xcd   :  { %3147 = vmatprep.subr.bf16.mxu1 %v10177_v51  ;;  %3339 = vmatpush1.bf16.msra.mxu0 %v10208_v53  ;;  %v10247_v51 = vld [vmem:[%s16221_s0 + $0xc0] ss:$28 sps:$4 sm:$0xff]  }
  0xce   :  { %3340 = vmatprep.subr.bf16.mxu0 %v10220_v56  ;;  %v10277_v53 = vld [vmem:[%s16220_s1 + $0x1e8] ss:$20 sps:$4 sm:$0xff]   ;;  %v10287_v56 = vld [vmem:[%s16220_s1 + $0x2b0] ss:$20 sps:$4 sm:$0xff]  }
  0xd0   :  { %3148 = vmatpush1.bf16.msra.mxu1 %v10175_v55  ;;  %v10286_v55 = vld [vmem:[%s16220_s1 + $0x1c4] ss:$20 sps:$4 sm:$0xff]  }
  0xd1   :  { %3149 = vmatprep.subr.bf16.mxu1 %v10186_v57  ;;  %3341 = vmatpush1.bf16.msra.mxu0 %v10218_v0  ;;  %v10284_v57 = vld [vmem:[%s16220_s1 + $0x1c0] ss:$20 sps:$4 sm:$0xff]   ;;  %v10267_v0 = vld [vmem:[%s16221_s0 + $0x20c] ss:$28 sps:$4 sm:$0xff]  }
  0xd2   :  { %3001 = vmatmul.mubr.bf16.gmra.mxu0 %v10182_v58  ;;  %3342 = vmatprep.subr.bf16.mxu0 %v10230_v1  ;;  %v10302_v58 = vld [vmem:[%s16220_s1 + $0x28c] ss:$20 sps:$4 sm:$0xff]  }
  0xd3   :  { %3121 = vmatmul.mubr.bf16.gmra.mxu1 %v10183_v59  ;;  %3010 = vmatprep.mubr.bf16.mxu0 %v10193_v61  ;;  %v10292_v59 = vld [vmem:[%s16220_s1 + $0x19c] ss:$20 sps:$4 sm:$0xff]   ;;  %v10290_v1 = vld [vmem:[%s16220_s1 + $0x198] ss:$20 sps:$4 sm:$0xff]  }
  0xd4   :  { %3150 = vmatpush1.bf16.msra.mxu1 %v10184_v60  ;;  %3130 = vmatprep.mubr.bf16.mxu1 %v10195_v63  ;;  %v503_v60 = vld [vmem:[%s16222_s2] sm:$0x1f]  ;;  %v10300_v61 = vld [vmem:[%s16220_s1 + $0x288] ss:$20 sps:$4 sm:$0xff]   ;;  %v10257_v63 = vld [vmem:[%s16221_s0 + $0xf8] ss:$28 sps:$4 sm:$0xff]  }
  0xd5   :  { %3151 = vmatprep.subr.bf16.mxu1 %v10192_v62  ;;  %3343 = vmatpush1.bf16.msra.mxu0 %v10228_v9  ;;  %v10256_v62 = vld [vmem:[%s16221_s0 + $0x1d0] ss:$28 sps:$4 sm:$0xff]   ;;  %v11801_v9 = vrot.slane %v503_v60, %v11634_v17  ;;  %v10741_v17 = vld [vmem:[%s16221_s0 + $0x8] ss:$28 sps:$4 sm:$0xff]  }
  0xd6   :  { %3344 = vmatprep.subr.bf16.mxu0 %v10235_v13 }
  0xd8   :  { %3152 = vmatpush1.bf16.msra.mxu1 %v10190_v3  ;;  %v10299_v3 = vld [vmem:[%s16220_s1 + $0x174] ss:$20 sps:$4 sm:$0xff]  }
  0xd9   :  { %3153 = vmatprep.subr.bf16.mxu1 %v10204_v4  ;;  %3345 = vmatpush1.bf16.msra.mxu0 %v10233_v12  ;;  %v10307_v4 = vld [vmem:[%s16220_s1 + $0x4e0] ss:$20 sps:$4 sm:$0xff]  }
  0xda   :  { %3011 = vmatmul.mubr.bf16.gmra.mxu0 %v10200_v5  ;;  %3346 = vmatprep.subr.bf16.mxu0 %v10243_v15  ;;  %v11792_v5 = vrot.slane %v503_v60, %v11631_v16  ;;  %v10305_v12 = vld [vmem:[%s16220_s1 + $0x14c] ss:$20 sps:$4 sm:$0xff]   ;;  %v10338_v60 = vld [vmem:[%s16220_s1 + $0x41c] ss:$20 sps:$4 sm:$0xff]  }
  0xdb   :  { %3131 = vmatmul.mubr.bf16.gmra.mxu1 %v10201_v7  ;;  %3020 = vmatprep.mubr.bf16.mxu0 %v10211_v11  ;;  %v10297_v7 = vld [vmem:[%s16220_s1 + $0x170] ss:$20 sps:$4 sm:$0xff]  }
  0xdc   :  { %3154 = vmatpush1.bf16.msra.mxu1 %v10202_v8  ;;  %3173 = vmatprep.mubr.bf16.mxu1 %v16232_v18  ;;  %v10313_v8 = vld [vmem:[%s16220_s1 + $0x4bc] ss:$20 sps:$4 sm:$0xff]  }
  0xdd   :  { %3155 = vmatprep.subr.bf16.mxu1 %v10207_v10  ;;  %3347 = vmatpush1.bf16.msra.mxu0 %v10241_v25 }
  0xde   :  { %3348 = vmatprep.subr.bf16.mxu0 %v10253_v26  ;;  %v10269_v26 = vld [vmem:[%s16221_s0 + $0x208] ss:$28 sps:$4 sm:$0xff]  }
  0xe0   :  { %3156 = vmatpush1.bf16.msra.mxu1 %v10205_v14 }
  0xe1   :  { %3527 = vmatprep.subr.bf16.mxu1 %v10217_v20  ;;  %3349 = vmatpush1.bf16.msra.mxu0 %v10251_v32 }
  0xe2   :  { %3021 = vmatmul.mubr.bf16.gmra.mxu0 %v10213_v19  ;;  %3350 = vmatprep.subr.bf16.mxu0 %v10260_v34  ;;  %v10311_v19 = vld [vmem:[%s16220_s1 + $0x4b8] ss:$20 sps:$4 sm:$0xff]  }
  0xe3   :  { %3174 = vmatmul.mubr.bf16.vlgmr.msra.gmra.mxu1 %v10214_v21  ;;  %3030 = vmatprep.mubr.bf16.mxu0 %v10221_v23  ;;  %v10317_v23 = vld [vmem:[%s16220_s1 + $0x494] ss:$20 sps:$4 sm:$0xff]   ;;  %v10320_v34 = vld [vmem:[%s16220_s1 + $0x624] ss:$20 sps:$4 sm:$0xff]  }
  0xe4   :  { %3528 = vmatpush1.bf16.msra.mxu1 %v10215_v22  ;;  %3183 = vmatprep.mubr.bf16.mxu1 %v16232_v18  ;;  %v10303_v22 = vld [vmem:[%s16220_s1 + $0x148] ss:$20 sps:$4 sm:$0xff]  }
  0xe5   :  { %3529 = vmatprep.subr.bf16.mxu1 %v10227_v24  ;;  %3351 = vmatpush2.bf16.msra.mxu0 %v10258_v36 }
  0xe6   :  { %3352 = vmatprep.subr.bf16.mxu0 %v10266_v37  ;;  %v10324_v37 = vld [vmem:[%s16220_s1 + $0x46c] ss:$20 sps:$4 sm:$0xff]  }
  0xe8   :  { %3530 = vmatpush1.bf16.msra.mxu1 %v10225_v27  ;;  %v10270_v27 = vld [vmem:[%s16221_s0 + $0x130] ss:$28 sps:$4 sm:$0xff]  }
  0xe9   :  { %3531 = vmatprep.subr.bf16.mxu1 %v10240_v28  ;;  %3353 = vmatpush2.bf16.msra.mxu0 %v10264_v43 }
  0xea   :  { %3031 = vmatmul.mubr.bf16.gmra.mxu0 %v10223_v29  ;;  %3354 = vmatprep.subr.bf16.mxu0 %v10273_v45 }
  0xeb   :  { %3184 = vmatmul.mubr.bf16.gmra.mxu1 %v10224_v30  ;;  %3040 = vmatprep.mubr.bf16.mxu0 %v10231_v31  ;;  %v10280_v30 = vld [vmem:[%s16221_s0 + $0x244] ss:$28 sps:$4 sm:$0xff]  }
  0xec   :  { %3193 = vmatprep.mubr.bf16.mxu1 %v16232_v18  ;;  %3532 = vmatpush1.bf16.msra.mxu1 %v10238_v33  ;;  %v10315_v33 = vld [vmem:[%s16220_s1 + $0x490] ss:$20 sps:$4 sm:$0xff]  }
  0xed   :  { %3533 = vmatprep.subr.bf16.mxu1 %v10250_v35  ;;  %3355 = vmatpush2.bf16.msra.mxu0 %v10271_v46 }
  0xee   :  { %3356 = vmatprep.subr.bf16.mxu0 %v10279_v48 }
  0xf0   :  { %3534 = vmatpush1.bf16.msra.mxu1 %v10248_v38 }
  0xf1   :  { %3535 = vmatprep.subr.bf16.mxu1 %v10263_v42  ;;  %3357 = vmatpush2.bf16.msra.mxu0 %v10277_v53 }
  0xf2   :  { %3041 = vmatmul.mubr.bf16.gmra.mxu0 %v10236_v39  ;;  %3358 = vmatprep.subr.bf16.mxu0 %v10286_v55 }
  0xf3   :  { %3194 = vmatmul.mubr.bf16.gmra.mxu1 %v10237_v40  ;;  %3050 = vmatprep.mubr.bf16.mxu0 %v10244_v41 }
  0xf4   :  { %3203 = vmatprep.mubr.bf16.mxu1 %v16232_v18  ;;  %3536 = vmatpush1.bf16.msra.mxu1 %v10261_v44  ;;  %v10322_v44 = vld [vmem:[%s16220_s1 + $0x468] ss:$20 sps:$4 sm:$0xff]  }
  0xf5   :  { %3537 = vmatprep.subr.bf16.mxu1 %v10276_v47  ;;  %3359 = vmatpush2.bf16.msra.mxu0 %v10284_v57  ;;  %v10331_v47 = vld [vmem:[%s16220_s1 + $0x444] ss:$20 sps:$4 sm:$0xff]   ;;  %v10329_v57 = vld [vmem:[%s16220_s1 + $0x440] ss:$20 sps:$4 sm:$0xff]  }
  0xf6   :  { %3360 = vmatprep.subr.bf16.mxu0 %v10292_v59 }
  0xf8   :  { %3538 = vmatpush1.bf16.msra.mxu1 %v10274_v49 }
  0xf9   :  { %3539 = vmatprep.subr.bf16.mxu1 %v10289_v54  ;;  %3361 = vmatpush2.bf16.msra.mxu0 %v10290_v1  ;;  %v10293_v54 = vld [vmem:[%s16221_s0 + $0x27c] ss:$28 sps:$4 sm:$0xff]  }
  0xfa   :  { %3051 = vmatmul.mubr.bf16.gmra.mxu0 %v10246_v50  ;;  %3362 = vmatprep.subr.bf16.mxu0 %v10299_v3  ;;  %v10282_v50 = vld [vmem:[%s16221_s0 + $0x240] ss:$28 sps:$4 sm:$0xff]   ;;  %v10336_v3 = vld [vmem:[%s16220_s1 + $0x418] ss:$20 sps:$4 sm:$0xff]  }
  0xfb   :  { %3204 = vmatmul.mubr.bf16.gmra.mxu1 %v10247_v51  ;;  %3060 = vmatprep.mubr.bf16.mxu0 %v10254_v52  ;;  %v10283_v51 = vld [vmem:[%s16221_s0 + $0x168] ss:$28 sps:$4 sm:$0xff]  }
  0xfc   :  { %3213 = vmatprep.mubr.bf16.mxu1 %v16232_v18  ;;  %3540 = vmatpush1.bf16.msra.mxu1 %v10287_v56 }
  0xfd   :  { %3541 = vmatprep.subr.bf16.mxu1 %v10302_v58  ;;  %3363 = vmatpush2.bf16.msra.mxu0 %v10297_v7 }
  0xfe   :  { %3364 = vmatprep.subr.bf16.mxu0 %v10305_v12  ;;  %v10295_v12 = vld [vmem:[%s16221_s0 + $0x278] ss:$28 sps:$4 sm:$0xff]  }
 0x100   :  { %3542 = vmatpush1.bf16.msra.mxu1 %v10300_v61 }
 0x101   :  { %3543 = vmatprep.subr.bf16.mxu1 %v10309_v2  ;;  %3365 = vmatpush2.bf16.msra.mxu0 %v10303_v22  ;;  %v10343_v22 = vld [vmem:[%s16220_s1 + $0x3f0] ss:$20 sps:$4 sm:$0xff]  }
 0x102   :  { %v2596_v10 = vpop.f32.mrf.mxu0  ;;  %3061 = vmatmul.mubr.bf16.gmra.mxu0 %v10256_v62  ;;  %3720 = vmatprep.subr.bf16.mxu0 %v10320_v34  ;;  %v10350_v34 = vld [vmem:[%s16220_s1 + $0x3c8] ss:$20 sps:$4 sm:$0xff]  }
 0x103   :  { %v2789_v11 = vpop.f32.mrf.mxu1  ;;  %3214 = vmatmul.mubr.bf16.gmra.mxu1 %v10257_v63  ;;  %v2597_v13 = vadd.f32 %v2596_v10, %v11792_v5  ;;  %3070 = vmatprep.mubr.bf16.mxu0 %v10267_v0 }
 0x104   :  { %3223 = vmatprep.mubr.bf16.mxu1 %v16232_v18  ;;  %v2598_v14 = vpop.f32.mrf.mxu0  ;;  %3544 = vmatpush2.bf16.msra.mxu1 %v10307_v4 }
 0x105   :  { %v2791_v15 = vpop.f32.mrf.mxu1  ;;  %v11811_v20 = vadd.f32 %v2789_v11, %v2597_v13  ;;  %v2599_v21 = vadd.f32 %v2598_v14, %v11801_v9  ;;  %3545 = vmatprep.subr.bf16.mxu1 %v10313_v8  ;;  %v10345_v8 = vld [vmem:[%s16220_s1 + $0x3f4] ss:$20 sps:$4 sm:$0xff]   ;;  %v10296_v13 = vld [vmem:[%s16221_s0 + $0x1a0] ss:$28 sps:$4 sm:$0xff]  }
 0x106   :  { %v2600_v24 = vpop.f32.mrf.mxu0 }
 0x107   :  { %v2793_v25 = vpop.f32.mrf.mxu1  ;;  %v11826_v28 = vadd.f32 %v2791_v15, %v2599_v21  ;;  %v2601_v29 = vadd.f32 %v2600_v24, %v11792_v5 }
 0x108   :  { %v2602_v31 = vpop.f32.mrf.mxu0  ;;  %3546 = vmatpush2.bf16.msra.mxu1 %v10311_v19 }
 0x109   :  { %v2795_v32 = vpop.f32.mrf.mxu1  ;;  %v11838_v35 = vadd.f32 %v2793_v25, %v2601_v29  ;;  %v2603_v36 = vadd.f32 %v2602_v31, %v11801_v9  ;;  %3547 = vmatprep.subr.bf16.mxu1 %v10317_v23  ;;  %v10352_v25 = vld [vmem:[%s16220_s1 + $0x3cc] ss:$20 sps:$4 sm:$0xff]  }
 0x10a   :  { %v2606_v38 = vpop.f32.mrf.mxu0  ;;  %3071 = vmatmul.mubr.bf16.gmra.mxu0 %v10269_v26  ;;  %v10722_v31 = vld [vmem:[%s16221_s0 + $0x4] ss:$28 sps:$4 sm:$0xff]  }
 0x10b   :  { %v2799_v39 = vpop.f32.mrf.mxu1  ;;  %3224 = vmatmul.mubr.bf16.gmra.mxu1 %v10270_v27  ;;  %v11844_v40 = vadd.f32 %v2795_v32, %v2603_v36  ;;  %v2607_v41 = vadd.f32 %v2606_v38, %v11792_v5  ;;  %3080 = vmatprep.mubr.bf16.mxu0 %v10280_v30  ;;  %v10358_v38 = vld [vmem:[%s16220_s1 + $0x8a4] ss:$20 sps:$4 sm:$0xff]  }
 0x10c   :  { %3233 = vmatprep.mubr.bf16.mxu1 %v16232_v18  ;;  %v2608_v42 = vpop.f32.mrf.mxu0  ;;  %3548 = vmatpush2.bf16.msra.mxu1 %v10315_v33 }
 0x10d   :  { %v2801_v43 = vpop.f32.mrf.mxu1  ;;  %v11851_v45 = vadd.f32 %v2799_v39, %v2607_v41  ;;  %v2609_v46 = vadd.f32 %v2608_v42, %v11801_v9  ;;  %3549 = vmatprep.subr.bf16.mxu1 %v10324_v37  ;;  %v10306_v42 = vld [vmem:[%s16221_s0 + $0x1d8] ss:$28 sps:$4 sm:$0xff]  }
 0x10e   :  { %v2610_v48 = vpop.f32.mrf.mxu0 }
 0x10f   :  { %v2803_v49 = vpop.f32.mrf.mxu1  ;;  %v11863_v52 = vadd.f32 %v2801_v43, %v2609_v46  ;;  %v2611_v53 = vadd.f32 %v2610_v48, %v11792_v5  ;;  %v10318_v48 = vld [vmem:[%s16220_s1 + $0x620] ss:$20 sps:$4 sm:$0xff]  }
 0x110   :  { %v2612_v55 = vpop.f32.mrf.mxu0  ;;  %3550 = vmatpush2.bf16.msra.mxu1 %v10322_v44 }
 0x111   :  { %v2805_v56 = vpop.f32.mrf.mxu1  ;;  %v11872_v58 = vadd.f32 %v2803_v49, %v2611_v53  ;;  %v2613_v59 = vadd.f32 %v2612_v55, %v11801_v9  ;;  %3551 = vmatprep.subr.bf16.mxu1 %v10331_v47  ;;  %v10723_v55 = vld [vmem:[%s16221_s0] ss:$28 sps:$4 sm:$0xff]  }
 0x112   :  { %v2616_v61 = vpop.f32.mrf.mxu0  ;;  %3081 = vmatmul.mubr.bf16.gmra.mxu0 %v10282_v50 }
 0x113   :  { %v2809_v62 = vpop.f32.mrf.mxu1  ;;  %3234 = vmatmul.mubr.bf16.gmra.mxu1 %v10283_v51  ;;  %v11878_v63 = vadd.f32 %v2805_v56, %v2613_v59  ;;  %v2617_v0 = vadd.f32 %v2616_v61, %v11792_v5  ;;  %3090 = vmatprep.mubr.bf16.mxu0 %v10293_v54  ;;  %v10327_v51 = vld [vmem:[%s16220_s1 + $0x5fc] ss:$20 sps:$4 sm:$0xff]  }
 0x114   :  { %3243 = vmatprep.mubr.bf16.mxu1 %v16232_v18  ;;  %v2618_v1 = vpop.f32.mrf.mxu0  ;;  %3552 = vmatpush2.bf16.msra.mxu1 %v10329_v57  ;;  %v10724_v59 = vld [vmem:[%s16221_s0 + $0x3c] ss:$28 sps:$4 sm:$0xff]  }
 0x115   :  { %v2811_v2 = vpop.f32.mrf.mxu1  ;;  %v11885_v4 = vadd.f32 %v2809_v62, %v2617_v0  ;;  %v2619_v7 = vadd.f32 %v2618_v1, %v11801_v9  ;;  %3553 = vmatprep.subr.bf16.mxu1 %v10338_v60  ;;  %v10325_v62 = vld [vmem:[%s16220_s1 + $0x5f8] ss:$20 sps:$4 sm:$0xff]  }
 0x116   :  { %v2620_v10 = vpop.f32.mrf.mxu0 }
 0x117   :  { %v2813_v11 = vpop.f32.mrf.mxu1  ;;  %v11897_v14 = vadd.f32 %v2811_v2, %v2619_v7  ;;  %v2621_v15 = vadd.f32 %v2620_v10, %v11792_v5  ;;  %v10334_v2 = vld [vmem:[%s16220_s1 + $0x5d4] ss:$20 sps:$4 sm:$0xff]  }
 0x118   :  { %v2622_v19 = vpop.f32.mrf.mxu0  ;;  %3554 = vmatpush2.bf16.msra.mxu1 %v10336_v3 }
 0x119   :  { %v2815_v21 = vpop.f32.mrf.mxu1  ;;  %v11903_v23 = vadd.f32 %v2813_v11, %v2621_v15  ;;  %v2623_v24 = vadd.f32 %v2622_v19, %v11801_v9  ;;  %3555 = vmatprep.subr.bf16.mxu1 %v10345_v8  ;;  %v10310_v8 = vld [vmem:[%s16221_s0 + $0x210] ss:$28 sps:$4 sm:$0xff]  }
 0x11a   :  { %v2626_v26 = vpop.f32.mrf.mxu0  ;;  %3091 = vmatmul.mubr.bf16.gmra.mxu0 %v10295_v12  ;;  %v10332_v15 = vld [vmem:[%s16220_s1 + $0x5d0] ss:$20 sps:$4 sm:$0xff]  }
 0x11b   :  { %v2819_v27 = vpop.f32.mrf.mxu1  ;;  %3244 = vmatmul.mubr.bf16.gmra.mxu1 %v10296_v13  ;;  %v11909_v29 = vadd.f32 %v2815_v21, %v2623_v24  ;;  %v2627_v30 = vadd.f32 %v2626_v26, %v11792_v5  ;;  %3366 = vmatprep.mubr.bf16.mxu0 %v10722_v31  ;;  %v10725_v26 = vld [vmem:[%s16221_s0 + $0x38] ss:$28 sps:$4 sm:$0xff]  }
 0x11c   :  { %3253 = vmatprep.mubr.bf16.mxu1 %v16232_v18  ;;  %v2628_v32 = vpop.f32.mrf.mxu0  ;;  %3556 = vmatpush2.bf16.msra.mxu1 %v10343_v22  ;;  %v10341_v22 = vld [vmem:[%s16220_s1 + $0x5ac] ss:$20 sps:$4 sm:$0xff]   ;;  %v10726_v31 = vld [vmem:[%s16221_s0 + $0x74] ss:$28 sps:$4 sm:$0xff]  }
 0x11d   :  { %v2821_v33 = vpop.f32.mrf.mxu1  ;;  %v11919_v36 = vadd.f32 %v2819_v27, %v2627_v30  ;;  %v2629_v37 = vadd.f32 %v2628_v32, %v11801_v9  ;;  %3557 = vmatprep.subr.bf16.mxu1 %v10352_v25 }
 0x11e   :  { %v2630_v39 = vpop.f32.mrf.mxu0 }
 0x11f   :  { %v2823_v41 = vpop.f32.mrf.mxu1  ;;  %v11928_v43 = vadd.f32 %v2821_v33, %v2629_v37  ;;  %v2631_v44 = vadd.f32 %v2630_v39, %v11792_v5  ;;  %v10348_v39 = vld [vmem:[%s16220_s1 + $0x584] ss:$20 sps:$4 sm:$0xff]  }
 0x120   :  { %v2632_v46 = vpop.f32.mrf.mxu0  ;;  %3558 = vmatpush2.bf16.msra.mxu1 %v10350_v34  ;;  %v10339_v34 = vld [vmem:[%s16220_s1 + $0x5a8] ss:$20 sps:$4 sm:$0xff]  }
 0x121   :  { %v2825_v47 = vpop.f32.mrf.mxu1  ;;  %v11934_v49 = vadd.f32 %v2823_v41, %v2631_v44  ;;  %v2633_v50 = vadd.f32 %v2632_v46, %v11801_v9  ;;  %3913 = vmatprep.subr.bf16.mxu1 %v10358_v38  ;;  %v10314_v44 = vld [vmem:[%s16221_s0 + $0x248] ss:$28 sps:$4 sm:$0xff]  }
 0x122   :  { %v2636_v53 = vpop.f32.mrf.mxu0  ;;  %3367 = vmatmul.mubr.bf16.vlgmr.msra.gmra.mxu0 %v10723_v55  ;;  %v10355_v55 = vld [vmem:[%s16220_s1 + $0x55c] ss:$20 sps:$4 sm:$0xff]  }
 0x123   :  { %v2829_v54 = vpop.f32.mrf.mxu1  ;;  %3254 = vmatmul.mubr.bf16.gmra.mxu1 %v10306_v42  ;;  %v11943_v56 = vadd.f32 %v2825_v47, %v2633_v50  ;;  %v2637_v57 = vadd.f32 %v2636_v53, %v11792_v5  ;;  %3376 = vmatprep.mubr.bf16.mxu0 %v10724_v59 }
 0x124   :  { %3263 = vmatprep.mubr.bf16.mxu1 %v16232_v18  ;;  %v2638_v60 = vpop.f32.mrf.mxu0  ;;  %3721 = vmatpush1.bf16.msra.mxu0 %v10318_v48 }
 0x125   :  { %v2831_v61 = vpop.f32.mrf.mxu1  ;;  %v11953_v0 = vadd.f32 %v2829_v54, %v2637_v57  ;;  %v2639_v1 = vadd.f32 %v2638_v60, %v11801_v9  ;;  %3722 = vmatprep.subr.bf16.mxu0 %v10327_v51  ;;  %v10346_v51 = vld [vmem:[%s16220_s1 + $0x580] ss:$20 sps:$4 sm:$0xff]   ;;  %v10727_v60 = vld [vmem:[%s16221_s0 + $0x70] ss:$28 sps:$4 sm:$0xff]  }
 0x126   :  { %v2640_v3 = vpop.f32.mrf.mxu0 }
 0x127   :  { %v2833_v7 = vpop.f32.mrf.mxu1  ;;  %v11962_v10 = vadd.f32 %v2831_v61, %v2639_v1  ;;  %v2641_v11 = vadd.f32 %v2640_v3, %v11792_v5  ;;  %v10728_v1 = vld [vmem:[%s16221_s0 + $0xac] ss:$28 sps:$4 sm:$0xff]  }
 0x128   :  { %v2642_v12 = vpop.f32.mrf.mxu0  ;;  %3723 = vmatpush1.bf16.msra.mxu0 %v10325_v62 }
 0x129   :  { %v2835_v13 = vpop.f32.mrf.mxu1  ;;  %v11968_v19 = vadd.f32 %v2833_v7, %v2641_v11  ;;  %v2643_v21 = vadd.f32 %v2642_v12, %v11801_v9  ;;  %3724 = vmatprep.subr.bf16.mxu0 %v10334_v2  ;;  %v10353_v7 = vld [vmem:[%s16220_s1 + $0x558] ss:$20 sps:$4 sm:$0xff]   ;;  %v10361_v12 = vld [vmem:[%s16220_s1 + $0x534] ss:$20 sps:$4 sm:$0xff]  }
 0x12a   :  { %v2646_v24 = vpop.f32.mrf.mxu0  ;;  %3377 = vmatmul.mubr.bf16.gmra.mxu0 %v10725_v26 }
 0x12b   :  { %v2839_v25 = vpop.f32.mrf.mxu1  ;;  %3264 = vmatmul.mubr.bf16.gmra.mxu1 %v10310_v8  ;;  %v11977_v27 = vadd.f32 %v2835_v13, %v2643_v21  ;;  %v2647_v30 = vadd.f32 %v2646_v24, %v11792_v5  ;;  %3386 = vmatprep.mubr.bf16.mxu0 %v10726_v31  ;;  %v10321_v21 = vld [vmem:[%s16221_s0 + $0x280] ss:$28 sps:$4 sm:$0xff]  }
 0x12c   :  { %3273 = vmatprep.mubr.bf16.mxu1 %v16232_v18  ;;  %v2648_v32 = vpop.f32.mrf.mxu0  ;;  %3725 = vmatpush1.bf16.msra.mxu0 %v10332_v15 }
 0x12d   :  { %v2841_v33 = vpop.f32.mrf.mxu1  ;;  %v11987_v37 = vadd.f32 %v2839_v25, %v2647_v30  ;;  %v2649_v38 = vadd.f32 %v2648_v32, %v11801_v9  ;;  %3726 = vmatprep.subr.bf16.mxu0 %v10341_v22  ;;  %v10359_v30 = vld [vmem:[%s16220_s1 + $0x530] ss:$20 sps:$4 sm:$0xff]  }
 0x12e   :  { %v2650_v41 = vpop.f32.mrf.mxu0 }
 0x12f   :  { %v2843_v42 = vpop.f32.mrf.mxu1  ;;  %v11996_v46 = vadd.f32 %v2841_v33, %v2649_v38  ;;  %v2651_v47 = vadd.f32 %v2650_v41, %v11792_v5  ;;  %v10364_v33 = vld [vmem:[%s16220_s1 + $0x50c] ss:$20 sps:$4 sm:$0xff]  }
 0x130   :  { %v2652_v48 = vpop.f32.mrf.mxu0  ;;  %3727 = vmatpush1.bf16.msra.mxu0 %v10339_v34 }
 0x131   :  { %v2845_v50 = vpop.f32.mrf.mxu1  ;;  %v12002_v53 = vadd.f32 %v2843_v42, %v2651_v47  ;;  %v2653_v54 = vadd.f32 %v2652_v48, %v11801_v9  ;;  %3728 = vmatprep.subr.bf16.mxu0 %v10348_v39  ;;  %v10729_v39 = vld [vmem:[%s16221_s0 + $0xa8] ss:$28 sps:$4 sm:$0xff]  }
 0x132   :  { %v2656_v57 = vpop.f32.mrf.mxu0  ;;  %3387 = vmatmul.mubr.bf16.gmra.mxu0 %v10727_v60  ;;  %v10328_v60 = vld [vmem:[%s16221_s0 + $0x2b8] ss:$28 sps:$4 sm:$0xff]  }
 0x133   :  { %v2849_v59 = vpop.f32.mrf.mxu1  ;;  %3274 = vmatmul.mubr.bf16.gmra.mxu1 %v10314_v44  ;;  %v12011_v61 = vadd.f32 %v2845_v50, %v2653_v54  ;;  %v2657_v62 = vadd.f32 %v2656_v57, %v11792_v5  ;;  %3396 = vmatprep.mubr.bf16.mxu0 %v10728_v1  ;;  %v10730_v44 = vld [vmem:[%s16221_s0 + $0xe4] ss:$28 sps:$4 sm:$0xff]   ;;  %v10362_v50 = vld [vmem:[%s16220_s1 + $0x508] ss:$20 sps:$4 sm:$0xff]  }
 0x134   :  { %3283 = vmatprep.mubr.bf16.mxu1 %v16232_v18  ;;  %v2658_v2 = vpop.f32.mrf.mxu0  ;;  %3729 = vmatpush1.bf16.msra.mxu0 %v10346_v51 }
 0x135   :  { %v2851_v3 = vpop.f32.mrf.mxu1  ;;  %v12021_v8 = vadd.f32 %v2849_v59, %v2657_v62  ;;  %v2659_v11 = vadd.f32 %v2658_v2, %v11801_v9  ;;  %3730 = vmatprep.subr.bf16.mxu0 %v10355_v55  ;;  %v10370_v55 = vld [vmem:[%s16220_s1 + $0x764] ss:$20 sps:$4 sm:$0xff]  }
 0x136   :  { %v2660_v13 = vpop.f32.mrf.mxu0 }
 0x137   :  { %v2853_v15 = vpop.f32.mrf.mxu1  ;;  %v12030_v22 = vadd.f32 %v2851_v3, %v2659_v11  ;;  %v2661_v24 = vadd.f32 %v2660_v13, %v11792_v5  ;;  %v10373_v13 = vld [vmem:[%s16220_s1 + $0x73c] ss:$20 sps:$4 sm:$0xff]  }
 0x138   :  { %v2662_v25 = vpop.f32.mrf.mxu0  ;;  %3731 = vmatpush1.bf16.msra.mxu0 %v10353_v7  ;;  %v10368_v7 = vld [vmem:[%s16220_s1 + $0x760] ss:$20 sps:$4 sm:$0xff]  }
 0x139   :  { %v2855_v26 = vpop.f32.mrf.mxu1  ;;  %v12036_v31 = vadd.f32 %v2853_v15, %v2661_v24  ;;  %v2663_v32 = vadd.f32 %v2662_v25, %v11801_v9  ;;  %3732 = vmatprep.subr.bf16.mxu0 %v10361_v12  ;;  %v10731_v24 = vld [vmem:[%s16221_s0 + $0xe0] ss:$28 sps:$4 sm:$0xff]  }
 0x13a   :  { %v2666_v34 = vpop.f32.mrf.mxu0  ;;  %3397 = vmatmul.mubr.bf16.gmra.mxu0 %v10729_v39 }
 0x13b   :  { %v2859_v38 = vpop.f32.mrf.mxu1  ;;  %3284 = vmatmul.mubr.bf16.gmra.mxu1 %v10321_v21  ;;  %v12045_v41 = vadd.f32 %v2855_v26, %v2663_v32  ;;  %v2667_v42 = vadd.f32 %v2666_v34, %v11792_v5  ;;  %3406 = vmatprep.mubr.bf16.mxu0 %v10730_v44  ;;  %v10371_v34 = vld [vmem:[%s16220_s1 + $0x738] ss:$20 sps:$4 sm:$0xff]  }
 0x13c   :  { %3293 = vmatprep.mubr.bf16.mxu1 %v16232_v18  ;;  %v2668_v47 = vpop.f32.mrf.mxu0  ;;  %3733 = vmatpush1.bf16.msra.mxu0 %v10359_v30  ;;  %v10732_v30 = vld [vmem:[%s16221_s0 + $0x11c] ss:$28 sps:$4 sm:$0xff]  }
 0x13d   :  { %v2861_v48 = vpop.f32.mrf.mxu1  ;;  %v12055_v51 = vadd.f32 %v2859_v38, %v2667_v42  ;;  %v2669_v54 = vadd.f32 %v2668_v47, %v11801_v9  ;;  %3734 = vmatprep.subr.bf16.mxu0 %v10364_v33  ;;  %v10379_v42 = vld [vmem:[%s16220_s1 + $0x714] ss:$20 sps:$4 sm:$0xff]  }
 0x13e   :  { %v2670_v57 = vpop.f32.mrf.mxu0 }
 0x13f   :  { %v2863_v59 = vpop.f32.mrf.mxu1  ;;  %v12064_v62 = vadd.f32 %v2861_v48, %v2669_v54  ;;  %v2671_v1 = vadd.f32 %v2670_v57, %v11792_v5  ;;  %v10335_v48 = vld [vmem:[%s16221_s0 + $0x2f0] ss:$28 sps:$4 sm:$0xff]  }
 0x140   :  { %v2672_v2 = vpop.f32.mrf.mxu0  ;;  %3735 = vmatpush1.bf16.msra.mxu0 %v10362_v50 }
 0x141   :  { %v2865_v3 = vpop.f32.mrf.mxu1  ;;  %v12070_v11 = vadd.f32 %v2863_v59, %v2671_v1  ;;  %v2673_v12 = vadd.f32 %v2672_v2, %v11801_v9  ;;  %3736 = vmatprep.subr.bf16.mxu0 %v10370_v55  ;;  %v10377_v59 = vld [vmem:[%s16220_s1 + $0x710] ss:$20 sps:$4 sm:$0xff]   ;;  %v10382_v2 = vld [vmem:[%s16220_s1 + $0x6ec] ss:$20 sps:$4 sm:$0xff]  }
 0x142   :  { %v2676_v15 = vpop.f32.mrf.mxu0  ;;  %3407 = vmatmul.mubr.bf16.gmra.mxu0 %v10731_v24 }
 0x143   :  { %v2869_v21 = vpop.f32.mrf.mxu1  ;;  %3294 = vmatmul.mubr.bf16.gmra.mxu1 %v10328_v60  ;;  %v12079_v25 = vadd.f32 %v2865_v3, %v2673_v12  ;;  %v2677_v26 = vadd.f32 %v2676_v15, %v11792_v5  ;;  %3416 = vmatprep.mubr.bf16.mxu0 %v10732_v30  ;;  %v10733_v12 = vld [vmem:[%s16221_s0 + $0x118] ss:$28 sps:$4 sm:$0xff]   ;;  %v10380_v30 = vld [vmem:[%s16220_s1 + $0x6e8] ss:$20 sps:$4 sm:$0xff]  }
 0x144   :  { %3303 = vmatprep.mubr.bf16.mxu1 %v16232_v18  ;;  %v2678_v32 = vpop.f32.mrf.mxu0  ;;  %3737 = vmatpush2.bf16.msra.mxu0 %v10368_v7 }
 0x145   :  { %v2871_v33 = vpop.f32.mrf.mxu1  ;;  %v12089_v38 = vadd.f32 %v2869_v21, %v2677_v26  ;;  %v2679_v39 = vadd.f32 %v2678_v32, %v11801_v9  ;;  %3738 = vmatprep.subr.bf16.mxu0 %v10373_v13  ;;  %v10734_v21 = vld [vmem:[%s16221_s0 + $0x154] ss:$28 sps:$4 sm:$0xff]  }
 0x146   :  { %v2680_v44 = vpop.f32.mrf.mxu0 }
 0x147   :  { %v2873_v47 = vpop.f32.mrf.mxu1  ;;  %v12098_v50 = vadd.f32 %v2871_v33, %v2679_v39  ;;  %v2681_v54 = vadd.f32 %v2680_v44, %v11792_v5  ;;  %v10342_v44 = vld [vmem:[%s16221_s0 + $0x328] ss:$28 sps:$4 sm:$0xff]  }
 0x148   :  { %v2682_v55 = vpop.f32.mrf.mxu0  ;;  %3739 = vmatpush2.bf16.msra.mxu0 %v10371_v34  ;;  %v10385_v34 = vld [vmem:[%s16220_s1 + $0x6c4] ss:$20 sps:$4 sm:$0xff]  }
 0x149   :  { %v2875_v57 = vpop.f32.mrf.mxu1  ;;  %v12104_v60 = vadd.f32 %v2873_v47, %v2681_v54  ;;  %v2683_v1 = vadd.f32 %v2682_v55, %v11801_v9  ;;  %3740 = vmatprep.subr.bf16.mxu0 %v10379_v42 }
 0x14a   :  { %v2686_v3 = vpop.f32.mrf.mxu0  ;;  %3417 = vmatmul.mubr.bf16.gmra.mxu0 %v10733_v12  ;;  %v10735_v12 = vld [vmem:[%s16221_s0 + $0x150] ss:$28 sps:$4 sm:$0xff]  }
 0x14b   :  { %16310 = vst [vmem:[#allocation5_spill] sm:$0xff] %v12104_v60  ;;  %v2879_v7 = vpop.f32.mrf.mxu1  ;;  %3304 = vmatmul.mubr.bf16.gmra.mxu1 %v10335_v48  ;;  %v12113_v13 = vadd.f32 %v2875_v57, %v2683_v1  ;;  %v2687_v15 = vadd.f32 %v2686_v3, %v11792_v5  ;;  %3426 = vmatprep.mubr.bf16.mxu0 %v10734_v21  ;;  %v10383_v57 = vld [vmem:[%s16220_s1 + $0x6c0] ss:$20 sps:$4 sm:$0xff]  }
 0x14c   :  { %3313 = vmatprep.mubr.bf16.mxu1 %v16232_v18  ;;  %v2688_v24 = vpop.f32.mrf.mxu0  ;;  %3741 = vmatpush2.bf16.msra.mxu0 %v10377_v59 }
 0x14d   :  { %16311 = vst [vmem:[#allocation6_spill] sm:$0xff] %v12113_v13  ;;  %v2881_v26 = vpop.f32.mrf.mxu1  ;;  %v12123_v32 = vadd.f32 %v2879_v7, %v2687_v15  ;;  %v2689_v33 = vadd.f32 %v2688_v24, %v11801_v9  ;;  %3742 = vmatprep.subr.bf16.mxu0 %v10382_v2  ;;  %v10391_v2 = vld [vmem:[%s16220_s1 + $0x69c] ss:$20 sps:$4 sm:$0xff]   ;;  %v10736_v24 = vld [vmem:[%s16221_s0 + $0x18c] ss:$28 sps:$4 sm:$0xff]  }
 0x14e   :  { %v2690_v39 = vpop.f32.mrf.mxu0 }
 0x14f   :  { %16312 = vst [vmem:[#allocation7_spill] sm:$0xff] %v12123_v32  ;;  %v2883_v42 = vpop.f32.mrf.mxu1  ;;  %v12132_v47 = vadd.f32 %v2881_v26, %v2689_v33  ;;  %v2691_v48 = vadd.f32 %v2690_v39, %v11792_v5  ;;  %v10389_v33 = vld [vmem:[%s16220_s1 + $0x698] ss:$20 sps:$4 sm:$0xff]  }
 0x150   :  { %v2692_v54 = vpop.f32.mrf.mxu0  ;;  %3743 = vmatpush2.bf16.msra.mxu0 %v10380_v30 }
 0x151   :  { %16313 = vst [vmem:[#allocation8_spill] sm:$0xff] %v12132_v47  ;;  %v2885_v55 = vpop.f32.mrf.mxu1  ;;  %v12138_v59 = vadd.f32 %v2883_v42, %v2691_v48  ;;  %v2693_v1 = vadd.f32 %v2692_v54, %v11801_v9  ;;  %3744 = vmatprep.subr.bf16.mxu0 %v10385_v34  ;;  %v10394_v42 = vld [vmem:[%s16220_s1 + $0x674] ss:$20 sps:$4 sm:$0xff]   ;;  %v10349_v54 = vld [vmem:[%s16221_s0 + $0x360] ss:$28 sps:$4 sm:$0xff]  }
 0x152   :  { %v2696_v3 = vpop.f32.mrf.mxu0  ;;  %3427 = vmatmul.mubr.bf16.gmra.mxu0 %v10735_v12 }
 0x153   :  { %16314 = vst [vmem:[#allocation9_spill] sm:$0xff] %v12138_v59  ;;  %v2889_v7 = vpop.f32.mrf.mxu1  ;;  %3314 = vmatmul.mubr.bf16.gmra.mxu1 %v10342_v44  ;;  %v12147_v15 = vadd.f32 %v2885_v55, %v2693_v1  ;;  %v2697_v21 = vadd.f32 %v2696_v3, %v11792_v5  ;;  %3436 = vmatprep.mubr.bf16.mxu0 %v10736_v24 }
 0x154   :  { %3323 = vmatprep.mubr.bf16.mxu1 %v16232_v18  ;;  %v2698_v26 = vpop.f32.mrf.mxu0  ;;  %3745 = vmatpush2.bf16.msra.mxu0 %v10383_v57 }
 0x155   :  { %16315 = vst [vmem:[#allocation10_spill] sm:$0xff] %v12147_v15  ;;  %v2891_v30 = vpop.f32.mrf.mxu1  ;;  %v12157_v34 = vadd.f32 %v2889_v7, %v2697_v21  ;;  %v2699_v39 = vadd.f32 %v2698_v26, %v11801_v9  ;;  %3746 = vmatprep.subr.bf16.mxu0 %v10391_v2  ;;  %v10392_v2 = vld [vmem:[%s16220_s1 + $0x670] ss:$20 sps:$4 sm:$0xff]   ;;  %v10397_v21 = vld [vmem:[%s16220_s1 + $0x64c] ss:$20 sps:$4 sm:$0xff]  }
 0x156   :  { %v2700_v44 = vpop.f32.mrf.mxu0 }
 0x157   :  { %16316 = vst [vmem:[#allocation11_spill] sm:$0xff] %v12157_v34  ;;  %v2893_v48 = vpop.f32.mrf.mxu1  ;;  %v12166_v55 = vadd.f32 %v2891_v30, %v2699_v39  ;;  %v2701_v57 = vadd.f32 %v2700_v44, %v11792_v5  ;;  %v10737_v30 = vld [vmem:[%s16221_s0 + $0x188] ss:$28 sps:$4 sm:$0xff]  }
 0x158   :  { %v2702_v1 = vpop.f32.mrf.mxu0  ;;  %3747 = vmatpush2.bf16.msra.mxu0 %v10389_v33  ;;  %v10739_v44 = vld [vmem:[%s16221_s0 + $0xc] ss:$28 sps:$4 sm:$0xff]  }
 0x159   :  { %16317 = vst [vmem:[#allocation12_spill] sm:$0xff] %v12166_v55  ;;  %v2895_v3 = vpop.f32.mrf.mxu1  ;;  %v12172_v7 = vadd.f32 %v2893_v48, %v2701_v57  ;;  %v2703_v12 = vadd.f32 %v2702_v1, %v11801_v9  ;;  %3748 = vmatprep.subr.bf16.mxu0 %v10394_v42  ;;  %v10738_v42 = vld [vmem:[%s16221_s0 + $0x1c4] ss:$28 sps:$4 sm:$0xff]   ;;  %v10395_v57 = vld [vmem:[%s16220_s1 + $0x648] ss:$20 sps:$4 sm:$0xff]  }
 0x15a   :  { %v2706_v24 = vpop.f32.mrf.mxu0  ;;  %3437 = vmatmul.mubr.bf16.gmra.mxu0 %v10737_v30 }
 0x15b   :  { %16318 = vst [vmem:[#allocation13_spill] sm:$0xff] %v12172_v7  ;;  %v2899_v26 = vpop.f32.mrf.mxu1  ;;  %3324 = vmatmul.mubr.bf16.gmra.mxu1 %v10349_v54  ;;  %v12181_v33 = vadd.f32 %v2895_v3, %v2703_v12  ;;  %v2707_v39 = vadd.f32 %v2706_v24, %v11792_v5  ;;  %3446 = vmatprep.mubr.bf16.mxu0 %v10738_v42  ;;  %v10404_v12 = vld [vmem:[%s16220_s1 + $0x268] ss:$20 sps:$4 sm:$0xff]  }
 0x15c   :  { %3559 = vmatprep.mubr.bf16.mxu1 %v10739_v44  ;;  %v2708_v48 = vpop.f32.mrf.mxu0  ;;  %3749 = vmatpush2.bf16.msra.mxu0 %v10392_v2  ;;  %v10356_v2 = vld [vmem:[%s16220_s1 + $0x8a0] ss:$20 sps:$4 sm:$0xff]  }
 0x15d   :  { %16319 = vst [vmem:[#allocation14_spill] sm:$0xff] %v12181_v33  ;;  %v2901_v54 = vpop.f32.mrf.mxu1  ;;  %v12193_v1 = vadd.f32 %v2899_v26, %v2707_v39  ;;  %v2709_v3 = vadd.f32 %v2708_v48, %v11801_v9  ;;  %3750 = vmatprep.subr.bf16.mxu0 %v10397_v21  ;;  %v10367_v21 = vld [vmem:[%s16220_s1 + $0x87c] ss:$20 sps:$4 sm:$0xff]  }
 0x15e   :  { %v2710_v24 = vpop.f32.mrf.mxu0 }
 0x15f   :  { %16320 = vst [vmem:[#allocation15_spill] sm:$0xff] %v12193_v1  ;;  %v2903_v30 = vpop.f32.mrf.mxu1  ;;  %v12199_v42 = vadd.f32 %v2901_v54, %v2709_v3  ;;  %v2711_v44 = vadd.f32 %v2710_v24, %v11792_v5  ;;  %v10740_v24 = vld [vmem:[%s16221_s0 + $0x1c0] ss:$28 sps:$4 sm:$0xff]  }
 0x160   :  { %v2712_v18 = vpop.f32.mrf.mxu0  ;;  %3751 = vmatpush2.bf16.msra.mxu0 %v10395_v57 }
 0x161   :  { %16321 = vst [vmem:[#allocation16_spill] sm:$0xff] %v12199_v42  ;;  %v2905_v26 = vpop.f32.mrf.mxu1  ;;  %v12208_v39 = vadd.f32 %v2903_v30, %v2711_v44  ;;  %v2713_v48 = vadd.f32 %v2712_v18, %v11801_v9  ;;  %8993 = vmatprep.subr.bf16.mxu0 %v10404_v12  ;;  %v10742_v18 = vld [vmem:[%s16221_s0 + $0x1fc] ss:$28 sps:$4 sm:$0xff]  }
 0x162   :  { %v2716_v54 = vpop.f32.mrf.mxu0  ;;  %3447 = vmatmul.mubr.bf16.gmra.mxu0 %v10740_v24  ;;  %v10365_v12 = vld [vmem:[%s16220_s1 + $0x878] ss:$20 sps:$4 sm:$0xff]  }
 0x163   :  { %16322 = vst [vmem:[#allocation17_spill] sm:$0xff] %v12208_v39  ;;  %v2909_v3 = vpop.f32.mrf.mxu1  ;;  %3560 = vmatmul.mubr.bf16.vlgmr.msra.gmra.mxu1 %v10741_v17  ;;  %v12217_v16 = vadd.f32 %v2905_v26, %v2713_v48  ;;  %v2717_v57 = vadd.f32 %v2716_v54, %v11792_v5  ;;  %3456 = vmatprep.mubr.bf16.mxu0 %v10742_v18  ;;  %v10743_v17 = vld [vmem:[%s16221_s0 + $0x44] ss:$28 sps:$4 sm:$0xff]  }
 0x164   :  { %3914 = vmatpush1.bf16.msra.mxu1 %v10356_v2  ;;  %v2718_v30 = vpop.f32.mrf.mxu0  ;;  %3569 = vmatprep.mubr.bf16.mxu1 %v10743_v17  ;;  %v10376_v2 = vld [vmem:[%s16220_s1 + $0x854] ss:$20 sps:$4 sm:$0xff]  }
 0x165   :  { %16323 = vst [vmem:[#allocation18_spill] sm:$0xff] %v12217_v16  ;;  %v2911_v44 = vpop.f32.mrf.mxu1  ;;  %3915 = vmatprep.subr.bf16.mxu1 %v10367_v21  ;;  %v12232_v26 = vadd.f32 %v2909_v3, %v2717_v57  ;;  %v2719_v48 = vadd.f32 %v2718_v30, %v11801_v9  ;;  %v10374_v21 = vld [vmem:[%s16220_s1 + $0x850] ss:$20 sps:$4 sm:$0xff]   ;;  %v10388_v57 = vld [vmem:[%s16220_s1 + $0x82c] ss:$20 sps:$4 sm:$0xff]  }
 0x166   :  { %v2720_v54 = vpop.f32.mrf.mxu0 }
 0x167   :  { %v2913_v24 = vpop.f32.mrf.mxu1  ;;  %v12235_v18 = vadd.f32 %v2911_v44, %v2719_v48  ;;  %v2721_v6 = vadd.f32 %v2720_v54, %v11792_v5  ;;  %v10745_v48 = vld [vmem:[%s16221_s0 + $0x40] ss:$28 sps:$4 sm:$0xff]  }
 0x168   :  { %3916 = vmatpush1.bf16.msra.mxu1 %v10365_v12  ;;  %v2722_v16 = vpop.f32.mrf.mxu0  ;;  %v10744_v12 = vld [vmem:[%s16221_s0 + $0x1f8] ss:$28 sps:$4 sm:$0xff]  }
 0x169   :  { %v2915_v39 = vpop.f32.mrf.mxu1  ;;  %3917 = vmatprep.subr.bf16.mxu1 %v10376_v2  ;;  %v12241_v17 = vadd.f32 %v2913_v24, %v2721_v6  ;;  %v2723_v3 = vadd.f32 %v2722_v16, %v11801_v9  ;;  %v10746_v2 = vld [vmem:[%s16221_s0 + $0x234] ss:$28 sps:$4 sm:$0xff]   ;;  %v10747_v54 = vld [vmem:[%s16221_s0 + $0x7c] ss:$28 sps:$4 sm:$0xff]  }
 0x16a   :  { %v2726_v30 = vpop.f32.mrf.mxu0  ;;  %3457 = vmatmul.mubr.bf16.gmra.mxu0 %v10744_v12 }
 0x16b   :  { %v2919_v44 = vpop.f32.mrf.mxu1  ;;  %3570 = vmatmul.mubr.bf16.gmra.mxu1 %v10745_v48  ;;  %v12253_v6 = vadd.f32 %v2915_v39, %v2723_v3  ;;  %v2727_v16 = vadd.f32 %v2726_v30, %v11792_v5  ;;  %3466 = vmatprep.mubr.bf16.mxu0 %v10746_v2  ;;  %v10386_v39 = vld [vmem:[%s16220_s1 + $0x828] ss:$20 sps:$4 sm:$0xff]   ;;  %v10400_v48 = vld [vmem:[%s16220_s1 + $0x804] ss:$20 sps:$4 sm:$0xff]  }
 0x16c   :  { %3579 = vmatprep.mubr.bf16.mxu1 %v10747_v54  ;;  %v2728_v24 = vpop.f32.mrf.mxu0  ;;  %3918 = vmatpush1.bf16.msra.mxu1 %v10374_v21 }
 0x16d   :  { %v2921_v12 = vpop.f32.mrf.mxu1  ;;  %v12265_v3 = vadd.f32 %v2919_v44, %v2727_v16  ;;  %v2729_v30 = vadd.f32 %v2728_v24, %v11801_v9  ;;  %3919 = vmatprep.subr.bf16.mxu1 %v10388_v57  ;;  %v10398_v44 = vld [vmem:[%s16220_s1 + $0x800] ss:$20 sps:$4 sm:$0xff]   ;;  %v10403_v24 = vld [vmem:[%s16220_s1 + $0x7dc] ss:$20 sps:$4 sm:$0xff]  }
 0x16e   :  { %v2730_v2 = vpop.f32.mrf.mxu0 }
 0x16f   :  { %v2923_v42 = vpop.f32.mrf.mxu1  ;;  %v12271_v1 = vadd.f32 %v2921_v12, %v2729_v30  ;;  %v2731_v54 = vadd.f32 %v2730_v2, %v11792_v5  ;;  %v10748_v2 = vld [vmem:[%s16221_s0 + $0x230] ss:$28 sps:$4 sm:$0xff]  }
 0x170   :  { %v2732_v21 = vpop.f32.mrf.mxu0  ;;  %3920 = vmatpush1.bf16.msra.mxu1 %v10386_v39  ;;  %v10749_v39 = vld [vmem:[%s16221_s0 + $0x78] ss:$28 sps:$4 sm:$0xff]  }
 0x171   :  { %v2925_v33 = vpop.f32.mrf.mxu1  ;;  %v12277_v16 = vadd.f32 %v2923_v42, %v2731_v54  ;;  %v2733_v57 = vadd.f32 %v2732_v21, %v11801_v9  ;;  %3921 = vmatprep.subr.bf16.mxu1 %v10400_v48  ;;  %v10750_v54 = vld [vmem:[%s16221_s0 + $0x26c] ss:$28 sps:$4 sm:$0xff]   ;;  %v10751_v21 = vld [vmem:[%s16221_s0 + $0xb4] ss:$28 sps:$4 sm:$0xff]  }
 0x172   :  { %v2736_v12 = vpop.f32.mrf.mxu0  ;;  %3467 = vmatmul.mubr.bf16.gmra.mxu0 %v10748_v2 }
 0x173   :  { %v2929_v30 = vpop.f32.mrf.mxu1  ;;  %3580 = vmatmul.mubr.bf16.gmra.mxu1 %v10749_v39  ;;  %v12289_v42 = vadd.f32 %v2925_v33, %v2733_v57  ;;  %v2737_v48 = vadd.f32 %v2736_v12, %v11792_v5  ;;  %3476 = vmatprep.mubr.bf16.mxu0 %v10750_v54  ;;  %v10401_v33 = vld [vmem:[%s16220_s1 + $0x7d8] ss:$20 sps:$4 sm:$0xff]   ;;  %v10408_v39 = vld [vmem:[%s16220_s1 + $0x7b4] ss:$20 sps:$4 sm:$0xff]  }
 0x174   :  { %3589 = vmatprep.mubr.bf16.mxu1 %v10751_v21  ;;  %v2738_v2 = vpop.f32.mrf.mxu0  ;;  %3922 = vmatpush1.bf16.msra.mxu1 %v10398_v44 }
 0x175   :  { %v2931_v7 = vpop.f32.mrf.mxu1  ;;  %v12301_v57 = vadd.f32 %v2929_v30, %v2737_v48  ;;  %v2739_v12 = vadd.f32 %v2738_v2, %v11801_v9  ;;  %3923 = vmatprep.subr.bf16.mxu1 %v10403_v24  ;;  %v10406_v30 = vld [vmem:[%s16220_s1 + $0x7b0] ss:$20 sps:$4 sm:$0xff]   ;;  %v10413_v2 = vld [vmem:[%s16220_s1 + $0x78c] ss:$20 sps:$4 sm:$0xff]  }
 0x176   :  { %v2740_v54 = vpop.f32.mrf.mxu0 }
 0x177   :  { %v2933_v55 = vpop.f32.mrf.mxu1  ;;  %v12307_v34 = vadd.f32 %v2931_v7, %v2739_v12  ;;  %v2741_v21 = vadd.f32 %v2740_v54, %v11792_v5  ;;  %v10752_v54 = vld [vmem:[%s16221_s0 + $0x268] ss:$28 sps:$4 sm:$0xff]  }
 0x178   :  { %v2742_v44 = vpop.f32.mrf.mxu0  ;;  %3924 = vmatpush1.bf16.msra.mxu1 %v10401_v33  ;;  %v10753_v33 = vld [vmem:[%s16221_s0 + $0xb0] ss:$28 sps:$4 sm:$0xff]  }
 0x179   :  { %v2935_v15 = vpop.f32.mrf.mxu1  ;;  %v12313_v48 = vadd.f32 %v2933_v55, %v2741_v21  ;;  %v2743_v24 = vadd.f32 %v2742_v44, %v11801_v9  ;;  %3925 = vmatprep.subr.bf16.mxu1 %v10408_v39  ;;  %v10754_v21 = vld [vmem:[%s16221_s0 + $0x2a4] ss:$28 sps:$4 sm:$0xff]   ;;  %v10755_v44 = vld [vmem:[%s16221_s0 + $0xec] ss:$28 sps:$4 sm:$0xff]  }
 0x17a   :  { %v2746_v7 = vpop.f32.mrf.mxu0  ;;  %3477 = vmatmul.mubr.bf16.gmra.mxu0 %v10752_v54 }
 0x17b   :  { %v2939_v12 = vpop.f32.mrf.mxu1  ;;  %3590 = vmatmul.mubr.bf16.gmra.mxu1 %v10753_v33  ;;  %v12325_v55 = vadd.f32 %v2935_v15, %v2743_v24  ;;  %v2747_v39 = vadd.f32 %v2746_v7, %v11792_v5  ;;  %3486 = vmatprep.mubr.bf16.mxu0 %v10754_v21  ;;  %v10411_v15 = vld [vmem:[%s16220_s1 + $0x788] ss:$20 sps:$4 sm:$0xff]  }
 0x17c   :  { %3599 = vmatprep.mubr.bf16.mxu1 %v10755_v44  ;;  %v2748_v54 = vpop.f32.mrf.mxu0  ;;  %3926 = vmatpush1.bf16.msra.mxu1 %v10406_v30  ;;  %v10416_v33 = vld [vmem:[%s16220_s1 + $0x4e8] ss:$20 sps:$4 sm:$0xff]  }
 0x17d   :  { %v2941_v59 = vpop.f32.mrf.mxu1  ;;  %v12337_v24 = vadd.f32 %v2939_v12, %v2747_v39  ;;  %v2749_v7 = vadd.f32 %v2748_v54, %v11801_v9  ;;  %3927 = vmatprep.subr.bf16.mxu1 %v10413_v2  ;;  %v10756_v54 = vld [vmem:[%s16221_s0 + $0x2a0] ss:$28 sps:$4 sm:$0xff]  }
 0x17e   :  { %v2750_v21 = vpop.f32.mrf.mxu0 }
 0x17f   :  { %v2943_v47 = vpop.f32.mrf.mxu1  ;;  %v12343_v32 = vadd.f32 %v2941_v59, %v2749_v7  ;;  %v2751_v44 = vadd.f32 %v2750_v21, %v11792_v5  ;;  %v10757_v59 = vld [vmem:[%s16221_s0 + $0xe8] ss:$28 sps:$4 sm:$0xff]  }
 0x180   :  { %v2752_v30 = vpop.f32.mrf.mxu0  ;;  %3928 = vmatpush1.bf16.msra.mxu1 %v10411_v15  ;;  %v10758_v15 = vld [vmem:[%s16221_s0 + $0x2dc] ss:$28 sps:$4 sm:$0xff]   ;;  %v10759_v7 = vld [vmem:[%s16221_s0 + $0x124] ss:$28 sps:$4 sm:$0xff]  }
 0x181   :  { %v2945_v13 = vpop.f32.mrf.mxu1  ;;  %v12346_v60 = vadd.f32 %v2943_v47, %v2751_v44  ;;  %v2753_v12 = vadd.f32 %v2752_v30, %v11801_v9  ;;  %9105 = vmatprep.subr.bf16.mxu1 %v10416_v33 }
 0x182   :  { %v2982_v39 = vpop.f32.mrf.mxu0  ;;  %3487 = vmatmul.mubr.bf16.gmra.mxu0 %v10756_v54 }
 0x183   :  { %v3102_v2 = vpop.f32.mrf.mxu1  ;;  %3600 = vmatmul.mubr.bf16.gmra.mxu1 %v10757_v59  ;;  %v12355_v5 = vadd.f32 %v2945_v13, %v2753_v12  ;;  %v12358_v47 = vadd.f32 %v2982_v39, %v11811_v20  ;;  %3496 = vmatprep.mubr.bf16.mxu0 %v10758_v15 }
 0x184   :  { %v12361_v9 = vadd.f32 %v3102_v2, %v12232_v26  ;;  %3609 = vmatprep.mubr.bf16.mxu1 %v10759_v7  ;;  %v2984_v33 = vpop.f32.mrf.mxu0  ;;  %v10763_v7 = vld [vmem:[%s16221_s0 + $0x15c] ss:$28 sps:$4 sm:$0xff]  }
 0x185   :  { %v3104_v21 = vpop.f32.mrf.mxu1  ;;  %v12370_v13 = vadd.f32 %v2984_v33, %v11826_v28 }
 0x186   :  { %v12373_v20 = vadd.f32 %v3104_v21, %v12235_v18  ;;  %v2986_v26 = vpop.f32.mrf.mxu0  ;;  %v10760_v18 = vld [vmem:[%s16221_s0 + $0x2d8] ss:$28 sps:$4 sm:$0xff]  }
 0x187   :  { %v3106_v44 = vpop.f32.mrf.mxu1  ;;  %v12376_v30 = vadd.f32 %v2986_v26, %v11838_v35  ;;  %v10761_v35 = vld [vmem:[%s16221_s0 + $0x120] ss:$28 sps:$4 sm:$0xff]  }
 0x188   :  { %v12379_v12 = vadd.f32 %v3106_v44, %v12241_v17  ;;  %v2988_v39 = vpop.f32.mrf.mxu0 }
 0x189   :  { %v3108_v2 = vpop.f32.mrf.mxu1  ;;  %v12382_v54 = vadd.f32 %v2988_v39, %v11844_v40 }
 0x18a   :  { %v12385_v59 = vadd.f32 %v3108_v2, %v12253_v6  ;;  %v2992_v28 = vpop.f32.mrf.mxu0  ;;  %3497 = vmatmul.mubr.bf16.gmra.mxu0 %v10760_v18  ;;  %v10762_v6 = vld [vmem:[%s16221_s0 + $0x314] ss:$28 sps:$4 sm:$0xff]  }
 0x18b   :  { %v3112_v15 = vpop.f32.mrf.mxu1  ;;  %3610 = vmatmul.mubr.bf16.gmra.mxu1 %v10761_v35  ;;  %v12394_v17 = vadd.f32 %v2992_v28, %v11851_v45  ;;  %3506 = vmatprep.mubr.bf16.mxu0 %v10762_v6 }
 0x18c   :  { %v12397_v40 = vadd.f32 %v3112_v15, %v12265_v3  ;;  %3619 = vmatprep.mubr.bf16.mxu1 %v10763_v7  ;;  %v2994_v33 = vpop.f32.mrf.mxu0  ;;  %v10767_v7 = vld [vmem:[%s16221_s0 + $0x194] ss:$28 sps:$4 sm:$0xff]  }
 0x18d   :  { %v3114_v21 = vpop.f32.mrf.mxu1  ;;  %v12406_v26 = vadd.f32 %v2994_v33, %v11863_v52 }
 0x18e   :  { %v12409_v45 = vadd.f32 %v3114_v21, %v12271_v1  ;;  %v2996_v3 = vpop.f32.mrf.mxu0  ;;  %v10764_v1 = vld [vmem:[%s16221_s0 + $0x310] ss:$28 sps:$4 sm:$0xff]  }
 0x18f   :  { %v3116_v44 = vpop.f32.mrf.mxu1  ;;  %v12412_v39 = vadd.f32 %v2996_v3, %v11872_v58  ;;  %v10765_v58 = vld [vmem:[%s16221_s0 + $0x158] ss:$28 sps:$4 sm:$0xff]  }
 0x190   :  { %v12415_v2 = vadd.f32 %v3116_v44, %v12277_v16  ;;  %v2998_v28 = vpop.f32.mrf.mxu0 }
 0x191   :  { %v3118_v15 = vpop.f32.mrf.mxu1  ;;  %v12418_v18 = vadd.f32 %v2998_v28, %v11878_v63 }
 0x192   :  { %v12421_v35 = vadd.f32 %v3118_v15, %v12289_v42  ;;  %v3002_v52 = vpop.f32.mrf.mxu0  ;;  %3507 = vmatmul.mubr.bf16.gmra.mxu0 %v10764_v1  ;;  %v10766_v42 = vld [vmem:[%s16221_s0 + $0x34c] ss:$28 sps:$4 sm:$0xff]  }
 0x193   :  { %v3122_v6 = vpop.f32.mrf.mxu1  ;;  %3620 = vmatmul.mubr.bf16.gmra.mxu1 %v10765_v58  ;;  %v12430_v16 = vadd.f32 %v3002_v52, %v11885_v4  ;;  %3516 = vmatprep.mubr.bf16.mxu0 %v10766_v42 }
 0x194   :  { %v12433_v63 = vadd.f32 %v3122_v6, %v12301_v57  ;;  %3629 = vmatprep.mubr.bf16.mxu1 %v10767_v7  ;;  %v3004_v33 = vpop.f32.mrf.mxu0  ;;  %v10771_v7 = vld [vmem:[%s16221_s0 + $0x14] ss:$28 sps:$4 sm:$0xff]  }
 0x195   :  { %v3124_v21 = vpop.f32.mrf.mxu1  ;;  %v12442_v3 = vadd.f32 %v3004_v33, %v11897_v14 }
 0x196   :  { %v12445_v4 = vadd.f32 %v3124_v21, %v12307_v34  ;;  %v3006_v57 = vpop.f32.mrf.mxu0  ;;  %v10768_v34 = vld [vmem:[%s16221_s0 + $0x348] ss:$28 sps:$4 sm:$0xff]  }
 0x197   :  { %v3126_v44 = vpop.f32.mrf.mxu1  ;;  %v12448_v28 = vadd.f32 %v3006_v57, %v11903_v23  ;;  %v10769_v23 = vld [vmem:[%s16221_s0 + $0x190] ss:$28 sps:$4 sm:$0xff]  }
 0x198   :  { %v12451_v15 = vadd.f32 %v3126_v44, %v12313_v48  ;;  %v3008_v52 = vpop.f32.mrf.mxu0 }
 0x199   :  { %v3128_v6 = vpop.f32.mrf.mxu1  ;;  %v12454_v1 = vadd.f32 %v3008_v52, %v11909_v29 }
 0x19a   :  { %v12457_v58 = vadd.f32 %v3128_v6, %v12325_v55  ;;  %v3012_v14 = vpop.f32.mrf.mxu0  ;;  %3517 = vmatmul.mubr.bf16.gmra.mxu0 %v10768_v34  ;;  %v10770_v55 = vld [vmem:[%s16221_s0 + $0x1cc] ss:$28 sps:$4 sm:$0xff]  }
 0x19b   :  { %v3132_v42 = vpop.f32.mrf.mxu1  ;;  %3630 = vmatmul.mubr.bf16.gmra.mxu1 %v10769_v23  ;;  %v12466_v48 = vadd.f32 %v3012_v14, %v11919_v36  ;;  %3752 = vmatprep.mubr.bf16.mxu0 %v10771_v7  ;;  %v10405_v34 = vld [vmem:[%s16220_s1 + $0x128] ss:$20 sps:$4 sm:$0xff]   ;;  %v10773_v7 = vld [vmem:[%s16221_s0 + $0x10] ss:$28 sps:$4 sm:$0xff]  }
 0x19c   :  { %v12469_v29 = vadd.f32 %v3132_v42, %v12337_v24  ;;  %3639 = vmatprep.mubr.bf16.mxu1 %v10770_v55  ;;  %v3014_v33 = vpop.f32.mrf.mxu0 }
 0x19d   :  { %v3134_v21 = vpop.f32.mrf.mxu1  ;;  %v12478_v57 = vadd.f32 %v3014_v33, %v11928_v43  ;;  %v10774_v33 = vld [vmem:[%s16221_s0 + $0x204] ss:$28 sps:$4 sm:$0xff]  }
 0x19e   :  { %v12481_v36 = vadd.f32 %v3134_v21, %v12343_v32  ;;  %v3016_v24 = vpop.f32.mrf.mxu0  ;;  %v10775_v21 = vld [vmem:[%s16221_s0 + $0x4c] ss:$28 sps:$4 sm:$0xff]  }
 0x19f   :  { %v3136_v44 = vpop.f32.mrf.mxu1  ;;  %v12484_v52 = vadd.f32 %v3016_v24, %v11934_v49  ;;  %v10409_v49 = vld [vmem:[%s16220_s1 + $0x240] ss:$20 sps:$4 sm:$0xff]  }
 0x1a0   :  { %v12487_v6 = vadd.f32 %v3136_v44, %v12346_v60  ;;  %v3018_v14 = vpop.f32.mrf.mxu0  ;;  %v10772_v60 = vld [vmem:[%s16221_s0 + $0x1c8] ss:$28 sps:$4 sm:$0xff]  }
 0x1a1   :  { %v3138_v42 = vpop.f32.mrf.mxu1  ;;  %v12493_v43 = vadd.f32 %v3018_v14, %v11943_v56 }
 0x1a2   :  { %v12496_v32 = vadd.f32 %v3138_v42, %v12355_v5  ;;  %v3022_v23 = vpop.f32.mrf.mxu0  ;;  %3753 = vmatmul.mubr.bf16.vlgmr.msra.gmra.mxu0 %v10773_v7  ;;  %v10414_v42 = vld [vmem:[%s16220_s1 + $0x218] ss:$20 sps:$4 sm:$0xff]  }
 0x1a3   :  { %v3175_v55 = vpop.f32.mrf.mxu1  ;;  %3640 = vmatmul.mubr.bf16.gmra.mxu1 %v10772_v60  ;;  %v12508_v56 = vadd.f32 %v3022_v23, %v11953_v0  ;;  %3762 = vmatprep.mubr.bf16.mxu0 %v10775_v21  ;;  %v10410_v0 = vld [vmem:[%s16220_s1 + $0x100] ss:$20 sps:$4 sm:$0xff]  }
 0x1a4   :  { %v3176_v5 = vadd.f32 %v3175_v55, %v12358_v47  ;;  %3649 = vmatprep.mubr.bf16.mxu1 %v10774_v33  ;;  %v3024_v24 = vpop.f32.mrf.mxu0  ;;  %8994 = vmatpush3.bf16.msra.mxu0 %v10405_v34 }
 0x1a5   :  { %v3177_v44 = vpop.f32.mrf.mxu1  ;;  %v12521_v14 = vadd.f32 %v3024_v24, %v11962_v10  ;;  %8995 = vmatprep.subr.bf16.mxu0 %v10409_v49  ;;  %v10415_v10 = vld [vmem:[%s16220_s1 + $0xd8] ss:$20 sps:$4 sm:$0xff]  }
 0x1a6   :  { %v3178_v47 = vadd.f32 %v3177_v44, %v12370_v13  ;;  %v3026_v23 = vpop.f32.mrf.mxu0  ;;  %v4750_v13 = vmax.f32 %v3176_v5, 0.0 }
 0x1a7   :  { %v3179_v55 = vpop.f32.mrf.mxu1  ;;  %v12528_v60 = vadd.f32 %v3026_v23, %v11968_v19  ;;  %v10417_v19 = vld [vmem:[%s16220_s1 + $0x1f0] ss:$20 sps:$4 sm:$0xff]  }
 0x1a8   :  { %v3180_v34 = vadd.f32 %v3179_v55, %v12376_v30  ;;  %v3028_v7 = vpop.f32.mrf.mxu0  ;;  %8996 = vmatpush3.bf16.msra.mxu0 %v10410_v0  ;;  %v4751_v30 = vmax.f32 %v3178_v47, 0.0  ;;  %v10776_v0 = vld [vmem:[%s16221_s0 + $0x200] ss:$28 sps:$4 sm:$0xff]  }
 0x1a9   :  { %v3181_v33 = vpop.f32.mrf.mxu1  ;;  %v12535_v21 = vadd.f32 %v3028_v7, %v11977_v27  ;;  %8997 = vmatprep.subr.bf16.mxu0 %v10414_v42  ;;  %v10777_v27 = vld [vmem:[%s16221_s0 + $0x48] ss:$28 sps:$4 sm:$0xff]   ;;  %v10778_v55 = vld [vmem:[%s16221_s0 + $0x23c] ss:$28 sps:$4 sm:$0xff]  }
 0x1aa   :  { %v4755_v49 = vmax.f32 %v3180_v34, 0.0  ;;  %v3182_v24 = vadd.f32 %v3181_v33, %v12382_v54  ;;  %v3032_v44 = vpop.f32.mrf.mxu0  ;;  %3763 = vmatmul.mubr.bf16.gmra.mxu0 %v10777_v27  ;;  %v10779_v34 = vld [vmem:[%s16221_s0 + $0x84] ss:$28 sps:$4 sm:$0xff]  }
 0x1ab   :  { %v3185_v23 = vpop.f32.mrf.mxu1  ;;  %3650 = vmatmul.mubr.bf16.gmra.mxu1 %v10776_v0  ;;  %v12550_v42 = vadd.f32 %v3032_v44, %v11987_v37  ;;  %3772 = vmatprep.mubr.bf16.mxu0 %v10779_v34  ;;  %v10419_v37 = vld [vmem:[%s16220_s1 + $0xb0] ss:$20 sps:$4 sm:$0xff]  }
 0x1ac   :  { %v12547_v5 = vpack.c.bf16 %v4755_v49, %v4750_v13  ;;  %v4756_v54 = vmax.f32 %v3182_v24, 0.0  ;;  %v3186_v47 = vadd.f32 %v3185_v23, %v12394_v17  ;;  %3659 = vmatprep.mubr.bf16.mxu1 %v10778_v55  ;;  %v3034_v7 = vpop.f32.mrf.mxu0  ;;  %8998 = vmatpush3.bf16.msra.mxu0 %v10415_v10  ;;  %v10421_v49 = vld [vmem:[%s16220_s1 + $0x1c8] ss:$20 sps:$4 sm:$0xff]  }
 0x1ad   :  { %v3187_v33 = vpop.f32.mrf.mxu1  ;;  %v12563_v13 = vadd.f32 %v3034_v7, %v11996_v46  ;;  %8999 = vmatprep.subr.bf16.mxu0 %v10417_v19  ;;  %v10423_v46 = vld [vmem:[%s16220_s1 + $0x88] ss:$20 sps:$4 sm:$0xff]  }
 0x1ae   :  { %16324 = vst [vmem:[#allocation19_spill] sm:$0xff] %v12547_v5  ;;  %v3188_v17 = vadd.f32 %v3187_v33, %v12406_v26  ;;  %v12569_v24 = vpack.c.bf16 %v4756_v54, %v4751_v30  ;;  %v3036_v44 = vpop.f32.mrf.mxu0  ;;  %v4760_v26 = vmax.f32 %v3186_v47, 0.0  ;;  %v10780_v33 = vld [vmem:[%s16221_s0 + $0x238] ss:$28 sps:$4 sm:$0xff]  }
 0x1af   :  { %v3189_v23 = vpop.f32.mrf.mxu1  ;;  %v12572_v10 = vadd.f32 %v3036_v44, %v12002_v53  ;;  %v10425_v53 = vld [vmem:[%s16220_s1 + $0x1a0] ss:$20 sps:$4 sm:$0xff]   ;;  %v10783_v44 = vld [vmem:[%s16221_s0 + $0xbc] ss:$28 sps:$4 sm:$0xff]  }
 0x1b0   :  { %16325 = vst [vmem:[#allocation20_spill] sm:$0xff] %v12569_v24  ;;  %v3190_v0 = vadd.f32 %v3189_v23, %v12412_v39  ;;  %v3038_v27 = vpop.f32.mrf.mxu0  ;;  %9000 = vmatpush3.bf16.msra.mxu0 %v10419_v37  ;;  %v4761_v39 = vmax.f32 %v3188_v17, 0.0 }
 0x1b1   :  { %v3191_v55 = vpop.f32.mrf.mxu1  ;;  %v12579_v34 = vadd.f32 %v3038_v27, %v12011_v61  ;;  %9001 = vmatprep.subr.bf16.mxu0 %v10421_v49  ;;  %v10781_v61 = vld [vmem:[%s16221_s0 + $0x80] ss:$28 sps:$4 sm:$0xff]   ;;  %v10782_v49 = vld [vmem:[%s16221_s0 + $0x274] ss:$28 sps:$4 sm:$0xff]  }
 0x1b2   :  { %v4765_v19 = vmax.f32 %v3190_v0, 0.0  ;;  %v3192_v30 = vadd.f32 %v3191_v55, %v12418_v18  ;;  %v3042_v54 = vpop.f32.mrf.mxu0  ;;  %3773 = vmatmul.mubr.bf16.gmra.mxu0 %v10781_v61  ;;  %v10429_v55 = vld [vmem:[%s16220_s1 + $0x178] ss:$20 sps:$4 sm:$0xff]  }
 0x1b3   :  { %v3195_v7 = vpop.f32.mrf.mxu1  ;;  %3660 = vmatmul.mubr.bf16.gmra.mxu1 %v10780_v33  ;;  %v12594_v37 = vadd.f32 %v3042_v54, %v12021_v8  ;;  %3782 = vmatprep.mubr.bf16.mxu0 %v10783_v44  ;;  %v10427_v8 = vld [vmem:[%s16220_s1 + $0x60] ss:$20 sps:$4 sm:$0xff]   ;;  %v10784_v44 = vld [vmem:[%s16221_s0 + $0x270] ss:$28 sps:$4 sm:$0xff]  }
 0x1b4   :  { %v12591_v47 = vpack.c.bf16 %v4765_v19, %v4760_v26  ;;  %v4766_v18 = vmax.f32 %v3192_v30, 0.0  ;;  %v3196_v17 = vadd.f32 %v3195_v7, %v12430_v16  ;;  %3669 = vmatprep.mubr.bf16.mxu1 %v10782_v49  ;;  %v3044_v23 = vpop.f32.mrf.mxu0  ;;  %9002 = vmatpush3.bf16.msra.mxu0 %v10423_v46 }
 0x1b5   :  { %v3197_v0 = vpop.f32.mrf.mxu1  ;;  %v12607_v27 = vadd.f32 %v3044_v23, %v12030_v22  ;;  %9003 = vmatprep.subr.bf16.mxu0 %v10425_v53  ;;  %v10431_v22 = vld [vmem:[%s16220_s1 + $0x38] ss:$20 sps:$4 sm:$0xff]  }
 0x1b6   :  { %16326 = vst [vmem:[#allocation21_spill] sm:$0xff] %v12591_v47  ;;  %v3198_v16 = vadd.f32 %v3197_v0, %v12442_v3  ;;  %v12613_v26 = vpack.c.bf16 %v4766_v18, %v4761_v39  ;;  %v3046_v19 = vpop.f32.mrf.mxu0  ;;  %v4770_v3 = vmax.f32 %v3196_v17, 0.0 }
 0x1b7   :  { %v3199_v30 = vpop.f32.mrf.mxu1  ;;  %v12616_v46 = vadd.f32 %v3046_v19, %v12036_v31  ;;  %v10432_v31 = vld [vmem:[%s16220_s1 + $0x150] ss:$20 sps:$4 sm:$0xff]  }
 0x1b8   :  { %16327 = vst [vmem:[#allocation22_spill] sm:$0xff] %v12613_v26  ;;  %v3200_v54 = vadd.f32 %v3199_v30, %v12448_v28  ;;  %v3048_v7 = vpop.f32.mrf.mxu0  ;;  %9004 = vmatpush3.bf16.msra.mxu0 %v10427_v8  ;;  %v4771_v28 = vmax.f32 %v3198_v16, 0.0  ;;  %v10786_v8 = vld [vmem:[%s16221_s0 + $0x2ac] ss:$28 sps:$4 sm:$0xff]   ;;  %v10787_v16 = vld [vmem:[%s16221_s0 + $0xf4] ss:$28 sps:$4 sm:$0xff]  }
 0x1b9   :  { %v3201_v33 = vpop.f32.mrf.mxu1  ;;  %v12623_v61 = vadd.f32 %v3048_v7, %v12045_v41  ;;  %9005 = vmatprep.subr.bf16.mxu0 %v10429_v55  ;;  %v10785_v41 = vld [vmem:[%s16221_s0 + $0xb8] ss:$28 sps:$4 sm:$0xff]  }
 0x1ba   :  { %v4775_v53 = vmax.f32 %v3200_v54, 0.0  ;;  %v3202_v39 = vadd.f32 %v3201_v33, %v12454_v1  ;;  %v3052_v18 = vpop.f32.mrf.mxu0  ;;  %3783 = vmatmul.mubr.bf16.gmra.mxu0 %v10785_v41  ;;  %v10438_v54 = vld [vmem:[%s16220_s1 + $0x768] ss:$20 sps:$4 sm:$0xff]  }
 0x1bb   :  { %v3205_v49 = vpop.f32.mrf.mxu1  ;;  %3670 = vmatmul.mubr.bf16.gmra.mxu1 %v10784_v44  ;;  %v12638_v23 = vadd.f32 %v3052_v18, %v12055_v51  ;;  %3792 = vmatprep.mubr.bf16.mxu0 %v10787_v16  ;;  %v10433_v51 = vld [vmem:[%s16220_s1 + $0x10] ss:$20 sps:$4 sm:$0xff]   ;;  %v10791_v16 = vld [vmem:[%s16221_s0 + $0x12c] ss:$28 sps:$4 sm:$0xff]  }
 0x1bc   :  { %v12635_v17 = vpack.c.bf16 %v4775_v53, %v4770_v3  ;;  %v4776_v1 = vmax.f32 %v3202_v39, 0.0  ;;  %v3206_v0 = vadd.f32 %v3205_v49, %v12466_v48  ;;  %3679 = vmatprep.mubr.bf16.mxu1 %v10786_v8  ;;  %v3054_v55 = vpop.f32.mrf.mxu0  ;;  %9006 = vmatpush3.bf16.msra.mxu0 %v10431_v22  ;;  %v10790_v8 = vld [vmem:[%s16221_s0 + $0x2e4] ss:$28 sps:$4 sm:$0xff]  }
 0x1bd   :  { %v3207_v19 = vpop.f32.mrf.mxu1  ;;  %v12651_v30 = vadd.f32 %v3054_v55, %v12064_v62  ;;  %9007 = vmatprep.subr.bf16.mxu0 %v10432_v31 }
 0x1be   :  { %16328 = vst [vmem:[#allocation23_spill] sm:$0xff] %v12635_v17  ;;  %v3208_v48 = vadd.f32 %v3207_v19, %v12478_v57  ;;  %v12657_v7 = vpack.c.bf16 %v4776_v1, %v4771_v28  ;;  %v3056_v33 = vpop.f32.mrf.mxu0  ;;  %v4780_v62 = vmax.f32 %v3206_v0, 0.0 }
 0x1bf   :  { %v3209_v3 = vpop.f32.mrf.mxu1  ;;  %v12660_v22 = vadd.f32 %v3056_v33, %v12070_v11  ;;  %v10788_v11 = vld [vmem:[%s16221_s0 + $0x2a8] ss:$28 sps:$4 sm:$0xff]   ;;  %v16332_v33 = vld [vmem:[#allocation5_spill] sm:$0xff] }
 0x1c0   :  { %16329 = vst [vmem:[#allocation24_spill] sm:$0xff] %v12657_v7  ;;  %v3210_v53 = vadd.f32 %v3209_v3, %v12484_v52  ;;  %v3058_v39 = vpop.f32.mrf.mxu0  ;;  %9008 = vmatpush3.bf16.msra.mxu0 %v10433_v51  ;;  %v4781_v28 = vmax.f32 %v3208_v48, 0.0  ;;  %v10789_v52 = vld [vmem:[%s16221_s0 + $0xf0] ss:$28 sps:$4 sm:$0xff]  }
 0x1c1   :  { %v3211_v18 = vpop.f32.mrf.mxu1  ;;  %v12664_v57 = vadd.f32 %v3058_v39, %v12079_v25  ;;  %9217 = vmatprep.subr.bf16.mxu0 %v10438_v54 }
 0x1c2   :  { %v4785_v49 = vmax.f32 %v3210_v53, 0.0  ;;  %v3212_v31 = vadd.f32 %v3211_v18, %v12493_v43  ;;  %v3062_v44 = vpop.f32.mrf.mxu0  ;;  %3793 = vmatmul.mubr.bf16.gmra.mxu0 %v10789_v52 }
 0x1c3   :  { %v3215_v41 = vpop.f32.mrf.mxu1  ;;  %3680 = vmatmul.mubr.bf16.gmra.mxu1 %v10788_v11  ;;  %v12676_v0 = vadd.f32 %v3062_v44, %v12089_v38  ;;  %3802 = vmatprep.mubr.bf16.mxu0 %v10791_v16  ;;  %v10792_v11 = vld [vmem:[%s16221_s0 + $0x2e0] ss:$28 sps:$4 sm:$0xff]  }
 0x1c4   :  { %v12673_v1 = vpack.c.bf16 %v4785_v49, %v4780_v62  ;;  %v4786_v25 = vmax.f32 %v3212_v31, 0.0  ;;  %v3216_v43 = vadd.f32 %v3215_v41, %v12508_v56  ;;  %3689 = vmatprep.mubr.bf16.mxu1 %v10790_v8  ;;  %v3064_v55 = vpop.f32.mrf.mxu0  ;;  %v16333_v31 = vld [vmem:[#allocation6_spill] sm:$0xff]  ;;  %v10794_v16 = vld [vmem:[%s16221_s0 + $0x31c] ss:$28 sps:$4 sm:$0xff]  }
 0x1c5   :  { %v3217_v19 = vpop.f32.mrf.mxu1  ;;  %v12686_v51 = vadd.f32 %v3064_v55, %v12098_v50  ;;  %v10795_v55 = vld [vmem:[%s16221_s0 + $0x164] ss:$28 sps:$4 sm:$0xff]  }
 0x1c6   :  { %16330 = vst [vmem:[#allocation25_spill] sm:$0xff] %v12673_v1  ;;  %v3218_v38 = vadd.f32 %v3217_v19, %v12521_v14  ;;  %v12689_v48 = vpack.c.bf16 %v4786_v25, %v4781_v28  ;;  %v3066_v56 = vpop.f32.mrf.mxu0  ;;  %v4790_v62 = vmax.f32 %v3216_v43, 0.0  ;;  %v16335_v43 = vld [vmem:[#allocation7_spill] sm:$0xff] }
 0x1c7   :  { %v3219_v54 = vpop.f32.mrf.mxu1  ;;  %v12692_v3 = vadd.f32 %v3066_v56, %v16332_v33  ;;  %v16336_v56 = vld [vmem:[#allocation8_spill] sm:$0xff] }
 0x1c8   :  { %16331 = vst [vmem:[#allocation26_spill] sm:$0xff] %v12689_v48  ;;  %v3220_v53 = vadd.f32 %v3219_v54, %v12528_v60  ;;  %v3068_v39 = vpop.f32.mrf.mxu0  ;;  %v4791_v41 = vmax.f32 %v3218_v38, 0.0  ;;  %v10793_v60 = vld [vmem:[%s16221_s0 + $0x128] ss:$28 sps:$4 sm:$0xff]  }
 0x1c9   :  { %v3221_v18 = vpop.f32.mrf.mxu1  ;;  %v12696_v44 = vadd.f32 %v3068_v39, %v16333_v31 }
 0x1ca   :  { %v4795_v49 = vmax.f32 %v3220_v53, 0.0  ;;  %v3222_v50 = vadd.f32 %v3221_v18, %v12535_v21  ;;  %v3072_v14 = vpop.f32.mrf.mxu0  ;;  %3803 = vmatmul.mubr.bf16.gmra.mxu0 %v10793_v60  ;;  %v16338_v18 = vld [vmem:[#allocation9_spill] sm:$0xff] }
 0x1cb   :  { %v3225_v28 = vpop.f32.mrf.mxu1  ;;  %3690 = vmatmul.mubr.bf16.gmra.mxu1 %v10792_v11  ;;  %v12708_v8 = vadd.f32 %v3072_v14, %v16335_v43  ;;  %3812 = vmatprep.mubr.bf16.mxu0 %v10795_v55  ;;  %v16339_v11 = vld [vmem:[#allocation10_spill] sm:$0xff] }
 0x1cc   :  { %v12705_v52 = vpack.c.bf16 %v4795_v49, %v4790_v62  ;;  %v4796_v25 = vmax.f32 %v3222_v50, 0.0  ;;  %v3226_v21 = vadd.f32 %v3225_v28, %v12550_v42  ;;  %3699 = vmatprep.mubr.bf16.mxu1 %v10794_v16  ;;  %v3074_v19 = vpop.f32.mrf.mxu0 }
 0x1cd   :  { %v3227_v38 = vpop.f32.mrf.mxu1  ;;  %v12718_v54 = vadd.f32 %v3074_v19, %v16336_v56  ;;  %v16341_v19 = vld [vmem:[#allocation11_spill] sm:$0xff]  ;;  %v10798_v56 = vld [vmem:[%s16221_s0 + $0x354] ss:$28 sps:$4 sm:$0xff]  }
 0x1ce   :  { %16334 = vst [vmem:[#allocation5_spill] sm:$0xff] %v12705_v52  ;;  %v3228_v33 = vadd.f32 %v3227_v38, %v12563_v13  ;;  %v12721_v53 = vpack.c.bf16 %v4796_v25, %v4791_v41  ;;  %v3076_v42 = vpop.f32.mrf.mxu0  ;;  %v4800_v14 = vmax.f32 %v3226_v21, 0.0  ;;  %v10796_v25 = vld [vmem:[%s16221_s0 + $0x318] ss:$28 sps:$4 sm:$0xff]  }
 0x1cf   :  { %v3229_v39 = vpop.f32.mrf.mxu1  ;;  %v12724_v62 = vadd.f32 %v3076_v42, %v16338_v18  ;;  %v16342_v18 = vld [vmem:[#allocation12_spill] sm:$0xff] }
 0x1d0   :  { %16337 = vst [vmem:[#allocation6_spill] sm:$0xff] %v12721_v53  ;;  %v3230_v49 = vadd.f32 %v3229_v39, %v12572_v10  ;;  %v3078_v31 = vpop.f32.mrf.mxu0  ;;  %v4801_v16 = vmax.f32 %v3228_v33, 0.0  ;;  %v10797_v10 = vld [vmem:[%s16221_s0 + $0x160] ss:$28 sps:$4 sm:$0xff]  }
 0x1d1   :  { %v3231_v50 = vpop.f32.mrf.mxu1  ;;  %v12728_v60 = vadd.f32 %v3078_v31, %v16339_v11  ;;  %v10799_v33 = vld [vmem:[%s16221_s0 + $0x19c] ss:$28 sps:$4 sm:$0xff]  }
 0x1d2   :  { %v4805_v28 = vmax.f32 %v3230_v49, 0.0  ;;  %v3232_v43 = vadd.f32 %v3231_v50, %v12579_v34  ;;  %v3082_v13 = vpop.f32.mrf.mxu0  ;;  %3813 = vmatmul.mubr.bf16.gmra.mxu0 %v10797_v10 }
 0x1d3   :  { %v3235_v41 = vpop.f32.mrf.mxu1  ;;  %3700 = vmatmul.mubr.bf16.gmra.mxu1 %v10796_v25  ;;  %v12740_v38 = vadd.f32 %v3082_v13, %v16341_v19  ;;  %3822 = vmatprep.mubr.bf16.mxu0 %v10799_v33  ;;  %v16345_v19 = vld [vmem:[#allocation14_spill] sm:$0xff] }
 0x1d4   :  { %v12737_v21 = vpack.c.bf16 %v4805_v28, %v4800_v14  ;;  %v4806_v55 = vmax.f32 %v3232_v43, 0.0  ;;  %v3236_v34 = vadd.f32 %v3235_v41, %v12594_v37  ;;  %3709 = vmatprep.mubr.bf16.mxu1 %v10798_v56  ;;  %v3084_v42 = vpop.f32.mrf.mxu0  ;;  %v16344_v28 = vld [vmem:[#allocation13_spill] sm:$0xff] }
 0x1d5   :  { %v3237_v39 = vpop.f32.mrf.mxu1  ;;  %v12750_v49 = vadd.f32 %v3084_v42, %v16342_v18  ;;  %v16347_v18 = vld [vmem:[#allocation15_spill] sm:$0xff] }
 0x1d6   :  { %16340 = vst [vmem:[#allocation7_spill] sm:$0xff] %v12737_v21  ;;  %v3238_v31 = vadd.f32 %v3237_v39, %v12607_v27  ;;  %v12753_v50 = vpack.c.bf16 %v4806_v55, %v4801_v16  ;;  %v3086_v37 = vpop.f32.mrf.mxu0  ;;  %v4810_v25 = vmax.f32 %v3236_v34, 0.0  ;;  %v10800_v55 = vld [vmem:[%s16221_s0 + $0x350] ss:$28 sps:$4 sm:$0xff]  }
 0x1d7   :  { %v3239_v14 = vpop.f32.mrf.mxu1  ;;  %v12756_v11 = vadd.f32 %v3086_v37, %v16344_v28 }
 0x1d8   :  { %16343 = vst [vmem:[#allocation8_spill] sm:$0xff] %v12753_v50  ;;  %v3240_v43 = vadd.f32 %v3239_v14, %v12616_v46  ;;  %v3088_v13 = vpop.f32.mrf.mxu0  ;;  %v4811_v42 = vmax.f32 %v3238_v31, 0.0  ;;  %v10801_v46 = vld [vmem:[%s16221_s0 + $0x198] ss:$28 sps:$4 sm:$0xff]   ;;  %v16348_v14 = vmov 0  }
 0x1d9   :  { %v3241_v41 = vpop.f32.mrf.mxu1  ;;  %v12760_v56 = vadd.f32 %v3088_v13, %v16345_v19  ;;  %v10802_v31 = vld [vmem:[%s16221_s0 + $0x1d4] ss:$28 sps:$4 sm:$0xff]  }
 0x1da   :  { %v4815_v10 = vmax.f32 %v3240_v43, 0.0  ;;  %v3242_v33 = vadd.f32 %v3241_v41, %v12623_v61  ;;  %v3092_v27 = vpop.f32.mrf.mxu0  ;;  %3823 = vmatmul.mubr.bf16.gmra.mxu0 %v10801_v46  ;;  %v16349_v13 = vld [vmem:[#allocation16_spill] sm:$0xff] }
 0x1db   :  { %v3245_v16 = vpop.f32.mrf.mxu1  ;;  %3710 = vmatmul.mubr.bf16.gmra.mxu1 %v10800_v55  ;;  %v12772_v37 = vadd.f32 %v3092_v27, %v16347_v18  ;;  %3832 = vmatprep.mubr.bf16.mxu0 %v10802_v31  ;;  %v16351_v27 = vld [vmem:[#allocation17_spill] sm:$0xff]  ;;  %v10420_v31 = vld [vmem:[%s16220_s1 + $0x4c0] ss:$20 sps:$4 sm:$0xff]  }
 0x1dc   :  { %v12769_v34 = vpack.c.bf16 %v4815_v10, %v4810_v25  ;;  %v4816_v39 = vmax.f32 %v3242_v33, 0.0  ;;  %v3246_v61 = vadd.f32 %v3245_v16, %v12638_v23  ;;  %3945 = vmatprep.mubr.bf16.mxu1 %v16348_v14  ;;  %v3094_v28 = vpop.f32.mrf.mxu0  ;;  %v10418_v55 = vld [vmem:[%s16220_s1 + $0x3a8] ss:$20 sps:$4 sm:$0xff]  }
 0x1dd   :  { %v3247_v43 = vpop.f32.mrf.mxu1  ;;  %v12780_v41 = vadd.f32 %v3094_v28, %v16349_v13 }
 0x1de   :  { %16346 = vst [vmem:[#allocation9_spill] sm:$0xff] %v12769_v34  ;;  %v3248_v25 = vadd.f32 %v3247_v43, %v12651_v30  ;;  %v12783_v10 = vpack.c.bf16 %v4816_v39, %v4811_v42  ;;  %v3096_v19 = vpop.f32.mrf.mxu0  ;;  %v4820_v30 = vmax.f32 %v3246_v61, 0.0  ;;  %v16352_v39 = vld [vmem:[#allocation18_spill] sm:$0xff] }
 0x1df   :  { %v3249_v33 = vpop.f32.mrf.mxu1  ;;  %v12786_v23 = vadd.f32 %v3096_v19, %v16351_v27 }
 0x1e0   :  { %16350 = vst [vmem:[#allocation10_spill] sm:$0xff] %v12783_v10  ;;  %v3250_v16 = vadd.f32 %v3249_v33, %v12660_v22  ;;  %v3098_v46 = vpop.f32.mrf.mxu0  ;;  %v10803_v22 = vld [vmem:[%s16221_s0 + $0x1d0] ss:$28 sps:$4 sm:$0xff]   ;;  %v10804_v33 = vld [vmem:[%s16221_s0 + $0x18] ss:$28 sps:$4 sm:$0xff]   ;;  %v4821_v61 = vmax.f32 %v3248_v25, 0.0 }
 0x1e1   :  { %v3251_v18 = vpop.f32.mrf.mxu1  ;;  %v12796_v28 = vadd.f32 %v3098_v46, %v16352_v39 }
 0x1e2   :  { %v4825_v42 = vmax.f32 %v3250_v16, 0.0  ;;  %v3252_v43 = vadd.f32 %v3251_v18, %v12664_v57  ;;  %v12799_v19 = vpop.f32.mrf.mxu0  ;;  %3833 = vmatmul.mubr.bf16.gmra.mxu0 %v10803_v22  ;;  %v10805_v57 = vld [vmem:[%s16221_s0 + $0x20c] ss:$28 sps:$4 sm:$0xff]   ;;  %v10422_v18 = vld [vmem:[%s16220_s1 + $0x380] ss:$20 sps:$4 sm:$0xff]  }
 0x1e3   :  { %v3255_v13 = vpop.f32.mrf.mxu1  ;;  %3946 = vmatmul.mubr.bf16.vlgmr.msra.gmra.mxu1 %v10804_v33  ;;  %3842 = vmatprep.mubr.bf16.mxu0 %v10805_v57 }
 0x1e4   :  { %v12807_v27 = vpack.c.bf16 %v4825_v42, %v4820_v30  ;;  %v4826_v16 = vmax.f32 %v3252_v43, 0.0  ;;  %v3256_v46 = vadd.f32 %v3255_v13, %v12676_v0  ;;  %9106 = vmatpush3.bf16.msra.mxu1 %v10418_v55  ;;  %v12816_v22 = vpop.f32.mrf.mxu0  ;;  %3955 = vmatprep.mubr.bf16.mxu1 %v16348_v14  ;;  %v10424_v0 = vld [vmem:[%s16220_s1 + $0x498] ss:$20 sps:$4 sm:$0xff]  }
 0x1e5   :  { %v3257_v39 = vpop.f32.mrf.mxu1  ;;  %9107 = vmatprep.subr.bf16.mxu1 %v10420_v31  ;;  %v10426_v31 = vld [vmem:[%s16220_s1 + $0x358] ss:$20 sps:$4 sm:$0xff]  }
 0x1e6   :  { %16353 = vst [vmem:[#allocation11_spill] sm:$0xff] %v12807_v27  ;;  %v3258_v25 = vadd.f32 %v3257_v39, %v12686_v51  ;;  %v12823_v55 = vpack.c.bf16 %v4826_v16, %v4821_v61  ;;  %v12825_v42 = vpop.f32.mrf.mxu0  ;;  %v4830_v57 = vmax.f32 %v3256_v46, 0.0  ;;  %v10428_v61 = vld [vmem:[%s16220_s1 + $0x470] ss:$20 sps:$4 sm:$0xff]  }
 0x1e7   :  { %v3259_v30 = vpop.f32.mrf.mxu1 }
 0x1e8   :  { %16354 = vst [vmem:[#allocation12_spill] sm:$0xff] %v12823_v55  ;;  %v3260_v43 = vadd.f32 %v3259_v30, %v12692_v3  ;;  %9108 = vmatpush3.bf16.msra.mxu1 %v10422_v18  ;;  %v12828_v33 = vpop.f32.mrf.mxu0  ;;  %v10806_v3 = vld [vmem:[%s16221_s0 + $0x208] ss:$28 sps:$4 sm:$0xff]   ;;  %v10807_v18 = vld [vmem:[%s16221_s0 + $0x50] ss:$28 sps:$4 sm:$0xff]   ;;  %v4831_v46 = vmax.f32 %v3258_v25, 0.0 }
 0x1e9   :  { %v3261_v13 = vpop.f32.mrf.mxu1  ;;  %9109 = vmatprep.subr.bf16.mxu1 %v10424_v0  ;;  %v10430_v25 = vld [vmem:[%s16220_s1 + $0x330] ss:$20 sps:$4 sm:$0xff]  }
 0x1ea   :  { %v4835_v27 = vmax.f32 %v3260_v43, 0.0  ;;  %v3262_v51 = vadd.f32 %v3261_v13, %v12696_v44  ;;  %v12837_v39 = vpop.f32.mrf.mxu0  ;;  %3843 = vmatmul.mubr.bf16.gmra.mxu0 %v10806_v3  ;;  %v10808_v43 = vld [vmem:[%s16221_s0 + $0x244] ss:$28 sps:$4 sm:$0xff]  }
 0x1eb   :  { %v3265_v16 = vpop.f32.mrf.mxu1  ;;  %3956 = vmatmul.mubr.bf16.gmra.mxu1 %v10807_v18  ;;  %3852 = vmatprep.mubr.bf16.mxu0 %v10808_v43 }
 0x1ec   :  { %v12845_v0 = vpack.c.bf16 %v4835_v27, %v4830_v57  ;;  %v4836_v44 = vmax.f32 %v3262_v51, 0.0  ;;  %v3266_v30 = vadd.f32 %v3265_v16, %v12708_v8  ;;  %3965 = vmatprep.mubr.bf16.mxu1 %v16348_v14  ;;  %v12852_v3 = vpop.f32.mrf.mxu0  ;;  %9110 = vmatpush3.bf16.msra.mxu1 %v10426_v31  ;;  %v10434_v8 = vld [vmem:[%s16220_s1 + $0x448] ss:$20 sps:$4 sm:$0xff]  }
 0x1ed   :  { %v3267_v13 = vpop.f32.mrf.mxu1  ;;  %9111 = vmatprep.subr.bf16.mxu1 %v10428_v61 }
 0x1ee   :  { %16355 = vst [vmem:[#allocation13_spill] sm:$0xff] %v12845_v0  ;;  %v3268_v27 = vadd.f32 %v3267_v13, %v12718_v54  ;;  %v12861_v57 = vpack.c.bf16 %v4836_v44, %v4831_v46  ;;  %v12863_v16 = vpop.f32.mrf.mxu0  ;;  %v10435_v54 = vld [vmem:[%s16220_s1 + $0x308] ss:$20 sps:$4 sm:$0xff]   ;;  %v4840_v61 = vmax.f32 %v3266_v30, 0.0  ;;  %v10436_v46 = vld [vmem:[%s16220_s1 + $0x420] ss:$20 sps:$4 sm:$0xff]  }
 0x1ef   :  { %v3269_v51 = vpop.f32.mrf.mxu1  ;;  %v10810_v30 = vld [vmem:[%s16221_s0 + $0x88] ss:$28 sps:$4 sm:$0xff]  }
 0x1f0   :  { %16356 = vst [vmem:[#allocation14_spill] sm:$0xff] %v12861_v57  ;;  %v3270_v18 = vadd.f32 %v3269_v51, %v12724_v62  ;;  %v12866_v31 = vpop.f32.mrf.mxu0  ;;  %9112 = vmatpush3.bf16.msra.mxu1 %v10430_v25  ;;  %v10809_v62 = vld [vmem:[%s16221_s0 + $0x240] ss:$28 sps:$4 sm:$0xff]   ;;  %v4841_v25 = vmax.f32 %v3268_v27, 0.0 }
 0x1f1   :  { %v3271_v43 = vpop.f32.mrf.mxu1  ;;  %9113 = vmatprep.subr.bf16.mxu1 %v10434_v8  ;;  %v10437_v27 = vld [vmem:[%s16220_s1 + $0x2e0] ss:$20 sps:$4 sm:$0xff]  }
 0x1f2   :  { %v4845_v13 = vmax.f32 %v3270_v18, 0.0  ;;  %v3272_v0 = vadd.f32 %v3271_v43, %v12728_v60  ;;  %v12875_v57 = vpop.f32.mrf.mxu0  ;;  %3853 = vmatmul.mubr.bf16.gmra.mxu0 %v10809_v62  ;;  %v10811_v18 = vld [vmem:[%s16221_s0 + $0x27c] ss:$28 sps:$4 sm:$0xff]  }
 0x1f3   :  { %v3275_v44 = vpop.f32.mrf.mxu1  ;;  %3966 = vmatmul.mubr.bf16.gmra.mxu1 %v10810_v30  ;;  %3862 = vmatprep.mubr.bf16.mxu0 %v10811_v18 }
 0x1f4   :  { %v12883_v60 = vpack.c.bf16 %v4845_v13, %v4840_v61  ;;  %v4846_v8 = vmax.f32 %v3272_v0, 0.0  ;;  %v3276_v51 = vadd.f32 %v3275_v44, %v12740_v38  ;;  %3975 = vmatprep.mubr.bf16.mxu1 %v16348_v14  ;;  %v12890_v62 = vpop.f32.mrf.mxu0  ;;  %9114 = vmatpush3.bf16.msra.mxu1 %v10435_v54  ;;  %v10440_v38 = vld [vmem:[%s16220_s1 + $0x3f8] ss:$20 sps:$4 sm:$0xff]  }
 0x1f5   :  { %v3277_v43 = vpop.f32.mrf.mxu1  ;;  %9115 = vmatprep.subr.bf16.mxu1 %v10436_v46 }
 0x1f6   :  { %16357 = vst [vmem:[#allocation15_spill] sm:$0xff] %v12883_v60  ;;  %v3278_v61 = vadd.f32 %v3277_v43, %v12750_v49  ;;  %v12899_v0 = vpack.c.bf16 %v4846_v8, %v4841_v25  ;;  %v12901_v44 = vpop.f32.mrf.mxu0  ;;  %v10441_v49 = vld [vmem:[%s16220_s1 + $0x2b8] ss:$20 sps:$4 sm:$0xff]   ;;  %v4850_v46 = vmax.f32 %v3276_v51, 0.0  ;;  %v10444_v25 = vld [vmem:[%s16220_s1 + $0x3d0] ss:$20 sps:$4 sm:$0xff]  }
 0x1f7   :  { %v3279_v13 = vpop.f32.mrf.mxu1  ;;  %v10813_v51 = vld [vmem:[%s16221_s0 + $0xc0] ss:$28 sps:$4 sm:$0xff]  }
 0x1f8   :  { %16358 = vst [vmem:[#allocation16_spill] sm:$0xff] %v12899_v0  ;;  %v3280_v30 = vadd.f32 %v3279_v13, %v12756_v11  ;;  %v12904_v54 = vpop.f32.mrf.mxu0  ;;  %9116 = vmatpush3.bf16.msra.mxu1 %v10437_v27  ;;  %v10812_v11 = vld [vmem:[%s16221_s0 + $0x278] ss:$28 sps:$4 sm:$0xff]   ;;  %v4851_v27 = vmax.f32 %v3278_v61, 0.0  ;;  %v10445_v61 = vld [vmem:[%s16220_s1 + $0x290] ss:$20 sps:$4 sm:$0xff]  }
 0x1f9   :  { %v3281_v18 = vpop.f32.mrf.mxu1  ;;  %9117 = vmatprep.subr.bf16.mxu1 %v10440_v38 }
 0x1fa   :  { %v4855_v43 = vmax.f32 %v3280_v30, 0.0  ;;  %v3282_v60 = vadd.f32 %v3281_v18, %v12760_v56  ;;  %v12913_v0 = vpop.f32.mrf.mxu0  ;;  %3863 = vmatmul.mubr.bf16.gmra.mxu0 %v10812_v11  ;;  %v10814_v30 = vld [vmem:[%s16221_s0 + $0x2b4] ss:$28 sps:$4 sm:$0xff]  }
 0x1fb   :  { %v3285_v8 = vpop.f32.mrf.mxu1  ;;  %3976 = vmatmul.mubr.bf16.gmra.mxu1 %v10813_v51  ;;  %3872 = vmatprep.mubr.bf16.mxu0 %v10814_v30 }
 0x1fc   :  { %v12921_v56 = vpack.c.bf16 %v4855_v43, %v4850_v46  ;;  %v4856_v38 = vmax.f32 %v3282_v60, 0.0  ;;  %v3286_v13 = vadd.f32 %v3285_v8, %v12772_v37  ;;  %3985 = vmatprep.mubr.bf16.mxu1 %v16348_v14  ;;  %v12928_v11 = vpop.f32.mrf.mxu0  ;;  %9118 = vmatpush3.bf16.msra.mxu1 %v10441_v49  ;;  %v12937_v37 = vld [vmem:[%s16220_s1 + $0x8a8] ss:$20 sps:$4 sm:$0xff]  }
 0x1fd   :  { %v3287_v18 = vpop.f32.mrf.mxu1  ;;  %9119 = vmatprep.subr.bf16.mxu1 %v10444_v25 }
 0x1fe   :  { %16359 = vst [vmem:[#allocation17_spill] sm:$0xff] %v12921_v56  ;;  %v3288_v46 = vadd.f32 %v3287_v18, %v12780_v41  ;;  %v12939_v60 = vpack.c.bf16 %v4856_v38, %v4851_v27  ;;  %v12941_v8 = vpop.f32.mrf.mxu0  ;;  %v4860_v56 = vmax.f32 %v3286_v13, 0.0  ;;  %v10815_v27 = vld [vmem:[%s16221_s0 + $0x2b0] ss:$28 sps:$4 sm:$0xff]  }
 0x1ff   :  { %v3289_v43 = vpop.f32.mrf.mxu1 }
 0x200   :  { %16360 = vst [vmem:[#allocation18_spill] sm:$0xff] %v12939_v60  ;;  %v3290_v51 = vadd.f32 %v3289_v43, %v12786_v23  ;;  %v12944_v30 = vpop.f32.mrf.mxu0  ;;  %9120 = vmatpush3.bf16.msra.mxu1 %v10445_v61  ;;  %v10816_v23 = vld [vmem:[%s16221_s0 + $0xf8] ss:$28 sps:$4 sm:$0xff]   ;;  %v4861_v38 = vmax.f32 %v3288_v46, 0.0  ;;  %v10817_v43 = vld [vmem:[%s16221_s0 + $0x2ec] ss:$28 sps:$4 sm:$0xff]  }
 0x201   :  { %v3291_v49 = vpop.f32.mrf.mxu1  ;;  %9737 = vmatprep.subr.bf16.mxu1 %v12937_v37 }
 0x202   :  { %v4865_v55 = vmax.f32 %v3290_v51, 0.0  ;;  %v3292_v41 = vadd.f32 %v3291_v49, %v12796_v28  ;;  %v12948_v18 = vpop.f32.mrf.mxu0  ;;  %3873 = vmatmul.mubr.bf16.gmra.mxu0 %v10815_v27 }
 0x203   :  { %v3295_v25 = vpop.f32.mrf.mxu1  ;;  %3986 = vmatmul.mubr.bf16.gmra.mxu1 %v10816_v23  ;;  %3882 = vmatprep.mubr.bf16.mxu0 %v10817_v43 }
 0x204   :  { %v12956_v13 = vpack.c.bf16 %v4865_v55, %v4860_v56  ;;  %v4866_v61 = vmax.f32 %v3292_v41, 0.0  ;;  %v3296_v28 = vadd.f32 %v3295_v25, %v12361_v9  ;;  %3995 = vmatprep.mubr.bf16.mxu1 %v16348_v14  ;;  %v12963_v49 = vpop.f32.mrf.mxu0 }
 0x205   :  { %v3297_v51 = vpop.f32.mrf.mxu1 }
 0x206   :  { %16361 = vst [vmem:[#allocation27_spill] sm:$0xff] %v12956_v13  ;;  %v3298_v27 = vadd.f32 %v3297_v51, %v12373_v20  ;;  %v12966_v60 = vpack.c.bf16 %v4866_v61, %v4861_v38  ;;  %v12968_v55 = vpop.f32.mrf.mxu0  ;;  %v4870_v25 = vmax.f32 %v3296_v28, 0.0  ;;  %v10818_v20 = vld [vmem:[%s16221_s0 + $0x2e8] ss:$28 sps:$4 sm:$0xff]   ;;  %v10819_v38 = vld [vmem:[%s16221_s0 + $0x130] ss:$28 sps:$4 sm:$0xff]  }
 0x207   :  { %v3299_v46 = vpop.f32.mrf.mxu1 }
 0x208   :  { %16362 = vst [vmem:[#allocation28_spill] sm:$0xff] %v12966_v60  ;;  %v3300_v56 = vadd.f32 %v3299_v46, %v12379_v12  ;;  %v12971_v41 = vpop.f32.mrf.mxu0  ;;  %v4871_v12 = vmax.f32 %v3298_v27, 0.0 }
 0x209   :  { %v3301_v9 = vpop.f32.mrf.mxu1 }
 0x20a   :  { %v4875_v23 = vmax.f32 %v3300_v56, 0.0  ;;  %v3302_v43 = vadd.f32 %v3301_v9, %v12385_v59  ;;  %v12974_v34 = vpop.f32.mrf.mxu0  ;;  %3883 = vmatmul.mubr.bf16.gmra.mxu0 %v10818_v20  ;;  %v10820_v59 = vld [vmem:[%s16221_s0 + $0x324] ss:$28 sps:$4 sm:$0xff]  }
 0x20b   :  { %v3305_v13 = vpop.f32.mrf.mxu1  ;;  %3996 = vmatmul.mubr.bf16.gmra.mxu1 %v10819_v38  ;;  %3892 = vmatprep.mubr.bf16.mxu0 %v10820_v59 }
 0x20c   :  { %v12982_v61 = vpack.c.bf16 %v4875_v23, %v4870_v25  ;;  %v4876_v28 = vmax.f32 %v3302_v43, 0.0  ;;  %v3306_v51 = vadd.f32 %v3305_v13, %v12397_v40  ;;  %4005 = vmatprep.mubr.bf16.mxu1 %v16348_v14  ;;  %v12989_v56 = vpop.f32.mrf.mxu0 }
 0x20d   :  { %v3307_v46 = vpop.f32.mrf.mxu1 }
 0x20e   :  { %16363 = vst [vmem:[#allocation29_spill] sm:$0xff] %v12982_v61  ;;  %v3308_v9 = vadd.f32 %v3307_v46, %v12409_v45  ;;  %v12992_v20 = vpack.c.bf16 %v4876_v28, %v4871_v12  ;;  %v12994_v25 = vpop.f32.mrf.mxu0  ;;  %v4880_v43 = vmax.f32 %v3306_v51, 0.0  ;;  %v10821_v45 = vld [vmem:[%s16221_s0 + $0x320] ss:$28 sps:$4 sm:$0xff]   ;;  %v10822_v12 = vld [vmem:[%s16221_s0 + $0x168] ss:$28 sps:$4 sm:$0xff]  }
 0x20f   :  { %v3309_v27 = vpop.f32.mrf.mxu1 }
 0x210   :  { %16364 = vst [vmem:[#allocation30_spill] sm:$0xff] %v12992_v20  ;;  %v3310_v23 = vadd.f32 %v3309_v27, %v12415_v2  ;;  %v12997_v13 = vpop.f32.mrf.mxu0  ;;  %v4881_v2 = vmax.f32 %v3308_v9, 0.0 }
 0x211   :  { %v3311_v40 = vpop.f32.mrf.mxu1 }
 0x212   :  { %v4885_v38 = vmax.f32 %v3310_v23, 0.0  ;;  %v3312_v59 = vadd.f32 %v3311_v40, %v12421_v35  ;;  %v13000_v60 = vpop.f32.mrf.mxu0  ;;  %3893 = vmatmul.mubr.bf16.gmra.mxu0 %v10821_v45  ;;  %v10823_v35 = vld [vmem:[%s16221_s0 + $0x35c] ss:$28 sps:$4 sm:$0xff]  }
 0x213   :  { %v3315_v61 = vpop.f32.mrf.mxu1  ;;  %4006 = vmatmul.mubr.bf16.gmra.mxu1 %v10822_v12  ;;  %3902 = vmatprep.mubr.bf16.mxu0 %v10823_v35 }
 0x214   :  { %v13008_v28 = vpack.c.bf16 %v4885_v38, %v4880_v43  ;;  %v4886_v51 = vmax.f32 %v3312_v59, 0.0  ;;  %v3316_v46 = vadd.f32 %v3315_v61, %v12433_v63  ;;  %4015 = vmatprep.mubr.bf16.mxu1 %v16348_v14  ;;  %v13015_v23 = vpop.f32.mrf.mxu0  ;;  %v16367_v59 = vld [vmem:[#allocation2_spill] sm:$0xff] }
 0x215   :  { %v3317_v27 = vpop.f32.mrf.mxu1  ;;  %v16258_v12 = vsub.s32 2, %v16367_v59  ;;  %v519_v10 = vsub.s32 3, %v16367_v59  ;;  %v10840_v59 = vld [vmem:[%s16221_s0 + $0x2b8] ss:$28 sps:$4 sm:$0xff]  }
 0x216   :  { %16365 = vst [vmem:[#allocation31_spill] sm:$0xff] %v13008_v28  ;;  %v3318_v40 = vadd.f32 %v3317_v27, %v12445_v4  ;;  %v13018_v45 = vpack.c.bf16 %v4886_v51, %v4881_v2  ;;  %v13020_v43 = vpop.f32.mrf.mxu0  ;;  %v4890_v35 = vmax.f32 %v3316_v46, 0.0  ;;  %v10824_v2 = vld [vmem:[%s16221_s0 + $0x358] ss:$28 sps:$4 sm:$0xff]  }
 0x217   :  { %v3319_v9 = vpop.f32.mrf.mxu1 }
 0x218   :  { %16366 = vst [vmem:[#allocation32_spill] sm:$0xff] %v13018_v45  ;;  %v3320_v38 = vadd.f32 %v3319_v9, %v12451_v15  ;;  %v13023_v61 = vpop.f32.mrf.mxu0  ;;  %v10825_v15 = vld [vmem:[%s16221_s0 + $0x1a0] ss:$28 sps:$4 sm:$0xff]   ;;  %v4891_v51 = vmax.f32 %v3318_v40, 0.0 }
 0x219   :  { %v3321_v63 = vpop.f32.mrf.mxu1  ;;  %v10826_v9 = vld [vmem:[%s16221_s0 + $0x4] ss:$28 sps:$4 sm:$0xff]   ;;  %v10439_v45 = vld [vmem:[%s16220_s1 + $0x628] ss:$20 sps:$4 sm:$0xff]  }
 0x21a   :  { %v4895_v28 = vmax.f32 %v3320_v38, 0.0  ;;  %v3322_v20 = vadd.f32 %v3321_v63, %v12457_v58  ;;  %v13028_v4 = vpop.f32.mrf.mxu0  ;;  %3903 = vmatmul.mubr.bf16.gmra.mxu0 %v10824_v2  ;;  %v10827_v2 = vld [vmem:[%s16222_s2] sm:$0x1f] }
 0x21b   :  { %v3325_v21 = vpop.f32.mrf.mxu1  ;;  %4016 = vmatmul.mubr.bf16.gmra.mxu1 %v10825_v15  ;;  %4138 = vmatprep.mubr.bf16.mxu0 %v10826_v9 }
 0x21c   :  { %v13036_v46 = vpack.c.bf16 %v4895_v28, %v4890_v35  ;;  %v4896_v27 = vmax.f32 %v3322_v20, 0.0  ;;  %v3326_v58 = vadd.f32 %v3325_v21, %v12469_v29  ;;  %4025 = vmatprep.mubr.bf16.mxu1 %v16348_v14  ;;  %v13043_v63 = vpop.f32.mrf.mxu0  ;;  %v13050_v28 = vrot.slane %v10827_v2, %v16258_v12 }
 0x21d   :  { %v3327_v38 = vpop.f32.mrf.mxu1  ;;  %v13055_v20 = vrot.slane %v10827_v2, %v519_v10 }
 0x21e   :  { %16368 = vst [vmem:[#allocation33_spill] sm:$0xff] %v13036_v46  ;;  %v3328_v29 = vadd.f32 %v3327_v38, %v12481_v36  ;;  %v13053_v21 = vpack.c.bf16 %v4896_v27, %v4891_v51  ;;  %v13057_v35 = vpop.f32.mrf.mxu0  ;;  %v3369_v12 = vadd.f32 %v12799_v19, %v13050_v28  ;;  %v4900_v36 = vmax.f32 %v3326_v58, 0.0  ;;  %v10442_v27 = vld [vmem:[%s16220_s1 + $0x740] ss:$20 sps:$4 sm:$0xff]  }
 0x21f   :  { %v3329_v40 = vpop.f32.mrf.mxu1  ;;  %v10829_v19 = vld [vmem:[%s16221_s0] ss:$28 sps:$4 sm:$0xff]   ;;  %v3395_v1 = vadd.f32 %v12904_v54, %v13055_v20 }
 0x220   :  { %16369 = vst [vmem:[#allocation34_spill] sm:$0xff] %v13053_v21  ;;  %v3330_v15 = vadd.f32 %v3329_v40, %v12487_v6  ;;  %v13060_v46 = vpop.f32.mrf.mxu0  ;;  %v3371_v6 = vadd.f32 %v12816_v22, %v13055_v20  ;;  %v10828_v40 = vld [vmem:[%s16221_s0 + $0x1d8] ss:$28 sps:$4 sm:$0xff]   ;;  %v10837_v54 = vld [vmem:[%s16221_s0 + $0x280] ss:$28 sps:$4 sm:$0xff]  }
 0x221   :  { %v3331_v9 = vpop.f32.mrf.mxu1  ;;  %v10830_v22 = vld [vmem:[%s16221_s0 + $0x3c] ss:$28 sps:$4 sm:$0xff]  }
 0x222   :  { %v4905_v51 = vmax.f32 %v3330_v15, 0.0  ;;  %v3332_v10 = vadd.f32 %v3331_v9, %v12496_v32  ;;  %v13073_v38 = vpop.f32.mrf.mxu0  ;;  %4139 = vmatmul.mubr.bf16.vlgmr.msra.gmra.mxu0 %v10829_v19  ;;  %v4901_v32 = vmax.f32 %v3328_v29, 0.0  ;;  %v10443_v29 = vld [vmem:[%s16220_s1 + $0x600] ss:$20 sps:$4 sm:$0xff]  }
 0x223   :  { %v3561_v2 = vpop.f32.mrf.mxu1  ;;  %4026 = vmatmul.mubr.bf16.gmra.mxu1 %v10828_v40  ;;  %4146 = vmatprep.mubr.bf16.mxu0 %v10830_v22 }
 0x224   :  { %v13081_v58 = vpack.c.bf16 %v4905_v51, %v4900_v36  ;;  %v4906_v15 = vmax.f32 %v3332_v10, 0.0  ;;  %v13083_v9 = vadd.f32 %v3561_v2, %v3369_v12  ;;  %4035 = vmatprep.mubr.bf16.mxu1 %v16348_v14  ;;  %v13089_v21 = vpop.f32.mrf.mxu0  ;;  %9218 = vmatpush3.bf16.msra.mxu0 %v10439_v45  ;;  %v3373_v36 = vadd.f32 %v12825_v42, %v13050_v28  ;;  %v10446_v51 = vld [vmem:[%s16220_s1 + $0x718] ss:$20 sps:$4 sm:$0xff]  }
 0x225   :  { %v3563_v40 = vpop.f32.mrf.mxu1  ;;  %9219 = vmatprep.subr.bf16.mxu0 %v10442_v27  ;;  %v3375_v45 = vadd.f32 %v12828_v33, %v13055_v20  ;;  %v10447_v27 = vld [vmem:[%s16220_s1 + $0x5d8] ss:$20 sps:$4 sm:$0xff]   ;;  %v10449_v33 = vld [vmem:[%s16220_s1 + $0x6f0] ss:$20 sps:$4 sm:$0xff]  }
 0x226   :  { %16370 = vst [vmem:[#allocation35_spill] sm:$0xff] %v13081_v58  ;;  %v13096_v12 = vadd.f32 %v3563_v40, %v3371_v6  ;;  %v13101_v10 = vpack.c.bf16 %v4906_v15, %v4901_v32  ;;  %v13103_v2 = vpop.f32.mrf.mxu0  ;;  %v3379_v6 = vadd.f32 %v12837_v39, %v13050_v28  ;;  %v3381_v39 = vadd.f32 %v12852_v3, %v13055_v20 }
 0x227   :  { %v3565_v19 = vpop.f32.mrf.mxu1  ;;  %v3383_v3 = vadd.f32 %v12863_v16, %v13050_v28  ;;  %v10453_v16 = vld [vmem:[%s16220_s1 + $0x588] ss:$20 sps:$4 sm:$0xff]  }
 0x228   :  { %16371 = vst [vmem:[#allocation36_spill] sm:$0xff] %v13101_v10  ;;  %v13107_v22 = vadd.f32 %v3565_v19, %v3373_v36  ;;  %v13109_v58 = vpop.f32.mrf.mxu0  ;;  %9220 = vmatpush3.bf16.msra.mxu0 %v10443_v29  ;;  %v10831_v29 = vld [vmem:[%s16221_s0 + $0x210] ss:$28 sps:$4 sm:$0xff]   ;;  %v10832_v36 = vld [vmem:[%s16221_s0 + $0x38] ss:$28 sps:$4 sm:$0xff]  }
 0x229   :  { %v3567_v42 = vpop.f32.mrf.mxu1  ;;  %9221 = vmatprep.subr.bf16.mxu0 %v10446_v51  ;;  %v10833_v19 = vld [vmem:[%s16221_s0 + $0x74] ss:$28 sps:$4 sm:$0xff]  }
 0x22a   :  { %v13116_v32 = vadd.f32 %v3567_v42, %v3375_v45  ;;  %v13121_v15 = vpop.f32.mrf.mxu0  ;;  %4147 = vmatmul.mubr.bf16.gmra.mxu0 %v10832_v36 }
 0x22b   :  { %v3571_v40 = vpop.f32.mrf.mxu1  ;;  %4036 = vmatmul.mubr.bf16.gmra.mxu1 %v10831_v29  ;;  %4154 = vmatprep.mubr.bf16.mxu0 %v10833_v19  ;;  %v10450_v29 = vld [vmem:[%s16220_s1 + $0x5b0] ss:$20 sps:$4 sm:$0xff]  }
 0x22c   :  { %v13131_v51 = vadd.f32 %v3571_v40, %v3379_v6  ;;  %4045 = vmatprep.mubr.bf16.mxu1 %v16348_v14  ;;  %v13137_v45 = vpop.f32.mrf.mxu0  ;;  %9222 = vmatpush3.bf16.msra.mxu0 %v10447_v27  ;;  %v10452_v40 = vld [vmem:[%s16220_s1 + $0x6c8] ss:$20 sps:$4 sm:$0xff]   ;;  %v3385_v27 = vadd.f32 %v12866_v31, %v13055_v20  ;;  %v10455_v31 = vld [vmem:[%s16220_s1 + $0x6a0] ss:$20 sps:$4 sm:$0xff]  }
 0x22d   :  { %v3573_v42 = vpop.f32.mrf.mxu1  ;;  %9223 = vmatprep.subr.bf16.mxu0 %v10449_v33  ;;  %v3389_v33 = vadd.f32 %v12875_v57, %v13050_v28 }
 0x22e   :  { %v13144_v6 = vadd.f32 %v3573_v42, %v3381_v39  ;;  %v13149_v36 = vpop.f32.mrf.mxu0 }
 0x22f   :  { %v3575_v19 = vpop.f32.mrf.mxu1 }
 0x230   :  { %v13153_v10 = vadd.f32 %v3575_v19, %v3383_v3  ;;  %v13155_v50 = vpop.f32.mrf.mxu0  ;;  %9224 = vmatpush3.bf16.msra.mxu0 %v10450_v29  ;;  %v10834_v29 = vld [vmem:[%s16221_s0 + $0x248] ss:$28 sps:$4 sm:$0xff]   ;;  %v10835_v19 = vld [vmem:[%s16221_s0 + $0x70] ss:$28 sps:$4 sm:$0xff]  }
 0x231   :  { %v3577_v52 = vpop.f32.mrf.mxu1  ;;  %9225 = vmatprep.subr.bf16.mxu0 %v10452_v40  ;;  %v10836_v40 = vld [vmem:[%s16221_s0 + $0xac] ss:$28 sps:$4 sm:$0xff]  }
 0x232   :  { %v13162_v39 = vadd.f32 %v3577_v52, %v3385_v27  ;;  %v13167_v42 = vpop.f32.mrf.mxu0  ;;  %4155 = vmatmul.mubr.bf16.gmra.mxu0 %v10835_v19  ;;  %v3391_v52 = vadd.f32 %v12890_v62, %v13055_v20  ;;  %v10456_v19 = vld [vmem:[%s16220_s1 + $0x560] ss:$20 sps:$4 sm:$0xff]   ;;  %v3393_v62 = vadd.f32 %v12901_v44, %v13050_v28  ;;  %v10460_v44 = vld [vmem:[%s16220_s1 + $0x650] ss:$20 sps:$4 sm:$0xff]  }
 0x233   :  { %v3581_v3 = vpop.f32.mrf.mxu1  ;;  %4046 = vmatmul.mubr.bf16.gmra.mxu1 %v10834_v29  ;;  %4162 = vmatprep.mubr.bf16.mxu0 %v10836_v40 }
 0x234   :  { %v13177_v57 = vadd.f32 %v3581_v3, %v3389_v33  ;;  %4055 = vmatprep.mubr.bf16.mxu1 %v16348_v14  ;;  %v13183_v27 = vpop.f32.mrf.mxu0  ;;  %9226 = vmatpush3.bf16.msra.mxu0 %v10453_v16  ;;  %v10458_v3 = vld [vmem:[%s16220_s1 + $0x678] ss:$20 sps:$4 sm:$0xff]  }
 0x235   :  { %v3583_v29 = vpop.f32.mrf.mxu1  ;;  %9227 = vmatprep.subr.bf16.mxu0 %v10455_v31  ;;  %v10459_v16 = vld [vmem:[%s16220_s1 + $0x538] ss:$20 sps:$4 sm:$0xff]  }
 0x236   :  { %v13190_v33 = vadd.f32 %v3583_v29, %v3391_v52  ;;  %v13195_v53 = vpop.f32.mrf.mxu0  ;;  %v3399_v29 = vadd.f32 %v12913_v0, %v13050_v28  ;;  %v10461_v0 = vld [vmem:[%s16220_s1 + $0x510] ss:$20 sps:$4 sm:$0xff]  }
 0x237   :  { %v3585_v40 = vpop.f32.mrf.mxu1 }
 0x238   :  { %v13202_v48 = vadd.f32 %v3585_v40, %v3393_v62  ;;  %v13207_v31 = vpop.f32.mrf.mxu0  ;;  %9228 = vmatpush3.bf16.msra.mxu0 %v10456_v19  ;;  %v10838_v62 = vld [vmem:[%s16221_s0 + $0xa8] ss:$28 sps:$4 sm:$0xff]  }
 0x239   :  { %v3587_v52 = vpop.f32.mrf.mxu1  ;;  %9229 = vmatprep.subr.bf16.mxu0 %v10458_v3  ;;  %v10839_v3 = vld [vmem:[%s16221_s0 + $0xe4] ss:$28 sps:$4 sm:$0xff]  }
 0x23a   :  { %v13211_v17 = vadd.f32 %v3587_v52, %v3395_v1  ;;  %v13213_v7 = vpop.f32.mrf.mxu0  ;;  %4163 = vmatmul.mubr.bf16.gmra.mxu0 %v10838_v62  ;;  %v3401_v1 = vadd.f32 %v12928_v11, %v13055_v20 }
 0x23b   :  { %v3591_v47 = vpop.f32.mrf.mxu1  ;;  %4056 = vmatmul.mubr.bf16.gmra.mxu1 %v10837_v54  ;;  %4170 = vmatprep.mubr.bf16.mxu0 %v10839_v3  ;;  %v3403_v54 = vadd.f32 %v12941_v8, %v13050_v28  ;;  %v3405_v3 = vadd.f32 %v12944_v30, %v13055_v20  ;;  %v3409_v8 = vadd.f32 %v12948_v18, %v13050_v28  ;;  %v10841_v30 = vld [vmem:[%s16221_s0 + $0xe0] ss:$28 sps:$4 sm:$0xff]  }
 0x23c   :  { %v13226_v19 = vadd.f32 %v3591_v47, %v3399_v29  ;;  %4065 = vmatprep.mubr.bf16.mxu1 %v16348_v14  ;;  %v13232_v40 = vpop.f32.mrf.mxu0  ;;  %9230 = vmatpush3.bf16.msra.mxu0 %v10459_v16  ;;  %v10466_v47 = vld [vmem:[%s16223_s3 + $0x22c] ss:$12 sps:$4 sm:$0xff]  }
 0x23d   :  { %v3593_v52 = vpop.f32.mrf.mxu1  ;;  %9231 = vmatprep.subr.bf16.mxu0 %v10460_v44 }
 0x23e   :  { %v13236_v62 = vadd.f32 %v3593_v52, %v3401_v1  ;;  %v13241_v11 = vpop.f32.mrf.mxu0 }
 0x23f   :  { %v3595_v29 = vpop.f32.mrf.mxu1 }
 0x240   :  { %v13245_v26 = vadd.f32 %v3595_v29, %v3403_v54  ;;  %v13247_v5 = vpop.f32.mrf.mxu0  ;;  %9232 = vmatpush3.bf16.msra.mxu0 %v10461_v0  ;;  %v3411_v0 = vadd.f32 %v12963_v49, %v13055_v20  ;;  %v10842_v54 = vld [vmem:[%s16221_s0 + $0x11c] ss:$28 sps:$4 sm:$0xff]   ;;  %v3413_v29 = vadd.f32 %v12968_v55, %v13050_v28 }
 0x241   :  { %v3597_v16 = vpop.f32.mrf.mxu1  ;;  %6000 = vmatprep.subr.bf16.mxu0 %v10466_v47 }
 0x242   :  { %v13251_v44 = vadd.f32 %v3597_v16, %v3405_v3  ;;  %v13253_v1 = vpop.f32.mrf.mxu0  ;;  %4171 = vmatmul.mubr.bf16.gmra.mxu0 %v10841_v30 }
 0x243   :  { %v3601_v52 = vpop.f32.mrf.mxu1  ;;  %4066 = vmatmul.mubr.bf16.gmra.mxu1 %v10840_v59  ;;  %4178 = vmatprep.mubr.bf16.mxu0 %v10842_v54  ;;  %v3419_v54 = vadd.f32 %v12974_v34, %v13050_v28 }
 0x244   :  { %v13263_v18 = vadd.f32 %v3601_v52, %v3409_v8  ;;  %4075 = vmatprep.mubr.bf16.mxu1 %v16348_v14  ;;  %v13269_v47 = vpop.f32.mrf.mxu0  ;;  %v3415_v8 = vadd.f32 %v12971_v41, %v13055_v20  ;;  %v10844_v41 = vld [vmem:[%s16221_s0 + $0x118] ss:$28 sps:$4 sm:$0xff]  }
 0x245   :  { %16373 = vst [vmem:[#allocation38_spill] sm:$0xff] %v13269_v47  ;;  %v3603_v59 = vpop.f32.mrf.mxu1 }
 0x246   :  { %16372 = vst [vmem:[#allocation37_spill] sm:$0xff] %v13263_v18  ;;  %v13273_v3 = vadd.f32 %v3603_v59, %v3411_v0  ;;  %v13275_v16 = vpop.f32.mrf.mxu0  ;;  %v10843_v0 = vld [vmem:[%s16221_s0 + $0x2f0] ss:$28 sps:$4 sm:$0xff]   ;;  %v3421_v59 = vadd.f32 %v12989_v56, %v13055_v20 }
 0x247   :  { %v3605_v49 = vpop.f32.mrf.mxu1 }
 0x248   :  { %v13279_v52 = vadd.f32 %v3605_v49, %v3413_v29  ;;  %v13281_v30 = vpop.f32.mrf.mxu0 }
 0x249   :  { %v3607_v24 = vpop.f32.mrf.mxu1 }
 0x24a   :  { %v13285_v18 = vadd.f32 %v3607_v24, %v3415_v8  ;;  %v13287_v47 = vpop.f32.mrf.mxu0  ;;  %4179 = vmatmul.mubr.bf16.gmra.mxu0 %v10844_v41  ;;  %v10845_v24 = vld [vmem:[%s16221_s0 + $0x154] ss:$28 sps:$4 sm:$0xff]   ;;  %v3423_v8 = vadd.f32 %v12994_v25, %v13050_v28 }
 0x24b   :  { %16375 = vst [vmem:[#allocation40_spill] sm:$0xff] %v13287_v47  ;;  %v3611_v55 = vpop.f32.mrf.mxu1  ;;  %4076 = vmatmul.mubr.bf16.gmra.mxu1 %v10843_v0  ;;  %4186 = vmatprep.mubr.bf16.mxu0 %v10845_v24  ;;  %v3429_v24 = vadd.f32 %v13000_v60, %v13050_v28  ;;  %v10848_v60 = vld [vmem:[%s16221_s0 + $0x18c] ss:$28 sps:$4 sm:$0xff]  }
 0x24c   :  { %16374 = vst [vmem:[#allocation39_spill] sm:$0xff] %v13285_v18  ;;  %v13297_v29 = vadd.f32 %v3611_v55, %v3419_v54  ;;  %4085 = vmatprep.mubr.bf16.mxu1 %v16348_v14  ;;  %v13303_v34 = vpop.f32.mrf.mxu0  ;;  %v3425_v54 = vadd.f32 %v12997_v13, %v13055_v20  ;;  %v10847_v13 = vld [vmem:[%s16221_s0 + $0x150] ss:$28 sps:$4 sm:$0xff]  }
 0x24d   :  { %16377 = vst [vmem:[#allocation42_spill] sm:$0xff] %v13303_v34  ;;  %v3613_v49 = vpop.f32.mrf.mxu1 }
 0x24e   :  { %16376 = vst [vmem:[#allocation41_spill] sm:$0xff] %v13297_v29  ;;  %v13307_v0 = vadd.f32 %v3613_v49, %v3421_v59  ;;  %v13309_v41 = vpop.f32.mrf.mxu0  ;;  %v10846_v59 = vld [vmem:[%s16221_s0 + $0x328] ss:$28 sps:$4 sm:$0xff]   ;;  %v3431_v49 = vadd.f32 %v13015_v23, %v13055_v20 }
 0x24f   :  { %v3615_v56 = vpop.f32.mrf.mxu1 }
 0x250   :  { %v13313_v55 = vadd.f32 %v3615_v56, %v3423_v8  ;;  %v13315_v29 = vpop.f32.mrf.mxu0 }
 0x251   :  { %v3617_v18 = vpop.f32.mrf.mxu1 }
 0x252   :  { %v13319_v34 = vadd.f32 %v3617_v18, %v3425_v54  ;;  %v13321_v47 = vpop.f32.mrf.mxu0  ;;  %4187 = vmatmul.mubr.bf16.gmra.mxu0 %v10847_v13  ;;  %v3433_v54 = vadd.f32 %v13020_v43, %v13050_v28 }
 0x253   :  { %v3621_v25 = vpop.f32.mrf.mxu1  ;;  %4086 = vmatmul.mubr.bf16.gmra.mxu1 %v10846_v59  ;;  %4194 = vmatprep.mubr.bf16.mxu0 %v10848_v60  ;;  %v3439_v60 = vadd.f32 %v13028_v4, %v13050_v28  ;;  %v10851_v4 = vld [vmem:[%s16221_s0 + $0x1c4] ss:$28 sps:$4 sm:$0xff]  }
 0x254   :  { %16378 = vst [vmem:[#allocation43_spill] sm:$0xff] %v13319_v34  ;;  %v13331_v8 = vadd.f32 %v3621_v25, %v3429_v24  ;;  %4095 = vmatprep.mubr.bf16.mxu1 %v16348_v14  ;;  %v13337_v18 = vpop.f32.mrf.mxu0  ;;  %v3435_v24 = vadd.f32 %v13023_v61, %v13055_v20  ;;  %v10850_v61 = vld [vmem:[%s16221_s0 + $0x188] ss:$28 sps:$4 sm:$0xff]  }
 0x255   :  { %16380 = vst [vmem:[#allocation45_spill] sm:$0xff] %v13337_v18  ;;  %v3623_v56 = vpop.f32.mrf.mxu1 }
 0x256   :  { %16379 = vst [vmem:[#allocation44_spill] sm:$0xff] %v13331_v8  ;;  %v13341_v59 = vadd.f32 %v3623_v56, %v3431_v49  ;;  %v13343_v13 = vpop.f32.mrf.mxu0  ;;  %v10849_v49 = vld [vmem:[%s16221_s0 + $0x360] ss:$28 sps:$4 sm:$0xff]   ;;  %v3441_v56 = vadd.f32 %v13043_v63, %v13055_v20 }
 0x257   :  { %v3625_v23 = vpop.f32.mrf.mxu1 }
 0x258   :  { %v13347_v25 = vadd.f32 %v3625_v23, %v3433_v54  ;;  %v13349_v14 = vpop.f32.mrf.mxu0 }
 0x259   :  { %v3627_v8 = vpop.f32.mrf.mxu1 }
 0x25a   :  { %v13353_v18 = vadd.f32 %v3627_v8, %v3435_v24  ;;  %v13355_v34 = vpop.f32.mrf.mxu0  ;;  %4195 = vmatmul.mubr.bf16.gmra.mxu0 %v10850_v61  ;;  %v10852_v8 = vld [vmem:[%s16221_s0 + $0xc] ss:$28 sps:$4 sm:$0xff]  }
 0x25b   :  { %v3631_v43 = vpop.f32.mrf.mxu1  ;;  %4096 = vmatmul.mubr.bf16.gmra.mxu1 %v10849_v49  ;;  %4202 = vmatprep.mubr.bf16.mxu0 %v10851_v4  ;;  %v3443_v49 = vadd.f32 %v13057_v35, %v13050_v28  ;;  %v3449_v35 = vadd.f32 %v13073_v38, %v13050_v28 }
 0x25c   :  { %16381 = vst [vmem:[#allocation46_spill] sm:$0xff] %v13353_v18  ;;  %v13365_v54 = vadd.f32 %v3631_v43, %v3439_v60  ;;  %4299 = vmatprep.mubr.bf16.mxu1 %v10852_v8  ;;  %v13373_v23 = vpop.f32.mrf.mxu0  ;;  %v3445_v43 = vadd.f32 %v13060_v46, %v13055_v20  ;;  %v10451_v8 = vld [vmem:[%s16220_s1 + $0x880] ss:$20 sps:$4 sm:$0xff]  }
 0x25d   :  { %v3633_v24 = vpop.f32.mrf.mxu1  ;;  %v10853_v46 = vld [vmem:[%s16221_s0 + $0x1c0] ss:$28 sps:$4 sm:$0xff]  }
 0x25e   :  { %16382 = vst [vmem:[#allocation47_spill] sm:$0xff] %v13365_v54  ;;  %v13377_v61 = vadd.f32 %v3633_v24, %v3441_v56  ;;  %v13379_v63 = vpop.f32.mrf.mxu0 }
 0x25f   :  { %v3635_v60 = vpop.f32.mrf.mxu1 }
 0x260   :  { %16383 = vst [vmem:[#allocation48_spill] sm:$0xff] %v13377_v61  ;;  %v13383_v4 = vadd.f32 %v3635_v60, %v3443_v49  ;;  %v13385_v54 = vpop.f32.mrf.mxu0  ;;  %v10854_v49 = vld [vmem:[%s16221_s0 + $0x8] ss:$28 sps:$4 sm:$0xff]   ;;  %v3451_v60 = vadd.f32 %v13089_v21, %v13055_v20  ;;  %v10454_v21 = vld [vmem:[%s16220_s1 + $0x858] ss:$20 sps:$4 sm:$0xff]  }
 0x261   :  { %v3637_v18 = vpop.f32.mrf.mxu1 }
 0x262   :  { %16384 = vst [vmem:[#allocation49_spill] sm:$0xff] %v13383_v4  ;;  %v13392_v56 = vadd.f32 %v3637_v18, %v3445_v43  ;;  %v3754_v61 = vpop.f32.mrf.mxu0  ;;  %4203 = vmatmul.mubr.bf16.gmra.mxu0 %v10853_v46  ;;  %v10855_v18 = vld [vmem:[%s16221_s0 + $0x1fc] ss:$28 sps:$4 sm:$0xff]  }
 0x263   :  { %v3641_v24 = vpop.f32.mrf.mxu1  ;;  %4300 = vmatmul.mubr.bf16.vlgmr.msra.gmra.mxu1 %v10854_v49  ;;  %v13405_v38 = vadd.f32 %v3754_v61, %v13083_v9  ;;  %4210 = vmatprep.mubr.bf16.mxu0 %v10855_v18  ;;  %v10856_v49 = vld [vmem:[%s16221_s0 + $0x44] ss:$28 sps:$4 sm:$0xff]   ;;  %v3455_v18 = vadd.f32 %v13109_v58, %v13055_v20 }
 0x264   :  { %16385 = vst [vmem:[#allocation50_spill] sm:$0xff] %v13392_v56  ;;  %v13402_v4 = vadd.f32 %v3641_v24, %v3449_v35  ;;  %9738 = vmatpush3.bf16.msra.mxu1 %v12937_v37  ;;  %v3756_v46 = vpop.f32.mrf.mxu0  ;;  %4307 = vmatprep.mubr.bf16.mxu1 %v10856_v49  ;;  %v3453_v37 = vadd.f32 %v13103_v2, %v13050_v28  ;;  %v10457_v58 = vld [vmem:[%s16220_s1 + $0x830] ss:$20 sps:$4 sm:$0xff]  }
 0x265   :  { %16387 = vst [vmem:[#allocation52_spill] sm:$0xff] %v13405_v38  ;;  %v3643_v43 = vpop.f32.mrf.mxu1  ;;  %9739 = vmatprep.subr.bf16.mxu1 %v10451_v8  ;;  %v13422_v61 = vadd.f32 %v3756_v46, %v13096_v12  ;;  %v3459_v2 = vadd.f32 %v13121_v15, %v13050_v28  ;;  %v10858_v15 = vld [vmem:[%s16221_s0 + $0x40] ss:$28 sps:$4 sm:$0xff]  }
 0x266   :  { %16386 = vst [vmem:[#allocation51_spill] sm:$0xff] %v13402_v4  ;;  %v13419_v9 = vadd.f32 %v3643_v43, %v3451_v60  ;;  %v3758_v24 = vpop.f32.mrf.mxu0 }
 0x267   :  { %v3645_v35 = vpop.f32.mrf.mxu1  ;;  %v13429_v49 = vadd.f32 %v3758_v24, %v13107_v22  ;;  %v10857_v22 = vld [vmem:[%s16221_s0 + $0x1f8] ss:$28 sps:$4 sm:$0xff]  }
 0x268   :  { %v13426_v38 = vadd.f32 %v3645_v35, %v3453_v37  ;;  %9740 = vmatpush3.bf16.msra.mxu1 %v10451_v8  ;;  %v3760_v56 = vpop.f32.mrf.mxu0  ;;  %v10860_v37 = vld [vmem:[%s16221_s0 + $0x7c] ss:$28 sps:$4 sm:$0xff]  }
 0x269   :  { %v3647_v4 = vpop.f32.mrf.mxu1  ;;  %9741 = vmatprep.subr.bf16.mxu1 %v10454_v21  ;;  %v13436_v12 = vadd.f32 %v3760_v56, %v13116_v32  ;;  %v3461_v32 = vadd.f32 %v13137_v45, %v13055_v20  ;;  %v10859_v56 = vld [vmem:[%s16221_s0 + $0x234] ss:$28 sps:$4 sm:$0xff]   ;;  %v3463_v45 = vadd.f32 %v13149_v36, %v13050_v28 }
 0x26a   :  { %v13433_v60 = vadd.f32 %v3647_v4, %v3455_v18  ;;  %v3764_v46 = vpop.f32.mrf.mxu0  ;;  %4211 = vmatmul.mubr.bf16.gmra.mxu0 %v10857_v22  ;;  %v3465_v22 = vadd.f32 %v13155_v50, %v13055_v20  ;;  %v10463_v50 = vld [vmem:[%s16220_s1 + $0x7e0] ss:$20 sps:$4 sm:$0xff]  }
 0x26b   :  { %v3651_v43 = vpop.f32.mrf.mxu1  ;;  %4308 = vmatmul.mubr.bf16.gmra.mxu1 %v10858_v15  ;;  %v13452_v8 = vadd.f32 %v3764_v46, %v13131_v51  ;;  %4218 = vmatprep.mubr.bf16.mxu0 %v10859_v56 }
 0x26c   :  { %v13449_v4 = vadd.f32 %v3651_v43, %v3459_v2  ;;  %4315 = vmatprep.mubr.bf16.mxu1 %v10860_v37  ;;  %v3766_v24 = vpop.f32.mrf.mxu0  ;;  %9742 = vmatpush3.bf16.msra.mxu1 %v10454_v21  ;;  %v10462_v2 = vld [vmem:[%s16220_s1 + $0x808] ss:$20 sps:$4 sm:$0xff]  }
 0x26d   :  { %v3653_v35 = vpop.f32.mrf.mxu1  ;;  %v13465_v51 = vadd.f32 %v3766_v24, %v13144_v6  ;;  %9743 = vmatprep.subr.bf16.mxu1 %v10457_v58  ;;  %v3469_v6 = vadd.f32 %v13167_v42, %v13050_v28  ;;  %v10862_v42 = vld [vmem:[%s16221_s0 + $0x78] ss:$28 sps:$4 sm:$0xff]  }
 0x26e   :  { %v13462_v18 = vadd.f32 %v3653_v35, %v3461_v32  ;;  %v3768_v46 = vpop.f32.mrf.mxu0 }
 0x26f   :  { %v3655_v43 = vpop.f32.mrf.mxu1  ;;  %v13475_v21 = vadd.f32 %v3768_v46, %v13153_v10  ;;  %v10861_v10 = vld [vmem:[%s16221_s0 + $0x230] ss:$28 sps:$4 sm:$0xff]  }
 0x270   :  { %v13472_v15 = vadd.f32 %v3655_v43, %v3463_v45  ;;  %v3770_v32 = vpop.f32.mrf.mxu0  ;;  %9744 = vmatpush3.bf16.msra.mxu1 %v10457_v58  ;;  %v10863_v43 = vld [vmem:[%s16221_s0 + $0x26c] ss:$28 sps:$4 sm:$0xff]   ;;  %v10864_v46 = vld [vmem:[%s16221_s0 + $0xb4] ss:$28 sps:$4 sm:$0xff]  }
 0x271   :  { %v3657_v36 = vpop.f32.mrf.mxu1  ;;  %v13482_v37 = vadd.f32 %v3770_v32, %v13162_v39  ;;  %9745 = vmatprep.subr.bf16.mxu1 %v10462_v2  ;;  %v3471_v39 = vadd.f32 %v13183_v27, %v13055_v20  ;;  %v3473_v27 = vadd.f32 %v13195_v53, %v13050_v28 }
 0x272   :  { %v13479_v56 = vadd.f32 %v3657_v36, %v3465_v22  ;;  %v3774_v24 = vpop.f32.mrf.mxu0  ;;  %4219 = vmatmul.mubr.bf16.gmra.mxu0 %v10861_v10  ;;  %v3475_v10 = vadd.f32 %v13207_v31, %v13055_v20  ;;  %v10477_v31 = vld [vmem:[%s16220_s1 + $0x790] ss:$20 sps:$4 sm:$0xff]  }
 0x273   :  { %v3661_v35 = vpop.f32.mrf.mxu1  ;;  %4316 = vmatmul.mubr.bf16.gmra.mxu1 %v10862_v42  ;;  %v13498_v45 = vadd.f32 %v3774_v24, %v13177_v57  ;;  %4226 = vmatprep.mubr.bf16.mxu0 %v10863_v43 }
 0x274   :  { %v13495_v58 = vadd.f32 %v3661_v35, %v3469_v6  ;;  %4323 = vmatprep.mubr.bf16.mxu1 %v10864_v46  ;;  %v3776_v36 = vpop.f32.mrf.mxu0  ;;  %9746 = vmatpush3.bf16.msra.mxu1 %v10462_v2  ;;  %v10470_v6 = vld [vmem:[%s16220_s1 + $0x7b8] ss:$20 sps:$4 sm:$0xff]  }
 0x275   :  { %v3663_v22 = vpop.f32.mrf.mxu1  ;;  %v13511_v57 = vadd.f32 %v3776_v36, %v13190_v33  ;;  %9747 = vmatprep.subr.bf16.mxu1 %v10463_v50  ;;  %v3479_v33 = vadd.f32 %v13213_v7, %v13050_v28  ;;  %v10866_v7 = vld [vmem:[%s16221_s0 + $0xb0] ss:$28 sps:$4 sm:$0xff]  }
 0x276   :  { %v13508_v32 = vadd.f32 %v3663_v22, %v3471_v39  ;;  %v3778_v24 = vpop.f32.mrf.mxu0 }
 0x277   :  { %v3665_v35 = vpop.f32.mrf.mxu1  ;;  %v13521_v2 = vadd.f32 %v3778_v24, %v13202_v48  ;;  %v10865_v48 = vld [vmem:[%s16221_s0 + $0x268] ss:$28 sps:$4 sm:$0xff]  }
 0x278   :  { %v13518_v42 = vadd.f32 %v3665_v35, %v3473_v27  ;;  %v3780_v39 = vpop.f32.mrf.mxu0  ;;  %9748 = vmatpush3.bf16.msra.mxu1 %v10463_v50  ;;  %v10867_v35 = vld [vmem:[%s16221_s0 + $0x2a4] ss:$28 sps:$4 sm:$0xff]   ;;  %v10868_v24 = vld [vmem:[%s16221_s0 + $0xec] ss:$28 sps:$4 sm:$0xff]  }
 0x279   :  { %v3667_v53 = vpop.f32.mrf.mxu1  ;;  %v13528_v46 = vadd.f32 %v3780_v39, %v13211_v17  ;;  %9749 = vmatprep.subr.bf16.mxu1 %v10470_v6  ;;  %v3481_v17 = vadd.f32 %v13232_v40, %v13055_v20  ;;  %v3483_v40 = vadd.f32 %v13241_v11, %v13050_v28 }
 0x27a   :  { %v13525_v43 = vadd.f32 %v3667_v53, %v3475_v10  ;;  %v3784_v36 = vpop.f32.mrf.mxu0  ;;  %4227 = vmatmul.mubr.bf16.gmra.mxu0 %v10865_v48  ;;  %v3485_v48 = vadd.f32 %v13247_v5, %v13055_v20  ;;  %v10869_v5 = vld [vmem:[%s16221_s0 + $0x2a0] ss:$28 sps:$4 sm:$0xff]  }
 0x27b   :  { %v3671_v22 = vpop.f32.mrf.mxu1  ;;  %4324 = vmatmul.mubr.bf16.gmra.mxu1 %v10866_v7  ;;  %v13544_v27 = vadd.f32 %v3784_v36, %v13226_v19  ;;  %4234 = vmatprep.mubr.bf16.mxu0 %v10867_v35 }
 0x27c   :  { %v13541_v50 = vadd.f32 %v3671_v22, %v3479_v33  ;;  %4331 = vmatprep.mubr.bf16.mxu1 %v10868_v24  ;;  %v3786_v53 = vpop.f32.mrf.mxu0  ;;  %9750 = vmatpush3.bf16.msra.mxu1 %v10470_v6  ;;  %v10486_v33 = vld [vmem:[%s16223_s3 + $0xac] ss:$12 sps:$4 sm:$0xff]  }
 0x27d   :  { %v3673_v10 = vpop.f32.mrf.mxu1  ;;  %v13557_v19 = vadd.f32 %v3786_v53, %v13236_v62  ;;  %9751 = vmatprep.subr.bf16.mxu1 %v10477_v31  ;;  %v3489_v62 = vadd.f32 %v13253_v1, %v13050_v28  ;;  %v16388_v1 = vld [vmem:[#allocation38_spill] sm:$0xff] }
 0x27e   :  { %v13554_v39 = vadd.f32 %v3673_v10, %v3481_v17  ;;  %v3788_v36 = vpop.f32.mrf.mxu0 }
 0x27f   :  { %v3675_v22 = vpop.f32.mrf.mxu1  ;;  %v13567_v6 = vadd.f32 %v3788_v36, %v13245_v26  ;;  %v10870_v26 = vld [vmem:[%s16221_s0 + $0xe8] ss:$28 sps:$4 sm:$0xff]  }
 0x280   :  { %v13564_v7 = vadd.f32 %v3675_v22, %v3483_v40  ;;  %v3790_v17 = vpop.f32.mrf.mxu0  ;;  %9752 = vmatpush3.bf16.msra.mxu1 %v10477_v31  ;;  %v3491_v31 = vadd.f32 %v16388_v1, %v13055_v20  ;;  %v10872_v36 = vld [vmem:[%s16221_s0 + $0x124] ss:$28 sps:$4 sm:$0xff]  }
 0x281   :  { %v3677_v11 = vpop.f32.mrf.mxu1  ;;  %v13574_v24 = vadd.f32 %v3790_v17, %v13251_v44  ;;  %5807 = vmatprep.subr.bf16.mxu1 %v10486_v33  ;;  %v16389_v44 = vld [vmem:[#allocation37_spill] sm:$0xff]  ;;  %v3493_v17 = vadd.f32 %v13275_v16, %v13050_v28 }
 0x282   :  { %v13571_v35 = vadd.f32 %v3677_v11, %v3485_v48  ;;  %v3794_v53 = vpop.f32.mrf.mxu0  ;;  %4235 = vmatmul.mubr.bf16.gmra.mxu0 %v10869_v5  ;;  %v10871_v33 = vld [vmem:[%s16221_s0 + $0x2dc] ss:$28 sps:$4 sm:$0xff]  }
 0x283   :  { %v3681_v10 = vpop.f32.mrf.mxu1  ;;  %4332 = vmatmul.mubr.bf16.gmra.mxu1 %v10870_v26  ;;  %v13587_v22 = vadd.f32 %v3794_v53, %v16389_v44  ;;  %4242 = vmatprep.mubr.bf16.mxu0 %v10871_v33  ;;  %v3495_v26 = vadd.f32 %v13281_v30, %v13055_v20  ;;  %v10873_v30 = vld [vmem:[%s16221_s0 + $0x2d8] ss:$28 sps:$4 sm:$0xff]  }
 0x284   :  { %v13584_v40 = vadd.f32 %v3681_v10, %v3489_v62  ;;  %4339 = vmatprep.mubr.bf16.mxu1 %v10872_v36  ;;  %v3796_v11 = vpop.f32.mrf.mxu0 }
 0x285   :  { %16390 = vst [vmem:[#allocation38_spill] sm:$0xff] %v13587_v22  ;;  %v3683_v48 = vpop.f32.mrf.mxu1  ;;  %v13600_v10 = vadd.f32 %v3796_v11, %v13273_v3  ;;  %v16392_v22 = vld [vmem:[#allocation40_spill] sm:$0xff] }
 0x286   :  { %v13597_v62 = vadd.f32 %v3683_v48, %v3491_v31  ;;  %v3798_v5 = vpop.f32.mrf.mxu0  ;;  %v3499_v16 = vadd.f32 %v16392_v22, %v13050_v28  ;;  %v16393_v48 = vld [vmem:[#allocation39_spill] sm:$0xff] }
 0x287   :  { %16391 = vst [vmem:[#allocation37_spill] sm:$0xff] %v13600_v10  ;;  %v3685_v53 = vpop.f32.mrf.mxu1  ;;  %v13607_v44 = vadd.f32 %v3798_v5, %v13279_v52  ;;  %v10874_v52 = vld [vmem:[%s16221_s0 + $0x120] ss:$28 sps:$4 sm:$0xff]  }
 0x288   :  { %v13604_v1 = vadd.f32 %v3685_v53, %v3493_v17  ;;  %v3800_v36 = vpop.f32.mrf.mxu0  ;;  %v16394_v17 = vld [vmem:[#allocation42_spill] sm:$0xff]  ;;  %v16396_v5 = vld [vmem:[#allocation41_spill] sm:$0xff] }
 0x289   :  { %v3687_v33 = vpop.f32.mrf.mxu1  ;;  %v13614_v3 = vadd.f32 %v3800_v36, %v16393_v48  ;;  %v3501_v22 = vadd.f32 %v16394_v17, %v13055_v20  ;;  %v10876_v36 = vld [vmem:[%s16221_s0 + $0x15c] ss:$28 sps:$4 sm:$0xff]  }
 0x28a   :  { %v13611_v31 = vadd.f32 %v3687_v33, %v3495_v26  ;;  %v3804_v10 = vpop.f32.mrf.mxu0  ;;  %4243 = vmatmul.mubr.bf16.gmra.mxu0 %v10873_v30  ;;  %v10875_v33 = vld [vmem:[%s16221_s0 + $0x314] ss:$28 sps:$4 sm:$0xff]  }
 0x28b   :  { %v3691_v11 = vpop.f32.mrf.mxu1  ;;  %4340 = vmatmul.mubr.bf16.gmra.mxu1 %v10874_v52  ;;  %v13627_v26 = vadd.f32 %v3804_v10, %v16396_v5  ;;  %4250 = vmatprep.mubr.bf16.mxu0 %v10875_v33  ;;  %v3503_v52 = vadd.f32 %v13309_v41, %v13050_v28  ;;  %v3505_v5 = vadd.f32 %v13315_v29, %v13055_v20  ;;  %v10877_v29 = vld [vmem:[%s16221_s0 + $0x310] ss:$28 sps:$4 sm:$0xff]  }
 0x28c   :  { %v13624_v53 = vadd.f32 %v3691_v11, %v3499_v16  ;;  %4347 = vmatprep.mubr.bf16.mxu1 %v10876_v36  ;;  %v3806_v30 = vpop.f32.mrf.mxu0  ;;  %v3509_v41 = vadd.f32 %v13321_v47, %v13050_v28 }
 0x28d   :  { %16397 = vst [vmem:[#allocation39_spill] sm:$0xff] %v13627_v26  ;;  %v3693_v48 = vpop.f32.mrf.mxu1  ;;  %v13640_v10 = vadd.f32 %v3806_v30, %v13307_v0 }
 0x28e   :  { %16395 = vst [vmem:[#allocation40_spill] sm:$0xff] %v13624_v53  ;;  %v13637_v16 = vadd.f32 %v3693_v48, %v3501_v22  ;;  %v3808_v17 = vpop.f32.mrf.mxu0  ;;  %v16399_v48 = vld [vmem:[#allocation43_spill] sm:$0xff] }
 0x28f   :  { %16398 = vst [vmem:[#allocation42_spill] sm:$0xff] %v13640_v10  ;;  %v3695_v11 = vpop.f32.mrf.mxu1  ;;  %v13647_v26 = vadd.f32 %v3808_v17, %v13313_v55  ;;  %v10878_v55 = vld [vmem:[%s16221_s0 + $0x158] ss:$28 sps:$4 sm:$0xff]  }
 0x290   :  { %v13644_v33 = vadd.f32 %v3695_v11, %v3503_v52  ;;  %v3810_v53 = vpop.f32.mrf.mxu0  ;;  %v16400_v52 = vld [vmem:[#allocation45_spill] sm:$0xff]  ;;  %v16402_v17 = vld [vmem:[#allocation44_spill] sm:$0xff] }
 0x291   :  { %v3697_v36 = vpop.f32.mrf.mxu1  ;;  %v13654_v0 = vadd.f32 %v3810_v53, %v16399_v48  ;;  %v3511_v47 = vadd.f32 %v16400_v52, %v13055_v20 }
 0x292   :  { %v13651_v22 = vadd.f32 %v3697_v36, %v3505_v5  ;;  %v3814_v10 = vpop.f32.mrf.mxu0  ;;  %4251 = vmatmul.mubr.bf16.gmra.mxu0 %v10877_v29  ;;  %v10879_v5 = vld [vmem:[%s16221_s0 + $0x34c] ss:$28 sps:$4 sm:$0xff]   ;;  %v10880_v36 = vld [vmem:[%s16221_s0 + $0x194] ss:$28 sps:$4 sm:$0xff]  }
 0x293   :  { %v3701_v30 = vpop.f32.mrf.mxu1  ;;  %4348 = vmatmul.mubr.bf16.gmra.mxu1 %v10878_v55  ;;  %v13667_v53 = vadd.f32 %v3814_v10, %v16402_v17  ;;  %4258 = vmatprep.mubr.bf16.mxu0 %v10879_v5  ;;  %v3513_v55 = vadd.f32 %v13343_v13, %v13050_v28  ;;  %v3515_v17 = vadd.f32 %v13349_v14, %v13055_v20  ;;  %v10881_v14 = vld [vmem:[%s16221_s0 + $0x348] ss:$28 sps:$4 sm:$0xff]  }
 0x294   :  { %v13664_v11 = vadd.f32 %v3701_v30, %v3509_v41  ;;  %4355 = vmatprep.mubr.bf16.mxu1 %v10880_v36  ;;  %v3816_v29 = vpop.f32.mrf.mxu0  ;;  %v3519_v13 = vadd.f32 %v13355_v34, %v13050_v28  ;;  %v3521_v34 = vadd.f32 %v13373_v23, %v13055_v20  ;;  %v3523_v23 = vadd.f32 %v13379_v63, %v13050_v28  ;;  %v10464_v28 = vld [vmem:[%s16223_s3 + $0x228] ss:$12 sps:$4 sm:$0xff]  }
 0x295   :  { %16403 = vst [vmem:[#allocation43_spill] sm:$0xff] %v13667_v53  ;;  %v3703_v48 = vpop.f32.mrf.mxu1  ;;  %v13680_v10 = vadd.f32 %v3816_v29, %v13341_v59 }
 0x296   :  { %16401 = vst [vmem:[#allocation41_spill] sm:$0xff] %v13664_v11  ;;  %v13677_v41 = vadd.f32 %v3703_v48, %v3511_v47  ;;  %v3818_v52 = vpop.f32.mrf.mxu0  ;;  %v16405_v48 = vld [vmem:[#allocation46_spill] sm:$0xff] }
 0x297   :  { %16404 = vst [vmem:[#allocation45_spill] sm:$0xff] %v13680_v10  ;;  %v3705_v30 = vpop.f32.mrf.mxu1  ;;  %v13687_v53 = vadd.f32 %v3818_v52, %v13347_v25  ;;  %v10882_v25 = vld [vmem:[%s16221_s0 + $0x190] ss:$28 sps:$4 sm:$0xff]  }
 0x298   :  { %v13684_v5 = vadd.f32 %v3705_v30, %v3513_v55  ;;  %v3820_v11 = vpop.f32.mrf.mxu0  ;;  %v16408_v30 = vld [vmem:[#allocation47_spill] sm:$0xff] }
 0x299   :  { %v3707_v36 = vpop.f32.mrf.mxu1  ;;  %v13694_v59 = vadd.f32 %v3820_v11, %v16405_v48  ;;  %v10883_v52 = vld [vmem:[%s16221_s0 + $0x1cc] ss:$28 sps:$4 sm:$0xff]  }
 0x29a   :  { %v13691_v47 = vadd.f32 %v3707_v36, %v3515_v17  ;;  %v3824_v10 = vpop.f32.mrf.mxu0  ;;  %4259 = vmatmul.mubr.bf16.gmra.mxu0 %v10881_v14  ;;  %v10884_v17 = vld [vmem:[%s16221_s0 + $0x14] ss:$28 sps:$4 sm:$0xff]  }
 0x29b   :  { %16406 = vst [vmem:[#allocation44_spill] sm:$0xff] %v13694_v59  ;;  %v3711_v29 = vpop.f32.mrf.mxu1  ;;  %4356 = vmatmul.mubr.bf16.gmra.mxu1 %v10882_v25  ;;  %v13707_v11 = vadd.f32 %v3824_v10, %v16408_v30  ;;  %4460 = vmatprep.mubr.bf16.mxu0 %v10884_v17  ;;  %v3525_v30 = vadd.f32 %v13385_v54, %v13055_v20  ;;  %v10469_v20 = vld [vmem:[%s16223_s3 + $0x214] ss:$12 sps:$4 sm:$0xff]  }
 0x29c   :  { %v13704_v55 = vadd.f32 %v3711_v29, %v3519_v13  ;;  %4363 = vmatprep.mubr.bf16.mxu1 %v10883_v52  ;;  %v3826_v48 = vpop.f32.mrf.mxu0  ;;  %v16410_v29 = vld [vmem:[#allocation48_spill] sm:$0xff] }
 0x29d   :  { %16409 = vst [vmem:[#allocation47_spill] sm:$0xff] %v13707_v11  ;;  %v3713_v36 = vpop.f32.mrf.mxu1  ;;  %v13720_v10 = vadd.f32 %v3826_v48, %v16410_v29  ;;  %v16411_v11 = vld [vmem:[#allocation49_spill] sm:$0xff]  ;;  %v16414_v29 = vld [vmem:[#allocation51_spill] sm:$0xff] }
 0x29e   :  { %16407 = vst [vmem:[#allocation46_spill] sm:$0xff] %v13704_v55  ;;  %v13717_v13 = vadd.f32 %v3713_v36, %v3521_v34  ;;  %v3828_v25 = vpop.f32.mrf.mxu0  ;;  %v16412_v34 = vld [vmem:[#allocation50_spill] sm:$0xff] }
 0x29f   :  { %v3715_v14 = vpop.f32.mrf.mxu1  ;;  %v13727_v55 = vadd.f32 %v3828_v25, %v16411_v11  ;;  %v10885_v11 = vld [vmem:[%s16221_s0 + $0x1c8] ss:$28 sps:$4 sm:$0xff]  }
 0x2a0   :  { %v13724_v52 = vadd.f32 %v3715_v14, %v3523_v23  ;;  %v3830_v59 = vpop.f32.mrf.mxu0  ;;  %v10886_v23 = vld [vmem:[%s16221_s0 + $0x10] ss:$28 sps:$4 sm:$0xff]  }
 0x2a1   :  { %v3717_v17 = vpop.f32.mrf.mxu1  ;;  %v13735_v36 = vadd.f32 %v3830_v59, %v16412_v34  ;;  %v16416_v59 = vld [vmem:[#allocation52_spill] sm:$0xff] }
 0x2a2   :  { %v13732_v63 = vadd.f32 %v3717_v17, %v3525_v30  ;;  %v3834_v54 = vpop.f32.mrf.mxu0  ;;  %4461 = vmatmul.mubr.bf16.vlgmr.msra.gmra.mxu0 %v10886_v23  ;;  %v10887_v30 = vld [vmem:[%s16221_s0 + $0x204] ss:$28 sps:$4 sm:$0xff]   ;;  %v10888_v17 = vld [vmem:[%s16221_s0 + $0x4c] ss:$28 sps:$4 sm:$0xff]  }
 0x2a3   :  { %16413 = vst [vmem:[#allocation48_spill] sm:$0xff] %v13735_v36  ;;  %v3947_v48 = vpop.f32.mrf.mxu1  ;;  %4364 = vmatmul.mubr.bf16.gmra.mxu1 %v10885_v11  ;;  %v13747_v14 = vadd.f32 %v3834_v54, %v16414_v29  ;;  %4468 = vmatprep.mubr.bf16.mxu0 %v10888_v17  ;;  %v10467_v54 = vld [vmem:[%s16223_s3 + $0x210] ss:$12 sps:$4 sm:$0xff]  }
 0x2a4   :  { %v3948_v25 = vadd.f32 %v3947_v48, %v16416_v59  ;;  %4371 = vmatprep.mubr.bf16.mxu1 %v10887_v30  ;;  %v3836_v34 = vpop.f32.mrf.mxu0  ;;  %6001 = vmatpush1.bf16.msra.mxu0 %v10464_v28  ;;  %v10473_v29 = vld [vmem:[%s16223_s3 + $0x1fc] ss:$12 sps:$4 sm:$0xff]  }
 0x2a5   :  { %16415 = vst [vmem:[#allocation49_spill] sm:$0xff] %v13747_v14  ;;  %v3949_v11 = vpop.f32.mrf.mxu1  ;;  %v13760_v23 = vadd.f32 %v3836_v34, %v13419_v9  ;;  %6002 = vmatprep.subr.bf16.mxu0 %v10469_v20  ;;  %v10471_v9 = vld [vmem:[%s16223_s3 + $0x1f8] ss:$12 sps:$4 sm:$0xff]  }
 0x2a6   :  { %v3950_v48 = vadd.f32 %v3949_v11, %v13422_v61  ;;  %v3838_v59 = vpop.f32.mrf.mxu0  ;;  %v4752_v61 = vmax.f32 %v3948_v25, 0.0 }
 0x2a7   :  { %v3951_v30 = vpop.f32.mrf.mxu1  ;;  %v13767_v17 = vadd.f32 %v3838_v59, %v13426_v38  ;;  %v10476_v38 = vld [vmem:[%s16223_s3 + $0x1e4] ss:$12 sps:$4 sm:$0xff]  }
 0x2a8   :  { %v3952_v28 = vadd.f32 %v3951_v30, %v13429_v49  ;;  %v3840_v14 = vpop.f32.mrf.mxu0  ;;  %6003 = vmatpush1.bf16.msra.mxu0 %v10467_v54  ;;  %v4753_v49 = vmax.f32 %v3950_v48, 0.0  ;;  %v10889_v54 = vld [vmem:[%s16221_s0 + $0x200] ss:$28 sps:$4 sm:$0xff]  }
 0x2a9   :  { %v3953_v36 = vpop.f32.mrf.mxu1  ;;  %v13774_v34 = vadd.f32 %v3840_v14, %v13433_v60  ;;  %6004 = vmatprep.subr.bf16.mxu0 %v10473_v29  ;;  %v10890_v60 = vld [vmem:[%s16221_s0 + $0x48] ss:$28 sps:$4 sm:$0xff]   ;;  %v10891_v48 = vld [vmem:[%s16221_s0 + $0x23c] ss:$28 sps:$4 sm:$0xff]  }
 0x2aa   :  { %v4757_v20 = vmax.f32 %v3952_v28, 0.0  ;;  %v3954_v11 = vadd.f32 %v3953_v36, %v13436_v12  ;;  %v3844_v59 = vpop.f32.mrf.mxu0  ;;  %4469 = vmatmul.mubr.bf16.gmra.mxu0 %v10890_v60  ;;  %v10892_v29 = vld [vmem:[%s16221_s0 + $0x84] ss:$28 sps:$4 sm:$0xff]  }
 0x2ab   :  { %v3957_v30 = vpop.f32.mrf.mxu1  ;;  %4372 = vmatmul.mubr.bf16.gmra.mxu1 %v10889_v54  ;;  %v13789_v36 = vadd.f32 %v3844_v59, %v13449_v4  ;;  %4476 = vmatprep.mubr.bf16.mxu0 %v10892_v29  ;;  %v10474_v4 = vld [vmem:[%s16223_s3 + $0x1e0] ss:$12 sps:$4 sm:$0xff]  }
 0x2ac   :  { %v13786_v14 = vpack.c.bf16 %v4757_v20, %v4752_v61  ;;  %v4758_v12 = vmax.f32 %v3954_v11, 0.0  ;;  %v3958_v25 = vadd.f32 %v3957_v30, %v13452_v8  ;;  %4379 = vmatprep.mubr.bf16.mxu1 %v10891_v48  ;;  %v3846_v28 = vpop.f32.mrf.mxu0  ;;  %6005 = vmatpush1.bf16.msra.mxu0 %v10471_v9  ;;  %v10480_v20 = vld [vmem:[%s16223_s3 + $0x1cc] ss:$12 sps:$4 sm:$0xff]  }
 0x2ad   :  { %v3959_v54 = vpop.f32.mrf.mxu1  ;;  %v13802_v61 = vadd.f32 %v3846_v28, %v13462_v18  ;;  %6006 = vmatprep.subr.bf16.mxu0 %v10476_v38  ;;  %v10478_v18 = vld [vmem:[%s16223_s3 + $0x1c8] ss:$12 sps:$4 sm:$0xff]  }
 0x2ae   :  { %16417 = vst [vmem:[#allocation50_spill] sm:$0xff] %v13786_v14  ;;  %v3960_v8 = vadd.f32 %v3959_v54, %v13465_v51  ;;  %v13808_v11 = vpack.c.bf16 %v4758_v12, %v4753_v49  ;;  %v3848_v59 = vpop.f32.mrf.mxu0  ;;  %v4762_v51 = vmax.f32 %v3958_v25, 0.0 }
 0x2af   :  { %v3961_v30 = vpop.f32.mrf.mxu1  ;;  %v13811_v9 = vadd.f32 %v3848_v59, %v13472_v15  ;;  %v10483_v15 = vld [vmem:[%s16223_s3 + $0x1b4] ss:$12 sps:$4 sm:$0xff]  }
 0x2b0   :  { %16418 = vst [vmem:[#allocation51_spill] sm:$0xff] %v13808_v11  ;;  %v3962_v60 = vadd.f32 %v3961_v30, %v13475_v21  ;;  %v3850_v48 = vpop.f32.mrf.mxu0  ;;  %6007 = vmatpush1.bf16.msra.mxu0 %v10474_v4  ;;  %v4763_v21 = vmax.f32 %v3960_v8, 0.0  ;;  %v10893_v4 = vld [vmem:[%s16221_s0 + $0x238] ss:$28 sps:$4 sm:$0xff]  }
 0x2b1   :  { %v3963_v29 = vpop.f32.mrf.mxu1  ;;  %v13818_v28 = vadd.f32 %v3850_v48, %v13479_v56  ;;  %6008 = vmatprep.subr.bf16.mxu0 %v10480_v20  ;;  %v10894_v56 = vld [vmem:[%s16221_s0 + $0x80] ss:$28 sps:$4 sm:$0xff]   ;;  %v10895_v59 = vld [vmem:[%s16221_s0 + $0x274] ss:$28 sps:$4 sm:$0xff]  }
 0x2b2   :  { %v4767_v38 = vmax.f32 %v3962_v60, 0.0  ;;  %v3964_v49 = vadd.f32 %v3963_v29, %v13482_v37  ;;  %v3854_v12 = vpop.f32.mrf.mxu0  ;;  %4477 = vmatmul.mubr.bf16.gmra.mxu0 %v10894_v56  ;;  %v10896_v30 = vld [vmem:[%s16221_s0 + $0xbc] ss:$28 sps:$4 sm:$0xff]  }
 0x2b3   :  { %v3967_v54 = vpop.f32.mrf.mxu1  ;;  %4380 = vmatmul.mubr.bf16.gmra.mxu1 %v10893_v4  ;;  %v13833_v20 = vadd.f32 %v3854_v12, %v13495_v58  ;;  %4484 = vmatprep.mubr.bf16.mxu0 %v10896_v30  ;;  %v10481_v58 = vld [vmem:[%s16223_s3 + $0x1b0] ss:$12 sps:$4 sm:$0xff]  }
 0x2b4   :  { %v13830_v25 = vpack.c.bf16 %v4767_v38, %v4762_v51  ;;  %v4768_v37 = vmax.f32 %v3964_v49, 0.0  ;;  %v3968_v8 = vadd.f32 %v3967_v54, %v13498_v45  ;;  %4387 = vmatprep.mubr.bf16.mxu1 %v10895_v59  ;;  %v3856_v60 = vpop.f32.mrf.mxu0  ;;  %6009 = vmatpush1.bf16.msra.mxu0 %v10478_v18  ;;  %v10489_v51 = vld [vmem:[%s16223_s3 + $0x19c] ss:$12 sps:$4 sm:$0xff]  }
 0x2b5   :  { %v3969_v48 = vpop.f32.mrf.mxu1  ;;  %v13846_v29 = vadd.f32 %v3856_v60, %v13508_v32  ;;  %6010 = vmatprep.subr.bf16.mxu0 %v10483_v15  ;;  %v10487_v32 = vld [vmem:[%s16223_s3 + $0x198] ss:$12 sps:$4 sm:$0xff]   ;;  %v10897_v60 = vld [vmem:[%s16221_s0 + $0x270] ss:$28 sps:$4 sm:$0xff]  }
 0x2b6   :  { %16419 = vst [vmem:[#allocation52_spill] sm:$0xff] %v13830_v25  ;;  %v3970_v45 = vadd.f32 %v3969_v48, %v13511_v57  ;;  %v13852_v38 = vpack.c.bf16 %v4768_v37, %v4763_v21  ;;  %v3858_v49 = vpop.f32.mrf.mxu0  ;;  %v4772_v57 = vmax.f32 %v3968_v8, 0.0 }
 0x2b7   :  { %v3971_v12 = vpop.f32.mrf.mxu1  ;;  %v13855_v18 = vadd.f32 %v3858_v49, %v13518_v42  ;;  %v10498_v42 = vld [vmem:[%s16223_s3 + $0x184] ss:$12 sps:$4 sm:$0xff]  }
 0x2b8   :  { %16420 = vst [vmem:[#allocation53_spill] sm:$0xff] %v13852_v38  ;;  %v3972_v54 = vadd.f32 %v3971_v12, %v13521_v2  ;;  %v3860_v4 = vpop.f32.mrf.mxu0  ;;  %6011 = vmatpush1.bf16.msra.mxu0 %v10481_v58  ;;  %v4773_v2 = vmax.f32 %v3970_v45, 0.0  ;;  %v10899_v45 = vld [vmem:[%s16221_s0 + $0x2ac] ss:$28 sps:$4 sm:$0xff]  }
 0x2b9   :  { %v3973_v56 = vpop.f32.mrf.mxu1  ;;  %v13862_v59 = vadd.f32 %v3860_v4, %v13525_v43  ;;  %6012 = vmatprep.subr.bf16.mxu0 %v10489_v51  ;;  %v10898_v43 = vld [vmem:[%s16221_s0 + $0xb8] ss:$28 sps:$4 sm:$0xff]  }
 0x2ba   :  { %v4777_v15 = vmax.f32 %v3972_v54, 0.0  ;;  %v3974_v21 = vadd.f32 %v3973_v56, %v13528_v46  ;;  %v3864_v37 = vpop.f32.mrf.mxu0  ;;  %4485 = vmatmul.mubr.bf16.gmra.mxu0 %v10898_v43  ;;  %v10900_v51 = vld [vmem:[%s16221_s0 + $0xf4] ss:$28 sps:$4 sm:$0xff]   ;;  %v10507_v4 = vld [vmem:[%s16223_s3 + $0x2ec] ss:$12 sps:$4 sm:$0xff]  }
 0x2bb   :  { %v3977_v30 = vpop.f32.mrf.mxu1  ;;  %4388 = vmatmul.mubr.bf16.gmra.mxu1 %v10897_v60  ;;  %v13877_v48 = vadd.f32 %v3864_v37, %v13541_v50  ;;  %4492 = vmatprep.mubr.bf16.mxu0 %v10900_v51  ;;  %v10496_v50 = vld [vmem:[%s16223_s3 + $0x180] ss:$12 sps:$4 sm:$0xff]  }
 0x2bc   :  { %v13874_v8 = vpack.c.bf16 %v4777_v15, %v4772_v57  ;;  %v4778_v46 = vmax.f32 %v3974_v21, 0.0  ;;  %v3978_v58 = vadd.f32 %v3977_v30, %v13544_v27  ;;  %4395 = vmatprep.mubr.bf16.mxu1 %v10899_v45  ;;  %v3866_v49 = vpop.f32.mrf.mxu0  ;;  %6013 = vmatpush1.bf16.msra.mxu0 %v10487_v32  ;;  %v10901_v45 = vld [vmem:[%s16221_s0 + $0x2a8] ss:$28 sps:$4 sm:$0xff]  }
 0x2bd   :  { %v3979_v12 = vpop.f32.mrf.mxu1  ;;  %v13890_v54 = vadd.f32 %v3866_v49, %v13554_v39  ;;  %6014 = vmatprep.subr.bf16.mxu0 %v10498_v42  ;;  %v10505_v39 = vld [vmem:[%s16223_s3 + $0x2e8] ss:$12 sps:$4 sm:$0xff]   ;;  %v16424_v49 = vld [vmem:[#allocation38_spill] sm:$0xff] }
 0x2be   :  { %16421 = vst [vmem:[#allocation54_spill] sm:$0xff] %v13874_v8  ;;  %v3980_v27 = vadd.f32 %v3979_v12, %v13557_v19  ;;  %v13896_v56 = vpack.c.bf16 %v4778_v46, %v4773_v2  ;;  %v3868_v57 = vpop.f32.mrf.mxu0  ;;  %v4782_v19 = vmax.f32 %v3978_v58, 0.0 }
 0x2bf   :  { %v3981_v15 = vpop.f32.mrf.mxu1  ;;  %v13899_v32 = vadd.f32 %v3868_v57, %v13564_v7  ;;  %v10516_v7 = vld [vmem:[%s16223_s3 + $0x2d4] ss:$12 sps:$4 sm:$0xff]  }
 0x2c0   :  { %16422 = vst [vmem:[#allocation55_spill] sm:$0xff] %v13896_v56  ;;  %v3982_v21 = vadd.f32 %v3981_v15, %v13567_v6  ;;  %v3870_v37 = vpop.f32.mrf.mxu0  ;;  %6015 = vmatpush1.bf16.msra.mxu0 %v10496_v50  ;;  %v4783_v6 = vmax.f32 %v3980_v27, 0.0  ;;  %v10903_v50 = vld [vmem:[%s16221_s0 + $0x2e4] ss:$28 sps:$4 sm:$0xff]   ;;  %v10904_v27 = vld [vmem:[%s16221_s0 + $0x12c] ss:$28 sps:$4 sm:$0xff]  }
 0x2c1   :  { %v3983_v30 = vpop.f32.mrf.mxu1  ;;  %v13906_v60 = vadd.f32 %v3870_v37, %v13571_v35  ;;  %6016 = vmatprep.subr.bf16.mxu0 %v10507_v4  ;;  %v10902_v35 = vld [vmem:[%s16221_s0 + $0xf0] ss:$28 sps:$4 sm:$0xff]  }
 0x2c2   :  { %v4787_v42 = vmax.f32 %v3982_v21, 0.0  ;;  %v3984_v2 = vadd.f32 %v3983_v30, %v13574_v24  ;;  %v3874_v43 = vpop.f32.mrf.mxu0  ;;  %4493 = vmatmul.mubr.bf16.gmra.mxu0 %v10902_v35  ;;  %v16425_v21 = vld [vmem:[#allocation37_spill] sm:$0xff] }
 0x2c3   :  { %v3987_v46 = vpop.f32.mrf.mxu1  ;;  %4396 = vmatmul.mubr.bf16.gmra.mxu1 %v10901_v45  ;;  %v13921_v51 = vadd.f32 %v3874_v43, %v13584_v40  ;;  %4500 = vmatprep.mubr.bf16.mxu0 %v10904_v27  ;;  %v10514_v40 = vld [vmem:[%s16223_s3 + $0x2d0] ss:$12 sps:$4 sm:$0xff]  }
 0x2c4   :  { %v13918_v58 = vpack.c.bf16 %v4787_v42, %v4782_v19  ;;  %v4788_v24 = vmax.f32 %v3984_v2, 0.0  ;;  %v3988_v12 = vadd.f32 %v3987_v46, %v16424_v49  ;;  %4403 = vmatprep.mubr.bf16.mxu1 %v10903_v50  ;;  %v3876_v4 = vpop.f32.mrf.mxu0  ;;  %6017 = vmatpush2.bf16.msra.mxu0 %v10505_v39  ;;  %v10525_v30 = vld [vmem:[%s16223_s3 + $0x2bc] ss:$12 sps:$4 sm:$0xff]  }
 0x2c5   :  { %v3989_v57 = vpop.f32.mrf.mxu1  ;;  %v13934_v15 = vadd.f32 %v3876_v4, %v13597_v62  ;;  %6018 = vmatprep.subr.bf16.mxu0 %v10516_v7  ;;  %v10523_v62 = vld [vmem:[%s16223_s3 + $0x2b8] ss:$12 sps:$4 sm:$0xff]   ;;  %v10905_v27 = vld [vmem:[%s16221_s0 + $0x2e0] ss:$28 sps:$4 sm:$0xff]   ;;  %v16428_v4 = vld [vmem:[#allocation40_spill] sm:$0xff] }
 0x2c6   :  { %16423 = vst [vmem:[#allocation56_spill] sm:$0xff] %v13918_v58  ;;  %v3990_v37 = vadd.f32 %v3989_v57, %v16425_v21  ;;  %v13940_v19 = vpack.c.bf16 %v4788_v24, %v4783_v6  ;;  %v3878_v42 = vpop.f32.mrf.mxu0  ;;  %v4792_v7 = vmax.f32 %v3988_v12, 0.0 }
 0x2c7   :  { %v3991_v2 = vpop.f32.mrf.mxu1  ;;  %v13943_v39 = vadd.f32 %v3878_v42, %v13604_v1  ;;  %v10534_v1 = vld [vmem:[%s16223_s3 + $0x2a4] ss:$12 sps:$4 sm:$0xff]  }
 0x2c8   :  { %16426 = vst [vmem:[#allocation38_spill] sm:$0xff] %v13940_v19  ;;  %v3992_v43 = vadd.f32 %v3991_v2, %v13607_v44  ;;  %v3880_v46 = vpop.f32.mrf.mxu0  ;;  %6019 = vmatpush2.bf16.msra.mxu0 %v10514_v40  ;;  %v4793_v44 = vmax.f32 %v3990_v37, 0.0  ;;  %v16429_v40 = vld [vmem:[#allocation39_spill] sm:$0xff]  ;;  %v10907_v37 = vld [vmem:[%s16221_s0 + $0x31c] ss:$28 sps:$4 sm:$0xff]  }
 0x2c9   :  { %v3993_v45 = vpop.f32.mrf.mxu1  ;;  %v13950_v49 = vadd.f32 %v3880_v46, %v13611_v31  ;;  %6020 = vmatprep.subr.bf16.mxu0 %v10525_v30  ;;  %v10906_v31 = vld [vmem:[%s16221_s0 + $0x128] ss:$28 sps:$4 sm:$0xff]  }
 0x2ca   :  { %v4797_v35 = vmax.f32 %v3992_v43, 0.0  ;;  %v3994_v6 = vadd.f32 %v3993_v45, %v13614_v3  ;;  %v3884_v24 = vpop.f32.mrf.mxu0  ;;  %4501 = vmatmul.mubr.bf16.gmra.mxu0 %v10906_v31  ;;  %v10908_v30 = vld [vmem:[%s16221_s0 + $0x164] ss:$28 sps:$4 sm:$0xff]  }
 0x2cb   :  { %v3997_v50 = vpop.f32.mrf.mxu1  ;;  %4404 = vmatmul.mubr.bf16.gmra.mxu1 %v10905_v27  ;;  %v13965_v57 = vadd.f32 %v3884_v24, %v16428_v4  ;;  %4508 = vmatprep.mubr.bf16.mxu0 %v10908_v30  ;;  %v10532_v43 = vld [vmem:[%s16223_s3 + $0x2a0] ss:$12 sps:$4 sm:$0xff]  }
 0x2cc   :  { %v13962_v12 = vpack.c.bf16 %v4797_v35, %v4792_v7  ;;  %v4798_v3 = vmax.f32 %v3994_v6, 0.0  ;;  %v3998_v21 = vadd.f32 %v3997_v50, %v16429_v40  ;;  %4411 = vmatprep.mubr.bf16.mxu1 %v10907_v37  ;;  %v3886_v42 = vpop.f32.mrf.mxu0  ;;  %6021 = vmatpush2.bf16.msra.mxu0 %v10523_v62  ;;  %v16430_v45 = vld [vmem:[#allocation42_spill] sm:$0xff]  ;;  %v10543_v35 = vld [vmem:[%s16223_s3 + $0x28c] ss:$12 sps:$4 sm:$0xff]  }
 0x2cd   :  { %v3999_v2 = vpop.f32.mrf.mxu1  ;;  %v13978_v46 = vadd.f32 %v3886_v42, %v13637_v16  ;;  %6022 = vmatprep.subr.bf16.mxu0 %v10534_v1  ;;  %v10541_v16 = vld [vmem:[%s16223_s3 + $0x288] ss:$12 sps:$4 sm:$0xff]  }
 0x2ce   :  { %16427 = vst [vmem:[#allocation37_spill] sm:$0xff] %v13962_v12  ;;  %v4000_v7 = vadd.f32 %v3999_v2, %v16430_v45  ;;  %v13984_v6 = vpack.c.bf16 %v4798_v3, %v4793_v44  ;;  %v3888_v24 = vpop.f32.mrf.mxu0  ;;  %v4802_v1 = vmax.f32 %v3998_v21, 0.0  ;;  %v10909_v42 = vld [vmem:[%s16221_s0 + $0x318] ss:$28 sps:$4 sm:$0xff]   ;;  %v16434_v45 = vld [vmem:[#allocation43_spill] sm:$0xff] }
 0x2cf   :  { %v4001_v50 = vpop.f32.mrf.mxu1  ;;  %v13987_v62 = vadd.f32 %v3888_v24, %v13644_v33  ;;  %v10549_v33 = vld [vmem:[%s16223_s3 + $0x274] ss:$12 sps:$4 sm:$0xff]   ;;  %v16433_v2 = vld [vmem:[#allocation41_spill] sm:$0xff] }
 0x2d0   :  { %16431 = vst [vmem:[#allocation40_spill] sm:$0xff] %v13984_v6  ;;  %v4002_v27 = vadd.f32 %v4001_v50, %v13647_v26  ;;  %v3890_v31 = vpop.f32.mrf.mxu0  ;;  %6023 = vmatpush2.bf16.msra.mxu0 %v10532_v43  ;;  %v4803_v26 = vmax.f32 %v4000_v7, 0.0  ;;  %v10912_v24 = vld [vmem:[%s16221_s0 + $0x19c] ss:$28 sps:$4 sm:$0xff]  }
 0x2d1   :  { %v4003_v4 = vpop.f32.mrf.mxu1  ;;  %v13994_v37 = vadd.f32 %v3890_v31, %v13651_v22  ;;  %6024 = vmatprep.subr.bf16.mxu0 %v10543_v35  ;;  %v10910_v22 = vld [vmem:[%s16221_s0 + $0x160] ss:$28 sps:$4 sm:$0xff]   ;;  %v10911_v35 = vld [vmem:[%s16221_s0 + $0x354] ss:$28 sps:$4 sm:$0xff]  }
 0x2d2   :  { %v4807_v40 = vmax.f32 %v4002_v27, 0.0  ;;  %v4004_v44 = vadd.f32 %v4003_v4, %v13654_v0  ;;  %v3894_v3 = vpop.f32.mrf.mxu0  ;;  %4509 = vmatmul.mubr.bf16.gmra.mxu0 %v10910_v22  ;;  %v10547_v31 = vld [vmem:[%s16223_s3 + $0x270] ss:$12 sps:$4 sm:$0xff]  }
 0x2d3   :  { %v4007_v30 = vpop.f32.mrf.mxu1  ;;  %4412 = vmatmul.mubr.bf16.gmra.mxu1 %v10909_v42  ;;  %v14009_v43 = vadd.f32 %v3894_v3, %v16433_v2  ;;  %4516 = vmatprep.mubr.bf16.mxu0 %v10912_v24 }
 0x2d4   :  { %v14006_v21 = vpack.c.bf16 %v4807_v40, %v4802_v1  ;;  %v4808_v0 = vmax.f32 %v4004_v44, 0.0  ;;  %v4008_v7 = vadd.f32 %v4007_v30, %v16434_v45  ;;  %4419 = vmatprep.mubr.bf16.mxu1 %v10911_v35  ;;  %v3896_v50 = vpop.f32.mrf.mxu0  ;;  %6025 = vmatpush2.bf16.msra.mxu0 %v10541_v16  ;;  %v16435_v1 = vld [vmem:[#allocation45_spill] sm:$0xff] }
 0x2d5   :  { %v4009_v27 = vpop.f32.mrf.mxu1  ;;  %v14022_v4 = vadd.f32 %v3896_v50, %v13677_v41  ;;  %6026 = vmatprep.subr.bf16.mxu0 %v10549_v33  ;;  %v10555_v44 = vld [vmem:[%s16223_s3 + $0x25c] ss:$12 sps:$4 sm:$0xff]   ;;  %v10553_v41 = vld [vmem:[%s16223_s3 + $0x258] ss:$12 sps:$4 sm:$0xff]  }
 0x2d6   :  { %16432 = vst [vmem:[#allocation39_spill] sm:$0xff] %v14006_v21  ;;  %v4010_v40 = vadd.f32 %v4009_v27, %v16435_v1  ;;  %v14028_v3 = vpack.c.bf16 %v4808_v0, %v4803_v26  ;;  %v3898_v30 = vpop.f32.mrf.mxu0  ;;  %v4812_v33 = vmax.f32 %v4008_v7, 0.0  ;;  %v16437_v26 = vld [vmem:[#allocation44_spill] sm:$0xff] }
 0x2d7   :  { %v4011_v42 = vpop.f32.mrf.mxu1  ;;  %v14031_v16 = vadd.f32 %v3898_v30, %v13684_v5  ;;  %v10561_v5 = vld [vmem:[%s16223_s3 + $0x244] ss:$12 sps:$4 sm:$0xff]  }
 0x2d8   :  { %16436 = vst [vmem:[#allocation42_spill] sm:$0xff] %v14028_v3  ;;  %v4012_v22 = vadd.f32 %v4011_v42, %v13687_v53  ;;  %v3900_v2 = vpop.f32.mrf.mxu0  ;;  %6027 = vmatpush2.bf16.msra.mxu0 %v10547_v31  ;;  %v4813_v53 = vmax.f32 %v4010_v40, 0.0  ;;  %v10913_v31 = vld [vmem:[%s16221_s0 + $0x350] ss:$28 sps:$4 sm:$0xff]  }
 0x2d9   :  { %v4013_v45 = vpop.f32.mrf.mxu1  ;;  %v14038_v24 = vadd.f32 %v3900_v2, %v13691_v47  ;;  %6028 = vmatprep.subr.bf16.mxu0 %v10555_v44  ;;  %v10914_v47 = vld [vmem:[%s16221_s0 + $0x198] ss:$28 sps:$4 sm:$0xff]   ;;  %v16439_v44 = vld [vmem:[#allocation46_spill] sm:$0xff]  ;;  %v16440_v42 = vld [vmem:[#allocation47_spill] sm:$0xff] }
 0x2da   :  { %v4817_v35 = vmax.f32 %v4012_v22, 0.0  ;;  %v4014_v0 = vadd.f32 %v4013_v45, %v16437_v26  ;;  %v3904_v50 = vpop.f32.mrf.mxu0  ;;  %4517 = vmatmul.mubr.bf16.gmra.mxu0 %v10914_v47  ;;  %v10915_v22 = vld [vmem:[%s16221_s0 + $0x1d4] ss:$28 sps:$4 sm:$0xff]  }
 0x2db   :  { %v4017_v27 = vpop.f32.mrf.mxu1  ;;  %4420 = vmatmul.mubr.bf16.gmra.mxu1 %v10913_v31  ;;  %v14053_v30 = vadd.f32 %v3904_v50, %v16439_v44  ;;  %4524 = vmatprep.mubr.bf16.mxu0 %v10915_v22  ;;  %v10916_v2 = vld [vmem:[%s16221_s0 + $0x18] ss:$28 sps:$4 sm:$0xff]   ;;  %v10565_v50 = vld [vmem:[%s16223_s3 + $0x170] ss:$12 sps:$4 sm:$0xff]  }
 0x2dc   :  { %v14050_v7 = vpack.c.bf16 %v4817_v35, %v4812_v33  ;;  %v4818_v1 = vmax.f32 %v4014_v0, 0.0  ;;  %v4018_v40 = vadd.f32 %v4017_v27, %v16440_v42  ;;  %9753 = vmatprep.mubr.bf16.mxu1 %v10916_v2  ;;  %v3906_v45 = vpop.f32.mrf.mxu0  ;;  %6029 = vmatpush2.bf16.msra.mxu0 %v10553_v41  ;;  %v10559_v33 = vld [vmem:[%s16223_s3 + $0x240] ss:$12 sps:$4 sm:$0xff]  }
 0x2dd   :  { %v4019_v26 = vpop.f32.mrf.mxu1  ;;  %v14066_v35 = vadd.f32 %v3906_v45, %v13717_v13  ;;  %6030 = vmatprep.subr.bf16.mxu0 %v10561_v5  ;;  %v10484_v13 = vld [vmem:[%s16223_s3 + $0xa8] ss:$12 sps:$4 sm:$0xff]  }
 0x2de   :  { %16438 = vst [vmem:[#allocation41_spill] sm:$0xff] %v14050_v7  ;;  %v4020_v0 = vadd.f32 %v4019_v26, %v13720_v10  ;;  %v14072_v27 = vpack.c.bf16 %v4818_v1, %v4813_v53  ;;  %v3908_v31 = vpop.f32.mrf.mxu0  ;;  %v10492_v5 = vld [vmem:[%s16223_s3 + $0x94] ss:$12 sps:$4 sm:$0xff]   ;;  %v4822_v53 = vmax.f32 %v4018_v40, 0.0  ;;  %v10917_v26 = vld [vmem:[%s16221_s0 + $0x1d0] ss:$28 sps:$4 sm:$0xff]  }
 0x2df   :  { %v4021_v47 = vpop.f32.mrf.mxu1  ;;  %v14075_v41 = vadd.f32 %v3908_v31, %v13724_v52  ;;  %v16442_v52 = vld [vmem:[#allocation48_spill] sm:$0xff] }
 0x2e0   :  { %16441 = vst [vmem:[#allocation43_spill] sm:$0xff] %v14072_v27  ;;  %v4022_v44 = vadd.f32 %v4021_v47, %v13727_v55  ;;  %v3910_v42 = vpop.f32.mrf.mxu0  ;;  %6031 = vmatpush2.bf16.msra.mxu0 %v10559_v33  ;;  %v10918_v31 = vld [vmem:[%s16221_s0 + $0x50] ss:$28 sps:$4 sm:$0xff]   ;;  %v4823_v40 = vmax.f32 %v4020_v0, 0.0  ;;  %v16444_v47 = vld [vmem:[#allocation49_spill] sm:$0xff] }
 0x2e1   :  { %v4023_v10 = vpop.f32.mrf.mxu1  ;;  %v14085_v22 = vadd.f32 %v3910_v42, %v13732_v63  ;;  %9353 = vmatprep.subr.bf16.mxu0 %v10565_v50  ;;  %v10490_v50 = vld [vmem:[%s16223_s3 + $0x90] ss:$12 sps:$4 sm:$0xff]   ;;  %v10919_v42 = vld [vmem:[%s16221_s0 + $0x20c] ss:$28 sps:$4 sm:$0xff]  }
 0x2e2   :  { %v4827_v1 = vmax.f32 %v4022_v44, 0.0  ;;  %v4024_v2 = vadd.f32 %v4023_v10, %v16442_v52  ;;  %v9009_v45 = vpop.f32.mrf.mxu0  ;;  %4525 = vmatmul.mubr.bf16.gmra.mxu0 %v10917_v26  ;;  %v10920_v0 = vld [vmem:[%s16221_s0 + $0x88] ss:$28 sps:$4 sm:$0xff]  }
 0x2e3   :  { %v4027_v55 = vpop.f32.mrf.mxu1  ;;  %9754 = vmatmul.mubr.bf16.vlgmr.msra.gmra.mxu1 %v10918_v31  ;;  %4532 = vmatprep.mubr.bf16.mxu0 %v10919_v42 }
 0x2e4   :  { %v14094_v33 = vpack.c.bf16 %v4827_v1, %v4822_v53  ;;  %v4828_v63 = vmax.f32 %v4024_v2, 0.0  ;;  %v4028_v44 = vadd.f32 %v4027_v55, %v16444_v47  ;;  %5808 = vmatpush1.bf16.msra.mxu1 %v10484_v13  ;;  %v9010_v52 = vpop.f32.mrf.mxu0  ;;  %9757 = vmatprep.mubr.bf16.mxu1 %v10920_v0  ;;  %v10495_v13 = vld [vmem:[%s16223_s3 + $0x7c] ss:$12 sps:$4 sm:$0xff]  }
 0x2e5   :  { %v4029_v10 = vpop.f32.mrf.mxu1  ;;  %5809 = vmatprep.subr.bf16.mxu1 %v10492_v5  ;;  %v14110_v1 = vadd.f32 %v9010_v52, %v9009_v45  ;;  %v10493_v5 = vld [vmem:[%s16223_s3 + $0x78] ss:$12 sps:$4 sm:$0xff]   ;;  %v10922_v0 = vld [vmem:[%s16221_s0 + $0xc0] ss:$28 sps:$4 sm:$0xff]  }
 0x2e6   :  { %16443 = vst [vmem:[#allocation45_spill] sm:$0xff] %v14094_v33  ;;  %v4030_v53 = vadd.f32 %v4029_v10, %v13760_v23  ;;  %v14112_v2 = vpack.c.bf16 %v4828_v63, %v4823_v40  ;;  %v9012_v26 = vpop.f32.mrf.mxu0  ;;  %v10501_v23 = vld [vmem:[%s16223_s3 + $0x64] ss:$12 sps:$4 sm:$0xff]   ;;  %v4832_v45 = vmax.f32 %v4028_v44, 0.0 }
 0x2e7   :  { %v4031_v55 = vpop.f32.mrf.mxu1 }
 0x2e8   :  { %16445 = vst [vmem:[#allocation44_spill] sm:$0xff] %v14112_v2  ;;  %v4032_v31 = vadd.f32 %v4031_v55, %v13767_v17  ;;  %5810 = vmatpush1.bf16.msra.mxu1 %v10490_v50  ;;  %v9013_v42 = vpop.f32.mrf.mxu0  ;;  %v10921_v50 = vld [vmem:[%s16221_s0 + $0x208] ss:$28 sps:$4 sm:$0xff]  }
 0x2e9   :  { %v4033_v47 = vpop.f32.mrf.mxu1  ;;  %5811 = vmatprep.subr.bf16.mxu1 %v10495_v13  ;;  %v14122_v63 = vadd.f32 %v9013_v42, %v9012_v26  ;;  %v4833_v13 = vmax.f32 %v4030_v53, 0.0  ;;  %v10499_v26 = vld [vmem:[%s16223_s3 + $0x60] ss:$12 sps:$4 sm:$0xff]   ;;  %v10924_v53 = vld [vmem:[%s16221_s0 + $0xf8] ss:$28 sps:$4 sm:$0xff]  }
 0x2ea   :  { %v4837_v10 = vmax.f32 %v4032_v31, 0.0  ;;  %v4034_v40 = vadd.f32 %v4033_v47, %v13774_v34  ;;  %v9015_v17 = vpop.f32.mrf.mxu0  ;;  %4533 = vmatmul.mubr.bf16.gmra.mxu0 %v10921_v50  ;;  %v10923_v31 = vld [vmem:[%s16221_s0 + $0x244] ss:$28 sps:$4 sm:$0xff]  }
 0x2eb   :  { %v4037_v52 = vpop.f32.mrf.mxu1  ;;  %9758 = vmatmul.mubr.bf16.gmra.mxu1 %v10922_v0  ;;  %4540 = vmatprep.mubr.bf16.mxu0 %v10923_v31 }
 0x2ec   :  { %v14130_v55 = vpack.c.bf16 %v4837_v10, %v4832_v45  ;;  %v4838_v44 = vmax.f32 %v4034_v40, 0.0  ;;  %v4038_v34 = vadd.f32 %v4037_v52, %v13789_v36  ;;  %5812 = vmatpush1.bf16.msra.mxu1 %v10493_v5  ;;  %v9016_v42 = vpop.f32.mrf.mxu0  ;;  %9761 = vmatprep.mubr.bf16.mxu1 %v10924_v53  ;;  %v10504_v36 = vld [vmem:[%s16223_s3 + $0x4c] ss:$12 sps:$4 sm:$0xff]  }
 0x2ed   :  { %v4039_v47 = vpop.f32.mrf.mxu1  ;;  %5813 = vmatprep.subr.bf16.mxu1 %v10501_v23  ;;  %v14146_v45 = vadd.f32 %v9016_v42, %v9015_v17  ;;  %v10502_v23 = vld [vmem:[%s16223_s3 + $0x48] ss:$12 sps:$4 sm:$0xff]   ;;  %v10926_v53 = vld [vmem:[%s16221_s0 + $0x130] ss:$28 sps:$4 sm:$0xff]  }
 0x2ee   :  { %16446 = vst [vmem:[#allocation46_spill] sm:$0xff] %v14130_v55  ;;  %v4040_v5 = vadd.f32 %v4039_v47, %v13802_v61  ;;  %v14148_v10 = vpack.c.bf16 %v4838_v44, %v4833_v13  ;;  %v9018_v52 = vpop.f32.mrf.mxu0  ;;  %v10510_v61 = vld [vmem:[%s16223_s3 + $0x34] ss:$12 sps:$4 sm:$0xff]   ;;  %v4842_v17 = vmax.f32 %v4038_v34, 0.0 }
 0x2ef   :  { %v4041_v40 = vpop.f32.mrf.mxu1 }
 0x2f0   :  { %16447 = vst [vmem:[#allocation47_spill] sm:$0xff] %v14148_v10  ;;  %v4042_v50 = vadd.f32 %v4041_v40, %v13811_v9  ;;  %5814 = vmatpush1.bf16.msra.mxu1 %v10499_v26  ;;  %v9019_v31 = vpop.f32.mrf.mxu0  ;;  %v10925_v26 = vld [vmem:[%s16221_s0 + $0x240] ss:$28 sps:$4 sm:$0xff]  }
 0x2f1   :  { %v4043_v0 = vpop.f32.mrf.mxu1  ;;  %5815 = vmatprep.subr.bf16.mxu1 %v10504_v36  ;;  %v14158_v44 = vadd.f32 %v9019_v31, %v9018_v52  ;;  %v4843_v36 = vmax.f32 %v4040_v5, 0.0  ;;  %v10508_v52 = vld [vmem:[%s16223_s3 + $0x30] ss:$12 sps:$4 sm:$0xff]   ;;  %v10928_v5 = vld [vmem:[%s16221_s0 + $0x168] ss:$28 sps:$4 sm:$0xff]  }
 0x2f2   :  { %v4847_v47 = vmax.f32 %v4042_v50, 0.0  ;;  %v4044_v13 = vadd.f32 %v4043_v0, %v13818_v28  ;;  %v9021_v9 = vpop.f32.mrf.mxu0  ;;  %4541 = vmatmul.mubr.bf16.gmra.mxu0 %v10925_v26  ;;  %v10927_v50 = vld [vmem:[%s16221_s0 + $0x27c] ss:$28 sps:$4 sm:$0xff]  }
 0x2f3   :  { %v4047_v42 = vpop.f32.mrf.mxu1  ;;  %9762 = vmatmul.mubr.bf16.gmra.mxu1 %v10926_v53  ;;  %4548 = vmatprep.mubr.bf16.mxu0 %v10927_v50 }
 0x2f4   :  { %v14166_v40 = vpack.c.bf16 %v4847_v47, %v4842_v17  ;;  %v4848_v34 = vmax.f32 %v4044_v13, 0.0  ;;  %v4048_v28 = vadd.f32 %v4047_v42, %v13833_v20  ;;  %5816 = vmatpush1.bf16.msra.mxu1 %v10502_v23  ;;  %v9022_v31 = vpop.f32.mrf.mxu0  ;;  %9765 = vmatprep.mubr.bf16.mxu1 %v10928_v5  ;;  %v10513_v20 = vld [vmem:[%s16223_s3 + $0x1c] ss:$12 sps:$4 sm:$0xff]  }
 0x2f5   :  { %v4049_v0 = vpop.f32.mrf.mxu1  ;;  %5817 = vmatprep.subr.bf16.mxu1 %v10510_v61  ;;  %v14182_v17 = vadd.f32 %v9022_v31, %v9021_v9  ;;  %v10511_v61 = vld [vmem:[%s16223_s3 + $0x18] ss:$12 sps:$4 sm:$0xff]   ;;  %v10930_v5 = vld [vmem:[%s16221_s0 + $0x1a0] ss:$28 sps:$4 sm:$0xff]  }
 0x2f6   :  { %16448 = vst [vmem:[#allocation48_spill] sm:$0xff] %v14166_v40  ;;  %v4050_v23 = vadd.f32 %v4049_v0, %v13846_v29  ;;  %v14184_v47 = vpack.c.bf16 %v4848_v34, %v4843_v36  ;;  %v9024_v42 = vpop.f32.mrf.mxu0  ;;  %v10519_v29 = vld [vmem:[%s16223_s3 + $0x4] ss:$12 sps:$4 sm:$0xff]   ;;  %v4852_v9 = vmax.f32 %v4048_v28, 0.0 }
 0x2f7   :  { %v4051_v13 = vpop.f32.mrf.mxu1 }
 0x2f8   :  { %16449 = vst [vmem:[#allocation49_spill] sm:$0xff] %v14184_v47  ;;  %v4052_v26 = vadd.f32 %v4051_v13, %v13855_v18  ;;  %5818 = vmatpush1.bf16.msra.mxu1 %v10508_v52  ;;  %v9025_v50 = vpop.f32.mrf.mxu0  ;;  %v10929_v52 = vld [vmem:[%s16221_s0 + $0x278] ss:$28 sps:$4 sm:$0xff]  }
 0x2f9   :  { %v4053_v53 = vpop.f32.mrf.mxu1  ;;  %5819 = vmatprep.subr.bf16.mxu1 %v10513_v20  ;;  %v14194_v34 = vadd.f32 %v9025_v50, %v9024_v42  ;;  %v4853_v20 = vmax.f32 %v4050_v23, 0.0  ;;  %v10517_v42 = vld [vmem:[%s16223_s3] ss:$12 sps:$4 sm:$0xff]   ;;  %v10932_v23 = vld [vmem:[%s16221_s0 + $0x1d8] ss:$28 sps:$4 sm:$0xff]  }
 0x2fa   :  { %v4857_v0 = vmax.f32 %v4052_v26, 0.0  ;;  %v4054_v36 = vadd.f32 %v4053_v53, %v13862_v59  ;;  %v9027_v18 = vpop.f32.mrf.mxu0  ;;  %4549 = vmatmul.mubr.bf16.gmra.mxu0 %v10929_v52  ;;  %v10931_v26 = vld [vmem:[%s16221_s0 + $0x2b4] ss:$28 sps:$4 sm:$0xff]  }
 0x2fb   :  { %v4057_v31 = vpop.f32.mrf.mxu1  ;;  %9766 = vmatmul.mubr.bf16.gmra.mxu1 %v10930_v5  ;;  %4556 = vmatprep.mubr.bf16.mxu0 %v10931_v26 }
 0x2fc   :  { %v14202_v13 = vpack.c.bf16 %v4857_v0, %v4852_v9  ;;  %v4858_v28 = vmax.f32 %v4054_v36, 0.0  ;;  %v4058_v59 = vadd.f32 %v4057_v31, %v13877_v48  ;;  %5820 = vmatpush1.bf16.msra.mxu1 %v10511_v61  ;;  %v9028_v50 = vpop.f32.mrf.mxu0  ;;  %9769 = vmatprep.mubr.bf16.mxu1 %v10932_v23  ;;  %v10522_v48 = vld [vmem:[%s16223_s3 + $0x16c] ss:$12 sps:$4 sm:$0xff]  }
 0x2fd   :  { %v4059_v53 = vpop.f32.mrf.mxu1  ;;  %5821 = vmatprep.subr.bf16.mxu1 %v10519_v29  ;;  %v14218_v9 = vadd.f32 %v9028_v50, %v9027_v18  ;;  %v10520_v29 = vld [vmem:[%s16223_s3 + $0x168] ss:$12 sps:$4 sm:$0xff]   ;;  %v10934_v23 = vld [vmem:[%s16221_s0 + $0x210] ss:$28 sps:$4 sm:$0xff]  }
 0x2fe   :  { %16450 = vst [vmem:[#allocation57_spill] sm:$0xff] %v14202_v13  ;;  %v4060_v61 = vadd.f32 %v4059_v53, %v13890_v54  ;;  %v14220_v0 = vpack.c.bf16 %v4858_v28, %v4853_v20  ;;  %v9030_v31 = vpop.f32.mrf.mxu0  ;;  %v10528_v54 = vld [vmem:[%s16223_s3 + $0x154] ss:$12 sps:$4 sm:$0xff]   ;;  %v4862_v18 = vmax.f32 %v4058_v59, 0.0 }
 0x2ff   :  { %v4061_v36 = vpop.f32.mrf.mxu1 }
 0x300   :  { %16451 = vst [vmem:[#allocation58_spill] sm:$0xff] %v14220_v0  ;;  %v4062_v52 = vadd.f32 %v4061_v36, %v13899_v32  ;;  %5822 = vmatpush1.bf16.msra.mxu1 %v10517_v42  ;;  %v9031_v26 = vpop.f32.mrf.mxu0  ;;  %v10933_v42 = vld [vmem:[%s16221_s0 + $0x2b0] ss:$28 sps:$4 sm:$0xff]  }
 0x301   :  { %v4063_v5 = vpop.f32.mrf.mxu1  ;;  %5823 = vmatprep.subr.bf16.mxu1 %v10522_v48  ;;  %v14230_v28 = vadd.f32 %v9031_v26, %v9030_v31  ;;  %v4863_v48 = vmax.f32 %v4060_v61, 0.0  ;;  %v10526_v31 = vld [vmem:[%s16223_s3 + $0x150] ss:$12 sps:$4 sm:$0xff]   ;;  %v10936_v61 = vld [vmem:[%s16221_s0 + $0x248] ss:$28 sps:$4 sm:$0xff]  }
 0x302   :  { %v4867_v53 = vmax.f32 %v4062_v52, 0.0  ;;  %v4064_v20 = vadd.f32 %v4063_v5, %v13906_v60  ;;  %v9033_v32 = vpop.f32.mrf.mxu0  ;;  %4557 = vmatmul.mubr.bf16.gmra.mxu0 %v10933_v42  ;;  %v10935_v52 = vld [vmem:[%s16221_s0 + $0x2ec] ss:$28 sps:$4 sm:$0xff]  }
 0x303   :  { %v4067_v50 = vpop.f32.mrf.mxu1  ;;  %9770 = vmatmul.mubr.bf16.gmra.mxu1 %v10934_v23  ;;  %4564 = vmatprep.mubr.bf16.mxu0 %v10935_v52 }
 0x304   :  { %v14238_v36 = vpack.c.bf16 %v4867_v53, %v4862_v18  ;;  %v4868_v59 = vmax.f32 %v4064_v20, 0.0  ;;  %v4068_v60 = vadd.f32 %v4067_v50, %v13921_v51  ;;  %5824 = vmatpush2.bf16.msra.mxu1 %v10520_v29  ;;  %v9034_v26 = vpop.f32.mrf.mxu0  ;;  %9773 = vmatprep.mubr.bf16.mxu1 %v10936_v61  ;;  %v10531_v51 = vld [vmem:[%s16223_s3 + $0x13c] ss:$12 sps:$4 sm:$0xff]  }
 0x305   :  { %v4069_v5 = vpop.f32.mrf.mxu1  ;;  %5825 = vmatprep.subr.bf16.mxu1 %v10528_v54  ;;  %v14254_v18 = vadd.f32 %v9034_v26, %v9033_v32  ;;  %v10529_v54 = vld [vmem:[%s16223_s3 + $0x138] ss:$12 sps:$4 sm:$0xff]   ;;  %v10938_v61 = vld [vmem:[%s16221_s0 + $0x280] ss:$28 sps:$4 sm:$0xff]  }
 0x306   :  { %16452 = vst [vmem:[#allocation59_spill] sm:$0xff] %v14238_v36  ;;  %v4070_v29 = vadd.f32 %v4069_v5, %v13934_v15  ;;  %v14256_v53 = vpack.c.bf16 %v4868_v59, %v4863_v48  ;;  %v9036_v50 = vpop.f32.mrf.mxu0  ;;  %v10537_v15 = vld [vmem:[%s16223_s3 + $0x124] ss:$12 sps:$4 sm:$0xff]   ;;  %v4872_v32 = vmax.f32 %v4068_v60, 0.0 }
 0x307   :  { %v4071_v20 = vpop.f32.mrf.mxu1 }
 0x308   :  { %16453 = vst [vmem:[#allocation60_spill] sm:$0xff] %v14256_v53  ;;  %v4072_v42 = vadd.f32 %v4071_v20, %v13943_v39  ;;  %5826 = vmatpush2.bf16.msra.mxu1 %v10526_v31  ;;  %v9037_v52 = vpop.f32.mrf.mxu0  ;;  %v10937_v31 = vld [vmem:[%s16221_s0 + $0x2e8] ss:$28 sps:$4 sm:$0xff]  }
 0x309   :  { %v4073_v23 = vpop.f32.mrf.mxu1  ;;  %5827 = vmatprep.subr.bf16.mxu1 %v10531_v51  ;;  %v14266_v59 = vadd.f32 %v9037_v52, %v9036_v50  ;;  %v4873_v51 = vmax.f32 %v4070_v29, 0.0  ;;  %v10535_v50 = vld [vmem:[%s16223_s3 + $0x120] ss:$12 sps:$4 sm:$0xff]   ;;  %v10940_v29 = vld [vmem:[%s16221_s0 + $0x2b8] ss:$28 sps:$4 sm:$0xff]  }
 0x30a   :  { %v4877_v5 = vmax.f32 %v4072_v42, 0.0  ;;  %v4074_v48 = vadd.f32 %v4073_v23, %v13950_v49  ;;  %v9039_v39 = vpop.f32.mrf.mxu0  ;;  %4565 = vmatmul.mubr.bf16.gmra.mxu0 %v10937_v31  ;;  %v10939_v42 = vld [vmem:[%s16221_s0 + $0x324] ss:$28 sps:$4 sm:$0xff]  }
 0x30b   :  { %v4077_v26 = vpop.f32.mrf.mxu1  ;;  %9774 = vmatmul.mubr.bf16.gmra.mxu1 %v10938_v61  ;;  %4572 = vmatprep.mubr.bf16.mxu0 %v10939_v42 }
 0x30c   :  { %v14274_v20 = vpack.c.bf16 %v4877_v5, %v4872_v32  ;;  %v4878_v60 = vmax.f32 %v4074_v48, 0.0  ;;  %v4078_v49 = vadd.f32 %v4077_v26, %v13965_v57  ;;  %5828 = vmatpush2.bf16.msra.mxu1 %v10529_v54  ;;  %v9040_v52 = vpop.f32.mrf.mxu0  ;;  %9777 = vmatprep.mubr.bf16.mxu1 %v10940_v29  ;;  %v10540_v57 = vld [vmem:[%s16223_s3 + $0x10c] ss:$12 sps:$4 sm:$0xff]  }
 0x30d   :  { %v4079_v23 = vpop.f32.mrf.mxu1  ;;  %5829 = vmatprep.subr.bf16.mxu1 %v10537_v15  ;;  %v14290_v32 = vadd.f32 %v9040_v52, %v9039_v39  ;;  %v10538_v15 = vld [vmem:[%s16223_s3 + $0x108] ss:$12 sps:$4 sm:$0xff]   ;;  %v10942_v29 = vld [vmem:[%s16221_s0 + $0x2f0] ss:$28 sps:$4 sm:$0xff]  }
 0x30e   :  { %16454 = vst [vmem:[#allocation61_spill] sm:$0xff] %v14274_v20  ;;  %v4080_v54 = vadd.f32 %v4079_v23, %v13978_v46  ;;  %v14292_v5 = vpack.c.bf16 %v4878_v60, %v4873_v51  ;;  %v9042_v26 = vpop.f32.mrf.mxu0  ;;  %v10546_v46 = vld [vmem:[%s16223_s3 + $0xf4] ss:$12 sps:$4 sm:$0xff]   ;;  %v4882_v39 = vmax.f32 %v4078_v49, 0.0 }
 0x30f   :  { %v4081_v48 = vpop.f32.mrf.mxu1 }
 0x310   :  { %16455 = vst [vmem:[#allocation62_spill] sm:$0xff] %v14292_v5  ;;  %v4082_v31 = vadd.f32 %v4081_v48, %v13987_v62  ;;  %5830 = vmatpush2.bf16.msra.mxu1 %v10535_v50  ;;  %v9043_v42 = vpop.f32.mrf.mxu0  ;;  %v10941_v50 = vld [vmem:[%s16221_s0 + $0x320] ss:$28 sps:$4 sm:$0xff]  }
 0x311   :  { %v4083_v61 = vpop.f32.mrf.mxu1  ;;  %5831 = vmatprep.subr.bf16.mxu1 %v10540_v57  ;;  %v14302_v60 = vadd.f32 %v9043_v42, %v9042_v26  ;;  %v4883_v57 = vmax.f32 %v4080_v54, 0.0  ;;  %v10544_v26 = vld [vmem:[%s16223_s3 + $0xf0] ss:$12 sps:$4 sm:$0xff]   ;;  %v10944_v54 = vld [vmem:[%s16221_s0 + $0x328] ss:$28 sps:$4 sm:$0xff]  }
 0x312   :  { %v4887_v23 = vmax.f32 %v4082_v31, 0.0  ;;  %v4084_v51 = vadd.f32 %v4083_v61, %v13994_v37  ;;  %v9045_v62 = vpop.f32.mrf.mxu0  ;;  %4573 = vmatmul.mubr.bf16.gmra.mxu0 %v10941_v50  ;;  %v10943_v31 = vld [vmem:[%s16221_s0 + $0x35c] ss:$28 sps:$4 sm:$0xff]  }
 0x313   :  { %v4087_v52 = vpop.f32.mrf.mxu1  ;;  %9778 = vmatmul.mubr.bf16.gmra.mxu1 %v10942_v29  ;;  %4580 = vmatprep.mubr.bf16.mxu0 %v10943_v31 }
 0x314   :  { %v14310_v48 = vpack.c.bf16 %v4887_v23, %v4882_v39  ;;  %v4888_v49 = vmax.f32 %v4084_v51, 0.0  ;;  %v4088_v37 = vadd.f32 %v4087_v52, %v14009_v43  ;;  %5832 = vmatpush2.bf16.msra.mxu1 %v10538_v15  ;;  %v9046_v42 = vpop.f32.mrf.mxu0  ;;  %9781 = vmatprep.mubr.bf16.mxu1 %v10944_v54  ;;  %v10552_v43 = vld [vmem:[%s16223_s3 + $0xdc] ss:$12 sps:$4 sm:$0xff]  }
 0x315   :  { %v4089_v61 = vpop.f32.mrf.mxu1  ;;  %5833 = vmatprep.subr.bf16.mxu1 %v10546_v46  ;;  %v14326_v39 = vadd.f32 %v9046_v42, %v9045_v62  ;;  %v10550_v46 = vld [vmem:[%s16223_s3 + $0xd8] ss:$12 sps:$4 sm:$0xff]   ;;  %v10946_v54 = vld [vmem:[%s16221_s0 + $0x360] ss:$28 sps:$4 sm:$0xff]  }
 0x316   :  { %16456 = vst [vmem:[#allocation63_spill] sm:$0xff] %v14310_v48  ;;  %v4090_v15 = vadd.f32 %v4089_v61, %v14022_v4  ;;  %v14328_v23 = vpack.c.bf16 %v4888_v49, %v4883_v57  ;;  %v9048_v52 = vpop.f32.mrf.mxu0  ;;  %v10558_v4 = vld [vmem:[%s16223_s3 + $0xc4] ss:$12 sps:$4 sm:$0xff]   ;;  %v4892_v62 = vmax.f32 %v4088_v37, 0.0 }
 0x317   :  { %v4091_v51 = vpop.f32.mrf.mxu1 }
 0x318   :  { %16457 = vst [vmem:[#allocation64_spill] sm:$0xff] %v14328_v23  ;;  %v4092_v50 = vadd.f32 %v4091_v51, %v14031_v16  ;;  %5834 = vmatpush2.bf16.msra.mxu1 %v10544_v26  ;;  %v9049_v31 = vpop.f32.mrf.mxu0  ;;  %v10945_v26 = vld [vmem:[%s16221_s0 + $0x358] ss:$28 sps:$4 sm:$0xff]  }
 0x319   :  { %v4093_v29 = vpop.f32.mrf.mxu1  ;;  %5835 = vmatprep.subr.bf16.mxu1 %v10552_v43  ;;  %v14338_v49 = vadd.f32 %v9049_v31, %v9048_v52  ;;  %v4893_v43 = vmax.f32 %v4090_v15, 0.0  ;;  %v16459_v52 = vld [vmem:[#allocation20_spill] sm:$0xff]  ;;  %v10564_v15 = vld [vmem:[%s16223_s3 + $0x3ac] ss:$12 sps:$4 sm:$0xff]  }
 0x31a   :  { %v4897_v61 = vmax.f32 %v4092_v50, 0.0  ;;  %v4094_v57 = vadd.f32 %v4093_v29, %v14038_v24  ;;  %v9051_v16 = vpop.f32.mrf.mxu0  ;;  %4581 = vmatmul.mubr.bf16.gmra.mxu0 %v10945_v26  ;;  %v10556_v50 = vld [vmem:[%s16223_s3 + $0xc0] ss:$12 sps:$4 sm:$0xff]  }
 0x31b   :  { %v4097_v42 = vpop.f32.mrf.mxu1  ;;  %9782 = vmatmul.mubr.bf16.gmra.mxu1 %v10946_v54  ;;  %v16460_v29 = vld [vmem:[#allocation2_spill] sm:$0xff]  ;;  %6032 = vmatprep.mubr.bf16.mxu0 %v13808_v11 }
 0x31c   :  { %v14346_v51 = vpack.c.bf16 %v4897_v61, %v4892_v62  ;;  %v4898_v37 = vmax.f32 %v4094_v57, 0.0  ;;  %v4098_v24 = vadd.f32 %v4097_v42, %v14053_v30  ;;  %5836 = vmatpush2.bf16.msra.mxu1 %v10550_v46  ;;  %5839 = vmatprep.mubr.bf16.mxu1 %v16459_v52  ;;  %v523_v31 = vsub.s32 4, %v16460_v29  ;;  %v9052_v48 = vpop.f32.mrf.mxu0  ;;  %v10947_v54 = vld [vmem:[%s16222_s2] sm:$0x1f] }
 0x31d   :  { %v4099_v26 = vpop.f32.mrf.mxu1  ;;  %5837 = vmatprep.subr.bf16.mxu1 %v10558_v4  ;;  %v14359_v46 = vadd.f32 %v9052_v48, %v9051_v16  ;;  %v10566_v48 = vld [vmem:[%s16223_s3 + $0xb0] ss:$12 sps:$4 sm:$0xff]  }
 0x31e   :  { %16458 = vst [vmem:[#allocation65_spill] sm:$0xff] %v14346_v51  ;;  %v4100_v30 = vadd.f32 %v4099_v26, %v14066_v35  ;;  %v14361_v62 = vpack.c.bf16 %v4898_v37, %v4893_v43  ;;  %v9054_v57 = vpop.f32.mrf.mxu0  ;;  %v14367_v4 = vrot.slane %v10947_v54, %v523_v31  ;;  %v10562_v35 = vld [vmem:[%s16223_s3 + $0x3a8] ss:$12 sps:$4 sm:$0xff]   ;;  %v4902_v16 = vmax.f32 %v4098_v24, 0.0  ;;  %v10570_v31 = vld [vmem:[%s16223_s3 + $0x158] ss:$12 sps:$4 sm:$0xff]  }
 0x31f   :  { %v4101_v61 = vpop.f32.mrf.mxu1 }
 0x320   :  { %16461 = vst [vmem:[#allocation20_spill] sm:$0xff] %v14361_v62  ;;  %v4102_v42 = vadd.f32 %v4101_v61, %v14075_v41  ;;  %5838 = vmatpush2.bf16.msra.mxu1 %v10556_v50  ;;  %v9055_v11 = vpop.f32.mrf.mxu0  ;;  %v10569_v50 = vld [vmem:[%s16223_s3 + $0x394] ss:$12 sps:$4 sm:$0xff]   ;;  %v16462_v61 = vld [vmem:[#allocation19_spill] sm:$0xff]  ;;  %v4903_v24 = vmax.f32 %v4100_v30, 0.0 }
 0x321   :  { %v4103_v29 = vpop.f32.mrf.mxu1  ;;  %6193 = vmatprep.subr.bf16.mxu1 %v10564_v15  ;;  %v14376_v37 = vadd.f32 %v9055_v11, %v9054_v57  ;;  %v16464_v11 = vld [vmem:[#allocation22_spill] sm:$0xff] }
 0x322   :  { %v4907_v41 = vmax.f32 %v4102_v42, 0.0  ;;  %v4104_v43 = vadd.f32 %v4103_v29, %v14085_v22  ;;  %v9057_v26 = vpop.f32.mrf.mxu0  ;;  %6033 = vmatmul.mubr.bf16.vlgmr.msra.gmra.mxu0 %v13786_v14  ;;  %v4141_v29 = vadd.f32 %v14110_v1, %v14367_v4  ;;  %v10571_v30 = vld [vmem:[%s16223_s3 + $0x98] ss:$12 sps:$4 sm:$0xff]   ;;  %v10574_v1 = vld [vmem:[%s16223_s3 + $0x37c] ss:$12 sps:$4 sm:$0xff]  }
 0x323   :  { %v9121_v15 = vpop.f32.mrf.mxu1  ;;  %5840 = vmatmul.mubr.bf16.vlgmr.msra.gmra.mxu1 %v16462_v61  ;;  %6042 = vmatprep.mubr.bf16.mxu0 %v13852_v38  ;;  %v10567_v61 = vld [vmem:[%s16223_s3 + $0x390] ss:$12 sps:$4 sm:$0xff]  }
 0x324   :  { %v14386_v42 = vpack.c.bf16 %v4907_v41, %v4902_v16  ;;  %v4908_v22 = vmax.f32 %v4104_v43, 0.0  ;;  %5849 = vmatprep.mubr.bf16.mxu1 %v16464_v11  ;;  %v9058_v57 = vpop.f32.mrf.mxu0  ;;  %6194 = vmatpush1.bf16.msra.mxu1 %v10562_v35  ;;  %v10575_v35 = vld [vmem:[%s16223_s3 + $0x140] ss:$12 sps:$4 sm:$0xff]  }
 0x325   :  { %v9122_v54 = vpop.f32.mrf.mxu1  ;;  %9354 = vmatpush3.bf16.msra.mxu0 %v10566_v48  ;;  %v14398_v16 = vadd.f32 %v9058_v57, %v9057_v26  ;;  %6195 = vmatprep.subr.bf16.mxu1 %v10569_v50  ;;  %v10572_v50 = vld [vmem:[%s16223_s3 + $0x378] ss:$12 sps:$4 sm:$0xff]  }
 0x326   :  { %16463 = vst [vmem:[#allocation66_spill] sm:$0xff] %v14386_v42  ;;  %v9123_v41 = vadd.f32 %v9122_v54, %v9121_v15  ;;  %9355 = vmatprep.subr.bf16.mxu0 %v10570_v31  ;;  %v14406_v48 = vpack.c.bf16 %v4908_v22, %v4903_v24  ;;  %v9060_v43 = vpop.f32.mrf.mxu0  ;;  %v10576_v31 = vld [vmem:[%s16223_s3 + $0x80] ss:$12 sps:$4 sm:$0xff]   ;;  %v4144_v15 = vadd.f32 %v14122_v63, %v14367_v4 }
 0x327   :  { %v9124_v38 = vpop.f32.mrf.mxu1 }
 0x328   :  { %16465 = vst [vmem:[#allocation67_spill] sm:$0xff] %v14406_v48  ;;  %v14408_v14 = vadd.f32 %v9123_v41, %v4141_v29  ;;  %v9061_v11 = vpop.f32.mrf.mxu0  ;;  %6196 = vmatpush1.bf16.msra.mxu1 %v10567_v61  ;;  %v10579_v61 = vld [vmem:[%s16223_s3 + $0x364] ss:$12 sps:$4 sm:$0xff]   ;;  %v10580_v29 = vld [vmem:[%s16223_s3 + $0x128] ss:$12 sps:$4 sm:$0xff]  }
 0x329   :  { %v9125_v26 = vpop.f32.mrf.mxu1  ;;  %9356 = vmatpush3.bf16.msra.mxu0 %v10571_v30  ;;  %v14418_v24 = vadd.f32 %v9061_v11, %v9060_v43  ;;  %6197 = vmatprep.subr.bf16.mxu1 %v10574_v1  ;;  %v16466_v30 = vld [vmem:[#allocation21_spill] sm:$0xff]  ;;  %v16467_v11 = vld [vmem:[#allocation24_spill] sm:$0xff]  ;;  %v10577_v1 = vld [vmem:[%s16223_s3 + $0x360] ss:$12 sps:$4 sm:$0xff]   ;;  %v4149_v43 = vadd.f32 %v14146_v45, %v14367_v4 }
 0x32a   :  { %v9126_v22 = vadd.f32 %v9125_v26, %v9124_v38  ;;  %9357 = vmatprep.subr.bf16.mxu0 %v10575_v35  ;;  %v9063_v57 = vpop.f32.mrf.mxu0  ;;  %6043 = vmatmul.mubr.bf16.gmra.mxu0 %v13830_v25  ;;  %v10581_v35 = vld [vmem:[%s16223_s3 + $0x68] ss:$12 sps:$4 sm:$0xff]  }
 0x32b   :  { %v9127_v54 = vpop.f32.mrf.mxu1  ;;  %5850 = vmatmul.mubr.bf16.gmra.mxu1 %v16466_v30  ;;  %6052 = vmatprep.mubr.bf16.mxu0 %v13896_v56  ;;  %v10582_v45 = vld [vmem:[%s16223_s3 + $0x348] ss:$12 sps:$4 sm:$0xff]  }
 0x32c   :  { %v14428_v63 = vadd.f32 %v9126_v22, %v4144_v15  ;;  %5859 = vmatprep.mubr.bf16.mxu1 %v16467_v11  ;;  %v9064_v38 = vpop.f32.mrf.mxu0  ;;  %6198 = vmatpush1.bf16.msra.mxu1 %v10572_v50  ;;  %v10584_v50 = vld [vmem:[%s16223_s3 + $0x34c] ss:$12 sps:$4 sm:$0xff]  }
 0x32d   :  { %v9128_v41 = vpop.f32.mrf.mxu1  ;;  %9358 = vmatpush3.bf16.msra.mxu0 %v10576_v31  ;;  %v14440_v26 = vadd.f32 %v9064_v38, %v9063_v57  ;;  %6199 = vmatprep.subr.bf16.mxu1 %v10579_v61  ;;  %v10585_v31 = vld [vmem:[%s16223_s3 + $0x110] ss:$12 sps:$4 sm:$0xff]   ;;  %v10589_v38 = vld [vmem:[%s16223_s3 + $0x334] ss:$12 sps:$4 sm:$0xff]  }
 0x32e   :  { %v9129_v15 = vadd.f32 %v9128_v41, %v9127_v54  ;;  %9359 = vmatprep.subr.bf16.mxu0 %v10580_v29  ;;  %v9066_v22 = vpop.f32.mrf.mxu0  ;;  %v10586_v61 = vld [vmem:[%s16223_s3 + $0x50] ss:$12 sps:$4 sm:$0xff]   ;;  %v4152_v29 = vadd.f32 %v14158_v44, %v14367_v4  ;;  %v10590_v41 = vld [vmem:[%s16223_s3 + $0xf8] ss:$12 sps:$4 sm:$0xff]  }
 0x32f   :  { %v9130_v56 = vpop.f32.mrf.mxu1 }
 0x330   :  { %v14448_v25 = vadd.f32 %v9129_v15, %v4149_v43  ;;  %v9067_v11 = vpop.f32.mrf.mxu0  ;;  %6200 = vmatpush1.bf16.msra.mxu1 %v10577_v1  ;;  %v16468_v43 = vld [vmem:[#allocation23_spill] sm:$0xff]  ;;  %v10587_v15 = vld [vmem:[%s16223_s3 + $0x330] ss:$12 sps:$4 sm:$0xff]  }
 0x331   :  { %v9131_v30 = vpop.f32.mrf.mxu1  ;;  %9360 = vmatpush3.bf16.msra.mxu0 %v10581_v35  ;;  %v14458_v57 = vadd.f32 %v9067_v11, %v9066_v22  ;;  %6201 = vmatprep.subr.bf16.mxu1 %v10584_v50  ;;  %v16469_v11 = vld [vmem:[#allocation26_spill] sm:$0xff] }
 0x332   :  { %v9132_v54 = vadd.f32 %v9131_v30, %v9130_v56  ;;  %9361 = vmatprep.subr.bf16.mxu0 %v10585_v31  ;;  %v9069_v1 = vpop.f32.mrf.mxu0  ;;  %6053 = vmatmul.mubr.bf16.gmra.mxu0 %v13874_v8  ;;  %v10591_v50 = vld [vmem:[%s16223_s3 + $0x38] ss:$12 sps:$4 sm:$0xff]   ;;  %v4157_v31 = vadd.f32 %v14182_v17, %v14367_v4 }
 0x333   :  { %v9133_v35 = vpop.f32.mrf.mxu1  ;;  %5860 = vmatmul.mubr.bf16.gmra.mxu1 %v16468_v43  ;;  %6062 = vmatprep.mubr.bf16.mxu0 %v13940_v19  ;;  %v10592_v17 = vld [vmem:[%s16223_s3 + $0x318] ss:$12 sps:$4 sm:$0xff]  }
 0x334   :  { %v14468_v44 = vadd.f32 %v9132_v54, %v4152_v29  ;;  %5869 = vmatprep.mubr.bf16.mxu1 %v16469_v11  ;;  %v9070_v56 = vpop.f32.mrf.mxu0  ;;  %6202 = vmatpush1.bf16.msra.mxu1 %v10582_v45  ;;  %v10594_v45 = vld [vmem:[%s16223_s3 + $0x31c] ss:$12 sps:$4 sm:$0xff]  }
 0x335   :  { %v9134_v30 = vpop.f32.mrf.mxu1  ;;  %9362 = vmatpush3.bf16.msra.mxu0 %v10586_v61  ;;  %v14480_v22 = vadd.f32 %v9070_v56, %v9069_v1  ;;  %6203 = vmatprep.subr.bf16.mxu1 %v10589_v38  ;;  %v10595_v61 = vld [vmem:[%s16223_s3 + $0xe0] ss:$12 sps:$4 sm:$0xff]   ;;  %v10597_v56 = vld [vmem:[%s16223_s3 + $0xc8] ss:$12 sps:$4 sm:$0xff]  }
 0x336   :  { %v9135_v29 = vadd.f32 %v9134_v30, %v9133_v35  ;;  %9363 = vmatprep.subr.bf16.mxu0 %v10590_v41  ;;  %v9072_v54 = vpop.f32.mrf.mxu0  ;;  %v10596_v38 = vld [vmem:[%s16223_s3 + $0x20] ss:$12 sps:$4 sm:$0xff]   ;;  %v4160_v41 = vadd.f32 %v14194_v34, %v14367_v4  ;;  %v10600_v30 = vld [vmem:[%s16223_s3 + $0x304] ss:$12 sps:$4 sm:$0xff]  }
 0x337   :  { %v9136_v19 = vpop.f32.mrf.mxu1 }
 0x338   :  { %v14488_v8 = vadd.f32 %v9135_v29, %v4157_v31  ;;  %v9073_v11 = vpop.f32.mrf.mxu0  ;;  %6204 = vmatpush1.bf16.msra.mxu1 %v10587_v15  ;;  %v16470_v31 = vld [vmem:[#allocation25_spill] sm:$0xff]  ;;  %v10598_v29 = vld [vmem:[%s16223_s3 + $0x300] ss:$12 sps:$4 sm:$0xff]  }
 0x339   :  { %v9137_v43 = vpop.f32.mrf.mxu1  ;;  %9364 = vmatpush3.bf16.msra.mxu0 %v10591_v50  ;;  %v14498_v1 = vadd.f32 %v9073_v11, %v9072_v54  ;;  %6205 = vmatprep.subr.bf16.mxu1 %v10594_v45  ;;  %v16472_v11 = vld [vmem:[#allocation6_spill] sm:$0xff]  ;;  %v10601_v45 = vld [vmem:[%s16223_s3 + $0x8] ss:$12 sps:$4 sm:$0xff]  }
 0x33a   :  { %v9138_v35 = vadd.f32 %v9137_v43, %v9136_v19  ;;  %9365 = vmatprep.subr.bf16.mxu0 %v10595_v61  ;;  %v9075_v15 = vpop.f32.mrf.mxu0  ;;  %6063 = vmatmul.mubr.bf16.gmra.mxu0 %v13918_v58  ;;  %v4165_v61 = vadd.f32 %v14218_v9, %v14367_v4 }
 0x33b   :  { %v9139_v50 = vpop.f32.mrf.mxu1  ;;  %5870 = vmatmul.mubr.bf16.gmra.mxu1 %v16470_v31  ;;  %6072 = vmatprep.mubr.bf16.mxu0 %v13984_v6 }
 0x33c   :  { %v14508_v34 = vadd.f32 %v9138_v35, %v4160_v41  ;;  %5879 = vmatprep.mubr.bf16.mxu1 %v16472_v11  ;;  %v9076_v19 = vpop.f32.mrf.mxu0  ;;  %6206 = vmatpush1.bf16.msra.mxu1 %v10592_v17  ;;  %v10602_v17 = vld [vmem:[%s16223_s3 + $0x2f0] ss:$12 sps:$4 sm:$0xff]  }
 0x33d   :  { %v9140_v43 = vpop.f32.mrf.mxu1  ;;  %9366 = vmatpush3.bf16.msra.mxu0 %v10596_v38  ;;  %v14520_v54 = vadd.f32 %v9076_v19, %v9075_v15  ;;  %6207 = vmatprep.subr.bf16.mxu1 %v10600_v30  ;;  %v14528_v38 = vld [vmem:[%s16223_s3 + $0x3b0] ss:$12 sps:$4 sm:$0xff]  }
 0x33e   :  { %16471 = vst [vmem:[#allocation68_spill] sm:$0xff] %v14508_v34  ;;  %v9141_v41 = vadd.f32 %v9140_v43, %v9139_v50  ;;  %9367 = vmatprep.subr.bf16.mxu0 %v10597_v56  ;;  %v9078_v35 = vpop.f32.mrf.mxu0  ;;  %v4168_v56 = vadd.f32 %v14230_v28, %v14367_v4  ;;  %v16473_v43 = vld [vmem:[#allocation5_spill] sm:$0xff]  ;;  %v16475_v34 = vld [vmem:[#allocation7_spill] sm:$0xff] }
 0x33f   :  { %v9142_v6 = vpop.f32.mrf.mxu1 }
 0x340   :  { %v14530_v58 = vadd.f32 %v9141_v41, %v4165_v61  ;;  %v9079_v11 = vpop.f32.mrf.mxu0  ;;  %6208 = vmatpush1.bf16.msra.mxu1 %v10598_v29  ;;  %v16474_v41 = vld [vmem:[#allocation8_spill] sm:$0xff] }
 0x341   :  { %v9143_v9 = vpop.f32.mrf.mxu1  ;;  %9368 = vmatpush3.bf16.msra.mxu0 %v10601_v45  ;;  %v14534_v30 = vadd.f32 %v9079_v11, %v9078_v35  ;;  %9465 = vmatprep.subr.bf16.mxu1 %v10602_v17 }
 0x342   :  { %v9144_v15 = vadd.f32 %v9143_v9, %v9142_v6  ;;  %9785 = vmatprep.subr.bf16.mxu0 %v14528_v38  ;;  %v9081_v50 = vpop.f32.mrf.mxu0  ;;  %6073 = vmatmul.mubr.bf16.gmra.mxu0 %v13962_v12  ;;  %v4173_v6 = vadd.f32 %v14254_v18, %v14367_v4 }
 0x343   :  { %v9145_v19 = vpop.f32.mrf.mxu1  ;;  %5880 = vmatmul.mubr.bf16.gmra.mxu1 %v16473_v43  ;;  %6082 = vmatprep.mubr.bf16.mxu0 %v14028_v3 }
 0x344   :  { %v14539_v61 = vadd.f32 %v9144_v15, %v4168_v56  ;;  %5889 = vmatprep.mubr.bf16.mxu1 %v16474_v41  ;;  %v9082_v29 = vpop.f32.mrf.mxu0  ;;  %v4176_v56 = vadd.f32 %v14266_v59, %v14367_v4  ;;  %v4181_v59 = vadd.f32 %v14290_v32, %v14367_v4 }
 0x345   :  { %v9146_v28 = vpop.f32.mrf.mxu1  ;;  %v14545_v11 = vadd.f32 %v9082_v29, %v9081_v50  ;;  %v16476_v50 = vld [vmem:[#allocation10_spill] sm:$0xff] }
 0x346   :  { %v9147_v45 = vadd.f32 %v9146_v28, %v9145_v19  ;;  %v9084_v17 = vpop.f32.mrf.mxu0 }
 0x347   :  { %v9148_v35 = vpop.f32.mrf.mxu1 }
 0x348   :  { %v14547_v9 = vadd.f32 %v9147_v45, %v4173_v6  ;;  %v9085_v43 = vpop.f32.mrf.mxu0 }
 0x349   :  { %v9149_v12 = vpop.f32.mrf.mxu1  ;;  %v14551_v15 = vadd.f32 %v9085_v43, %v9084_v17 }
 0x34a   :  { %v9150_v3 = vadd.f32 %v9149_v12, %v9148_v35  ;;  %v9087_v41 = vpop.f32.mrf.mxu0  ;;  %6083 = vmatmul.mubr.bf16.gmra.mxu0 %v14006_v21 }
 0x34b   :  { %v9151_v31 = vpop.f32.mrf.mxu1  ;;  %5890 = vmatmul.mubr.bf16.gmra.mxu1 %v16475_v34  ;;  %6092 = vmatprep.mubr.bf16.mxu0 %v14072_v27  ;;  %v16477_v34 = vld [vmem:[#allocation9_spill] sm:$0xff] }
 0x34c   :  { %v14555_v18 = vadd.f32 %v9150_v3, %v4176_v56  ;;  %5899 = vmatprep.mubr.bf16.mxu1 %v16476_v50  ;;  %v9088_v19 = vpop.f32.mrf.mxu0  ;;  %v4184_v3 = vadd.f32 %v14302_v60, %v14367_v4  ;;  %v4189_v60 = vadd.f32 %v14326_v39, %v14367_v4  ;;  %v16480_v39 = vld [vmem:[#allocation14_spill] sm:$0xff] }
 0x34d   :  { %v9152_v29 = vpop.f32.mrf.mxu1  ;;  %v14561_v43 = vadd.f32 %v9088_v19, %v9087_v41 }
 0x34e   :  { %v9153_v12 = vadd.f32 %v9152_v29, %v9151_v31  ;;  %v9090_v28 = vpop.f32.mrf.mxu0  ;;  %v16478_v31 = vld [vmem:[#allocation12_spill] sm:$0xff] }
 0x34f   :  { %v9154_v6 = vpop.f32.mrf.mxu1 }
 0x350   :  { %v14563_v45 = vadd.f32 %v9153_v12, %v4181_v59  ;;  %v9091_v17 = vpop.f32.mrf.mxu0 }
 0x351   :  { %v9155_v35 = vpop.f32.mrf.mxu1  ;;  %v14567_v56 = vadd.f32 %v9091_v17, %v9090_v28 }
 0x352   :  { %v9156_v27 = vadd.f32 %v9155_v35, %v9154_v6  ;;  %v9093_v21 = vpop.f32.mrf.mxu0  ;;  %6093 = vmatmul.mubr.bf16.gmra.mxu0 %v14050_v7 }
 0x353   :  { %v9157_v50 = vpop.f32.mrf.mxu1  ;;  %5900 = vmatmul.mubr.bf16.gmra.mxu1 %v16477_v34  ;;  %6102 = vmatprep.mubr.bf16.mxu0 %v14112_v2  ;;  %v16479_v34 = vld [vmem:[#allocation11_spill] sm:$0xff] }
 0x354   :  { %v14571_v32 = vadd.f32 %v9156_v27, %v4184_v3  ;;  %5909 = vmatprep.mubr.bf16.mxu1 %v16478_v31  ;;  %v9094_v41 = vpop.f32.mrf.mxu0  ;;  %v4192_v27 = vadd.f32 %v14338_v49, %v14367_v4  ;;  %v4197_v49 = vadd.f32 %v14359_v46, %v14367_v4  ;;  %v16482_v46 = vld [vmem:[#allocation16_spill] sm:$0xff] }
 0x355   :  { %v9158_v19 = vpop.f32.mrf.mxu1  ;;  %v14577_v29 = vadd.f32 %v9094_v41, %v9093_v21 }
 0x356   :  { %v9159_v59 = vadd.f32 %v9158_v19, %v9157_v50  ;;  %v9096_v12 = vpop.f32.mrf.mxu0 }
 0x357   :  { %v9160_v28 = vpop.f32.mrf.mxu1 }
 0x358   :  { %v14579_v6 = vadd.f32 %v9159_v59, %v4189_v60  ;;  %v9097_v17 = vpop.f32.mrf.mxu0 }
 0x359   :  { %v9161_v35 = vpop.f32.mrf.mxu1  ;;  %v14583_v3 = vadd.f32 %v9097_v17, %v9096_v12 }
 0x35a   :  { %v9162_v2 = vadd.f32 %v9161_v35, %v9160_v28  ;;  %v9099_v7 = vpop.f32.mrf.mxu0  ;;  %6103 = vmatmul.mubr.bf16.gmra.mxu0 %v14094_v33 }
 0x35b   :  { %v9163_v31 = vpop.f32.mrf.mxu1  ;;  %5910 = vmatmul.mubr.bf16.gmra.mxu1 %v16479_v34  ;;  %6112 = vmatprep.mubr.bf16.mxu0 %v14148_v10  ;;  %v16481_v34 = vld [vmem:[#allocation13_spill] sm:$0xff] }
 0x35c   :  { %v14587_v21 = vadd.f32 %v9162_v2, %v4192_v27  ;;  %5919 = vmatprep.mubr.bf16.mxu1 %v16480_v39  ;;  %v9100_v50 = vpop.f32.mrf.mxu0  ;;  %v4200_v2 = vadd.f32 %v14376_v37, %v14367_v4  ;;  %v4205_v37 = vadd.f32 %v14398_v16, %v14367_v4  ;;  %v16486_v16 = vld [vmem:[#allocation18_spill] sm:$0xff] }
 0x35d   :  { %v9164_v41 = vpop.f32.mrf.mxu1  ;;  %v14593_v19 = vadd.f32 %v9100_v50, %v9099_v7 }
 0x35e   :  { %v9165_v60 = vadd.f32 %v9164_v41, %v9163_v31  ;;  %v9102_v59 = vpop.f32.mrf.mxu0 }
 0x35f   :  { %v9166_v12 = vpop.f32.mrf.mxu1 }
 0x360   :  { %v14595_v28 = vadd.f32 %v9165_v60, %v4197_v49  ;;  %v9103_v17 = vpop.f32.mrf.mxu0 }
 0x361   :  { %v9167_v35 = vpop.f32.mrf.mxu1  ;;  %v14599_v27 = vadd.f32 %v9103_v17, %v9102_v59 }
 0x362   :  { %v9168_v10 = vadd.f32 %v9167_v35, %v9166_v12  ;;  %v14601_v39 = vpop.f32.mrf.mxu0  ;;  %6113 = vmatmul.mubr.bf16.gmra.mxu0 %v14130_v55  ;;  %v16484_v55 = vld [vmem:[#allocation15_spill] sm:$0xff] }
 0x363   :  { %v9169_v33 = vpop.f32.mrf.mxu1  ;;  %5920 = vmatmul.mubr.bf16.gmra.mxu1 %v16481_v34  ;;  %6122 = vmatprep.mubr.bf16.mxu0 %v14184_v47  ;;  %v16487_v34 = vld [vmem:[#allocation17_spill] sm:$0xff] }
 0x364   :  { %v14605_v7 = vadd.f32 %v9168_v10, %v4200_v2  ;;  %5929 = vmatprep.mubr.bf16.mxu1 %v16482_v46  ;;  %v14609_v50 = vpop.f32.mrf.mxu0  ;;  %v4208_v10 = vadd.f32 %v14418_v24, %v14367_v4  ;;  %v4213_v24 = vadd.f32 %v14440_v26, %v14367_v4 }
 0x365   :  { %v9170_v31 = vpop.f32.mrf.mxu1 }
 0x366   :  { %v9171_v41 = vadd.f32 %v9170_v31, %v9169_v33  ;;  %v14613_v60 = vpop.f32.mrf.mxu0 }
 0x367   :  { %v9172_v49 = vpop.f32.mrf.mxu1 }
 0x368   :  { %v14615_v59 = vadd.f32 %v9171_v41, %v4205_v37  ;;  %v14617_v17 = vpop.f32.mrf.mxu0 }
 0x369   :  { %v9173_v12 = vpop.f32.mrf.mxu1 }
 0x36a   :  { %16483 = vst [vmem:[#allocation69_spill] sm:$0xff] %v14615_v59  ;;  %v9174_v35 = vadd.f32 %v9173_v12, %v9172_v49  ;;  %v14621_v47 = vpop.f32.mrf.mxu0  ;;  %6123 = vmatmul.mubr.bf16.gmra.mxu0 %v14166_v40  ;;  %v16500_v59 = vld [vmem:[#allocation63_spill] sm:$0xff] }
 0x36b   :  { %v9175_v2 = vpop.f32.mrf.mxu1  ;;  %5930 = vmatmul.mubr.bf16.gmra.mxu1 %v16484_v55  ;;  %6132 = vmatprep.mubr.bf16.mxu0 %v14220_v0 }
 0x36c   :  { %v14625_v33 = vadd.f32 %v9174_v35, %v4208_v10  ;;  %5939 = vmatprep.mubr.bf16.mxu1 %v16486_v16  ;;  %v14629_v37 = vpop.f32.mrf.mxu0  ;;  %v4216_v10 = vadd.f32 %v14458_v57, %v14367_v4  ;;  %v4221_v57 = vadd.f32 %v14480_v22, %v14367_v4  ;;  %v16493_v22 = vld [vmem:[#allocation30_spill] sm:$0xff] }
 0x36d   :  { %v9176_v31 = vpop.f32.mrf.mxu1 }
 0x36e   :  { %16485 = vst [vmem:[#allocation70_spill] sm:$0xff] %v14625_v33  ;;  %v9177_v41 = vadd.f32 %v9176_v31, %v9175_v2  ;;  %v14633_v12 = vpop.f32.mrf.mxu0  ;;  %v16489_v2 = vld [vmem:[#allocation28_spill] sm:$0xff] }
 0x36f   :  { %v9178_v49 = vpop.f32.mrf.mxu1 }
 0x370   :  { %v14635_v46 = vadd.f32 %v9177_v41, %v4213_v24  ;;  %v14637_v40 = vpop.f32.mrf.mxu0 }
 0x371   :  { %v9179_v55 = vpop.f32.mrf.mxu1 }
 0x372   :  { %v9180_v35 = vadd.f32 %v9179_v55, %v9178_v49  ;;  %v14641_v16 = vpop.f32.mrf.mxu0  ;;  %6133 = vmatmul.mubr.bf16.gmra.mxu0 %v14202_v13 }
 0x373   :  { %v9181_v0 = vpop.f32.mrf.mxu1  ;;  %5940 = vmatmul.mubr.bf16.gmra.mxu1 %v16487_v34  ;;  %6142 = vmatprep.mubr.bf16.mxu0 %v14256_v53 }
 0x374   :  { %v14645_v26 = vadd.f32 %v9180_v35, %v4216_v10  ;;  %5949 = vmatprep.mubr.bf16.mxu1 %v16489_v2  ;;  %v14649_v24 = vpop.f32.mrf.mxu0  ;;  %v4224_v10 = vadd.f32 %v14498_v1, %v14367_v4  ;;  %v4229_v1 = vadd.f32 %v14520_v54, %v14367_v4  ;;  %v16497_v54 = vld [vmem:[#allocation32_spill] sm:$0xff] }
 0x375   :  { %v9182_v31 = vpop.f32.mrf.mxu1 }
 0x376   :  { %16488 = vst [vmem:[#allocation71_spill] sm:$0xff] %v14645_v26  ;;  %v9183_v55 = vadd.f32 %v9182_v31, %v9181_v0  ;;  %v14653_v49 = vpop.f32.mrf.mxu0  ;;  %v16491_v26 = vld [vmem:[#allocation27_spill] sm:$0xff] }
 0x377   :  { %v9184_v41 = vpop.f32.mrf.mxu1 }
 0x378   :  { %v14655_v33 = vadd.f32 %v9183_v55, %v4221_v57  ;;  %v14657_v13 = vpop.f32.mrf.mxu0 }
 0x379   :  { %v9185_v34 = vpop.f32.mrf.mxu1 }
 0x37a   :  { %16490 = vst [vmem:[#allocation72_spill] sm:$0xff] %v14655_v33  ;;  %v9186_v35 = vadd.f32 %v9185_v34, %v9184_v41  ;;  %v14661_v2 = vpop.f32.mrf.mxu0  ;;  %6143 = vmatmul.mubr.bf16.gmra.mxu0 %v14238_v36 }
 0x37b   :  { %v9187_v53 = vpop.f32.mrf.mxu1  ;;  %5950 = vmatmul.mubr.bf16.gmra.mxu1 %v16491_v26  ;;  %6152 = vmatprep.mubr.bf16.mxu0 %v14292_v5 }
 0x37c   :  { %v14665_v0 = vadd.f32 %v9186_v35, %v4224_v10  ;;  %5959 = vmatprep.mubr.bf16.mxu1 %v16493_v22  ;;  %v14669_v57 = vpop.f32.mrf.mxu0  ;;  %v4232_v10 = vadd.f32 %v14534_v30, %v14367_v4  ;;  %v4237_v30 = vadd.f32 %v14545_v11, %v14367_v4  ;;  %v16502_v11 = vld [vmem:[#allocation34_spill] sm:$0xff] }
 0x37d   :  { %v9188_v31 = vpop.f32.mrf.mxu1 }
 0x37e   :  { %16492 = vst [vmem:[#allocation73_spill] sm:$0xff] %v14665_v0  ;;  %v9189_v34 = vadd.f32 %v9188_v31, %v9187_v53  ;;  %v14673_v41 = vpop.f32.mrf.mxu0  ;;  %v16495_v0 = vld [vmem:[#allocation29_spill] sm:$0xff] }
 0x37f   :  { %v9190_v55 = vpop.f32.mrf.mxu1 }
 0x380   :  { %v14675_v33 = vadd.f32 %v9189_v34, %v4229_v1  ;;  %v14677_v36 = vpop.f32.mrf.mxu0 }
 0x381   :  { %v9191_v26 = vpop.f32.mrf.mxu1 }
 0x382   :  { %16494 = vst [vmem:[#allocation74_spill] sm:$0xff] %v14675_v33  ;;  %v9192_v35 = vadd.f32 %v9191_v26, %v9190_v55  ;;  %v14681_v22 = vpop.f32.mrf.mxu0  ;;  %6153 = vmatmul.mubr.bf16.gmra.mxu0 %v14274_v20 }
 0x383   :  { %v9193_v5 = vpop.f32.mrf.mxu1  ;;  %5960 = vmatmul.mubr.bf16.gmra.mxu1 %v16495_v0  ;;  %6162 = vmatprep.mubr.bf16.mxu0 %v14328_v23 }
 0x384   :  { %v14685_v53 = vadd.f32 %v9192_v35, %v4232_v10  ;;  %5969 = vmatprep.mubr.bf16.mxu1 %v16497_v54  ;;  %v14689_v1 = vpop.f32.mrf.mxu0  ;;  %v4240_v10 = vadd.f32 %v14551_v15, %v14367_v4  ;;  %v4245_v15 = vadd.f32 %v14561_v43, %v14367_v4  ;;  %v16506_v43 = vld [vmem:[#allocation36_spill] sm:$0xff] }
 0x385   :  { %v9194_v31 = vpop.f32.mrf.mxu1 }
 0x386   :  { %16496 = vst [vmem:[#allocation75_spill] sm:$0xff] %v14685_v53  ;;  %v9195_v26 = vadd.f32 %v9194_v31, %v9193_v5  ;;  %v14693_v55 = vpop.f32.mrf.mxu0  ;;  %v16499_v53 = vld [vmem:[#allocation31_spill] sm:$0xff] }
 0x387   :  { %v9196_v34 = vpop.f32.mrf.mxu1 }
 0x388   :  { %v14695_v33 = vadd.f32 %v9195_v26, %v4237_v30  ;;  %v14697_v20 = vpop.f32.mrf.mxu0 }
 0x389   :  { %v9197_v0 = vpop.f32.mrf.mxu1 }
 0x38a   :  { %16498 = vst [vmem:[#allocation76_spill] sm:$0xff] %v14695_v33  ;;  %v9198_v35 = vadd.f32 %v9197_v0, %v9196_v34  ;;  %v14701_v54 = vpop.f32.mrf.mxu0  ;;  %6163 = vmatmul.mubr.bf16.gmra.mxu0 %v16500_v59 }
 0x38b   :  { %v9199_v23 = vpop.f32.mrf.mxu1  ;;  %5970 = vmatmul.mubr.bf16.gmra.mxu1 %v16499_v53  ;;  %6172 = vmatprep.mubr.bf16.mxu0 %v14361_v62 }
 0x38c   :  { %v14705_v5 = vadd.f32 %v9198_v35, %v4240_v10  ;;  %5979 = vmatprep.mubr.bf16.mxu1 %v16502_v11  ;;  %v14709_v30 = vpop.f32.mrf.mxu0  ;;  %v4248_v10 = vadd.f32 %v14567_v56, %v14367_v4  ;;  %v4253_v56 = vadd.f32 %v14577_v29, %v14367_v4  ;;  %v16510_v29 = vmov 0  }
 0x38d   :  { %v9200_v31 = vpop.f32.mrf.mxu1 }
 0x38e   :  { %16501 = vst [vmem:[#allocation77_spill] sm:$0xff] %v14705_v5  ;;  %v9201_v0 = vadd.f32 %v9200_v31, %v9199_v23  ;;  %v14713_v34 = vpop.f32.mrf.mxu0  ;;  %v16504_v5 = vld [vmem:[#allocation33_spill] sm:$0xff] }
 0x38f   :  { %v9202_v26 = vpop.f32.mrf.mxu1 }
 0x390   :  { %v14715_v33 = vadd.f32 %v9201_v0, %v4245_v15  ;;  %v14717_v59 = vpop.f32.mrf.mxu0 }
 0x391   :  { %v9203_v53 = vpop.f32.mrf.mxu1 }
 0x392   :  { %16503 = vst [vmem:[#allocation78_spill] sm:$0xff] %v14715_v33  ;;  %v9204_v35 = vadd.f32 %v9203_v53, %v9202_v26  ;;  %v14721_v11 = vpop.f32.mrf.mxu0  ;;  %6173 = vmatmul.mubr.bf16.gmra.mxu0 %v14346_v51 }
 0x393   :  { %v9205_v62 = vpop.f32.mrf.mxu1  ;;  %5980 = vmatmul.mubr.bf16.gmra.mxu1 %v16504_v5  ;;  %6182 = vmatprep.mubr.bf16.mxu0 %v14406_v48 }
 0x394   :  { %v14725_v23 = vadd.f32 %v9204_v35, %v4248_v10  ;;  %5989 = vmatprep.mubr.bf16.mxu1 %v16506_v43  ;;  %v14729_v15 = vpop.f32.mrf.mxu0  ;;  %v4256_v10 = vadd.f32 %v14583_v3, %v14367_v4  ;;  %v4261_v3 = vadd.f32 %v14593_v19, %v14367_v4  ;;  %v9244_v19 = vadd.f32 %v14637_v40, %v14633_v12 }
 0x395   :  { %v9206_v31 = vpop.f32.mrf.mxu1 }
 0x396   :  { %16505 = vst [vmem:[#allocation79_spill] sm:$0xff] %v14725_v23  ;;  %v9207_v53 = vadd.f32 %v9206_v31, %v9205_v62  ;;  %v14733_v26 = vpop.f32.mrf.mxu0  ;;  %v16508_v23 = vld [vmem:[#allocation35_spill] sm:$0xff] }
 0x397   :  { %v9208_v0 = vpop.f32.mrf.mxu1 }
 0x398   :  { %v14735_v33 = vadd.f32 %v9207_v53, %v4253_v56  ;;  %v14737_v51 = vpop.f32.mrf.mxu0 }
 0x399   :  { %v9209_v5 = vpop.f32.mrf.mxu1 }
 0x39a   :  { %16507 = vst [vmem:[#allocation80_spill] sm:$0xff] %v14735_v33  ;;  %v9210_v35 = vadd.f32 %v9209_v5, %v9208_v0  ;;  %v14741_v43 = vpop.f32.mrf.mxu0  ;;  %6183 = vmatmul.mubr.bf16.gmra.mxu0 %v14386_v42 }
 0x39b   :  { %v9211_v48 = vpop.f32.mrf.mxu1  ;;  %5990 = vmatmul.mubr.bf16.gmra.mxu1 %v16508_v23  ;;  %6418 = vmatprep.mubr.bf16.mxu0 %v16459_v52  ;;  %v9241_v23 = vadd.f32 %v14629_v37, %v14621_v47  ;;  %v10607_v52 = vld [vmem:[%s16223_s3 + $0x398] ss:$12 sps:$4 sm:$0xff]  }
 0x39c   :  { %v14745_v62 = vadd.f32 %v9210_v35, %v4256_v10  ;;  %6225 = vmatprep.mubr.bf16.mxu1 %v16510_v29  ;;  %v14749_v56 = vpop.f32.mrf.mxu0 }
 0x39d   :  { %v9212_v31 = vpop.f32.mrf.mxu1  ;;  %v4471_v33 = vadd.f32 %v9241_v23, %v14448_v25  ;;  %v9253_v23 = vadd.f32 %v14669_v57, %v14661_v2 }
 0x39e   :  { %16509 = vst [vmem:[#allocation81_spill] sm:$0xff] %v14745_v62  ;;  %v9213_v5 = vadd.f32 %v9212_v31, %v9211_v48  ;;  %v14753_v0 = vpop.f32.mrf.mxu0  ;;  %v4264_v62 = vadd.f32 %v14599_v27, %v14367_v4  ;;  %v9235_v48 = vadd.f32 %v14609_v50, %v14601_v39  ;;  %v16513_v4 = vld [vmem:[#allocation22_spill] sm:$0xff] }
 0x39f   :  { %v9214_v53 = vpop.f32.mrf.mxu1  ;;  %v10610_v27 = vld [vmem:[%s16223_s3 + $0x380] ss:$12 sps:$4 sm:$0xff]  }
 0x3a0   :  { %v14757_v42 = vadd.f32 %v9213_v5, %v4261_v3  ;;  %v14759_v35 = vpop.f32.mrf.mxu0  ;;  %v16512_v3 = vld [vmem:[#allocation19_spill] sm:$0xff]  ;;  %v9238_v5 = vadd.f32 %v14617_v17, %v14613_v60  ;;  %v4463_v12 = vadd.f32 %v9235_v48, %v14408_v14  ;;  %v4474_v60 = vadd.f32 %v9244_v19, %v14468_v44 }
 0x3a1   :  { %v9215_v10 = vpop.f32.mrf.mxu1  ;;  %v10613_v14 = vld [vmem:[%s16223_s3 + $0x368] ss:$12 sps:$4 sm:$0xff]   ;;  %v9256_v44 = vadd.f32 %v14677_v36, %v14673_v41 }
 0x3a2   :  { %16511 = vst [vmem:[#allocation82_spill] sm:$0xff] %v14757_v42  ;;  %v9216_v31 = vadd.f32 %v9215_v10, %v9214_v53  ;;  %v14770_v47 = vpop.f32.mrf.mxu0  ;;  %6419 = vmatmul.mubr.bf16.vlgmr.msra.gmra.mxu0 %v16512_v3  ;;  %v4466_v53 = vadd.f32 %v9238_v5, %v14428_v63  ;;  %v9247_v10 = vadd.f32 %v14649_v24, %v14641_v16  ;;  %v16514_v24 = vld [vmem:[#allocation21_spill] sm:$0xff] }
 0x3a3   :  { %v9755_v37 = vpop.f32.mrf.mxu1  ;;  %6426 = vmatprep.mubr.bf16.mxu0 %v16513_v4  ;;  %9786 = vmatpush3.bf16.msra.mxu0 %v14528_v38  ;;  %v9250_v63 = vadd.f32 %v14657_v13, %v14653_v49  ;;  %v4487_v5 = vadd.f32 %v9253_v23, %v14530_v58  ;;  %v16515_v4 = vld [vmem:[#allocation24_spill] sm:$0xff]  ;;  %v10605_v58 = vld [vmem:[%s16223_s3 + $0x2d8] ss:$12 sps:$4 sm:$0xff]  }
 0x3a4   :  { %v14775_v42 = vadd.f32 %v9216_v31, %v4264_v62  ;;  %v14780_v39 = vpop.f32.mrf.mxu0  ;;  %9787 = vmatprep.subr.bf16.mxu0 %v10607_v52  ;;  %v4632_v50 = vadd.f32 %v9755_v37, %v4471_v33  ;;  %v10603_v13 = vld [vmem:[%s16223_s3 + $0x230] ss:$12 sps:$4 sm:$0xff]  }
 0x3a5   :  { %v4623_v40 = vpop.f32.mrf.mxu1  ;;  %v16516_v23 = vld [vmem:[#allocation68_spill] sm:$0xff] }
 0x3a6   :  { %v14787_v17 = vpop.f32.mrf.mxu0  ;;  %v4624_v38 = vadd.f32 %v4623_v40, %v4463_v12  ;;  %v4764_v2 = vmax.f32 %v4632_v50, 0.0  ;;  %v4479_v50 = vadd.f32 %v9247_v10, %v14488_v8  ;;  %v4490_v12 = vadd.f32 %v9256_v44, %v14539_v61  ;;  %v10606_v44 = vld [vmem:[%s16223_s3 + $0x218] ss:$12 sps:$4 sm:$0xff]  }
 0x3a7   :  { %v9756_v25 = vpop.f32.mrf.mxu1  ;;  %9788 = vmatpush3.bf16.msra.mxu0 %v10607_v52  ;;  %v9259_v61 = vadd.f32 %v14689_v1, %v14681_v22  ;;  %v10608_v1 = vld [vmem:[%s16223_s3 + $0x2c0] ss:$12 sps:$4 sm:$0xff]  }
 0x3a8   :  { %v4635_v62 = vadd.f32 %v9756_v25, %v4474_v60  ;;  %v14794_v31 = vpop.f32.mrf.mxu0  ;;  %9789 = vmatprep.subr.bf16.mxu0 %v10610_v27  ;;  %v4754_v19 = vmax.f32 %v4624_v38, 0.0  ;;  %v4482_v38 = vadd.f32 %v9250_v63, %v16516_v23 }
 0x3a9   :  { %v4626_v33 = vpop.f32.mrf.mxu1 }
 0x3aa   :  { %v4769_v57 = vmax.f32 %v4635_v62, 0.0  ;;  %v4627_v48 = vadd.f32 %v4626_v33, %v4466_v53  ;;  %v14803_v52 = vpop.f32.mrf.mxu0  ;;  %6427 = vmatmul.mubr.bf16.gmra.mxu0 %v16514_v24  ;;  %v9265_v62 = vadd.f32 %v14709_v30, %v14701_v54  ;;  %v10619_v54 = vld [vmem:[%s16223_s3 + $0x338] ss:$12 sps:$4 sm:$0xff]   ;;  %v9268_v30 = vadd.f32 %v14717_v59, %v14713_v34 }
 0x3ab   :  { %v9759_v16 = vpop.f32.mrf.mxu1  ;;  %6434 = vmatprep.mubr.bf16.mxu0 %v16515_v4  ;;  %9790 = vmatpush3.bf16.msra.mxu0 %v10610_v27  ;;  %v10616_v27 = vld [vmem:[%s16223_s3 + $0x350] ss:$12 sps:$4 sm:$0xff]  }
 0x3ac   :  { %v14806_v37 = vpack.c.bf16 %v4769_v57, %v4764_v2  ;;  %v4759_v3 = vmax.f32 %v4627_v48, 0.0  ;;  %v14810_v36 = vpop.f32.mrf.mxu0  ;;  %9791 = vmatprep.subr.bf16.mxu0 %v10613_v14  ;;  %v4648_v40 = vadd.f32 %v9759_v16, %v4487_v5  ;;  %v9262_v57 = vadd.f32 %v14697_v20, %v14693_v55  ;;  %v16517_v16 = vld [vmem:[#allocation23_spill] sm:$0xff] }
 0x3ad   :  { %v4639_v41 = vpop.f32.mrf.mxu1  ;;  %v4503_v34 = vadd.f32 %v9265_v62, %v14563_v45  ;;  %v10609_v20 = vld [vmem:[%s16223_s3 + $0x200] ss:$12 sps:$4 sm:$0xff]   ;;  %v10611_v45 = vld [vmem:[%s16223_s3 + $0x2a8] ss:$12 sps:$4 sm:$0xff]  }
 0x3ae   :  { %v14815_v49 = vpack.c.bf16 %v4759_v3, %v4754_v19  ;;  %v14825_v60 = vpop.f32.mrf.mxu0  ;;  %v4640_v53 = vadd.f32 %v4639_v41, %v4479_v50  ;;  %v16518_v3 = vld [vmem:[#allocation26_spill] sm:$0xff] }
 0x3af   :  { %v9760_v25 = vpop.f32.mrf.mxu1  ;;  %9792 = vmatpush3.bf16.msra.mxu0 %v10613_v14  ;;  %v4784_v14 = vmax.f32 %v4648_v40, 0.0  ;;  %v4506_v40 = vadd.f32 %v9268_v30, %v14571_v32  ;;  %v10622_v50 = vld [vmem:[%s16223_s3 + $0x320] ss:$12 sps:$4 sm:$0xff]   ;;  %v9271_v32 = vadd.f32 %v14729_v15, %v14721_v11  ;;  %v10614_v15 = vld [vmem:[%s16223_s3 + $0x290] ss:$12 sps:$4 sm:$0xff]  }
 0x3b0   :  { %v4651_v8 = vadd.f32 %v9760_v25, %v4490_v12  ;;  %6226 = vmatmul.mubr.bf16.vlgmr.msra.gmra.mxu1 %v14815_v49  ;;  %v14833_v10 = vpop.f32.mrf.mxu0  ;;  %9793 = vmatprep.subr.bf16.mxu0 %v10616_v27  ;;  %v4774_v24 = vmax.f32 %v4640_v53, 0.0  ;;  %v9277_v25 = vadd.f32 %v14749_v56, %v14741_v43  ;;  %v10623_v43 = vld [vmem:[%s16223_s3 + $0x308] ss:$12 sps:$4 sm:$0xff]   ;;  %v9280_v56 = vadd.f32 %v14759_v35, %v14753_v0 }
 0x3b1   :  { %v4642_v33 = vpop.f32.mrf.mxu1  ;;  %9466 = vmatpush3.bf16.msra.mxu1 %v10603_v13  ;;  %6235 = vmatprep.mubr.bf16.mxu1 %v16510_v29  ;;  %v4495_v13 = vadd.f32 %v9259_v61, %v14547_v9  ;;  %v9274_v61 = vadd.f32 %v14737_v51, %v14733_v26  ;;  %v10617_v26 = vld [vmem:[%s16223_s3 + $0x278] ss:$12 sps:$4 sm:$0xff]  }
 0x3b2   :  { %v4789_v2 = vmax.f32 %v4651_v8, 0.0  ;;  %v4643_v22 = vadd.f32 %v4642_v33, %v4482_v38  ;;  %9467 = vmatprep.subr.bf16.mxu1 %v10605_v58  ;;  %v14849_v48 = vpop.f32.mrf.mxu0  ;;  %6435 = vmatmul.mubr.bf16.gmra.mxu0 %v16517_v16  ;;  %v4519_v35 = vadd.f32 %v9277_v25, %v14595_v28  ;;  %v4511_v28 = vadd.f32 %v9271_v32, %v14579_v6 }
 0x3b3   :  { %v9763_v63 = vpop.f32.mrf.mxu1  ;;  %6442 = vmatprep.mubr.bf16.mxu0 %v16518_v3  ;;  %9794 = vmatpush3.bf16.msra.mxu0 %v10616_v27  ;;  %v4498_v27 = vadd.f32 %v9262_v57, %v14555_v18  ;;  %v10612_v18 = vld [vmem:[%s16223_s3 + $0x1e8] ss:$12 sps:$4 sm:$0xff]   ;;  %v4522_v16 = vadd.f32 %v9280_v56, %v14605_v7  ;;  %v4514_v3 = vadd.f32 %v9274_v61, %v14587_v21  ;;  %v10618_v21 = vld [vmem:[%s16223_s3 + $0x1b8] ss:$12 sps:$4 sm:$0xff]  }
 0x3b4   :  { %v14852_v19 = vpack.c.bf16 %v4789_v2, %v4784_v14  ;;  %v4779_v59 = vmax.f32 %v4643_v22, 0.0  ;;  %v14856_v5 = vpop.f32.mrf.mxu0  ;;  %9795 = vmatprep.subr.bf16.mxu0 %v10619_v54  ;;  %v4664_v41 = vadd.f32 %v9763_v63, %v4503_v34  ;;  %v16520_v2 = vld [vmem:[#allocation6_spill] sm:$0xff]  ;;  %v10615_v22 = vld [vmem:[%s16223_s3 + $0x1d0] ss:$12 sps:$4 sm:$0xff]   ;;  %v9283_v6 = vadd.f32 %v14780_v39, %v14770_v47 }
 0x3b5   :  { %v4655_v4 = vpop.f32.mrf.mxu1  ;;  %9468 = vmatpush3.bf16.msra.mxu1 %v10606_v44  ;;  %v10620_v47 = vld [vmem:[%s16223_s3 + $0x260] ss:$12 sps:$4 sm:$0xff]   ;;  %v9286_v39 = vadd.f32 %v14794_v31, %v14787_v17 }
 0x3b6   :  { %v14861_v55 = vpack.c.bf16 %v4779_v59, %v4774_v24  ;;  %9469 = vmatprep.subr.bf16.mxu1 %v10608_v1  ;;  %v14871_v12 = vpop.f32.mrf.mxu0  ;;  %v4656_v9 = vadd.f32 %v4655_v4, %v4495_v13  ;;  %v4804_v53 = vmax.f32 %v4664_v41, 0.0  ;;  %v10628_v24 = vld [vmem:[%s16224_s5 + $0x74] ss:$8 sps:$4 sm:$0xff]   ;;  %v9289_v4 = vadd.f32 %v14810_v36, %v14803_v52 }
 0x3b7   :  { %v9764_v58 = vpop.f32.mrf.mxu1  ;;  %9796 = vmatpush3.bf16.msra.mxu0 %v10619_v54  ;;  %v16519_v54 = vld [vmem:[#allocation25_spill] sm:$0xff]  ;;  %v9292_v52 = vadd.f32 %v14833_v10, %v14825_v60 }
 0x3b8   :  { %v4667_v23 = vadd.f32 %v9764_v58, %v4506_v40  ;;  %6236 = vmatmul.mubr.bf16.gmra.mxu1 %v14806_v37  ;;  %v14879_v38 = vpop.f32.mrf.mxu0  ;;  %9797 = vmatprep.subr.bf16.mxu0 %v10622_v50  ;;  %v4794_v30 = vmax.f32 %v4656_v9, 0.0  ;;  %v4535_v10 = vadd.f32 %v9289_v4, %v14635_v46  ;;  %v10624_v46 = vld [vmem:[%s16223_s3 + $0x248] ss:$12 sps:$4 sm:$0xff]   ;;  %v16527_v4 = vld [vmem:[#allocation74_spill] sm:$0xff] }
 0x3b9   :  { %v4658_v62 = vpop.f32.mrf.mxu1  ;;  %6245 = vmatprep.mubr.bf16.mxu1 %v16510_v29  ;;  %9470 = vmatpush3.bf16.msra.mxu1 %v10609_v20 }
 0x3ba   :  { %v4809_v8 = vmax.f32 %v4667_v23, 0.0  ;;  %v4659_v11 = vadd.f32 %v4658_v62, %v4498_v27  ;;  %9471 = vmatprep.subr.bf16.mxu1 %v10611_v45  ;;  %v14895_v33 = vpop.f32.mrf.mxu0  ;;  %6443 = vmatmul.mubr.bf16.gmra.mxu0 %v16519_v54  ;;  %v16521_v27 = vld [vmem:[#allocation5_spill] sm:$0xff]  ;;  %v16522_v23 = vld [vmem:[#allocation8_spill] sm:$0xff] }
 0x3bb   :  { %v9767_v44 = vpop.f32.mrf.mxu1  ;;  %6450 = vmatprep.mubr.bf16.mxu0 %v16520_v2  ;;  %9798 = vmatpush3.bf16.msra.mxu0 %v10622_v50 }
 0x3bc   :  { %v14898_v14 = vpack.c.bf16 %v4809_v8, %v4804_v53  ;;  %v4799_v0 = vmax.f32 %v4659_v11, 0.0  ;;  %v9300_v1 = vpop.f32.mrf.mxu0  ;;  %9799 = vmatprep.subr.bf16.mxu0 %v10623_v43  ;;  %v4680_v63 = vadd.f32 %v9767_v44, %v4519_v35  ;;  %v16524_v53 = vld [vmem:[#allocation71_spill] sm:$0xff]  ;;  %v9295_v35 = vadd.f32 %v14856_v5, %v14849_v48 }
 0x3bd   :  { %v4671_v51 = vpop.f32.mrf.mxu1  ;;  %9472 = vmatpush3.bf16.msra.mxu1 %v10612_v18  ;;  %v10621_v18 = vld [vmem:[%s16223_s3 + $0x1a0] ss:$12 sps:$4 sm:$0xff]   ;;  %v4538_v8 = vadd.f32 %v9292_v52, %v16524_v53  ;;  %v9301_v61 = vadd.f32 %v9300_v1, %v14895_v33 }
 0x3be   :  { %v14908_v57 = vpack.c.bf16 %v4799_v0, %v4794_v30  ;;  %9473 = vmatprep.subr.bf16.mxu1 %v10614_v15  ;;  %v9302_v59 = vpop.f32.mrf.mxu0  ;;  %v4672_v20 = vadd.f32 %v4671_v51, %v4511_v28  ;;  %v4824_v36 = vmax.f32 %v4680_v63, 0.0  ;;  %v16525_v30 = vld [vmem:[#allocation70_spill] sm:$0xff]  ;;  %v10625_v51 = vld [vmem:[%s16223_s3 + $0x188] ss:$12 sps:$4 sm:$0xff]   ;;  %v9298_v28 = vadd.f32 %v14879_v38, %v14871_v12 }
 0x3bf   :  { %v9768_v34 = vpop.f32.mrf.mxu1  ;;  %9800 = vmatpush3.bf16.msra.mxu0 %v10623_v43  ;;  %v16523_v43 = vld [vmem:[#allocation69_spill] sm:$0xff]  ;;  %v4530_v0 = vadd.f32 %v9286_v39, %v16525_v30  ;;  %v16526_v48 = vld [vmem:[#allocation7_spill] sm:$0xff] }
 0x3c0   :  { %v4683_v41 = vadd.f32 %v9768_v34, %v4522_v16  ;;  %6246 = vmatmul.mubr.bf16.gmra.mxu1 %v14861_v55  ;;  %v9303_v7 = vpop.f32.mrf.mxu0  ;;  %7313 = vmatprep.subr.bf16.mxu0 %v10628_v24  ;;  %v4814_v25 = vmax.f32 %v4672_v20, 0.0  ;;  %v4527_v56 = vadd.f32 %v9283_v6, %v16523_v43  ;;  %v4551_v20 = vadd.f32 %v9301_v61, %v16527_v4  ;;  %v16530_v38 = vld [vmem:[#allocation75_spill] sm:$0xff] }
 0x3c1   :  { %v4674_v13 = vpop.f32.mrf.mxu1  ;;  %6255 = vmatprep.mubr.bf16.mxu1 %v16510_v29  ;;  %9474 = vmatpush3.bf16.msra.mxu1 %v10615_v22 }
 0x3c2   :  { %v4829_v40 = vmax.f32 %v4683_v41, 0.0  ;;  %v4675_v45 = vadd.f32 %v4674_v13, %v4514_v3  ;;  %9475 = vmatprep.subr.bf16.mxu1 %v10617_v26  ;;  %v9305_v50 = vpop.f32.mrf.mxu0  ;;  %6451 = vmatmul.mubr.bf16.gmra.mxu0 %v16521_v27  ;;  %v9304_v26 = vadd.f32 %v9303_v7, %v9302_v59  ;;  %v16528_v41 = vld [vmem:[#allocation10_spill] sm:$0xff] }
 0x3c3   :  { %v9771_v58 = vpop.f32.mrf.mxu1  ;;  %6458 = vmatprep.mubr.bf16.mxu0 %v16522_v23 }
 0x3c4   :  { %v14933_v9 = vpack.c.bf16 %v4829_v40, %v4824_v36  ;;  %v4819_v60 = vmax.f32 %v4675_v45, 0.0  ;;  %v9306_v32 = vpop.f32.mrf.mxu0  ;;  %v4696_v31 = vadd.f32 %v9771_v58, %v4535_v10  ;;  %v4554_v52 = vadd.f32 %v9304_v26, %v16530_v38  ;;  %v16531_v58 = vld [vmem:[#allocation73_spill] sm:$0xff] }
 0x3c5   :  { %v4687_v62 = vpop.f32.mrf.mxu1  ;;  %9476 = vmatpush3.bf16.msra.mxu1 %v10618_v21  ;;  %v16529_v21 = vld [vmem:[#allocation72_spill] sm:$0xff]  ;;  %v4546_v27 = vadd.f32 %v9298_v28, %v16531_v58  ;;  %v16537_v28 = vld [vmem:[#allocation77_spill] sm:$0xff] }
 0x3c6   :  { %v14940_v17 = vpack.c.bf16 %v4819_v60, %v4814_v25  ;;  %9477 = vmatprep.subr.bf16.mxu1 %v10620_v47  ;;  %v9308_v11 = vpop.f32.mrf.mxu0  ;;  %v4688_v44 = vadd.f32 %v4687_v62, %v4527_v56  ;;  %v4844_v33 = vmax.f32 %v4696_v31, 0.0  ;;  %v4543_v12 = vadd.f32 %v9295_v35, %v16529_v21 }
 0x3c7   :  { %v9772_v15 = vpop.f32.mrf.mxu1  ;;  %v9307_v25 = vadd.f32 %v9306_v32, %v9305_v50  ;;  %v16534_v50 = vld [vmem:[#allocation12_spill] sm:$0xff] }
 0x3c8   :  { %v4699_v54 = vadd.f32 %v9772_v15, %v4538_v8  ;;  %6256 = vmatmul.mubr.bf16.gmra.mxu1 %v14852_v19  ;;  %v9309_v2 = vpop.f32.mrf.mxu0  ;;  %v4834_v5 = vmax.f32 %v4688_v44, 0.0  ;;  %v16532_v8 = vld [vmem:[#allocation9_spill] sm:$0xff]  ;;  %v16533_v44 = vld [vmem:[#allocation78_spill] sm:$0xff] }
 0x3c9   :  { %v4690_v22 = vpop.f32.mrf.mxu1  ;;  %6265 = vmatprep.mubr.bf16.mxu1 %v16510_v29  ;;  %9478 = vmatpush3.bf16.msra.mxu1 %v10621_v18  ;;  %v9310_v43 = vadd.f32 %v9309_v2, %v9308_v11  ;;  %v16536_v11 = vld [vmem:[#allocation79_spill] sm:$0xff] }
 0x3ca   :  { %v4849_v1 = vmax.f32 %v4699_v54, 0.0  ;;  %v4691_v63 = vadd.f32 %v4690_v22, %v4530_v0  ;;  %9479 = vmatprep.subr.bf16.mxu1 %v10624_v46  ;;  %v9311_v16 = vpop.f32.mrf.mxu0  ;;  %6459 = vmatmul.mubr.bf16.gmra.mxu0 %v16526_v48  ;;  %v16535_v22 = vld [vmem:[#allocation76_spill] sm:$0xff] }
 0x3cb   :  { %v9775_v24 = vpop.f32.mrf.mxu1  ;;  %6466 = vmatprep.mubr.bf16.mxu0 %v16528_v41 }
 0x3cc   :  { %v14959_v34 = vpack.c.bf16 %v4849_v1, %v4844_v33  ;;  %v4839_v3 = vmax.f32 %v4691_v63, 0.0  ;;  %v9312_v59 = vpop.f32.mrf.mxu0  ;;  %v4712_v13 = vadd.f32 %v9775_v24, %v4551_v20 }
 0x3cd   :  { %v4703_v6 = vpop.f32.mrf.mxu1  ;;  %9480 = vmatpush3.bf16.msra.mxu1 %v10625_v51  ;;  %v9313_v45 = vadd.f32 %v9312_v59, %v9311_v16  ;;  %v4559_v51 = vadd.f32 %v9307_v25, %v16535_v22  ;;  %v4562_v16 = vadd.f32 %v9310_v43, %v16537_v28  ;;  %v16543_v43 = vld [vmem:[#allocation3_spill] sm:$0xff] }
 0x3ce   :  { %v14963_v7 = vpack.c.bf16 %v4839_v3, %v4834_v5  ;;  %v9314_v36 = vpop.f32.mrf.mxu0  ;;  %v4704_v47 = vadd.f32 %v4703_v6, %v4543_v12  ;;  %v4864_v23 = vmax.f32 %v4712_v13, 0.0  ;;  %v16538_v6 = vld [vmem:[#allocation11_spill] sm:$0xff] }
 0x3cf   :  { %v9776_v40 = vpop.f32.mrf.mxu1  ;;  %v4567_v54 = vadd.f32 %v9313_v45, %v16533_v44  ;;  %v16544_v44 = vld [vmem:[#allocation4_spill] sm:$0xff] }
 0x3d0   :  { %v4715_v39 = vadd.f32 %v9776_v40, %v4554_v52  ;;  %6266 = vmatmul.mubr.bf16.gmra.mxu1 %v14908_v57  ;;  %v9315_v60 = vpop.f32.mrf.mxu0  ;;  %v4854_v46 = vmax.f32 %v4704_v47, 0.0  ;;  %v16539_v52 = vld [vmem:[#allocation14_spill] sm:$0xff]  ;;  %v16540_v40 = vld [vmem:[#allocation80_spill] sm:$0xff] }
 0x3d1   :  { %v4706_v10 = vpop.f32.mrf.mxu1  ;;  %6275 = vmatprep.mubr.bf16.mxu1 %v16510_v29  ;;  %v9316_v18 = vadd.f32 %v9315_v60, %v9314_v36 }
 0x3d2   :  { %v4869_v62 = vmax.f32 %v4715_v39, 0.0  ;;  %v4707_v31 = vadd.f32 %v4706_v10, %v4546_v27  ;;  %v9317_v56 = vpop.f32.mrf.mxu0  ;;  %6467 = vmatmul.mubr.bf16.gmra.mxu0 %v16532_v8  ;;  %v5150_v39 = vld [vmem:[%s16225_s4] sm:$0x7] }
 0x3d3   :  { %v9779_v53 = vpop.f32.mrf.mxu1  ;;  %6474 = vmatprep.mubr.bf16.mxu0 %v16534_v50  ;;  %v4570_v2 = vadd.f32 %v9316_v18, %v16536_v11  ;;  %v16542_v18 = vld [vmem:[#allocation81_spill] sm:$0xff] }
 0x3d4   :  { %v14971_v15 = vpack.c.bf16 %v4869_v62, %v4864_v23  ;;  %v4859_v61 = vmax.f32 %v4707_v31, 0.0  ;;  %v9318_v32 = vpop.f32.mrf.mxu0  ;;  %v4728_v35 = vadd.f32 %v9779_v53, %v4567_v54  ;;  %v16541_v23 = vld [vmem:[#allocation82_spill] sm:$0xff]  ;;  %v15000_v54 = vrot.slane %v5150_v39, %v16544_v44  ;;  %v16560_v44 = vld [vmem:[#allocation51_spill] sm:$0xff] }
 0x3d5   :  { %v4719_v30 = vpop.f32.mrf.mxu1  ;;  %v9319_v24 = vadd.f32 %v9318_v32, %v9317_v56  ;;  %v14996_v56 = vrot.slane %v5150_v39, %v16543_v43 }
 0x3d6   :  { %v14975_v0 = vpack.c.bf16 %v4859_v61, %v4854_v46  ;;  %v9320_v26 = vpop.f32.mrf.mxu0  ;;  %v4720_v1 = vadd.f32 %v4719_v30, %v4559_v51  ;;  %v4884_v3 = vmax.f32 %v4728_v35, 0.0  ;;  %v16545_v35 = vld [vmem:[#allocation13_spill] sm:$0xff] }
 0x3d7   :  { %v9780_v33 = vpop.f32.mrf.mxu1  ;;  %v4575_v45 = vadd.f32 %v9319_v24, %v16540_v40 }
 0x3d8   :  { %v4731_v63 = vadd.f32 %v9780_v33, %v4570_v2  ;;  %6276 = vmatmul.mubr.bf16.gmra.mxu1 %v14898_v14  ;;  %v9321_v48 = vpop.f32.mrf.mxu0  ;;  %v4874_v13 = vmax.f32 %v4720_v1, 0.0 }
 0x3d9   :  { %v4722_v5 = vpop.f32.mrf.mxu1  ;;  %6285 = vmatprep.mubr.bf16.mxu1 %v16510_v29  ;;  %v9322_v12 = vadd.f32 %v9321_v48, %v9320_v26  ;;  %v16546_v26 = vld [vmem:[#allocation16_spill] sm:$0xff] }
 0x3da   :  { %v4889_v4 = vmax.f32 %v4731_v63, 0.0  ;;  %v4723_v20 = vadd.f32 %v4722_v5, %v4562_v16  ;;  %v9323_v41 = vpop.f32.mrf.mxu0  ;;  %6475 = vmatmul.mubr.bf16.gmra.mxu0 %v16538_v6 }
 0x3db   :  { %v9783_v59 = vpop.f32.mrf.mxu1  ;;  %6482 = vmatprep.mubr.bf16.mxu0 %v16539_v52  ;;  %v4578_v31 = vadd.f32 %v9322_v12, %v16542_v18 }
 0x3dc   :  { %v14983_v21 = vpack.c.bf16 %v4889_v4, %v4884_v3  ;;  %v4879_v38 = vmax.f32 %v4723_v20, 0.0  ;;  %v9324_v36 = vpop.f32.mrf.mxu0 }
 0x3dd   :  { %v4735_v47 = vpop.f32.mrf.mxu1  ;;  %v9325_v27 = vadd.f32 %v9324_v36, %v9323_v41  ;;  %v16547_v36 = vld [vmem:[#allocation15_spill] sm:$0xff] }
 0x3de   :  { %v14990_v58 = vpack.c.bf16 %v4879_v38, %v4874_v13  ;;  %v4736_v25 = vadd.f32 %v4735_v47, %v4575_v45  ;;  %v9326_v60 = vpop.f32.mrf.mxu0  ;;  %v16548_v47 = vld [vmem:[#allocation18_spill] sm:$0xff] }
 0x3df   :  { %v9784_v10 = vpop.f32.mrf.mxu1  ;;  %v4583_v62 = vadd.f32 %v9325_v27, %v16541_v23 }
 0x3e0   :  { %6286 = vmatmul.mubr.bf16.gmra.mxu1 %v14940_v17  ;;  %v9327_v53 = vpop.f32.mrf.mxu0  ;;  %v4894_v50 = vmax.f32 %v4736_v25, 0.0 }
 0x3e1   :  { %v4738_v8 = vpop.f32.mrf.mxu1  ;;  %6295 = vmatprep.mubr.bf16.mxu1 %v16510_v29  ;;  %v9328_v46 = vadd.f32 %v9327_v53, %v9326_v60  ;;  %v4744_v22 = vadd.f32 %v9783_v59, %v4583_v62 }
 0x3e2   :  { %v4739_v61 = vadd.f32 %v4738_v8, %v4578_v31  ;;  %v6034_v30 = vpop.f32.mrf.mxu0  ;;  %6483 = vmatmul.mubr.bf16.gmra.mxu0 %v16545_v35 }
 0x3e3   :  { %v5841_v32 = vpop.f32.mrf.mxu1  ;;  %v4586_v51 = vadd.f32 %v9328_v46, %v14775_v42  ;;  %6490 = vmatprep.mubr.bf16.mxu0 %v16546_v26  ;;  %v4904_v3 = vmax.f32 %v4744_v22, 0.0  ;;  %v16550_v22 = vld [vmem:[#allocation28_spill] sm:$0xff] }
 0x3e4   :  { %v4899_v11 = vmax.f32 %v4739_v61, 0.0  ;;  %v5842_v2 = vadd.f32 %v5841_v32, %v14996_v56  ;;  %v6036_v1 = vpop.f32.mrf.mxu0  ;;  %v16549_v32 = vld [vmem:[#allocation17_spill] sm:$0xff] }
 0x3e5   :  { %v5843_v33 = vpop.f32.mrf.mxu1  ;;  %v4747_v63 = vadd.f32 %v9784_v10, %v4586_v51 }
 0x3e6   :  { %v15006_v28 = vpack.c.bf16 %v4899_v11, %v4894_v50  ;;  %v15008_v16 = vadd.f32 %v6034_v30, %v5842_v2  ;;  %v5844_v24 = vadd.f32 %v5843_v33, %v15000_v54  ;;  %v6038_v5 = vpop.f32.mrf.mxu0 }
 0x3e7   :  { %v5845_v48 = vpop.f32.mrf.mxu1  ;;  %v4909_v4 = vmax.f32 %v4747_v63, 0.0 }
 0x3e8   :  { %v15011_v20 = vadd.f32 %v6036_v1, %v5844_v24  ;;  %v5846_v42 = vadd.f32 %v5845_v48, %v14996_v56  ;;  %6296 = vmatmul.mubr.bf16.gmra.mxu1 %v14933_v9  ;;  %v6040_v59 = vpop.f32.mrf.mxu0 }
 0x3e9   :  { %v5847_v41 = vpop.f32.mrf.mxu1  ;;  %6305 = vmatprep.mubr.bf16.mxu1 %v16510_v29  ;;  %v15019_v12 = vpack.c.bf16 %v4909_v4, %v4904_v3 }
 0x3ea   :  { %v15016_v6 = vadd.f32 %v6038_v5, %v5846_v42  ;;  %v5848_v13 = vadd.f32 %v5847_v41, %v15000_v54  ;;  %v6044_v52 = vpop.f32.mrf.mxu0  ;;  %6491 = vmatmul.mubr.bf16.gmra.mxu0 %v16547_v36 }
 0x3eb   :  { %v5851_v38 = vpop.f32.mrf.mxu1  ;;  %6498 = vmatprep.mubr.bf16.mxu0 %v16548_v47 }
 0x3ec   :  { %v15022_v40 = vadd.f32 %v6040_v59, %v5848_v13  ;;  %v5852_v45 = vadd.f32 %v5851_v38, %v14996_v56  ;;  %v6046_v27 = vpop.f32.mrf.mxu0  ;;  %v16551_v59 = vld [vmem:[#allocation27_spill] sm:$0xff] }
 0x3ed   :  { %v5853_v39 = vpop.f32.mrf.mxu1 }
 0x3ee   :  { %v15026_v25 = vadd.f32 %v6044_v52, %v5852_v45  ;;  %v5854_v60 = vadd.f32 %v5853_v39, %v15000_v54  ;;  %v6048_v23 = vpop.f32.mrf.mxu0  ;;  %v16552_v52 = vld [vmem:[#allocation30_spill] sm:$0xff] }
 0x3ef   :  { %v5855_v10 = vpop.f32.mrf.mxu1 }
 0x3f0   :  { %v15029_v62 = vadd.f32 %v6046_v27, %v5854_v60  ;;  %v5856_v18 = vadd.f32 %v5855_v10, %v14996_v56  ;;  %6306 = vmatmul.mubr.bf16.gmra.mxu1 %v14963_v7  ;;  %v6050_v53 = vpop.f32.mrf.mxu0 }
 0x3f1   :  { %v5857_v31 = vpop.f32.mrf.mxu1  ;;  %6315 = vmatprep.mubr.bf16.mxu1 %v16510_v29 }
 0x3f2   :  { %v15034_v8 = vadd.f32 %v6048_v23, %v5856_v18  ;;  %v5858_v46 = vadd.f32 %v5857_v31, %v15000_v54  ;;  %v6054_v50 = vpop.f32.mrf.mxu0  ;;  %6499 = vmatmul.mubr.bf16.gmra.mxu0 %v16549_v32  ;;  %v16553_v32 = vld [vmem:[#allocation29_spill] sm:$0xff] }
 0x3f3   :  { %v5861_v61 = vpop.f32.mrf.mxu1  ;;  %6506 = vmatprep.mubr.bf16.mxu0 %v16550_v22 }
 0x3f4   :  { %v15038_v30 = vadd.f32 %v6050_v53, %v5858_v46  ;;  %v5862_v35 = vadd.f32 %v5861_v61, %v14996_v56  ;;  %v6056_v11 = vpop.f32.mrf.mxu0 }
 0x3f5   :  { %v5863_v51 = vpop.f32.mrf.mxu1 }
 0x3f6   :  { %v15042_v2 = vadd.f32 %v6054_v50, %v5862_v35  ;;  %v5864_v26 = vadd.f32 %v5863_v51, %v15000_v54  ;;  %v6058_v1 = vpop.f32.mrf.mxu0  ;;  %v16554_v51 = vld [vmem:[#allocation32_spill] sm:$0xff] }
 0x3f7   :  { %v5865_v33 = vpop.f32.mrf.mxu1 }
 0x3f8   :  { %v15045_v63 = vadd.f32 %v6056_v11, %v5864_v26  ;;  %v5866_v24 = vadd.f32 %v5865_v33, %v14996_v56  ;;  %6316 = vmatmul.mubr.bf16.gmra.mxu1 %v14959_v34  ;;  %v6060_v5 = vpop.f32.mrf.mxu0  ;;  %v10676_v11 = vld [vmem:[%s16224_s5 + $0x174] ss:$8 sps:$4 sm:$0xff]  }
 0x3f9   :  { %v5867_v48 = vpop.f32.mrf.mxu1  ;;  %6325 = vmatprep.mubr.bf16.mxu1 %v16510_v29  ;;  %7506 = vmatprep.subr.bf16.mxu1 %v10676_v11 }
 0x3fa   :  { %v15050_v3 = vadd.f32 %v6058_v1, %v5866_v24  ;;  %v5868_v4 = vadd.f32 %v5867_v48, %v15000_v54  ;;  %v6064_v41 = vpop.f32.mrf.mxu0  ;;  %6507 = vmatmul.mubr.bf16.gmra.mxu0 %v16551_v59 }
 0x3fb   :  { %v5871_v42 = vpop.f32.mrf.mxu1  ;;  %6514 = vmatprep.mubr.bf16.mxu0 %v16552_v52 }
 0x3fc   :  { %v15054_v13 = vadd.f32 %v6060_v5, %v5868_v4  ;;  %v5872_v38 = vadd.f32 %v5871_v42, %v14996_v56  ;;  %v6066_v45 = vpop.f32.mrf.mxu0 }
 0x3fd   :  { %v5873_v36 = vpop.f32.mrf.mxu1 }
 0x3fe   :  { %v15058_v47 = vadd.f32 %v6064_v41, %v5872_v38  ;;  %v5874_v39 = vadd.f32 %v5873_v36, %v15000_v54  ;;  %v6068_v60 = vpop.f32.mrf.mxu0 }
 0x3ff   :  { %v5875_v27 = vpop.f32.mrf.mxu1 }
 0x400   :  { %v15061_v10 = vadd.f32 %v6066_v45, %v5874_v39  ;;  %v5876_v23 = vadd.f32 %v5875_v27, %v14996_v56  ;;  %6326 = vmatmul.mubr.bf16.gmra.mxu1 %v14975_v0  ;;  %v6070_v31 = vpop.f32.mrf.mxu0  ;;  %v16555_v39 = vld [vmem:[#allocation31_spill] sm:$0xff] }
 0x401   :  { %v5877_v18 = vpop.f32.mrf.mxu1  ;;  %6335 = vmatprep.mubr.bf16.mxu1 %v16510_v29 }
 0x402   :  { %v15066_v53 = vadd.f32 %v6068_v60, %v5876_v23  ;;  %v5878_v46 = vadd.f32 %v5877_v18, %v15000_v54  ;;  %v6074_v50 = vpop.f32.mrf.mxu0  ;;  %6515 = vmatmul.mubr.bf16.gmra.mxu0 %v16553_v32  ;;  %v16556_v23 = vld [vmem:[#allocation34_spill] sm:$0xff] }
 0x403   :  { %v5881_v61 = vpop.f32.mrf.mxu1  ;;  %6522 = vmatprep.mubr.bf16.mxu0 %v16554_v51 }
 0x404   :  { %v15070_v35 = vadd.f32 %v6070_v31, %v5878_v46  ;;  %v5882_v22 = vadd.f32 %v5881_v61, %v14996_v56  ;;  %v6076_v33 = vpop.f32.mrf.mxu0 }
 0x405   :  { %v5883_v26 = vpop.f32.mrf.mxu1 }
 0x406   :  { %v15077_v1 = vadd.f32 %v6074_v50, %v5882_v22  ;;  %v5884_v24 = vadd.f32 %v5883_v26, %v15000_v54  ;;  %v6078_v5 = vpop.f32.mrf.mxu0 }
 0x407   :  { %v5885_v48 = vpop.f32.mrf.mxu1 }
 0x408   :  { %v15080_v4 = vadd.f32 %v6076_v33, %v5884_v24  ;;  %v5886_v42 = vadd.f32 %v5885_v48, %v14996_v56  ;;  %6336 = vmatmul.mubr.bf16.gmra.mxu1 %v14971_v15  ;;  %v6080_v59 = vpop.f32.mrf.mxu0 }
 0x409   :  { %v5887_v41 = vpop.f32.mrf.mxu1  ;;  %6345 = vmatprep.mubr.bf16.mxu1 %v16510_v29 }
 0x40a   :  { %v15085_v38 = vadd.f32 %v6078_v5, %v5886_v42  ;;  %v5888_v52 = vadd.f32 %v5887_v41, %v15000_v54  ;;  %v6084_v45 = vpop.f32.mrf.mxu0  ;;  %6523 = vmatmul.mubr.bf16.gmra.mxu0 %v16555_v39  ;;  %v16557_v42 = vld [vmem:[#allocation33_spill] sm:$0xff] }
 0x40b   :  { %v5891_v36 = vpop.f32.mrf.mxu1  ;;  %6530 = vmatprep.mubr.bf16.mxu0 %v16556_v23 }
 0x40c   :  { %v15089_v27 = vadd.f32 %v6080_v59, %v5888_v52  ;;  %v5892_v60 = vadd.f32 %v5891_v36, %v14996_v56  ;;  %v6086_v31 = vpop.f32.mrf.mxu0  ;;  %v16558_v52 = vld [vmem:[#allocation36_spill] sm:$0xff] }
 0x40d   :  { %v5893_v18 = vpop.f32.mrf.mxu1 }
 0x40e   :  { %v15093_v46 = vadd.f32 %v6084_v45, %v5892_v60  ;;  %v5894_v61 = vadd.f32 %v5893_v18, %v15000_v54  ;;  %v6088_v32 = vpop.f32.mrf.mxu0 }
 0x40f   :  { %v5895_v50 = vpop.f32.mrf.mxu1 }
 0x410   :  { %v15096_v22 = vadd.f32 %v6086_v31, %v5894_v61  ;;  %v5896_v51 = vadd.f32 %v5895_v50, %v14996_v56  ;;  %6346 = vmatmul.mubr.bf16.gmra.mxu1 %v14990_v58  ;;  %v6090_v26 = vpop.f32.mrf.mxu0 }
 0x411   :  { %v5897_v11 = vpop.f32.mrf.mxu1  ;;  %6355 = vmatprep.mubr.bf16.mxu1 %v16510_v29 }
 0x412   :  { %v15101_v33 = vadd.f32 %v6088_v32, %v5896_v51  ;;  %v5898_v24 = vadd.f32 %v5897_v11, %v15000_v54  ;;  %v6094_v5 = vpop.f32.mrf.mxu0  ;;  %6531 = vmatmul.mubr.bf16.gmra.mxu0 %v16557_v42 }
 0x413   :  { %v5901_v48 = vpop.f32.mrf.mxu1  ;;  %6538 = vmatprep.mubr.bf16.mxu0 %v16558_v52 }
 0x414   :  { %v15105_v41 = vadd.f32 %v6090_v26, %v5898_v24  ;;  %v5902_v59 = vadd.f32 %v5901_v48, %v14996_v56  ;;  %v6096_v45 = vpop.f32.mrf.mxu0  ;;  %v16559_v48 = vld [vmem:[#allocation35_spill] sm:$0xff] }
 0x415   :  { %v5903_v36 = vpop.f32.mrf.mxu1 }
 0x416   :  { %v15109_v39 = vadd.f32 %v6094_v5, %v5902_v59  ;;  %v5904_v60 = vadd.f32 %v5903_v36, %v15000_v54  ;;  %v6098_v18 = vpop.f32.mrf.mxu0 }
 0x417   :  { %v5905_v23 = vpop.f32.mrf.mxu1 }
 0x418   :  { %v15112_v31 = vadd.f32 %v6096_v45, %v5904_v60  ;;  %v5906_v61 = vadd.f32 %v5905_v23, %v14996_v56  ;;  %6356 = vmatmul.mubr.bf16.gmra.mxu1 %v14983_v21  ;;  %v6100_v32 = vpop.f32.mrf.mxu0 }
 0x419   :  { %v5907_v50 = vpop.f32.mrf.mxu1  ;;  %6365 = vmatprep.mubr.bf16.mxu1 %v16510_v29 }
 0x41a   :  { %v15117_v51 = vadd.f32 %v6098_v18, %v5906_v61  ;;  %v5908_v11 = vadd.f32 %v5907_v50, %v15000_v54  ;;  %v6104_v24 = vpop.f32.mrf.mxu0  ;;  %6539 = vmatmul.mubr.bf16.gmra.mxu0 %v16559_v48  ;;  %v10626_v50 = vld [vmem:[%s16224_s5 + $0x70] ss:$8 sps:$4 sm:$0xff]  }
 0x41b   :  { %v5911_v26 = vpop.f32.mrf.mxu1  ;;  %9801 = vmatprep.mubr.bf16.mxu0 %v14815_v49 }
 0x41c   :  { %v15121_v5 = vadd.f32 %v6100_v32, %v5908_v11  ;;  %v5912_v42 = vadd.f32 %v5911_v26, %v14996_v56  ;;  %v6106_v52 = vpop.f32.mrf.mxu0  ;;  %v10631_v11 = vld [vmem:[%s16224_s5 + $0x64] ss:$8 sps:$4 sm:$0xff]  }
 0x41d   :  { %v5913_v59 = vpop.f32.mrf.mxu1 }
 0x41e   :  { %v15125_v36 = vadd.f32 %v6104_v24, %v5912_v42  ;;  %v5914_v45 = vadd.f32 %v5913_v59, %v15000_v54  ;;  %v6108_v23 = vpop.f32.mrf.mxu0 }
 0x41f   :  { %v5915_v60 = vpop.f32.mrf.mxu1 }
 0x420   :  { %v15128_v18 = vadd.f32 %v6106_v52, %v5914_v45  ;;  %v5916_v61 = vadd.f32 %v5915_v60, %v14996_v56  ;;  %6366 = vmatmul.mubr.bf16.gmra.mxu1 %v15006_v28  ;;  %v6110_v49 = vpop.f32.mrf.mxu0  ;;  %v10629_v45 = vld [vmem:[%s16224_s5 + $0x60] ss:$8 sps:$4 sm:$0xff]  }
 0x421   :  { %v5917_v32 = vpop.f32.mrf.mxu1  ;;  %6375 = vmatprep.mubr.bf16.mxu1 %v16510_v29 }
 0x422   :  { %v15139_v26 = vadd.f32 %v6108_v23, %v5916_v61  ;;  %v5918_v24 = vadd.f32 %v5917_v32, %v15000_v54  ;;  %v6114_v42 = vpop.f32.mrf.mxu0  ;;  %9802 = vmatmul.mubr.bf16.vlgmr.msra.gmra.mxu0 %v14806_v37  ;;  %v10634_v61 = vld [vmem:[%s16224_s5 + $0x54] ss:$8 sps:$4 sm:$0xff]  }
 0x423   :  { %v5921_v48 = vpop.f32.mrf.mxu1  ;;  %9805 = vmatprep.mubr.bf16.mxu0 %v14861_v55  ;;  %7314 = vmatpush1.bf16.msra.mxu0 %v10626_v50  ;;  %v10632_v50 = vld [vmem:[%s16224_s5 + $0x50] ss:$8 sps:$4 sm:$0xff]  }
 0x424   :  { %v15143_v59 = vadd.f32 %v6110_v49, %v5918_v24  ;;  %v5922_v52 = vadd.f32 %v5921_v48, %v14996_v56  ;;  %v6116_v23 = vpop.f32.mrf.mxu0  ;;  %7315 = vmatprep.subr.bf16.mxu0 %v10631_v11 }
 0x425   :  { %v5923_v60 = vpop.f32.mrf.mxu1 }
 0x426   :  { %v15153_v32 = vadd.f32 %v6114_v42, %v5922_v52  ;;  %v5924_v37 = vadd.f32 %v5923_v60, %v15000_v54  ;;  %v6118_v24 = vpop.f32.mrf.mxu0  ;;  %v10637_v42 = vld [vmem:[%s16224_s5 + $0x44] ss:$8 sps:$4 sm:$0xff]  }
 0x427   :  { %v5925_v49 = vpop.f32.mrf.mxu1  ;;  %7316 = vmatpush1.bf16.msra.mxu0 %v10629_v45 }
 0x428   :  { %v15156_v48 = vadd.f32 %v6116_v23, %v5924_v37  ;;  %v5926_v55 = vadd.f32 %v5925_v49, %v14996_v56  ;;  %6376 = vmatmul.mubr.bf16.gmra.mxu1 %v15019_v12  ;;  %v6120_v43 = vpop.f32.mrf.mxu0  ;;  %7317 = vmatprep.subr.bf16.mxu0 %v10634_v61 }
 0x429   :  { %v5927_v11 = vpop.f32.mrf.mxu1  ;;  %6579 = vmatprep.mubr.bf16.mxu1 %v16560_v44  ;;  %v10635_v44 = vld [vmem:[%s16224_s5 + $0x40] ss:$8 sps:$4 sm:$0xff]  }
 0x42a   :  { %v15167_v52 = vadd.f32 %v6118_v24, %v5926_v55  ;;  %v5928_v60 = vadd.f32 %v5927_v11, %v15000_v54  ;;  %v6124_v37 = vpop.f32.mrf.mxu0  ;;  %9806 = vmatmul.mubr.bf16.gmra.mxu0 %v14852_v19  ;;  %v10640_v55 = vld [vmem:[%s16224_s5 + $0x34] ss:$8 sps:$4 sm:$0xff]  }
 0x42b   :  { %v5931_v23 = vpop.f32.mrf.mxu1  ;;  %9809 = vmatprep.mubr.bf16.mxu0 %v14908_v57  ;;  %7318 = vmatpush1.bf16.msra.mxu0 %v10632_v50  ;;  %v10674_v57 = vld [vmem:[%s16224_s5 + $0x170] ss:$8 sps:$4 sm:$0xff]  }
 0x42c   :  { %16561 = vst [vmem:[#allocation19_spill] sm:$0xff] %v15167_v52  ;;  %v15171_v45 = vadd.f32 %v6120_v43, %v5928_v60  ;;  %v5932_v49 = vadd.f32 %v5931_v23, %v14996_v56  ;;  %v6126_v24 = vpop.f32.mrf.mxu0  ;;  %7319 = vmatprep.subr.bf16.mxu0 %v10637_v42  ;;  %v10679_v60 = vld [vmem:[%s16224_s5 + $0x164] ss:$8 sps:$4 sm:$0xff]  }
 0x42d   :  { %v5933_v61 = vpop.f32.mrf.mxu1  ;;  %v10643_v52 = vld [vmem:[%s16224_s5 + $0x24] ss:$8 sps:$4 sm:$0xff]  }
 0x42e   :  { %16562 = vst [vmem:[#allocation22_spill] sm:$0xff] %v15171_v45  ;;  %v15181_v11 = vadd.f32 %v6124_v37, %v5932_v49  ;;  %v5934_v19 = vadd.f32 %v5933_v61, %v15000_v54  ;;  %v6128_v50 = vpop.f32.mrf.mxu0  ;;  %v16564_v45 = vld [vmem:[#allocation50_spill] sm:$0xff]  ;;  %v10638_v37 = vld [vmem:[%s16224_s5 + $0x30] ss:$8 sps:$4 sm:$0xff]  }
 0x42f   :  { %v5935_v43 = vpop.f32.mrf.mxu1  ;;  %7320 = vmatpush1.bf16.msra.mxu0 %v10635_v44 }
 0x430   :  { %16563 = vst [vmem:[#allocation21_spill] sm:$0xff] %v15181_v11  ;;  %v15190_v23 = vadd.f32 %v6126_v24, %v5934_v19  ;;  %v5936_v42 = vadd.f32 %v5935_v43, %v14996_v56  ;;  %6580 = vmatmul.mubr.bf16.vlgmr.msra.gmra.mxu1 %v16564_v45  ;;  %v6130_v61 = vpop.f32.mrf.mxu0  ;;  %v16565_v11 = vld [vmem:[#allocation53_spill] sm:$0xff]  ;;  %7321 = vmatprep.subr.bf16.mxu0 %v10640_v55  ;;  %v10677_v45 = vld [vmem:[%s16224_s5 + $0x160] ss:$8 sps:$4 sm:$0xff]  }
 0x431   :  { %v5937_v49 = vpop.f32.mrf.mxu1  ;;  %6587 = vmatprep.mubr.bf16.mxu1 %v16565_v11  ;;  %7507 = vmatpush1.bf16.msra.mxu1 %v10674_v57  ;;  %v10682_v55 = vld [vmem:[%s16224_s5 + $0x154] ss:$8 sps:$4 sm:$0xff]   ;;  %v10641_v57 = vld [vmem:[%s16224_s5 + $0x20] ss:$8 sps:$4 sm:$0xff]  }
 0x432   :  { %v15201_v24 = vadd.f32 %v6128_v50, %v5936_v42  ;;  %v5938_v19 = vadd.f32 %v5937_v49, %v15000_v54  ;;  %v6134_v43 = vpop.f32.mrf.mxu0  ;;  %9810 = vmatmul.mubr.bf16.gmra.mxu0 %v14898_v14  ;;  %7508 = vmatprep.subr.bf16.mxu1 %v10679_v60  ;;  %v10646_v14 = vld [vmem:[%s16224_s5 + $0x14] ss:$8 sps:$4 sm:$0xff]  }
 0x433   :  { %v5941_v44 = vpop.f32.mrf.mxu1  ;;  %9813 = vmatprep.mubr.bf16.mxu0 %v14940_v17  ;;  %7322 = vmatpush1.bf16.msra.mxu0 %v10638_v37  ;;  %v10680_v17 = vld [vmem:[%s16224_s5 + $0x150] ss:$8 sps:$4 sm:$0xff]  }
 0x434   :  { %v15211_v11 = vadd.f32 %v6130_v61, %v5938_v19  ;;  %v5942_v50 = vadd.f32 %v5941_v44, %v14996_v56  ;;  %v6136_v49 = vpop.f32.mrf.mxu0  ;;  %7323 = vmatprep.subr.bf16.mxu0 %v10643_v52  ;;  %v10685_v52 = vld [vmem:[%s16224_s5 + $0x144] ss:$8 sps:$4 sm:$0xff]  }
 0x435   :  { %v5943_v42 = vpop.f32.mrf.mxu1  ;;  %7509 = vmatpush1.bf16.msra.mxu1 %v10677_v45  ;;  %v10644_v45 = vld [vmem:[%s16224_s5 + $0x10] ss:$8 sps:$4 sm:$0xff]  }
 0x436   :  { %16566 = vst [vmem:[#allocation24_spill] sm:$0xff] %v15211_v11  ;;  %v15221_v60 = vadd.f32 %v6134_v43, %v5942_v50  ;;  %v5944_v61 = vadd.f32 %v5943_v42, %v15000_v54  ;;  %v6138_v19 = vpop.f32.mrf.mxu0  ;;  %7510 = vmatprep.subr.bf16.mxu1 %v10682_v55  ;;  %v16568_v43 = vld [vmem:[#allocation52_spill] sm:$0xff]  ;;  %v10649_v55 = vld [vmem:[%s16224_s5 + $0x4] ss:$8 sps:$4 sm:$0xff]  }
 0x437   :  { %v5945_v37 = vpop.f32.mrf.mxu1  ;;  %7324 = vmatpush1.bf16.msra.mxu0 %v10641_v57  ;;  %v10683_v57 = vld [vmem:[%s16224_s5 + $0x140] ss:$8 sps:$4 sm:$0xff]  }
 0x438   :  { %16567 = vst [vmem:[#allocation68_spill] sm:$0xff] %v15221_v60  ;;  %v15230_v44 = vadd.f32 %v6136_v49, %v5944_v61  ;;  %v5946_v11 = vadd.f32 %v5945_v37, %v14996_v56  ;;  %6588 = vmatmul.mubr.bf16.gmra.mxu1 %v16568_v43  ;;  %v6140_v42 = vpop.f32.mrf.mxu0  ;;  %v16569_v60 = vld [vmem:[#allocation55_spill] sm:$0xff]  ;;  %7325 = vmatprep.subr.bf16.mxu0 %v10646_v14 }
 0x439   :  { %v5947_v50 = vpop.f32.mrf.mxu1  ;;  %6595 = vmatprep.mubr.bf16.mxu1 %v16569_v60  ;;  %7511 = vmatpush1.bf16.msra.mxu1 %v10680_v17 }
 0x43a   :  { %v15241_v49 = vadd.f32 %v6138_v19, %v5946_v11  ;;  %v5948_v61 = vadd.f32 %v5947_v50, %v15000_v54  ;;  %v6144_v43 = vpop.f32.mrf.mxu0  ;;  %9814 = vmatmul.mubr.bf16.gmra.mxu0 %v14933_v9  ;;  %7512 = vmatprep.subr.bf16.mxu1 %v10685_v52  ;;  %v10647_v11 = vld [vmem:[%s16224_s5] ss:$8 sps:$4 sm:$0xff]   ;;  %v10652_v50 = vld [vmem:[%s16224_s5 + $0xf4] ss:$8 sps:$4 sm:$0xff]  }
 0x43b   :  { %v5951_v37 = vpop.f32.mrf.mxu1  ;;  %9817 = vmatprep.mubr.bf16.mxu0 %v14963_v7  ;;  %7326 = vmatpush1.bf16.msra.mxu0 %v10644_v45 }
 0x43c   :  { %16570 = vst [vmem:[#allocation23_spill] sm:$0xff] %v15241_v49  ;;  %v15248_v60 = vadd.f32 %v6140_v42, %v5948_v61  ;;  %v5952_v14 = vadd.f32 %v5951_v37, %v14996_v56  ;;  %v6146_v19 = vpop.f32.mrf.mxu0  ;;  %7327 = vmatprep.subr.bf16.mxu0 %v10649_v55  ;;  %v16572_v37 = vld [vmem:[#allocation54_spill] sm:$0xff]  ;;  %v10650_v55 = vld [vmem:[%s16224_s5 + $0xf0] ss:$8 sps:$4 sm:$0xff]  }
 0x43d   :  { %v5953_v17 = vpop.f32.mrf.mxu1  ;;  %7513 = vmatpush1.bf16.msra.mxu1 %v10683_v57  ;;  %v10655_v57 = vld [vmem:[%s16224_s5 + $0xe4] ss:$8 sps:$4 sm:$0xff]  }
 0x43e   :  { %16571 = vst [vmem:[#allocation26_spill] sm:$0xff] %v15248_v60  ;;  %v15258_v9 = vadd.f32 %v6144_v43, %v5952_v14  ;;  %v5954_v52 = vadd.f32 %v5953_v17, %v15000_v54  ;;  %v6148_v61 = vpop.f32.mrf.mxu0  ;;  %v16573_v43 = vld [vmem:[#allocation38_spill] sm:$0xff] }
 0x43f   :  { %v5955_v42 = vpop.f32.mrf.mxu1  ;;  %7328 = vmatpush1.bf16.msra.mxu0 %v10647_v11 }
 0x440   :  { %v15261_v7 = vadd.f32 %v6146_v19, %v5954_v52  ;;  %v5956_v45 = vadd.f32 %v5955_v42, %v14996_v56  ;;  %6596 = vmatmul.mubr.bf16.gmra.mxu1 %v16572_v37  ;;  %v6150_v49 = vpop.f32.mrf.mxu0  ;;  %7329 = vmatprep.subr.bf16.mxu0 %v10652_v50  ;;  %v10653_v50 = vld [vmem:[%s16224_s5 + $0xe0] ss:$8 sps:$4 sm:$0xff]  }
 0x441   :  { %v5957_v60 = vpop.f32.mrf.mxu1  ;;  %6603 = vmatprep.mubr.bf16.mxu1 %v16573_v43 }
 0x442   :  { %v15272_v14 = vadd.f32 %v6148_v61, %v5956_v45  ;;  %v5958_v17 = vadd.f32 %v5957_v60, %v15000_v54  ;;  %v6154_v52 = vpop.f32.mrf.mxu0  ;;  %9818 = vmatmul.mubr.bf16.gmra.mxu0 %v14959_v34  ;;  %v10686_v61 = vld [vmem:[%s16224_s5 + $0x130] ss:$8 sps:$4 sm:$0xff]   ;;  %v10688_v60 = vld [vmem:[%s16224_s5 + $0x134] ss:$8 sps:$4 sm:$0xff]  }
 0x443   :  { %v5961_v19 = vpop.f32.mrf.mxu1  ;;  %9821 = vmatprep.mubr.bf16.mxu0 %v14975_v0  ;;  %7330 = vmatpush2.bf16.msra.mxu0 %v10650_v55  ;;  %v10658_v0 = vld [vmem:[%s16224_s5 + $0xd4] ss:$8 sps:$4 sm:$0xff]  }
 0x444   :  { %16574 = vst [vmem:[#allocation25_spill] sm:$0xff] %v15272_v14  ;;  %v15276_v11 = vadd.f32 %v6150_v49, %v5958_v17  ;;  %v5962_v42 = vadd.f32 %v5961_v19, %v14996_v56  ;;  %v6156_v49 = vpop.f32.mrf.mxu0  ;;  %7331 = vmatprep.subr.bf16.mxu0 %v10655_v57  ;;  %7514 = vmatprep.subr.bf16.mxu1 %v10688_v60  ;;  %v10656_v57 = vld [vmem:[%s16224_s5 + $0xd0] ss:$8 sps:$4 sm:$0xff]  }
 0x445   :  { %v5963_v34 = vpop.f32.mrf.mxu1  ;;  %7515 = vmatpush1.bf16.msra.mxu1 %v10686_v61  ;;  %v10661_v61 = vld [vmem:[%s16224_s5 + $0xc4] ss:$8 sps:$4 sm:$0xff]  }
 0x446   :  { %16575 = vst [vmem:[#allocation6_spill] sm:$0xff] %v15276_v11  ;;  %v15292_v45 = vadd.f32 %v6154_v52, %v5962_v42  ;;  %v5964_v37 = vadd.f32 %v5963_v34, %v15000_v54  ;;  %v6158_v43 = vpop.f32.mrf.mxu0  ;;  %v16576_v11 = vld [vmem:[#allocation56_spill] sm:$0xff] }
 0x447   :  { %v5965_v55 = vpop.f32.mrf.mxu1  ;;  %7332 = vmatpush2.bf16.msra.mxu0 %v10653_v50  ;;  %v16577_v42 = vld [vmem:[#allocation40_spill] sm:$0xff] }
 0x448   :  { %v15295_v17 = vadd.f32 %v6156_v49, %v5964_v37  ;;  %v5966_v19 = vadd.f32 %v5965_v55, %v14996_v56  ;;  %6604 = vmatmul.mubr.bf16.gmra.mxu1 %v16576_v11  ;;  %v6160_v52 = vpop.f32.mrf.mxu0  ;;  %7333 = vmatprep.subr.bf16.mxu0 %v10658_v0  ;;  %v10659_v0 = vld [vmem:[%s16224_s5 + $0xc0] ss:$8 sps:$4 sm:$0xff]  }
 0x449   :  { %v5967_v14 = vpop.f32.mrf.mxu1  ;;  %6611 = vmatprep.mubr.bf16.mxu1 %v16577_v42 }
 0x44a   :  { %v15306_v60 = vadd.f32 %v6158_v43, %v5966_v19  ;;  %v5968_v34 = vadd.f32 %v5967_v14, %v15000_v54  ;;  %v6164_v11 = vpop.f32.mrf.mxu0  ;;  %9822 = vmatmul.mubr.bf16.gmra.mxu0 %v14971_v15  ;;  %v10664_v14 = vld [vmem:[%s16224_s5 + $0xb4] ss:$8 sps:$4 sm:$0xff]  }
 0x44b   :  { %v5971_v49 = vpop.f32.mrf.mxu1  ;;  %9825 = vmatprep.mubr.bf16.mxu0 %v14990_v58  ;;  %7334 = vmatpush2.bf16.msra.mxu0 %v10656_v57  ;;  %v16580_v57 = vld [vmem:[#allocation37_spill] sm:$0xff] }
 0x44c   :  { %16578 = vst [vmem:[#allocation5_spill] sm:$0xff] %v15306_v60  ;;  %v15310_v50 = vadd.f32 %v6160_v52, %v5968_v34  ;;  %v5972_v37 = vadd.f32 %v5971_v49, %v14996_v56  ;;  %v6166_v43 = vpop.f32.mrf.mxu0  ;;  %7335 = vmatprep.subr.bf16.mxu0 %v10661_v61  ;;  %v10662_v61 = vld [vmem:[%s16224_s5 + $0xb0] ss:$8 sps:$4 sm:$0xff]   ;;  %v16581_v60 = vld [vmem:[#allocation42_spill] sm:$0xff] }
 0x44d   :  { %v5973_v55 = vpop.f32.mrf.mxu1 }
 0x44e   :  { %16579 = vst [vmem:[#allocation8_spill] sm:$0xff] %v15310_v50  ;;  %v15320_v19 = vadd.f32 %v6164_v11, %v5972_v37  ;;  %v5974_v15 = vadd.f32 %v5973_v55, %v15000_v54  ;;  %v6168_v42 = vpop.f32.mrf.mxu0  ;;  %v10667_v11 = vld [vmem:[%s16224_s5 + $0xa4] ss:$8 sps:$4 sm:$0xff]  }
 0x44f   :  { %v5975_v52 = vpop.f32.mrf.mxu1  ;;  %7336 = vmatpush2.bf16.msra.mxu0 %v10659_v0 }
 0x450   :  { %v15323_v34 = vadd.f32 %v6166_v43, %v5974_v15  ;;  %v5976_v58 = vadd.f32 %v5975_v52, %v14996_v56  ;;  %6612 = vmatmul.mubr.bf16.gmra.mxu1 %v16580_v57  ;;  %v6170_v50 = vpop.f32.mrf.mxu0  ;;  %7337 = vmatprep.subr.bf16.mxu0 %v10664_v14  ;;  %v10689_v14 = vld [vmem:[%s16224_s5 + $0x120] ss:$8 sps:$4 sm:$0xff]  }
 0x451   :  { %v5977_v49 = vpop.f32.mrf.mxu1  ;;  %6619 = vmatprep.mubr.bf16.mxu1 %v16581_v60  ;;  %v10665_v60 = vld [vmem:[%s16224_s5 + $0xa0] ss:$8 sps:$4 sm:$0xff]  }
 0x452   :  { %v15334_v37 = vadd.f32 %v6168_v42, %v5976_v58  ;;  %v5978_v55 = vadd.f32 %v5977_v49, %v15000_v54  ;;  %v6174_v15 = vpop.f32.mrf.mxu0  ;;  %9826 = vmatmul.mubr.bf16.gmra.mxu0 %v14983_v21  ;;  %v10691_v42 = vld [vmem:[%s16224_s5 + $0x124] ss:$8 sps:$4 sm:$0xff]  }
 0x453   :  { %v5981_v43 = vpop.f32.mrf.mxu1  ;;  %9829 = vmatprep.mubr.bf16.mxu0 %v15006_v28  ;;  %7338 = vmatpush2.bf16.msra.mxu0 %v10662_v61  ;;  %v10670_v28 = vld [vmem:[%s16224_s5 + $0x94] ss:$8 sps:$4 sm:$0xff]  }
 0x454   :  { %16582 = vst [vmem:[#allocation69_spill] sm:$0xff] %v15334_v37  ;;  %v15338_v0 = vadd.f32 %v6170_v50, %v5978_v55  ;;  %v5982_v52 = vadd.f32 %v5981_v43, %v14996_v56  ;;  %v6176_v50 = vpop.f32.mrf.mxu0  ;;  %7339 = vmatprep.subr.bf16.mxu0 %v10667_v11  ;;  %7516 = vmatprep.subr.bf16.mxu1 %v10691_v42  ;;  %v10668_v11 = vld [vmem:[%s16224_s5 + $0x90] ss:$8 sps:$4 sm:$0xff]  }
 0x455   :  { %v5983_v21 = vpop.f32.mrf.mxu1  ;;  %7517 = vmatpush1.bf16.msra.mxu1 %v10689_v14  ;;  %v10673_v14 = vld [vmem:[%s16224_s5 + $0x84] ss:$8 sps:$4 sm:$0xff]  }
 0x456   :  { %16583 = vst [vmem:[#allocation71_spill] sm:$0xff] %v15338_v0  ;;  %v15354_v58 = vadd.f32 %v6174_v15, %v5982_v52  ;;  %v5984_v57 = vadd.f32 %v5983_v21, %v15000_v54  ;;  %v6178_v49 = vpop.f32.mrf.mxu0  ;;  %v16585_v0 = vld [vmem:[#allocation39_spill] sm:$0xff] }
 0x457   :  { %v5985_v61 = vpop.f32.mrf.mxu1  ;;  %7340 = vmatpush2.bf16.msra.mxu0 %v10665_v60  ;;  %v16586_v52 = vld [vmem:[#allocation43_spill] sm:$0xff] }
 0x458   :  { %v15357_v55 = vadd.f32 %v6176_v50, %v5984_v57  ;;  %v5986_v43 = vadd.f32 %v5985_v61, %v14996_v56  ;;  %6620 = vmatmul.mubr.bf16.gmra.mxu1 %v16585_v0  ;;  %v6180_v15 = vpop.f32.mrf.mxu0  ;;  %7341 = vmatprep.subr.bf16.mxu0 %v10670_v28  ;;  %v10671_v28 = vld [vmem:[%s16224_s5 + $0x80] ss:$8 sps:$4 sm:$0xff]  }
 0x459   :  { %v5987_v37 = vpop.f32.mrf.mxu1  ;;  %6627 = vmatprep.mubr.bf16.mxu1 %v16586_v52 }
 0x45a   :  { %16584 = vst [vmem:[#allocation70_spill] sm:$0xff] %v15357_v55  ;;  %v15368_v42 = vadd.f32 %v6178_v49, %v5986_v43  ;;  %v5988_v21 = vadd.f32 %v5987_v37, %v15000_v54  ;;  %v6184_v0 = vpop.f32.mrf.mxu0  ;;  %9830 = vmatmul.mubr.bf16.gmra.mxu0 %v15019_v12 }
 0x45b   :  { %v5991_v50 = vpop.f32.mrf.mxu1  ;;  %7342 = vmatpush2.bf16.msra.mxu0 %v10668_v11 }
 0x45c   :  { %16587 = vst [vmem:[#allocation7_spill] sm:$0xff] %v15368_v42  ;;  %v15372_v60 = vadd.f32 %v6180_v15, %v5988_v21  ;;  %v5992_v57 = vadd.f32 %v5991_v50, %v14996_v56  ;;  %v6186_v52 = vpop.f32.mrf.mxu0  ;;  %7343 = vmatprep.subr.bf16.mxu0 %v10673_v14  ;;  %v16591_v15 = vld [vmem:[#allocation41_spill] sm:$0xff]  ;;  %v16592_v50 = vld [vmem:[#allocation44_spill] sm:$0xff] }
 0x45d   :  { %v5993_v61 = vpop.f32.mrf.mxu1 }
 0x45e   :  { %16588 = vst [vmem:[#allocation74_spill] sm:$0xff] %v15372_v60  ;;  %v15378_v49 = vadd.f32 %v6184_v0, %v5992_v57  ;;  %v5994_v37 = vadd.f32 %v5993_v61, %v15000_v54  ;;  %v6188_v42 = vpop.f32.mrf.mxu0  ;;  %v10692_v61 = vld [vmem:[%s16224_s5 + $0x110] ss:$8 sps:$4 sm:$0xff]  }
 0x45f   :  { %v5995_v43 = vpop.f32.mrf.mxu1  ;;  %7344 = vmatpush2.bf16.msra.mxu0 %v10671_v28 }
 0x460   :  { %16589 = vst [vmem:[#allocation10_spill] sm:$0xff] %v15378_v49  ;;  %v15381_v55 = vadd.f32 %v6186_v52, %v5994_v37  ;;  %v5996_v12 = vadd.f32 %v5995_v43, %v14996_v56  ;;  %6628 = vmatmul.mubr.bf16.gmra.mxu1 %v16591_v15  ;;  %v6190_v21 = vpop.f32.mrf.mxu0  ;;  %v10694_v56 = vld [vmem:[%s16224_s5 + $0x114] ss:$8 sps:$4 sm:$0xff]   ;;  %v16597_v43 = vld [vmem:[#allocation47_spill] sm:$0xff]  ;;  %v16604_v49 = vld [vmem:[#allocation58_spill] sm:$0xff] }
 0x461   :  { %v5997_v11 = vpop.f32.mrf.mxu1  ;;  %6635 = vmatprep.mubr.bf16.mxu1 %v16592_v50  ;;  %7518 = vmatprep.subr.bf16.mxu1 %v10694_v56  ;;  %v10697_v56 = vld [vmem:[%s16224_s5 + $0x104] ss:$8 sps:$4 sm:$0xff]  }
 0x462   :  { %16590 = vst [vmem:[#allocation72_spill] sm:$0xff] %v15381_v55  ;;  %v15386_v60 = vadd.f32 %v6188_v42, %v5996_v12  ;;  %v5998_v14 = vadd.f32 %v5997_v11, %v15000_v54  ;;  %v9369_v0 = vpop.f32.mrf.mxu0  ;;  %7519 = vmatpush1.bf16.msra.mxu1 %v10692_v61  ;;  %v16596_v42 = vld [vmem:[#allocation45_spill] sm:$0xff]  ;;  %v10695_v61 = vld [vmem:[%s16224_s5 + $0x100] ss:$8 sps:$4 sm:$0xff]   ;;  %v16603_v55 = vld [vmem:[#allocation48_spill] sm:$0xff] }
 0x463   :  { %7520 = vmatprep.subr.bf16.mxu1 %v10697_v56 }
 0x464   :  { %16593 = vst [vmem:[#allocation75_spill] sm:$0xff] %v15386_v60  ;;  %v15389_v57 = vadd.f32 %v6190_v21, %v5998_v14  ;;  %v9370_v28 = vpop.f32.mrf.mxu0 }
 0x465   :  { %v15397_v52 = vadd.f32 %v9370_v28, %v9369_v0  ;;  %v16601_v28 = vld [vmem:[#allocation49_spill] sm:$0xff] }
 0x466   :  { %16594 = vst [vmem:[#allocation73_spill] sm:$0xff] %v15389_v57  ;;  %v9372_v37 = vpop.f32.mrf.mxu0  ;;  %v16600_v57 = vld [vmem:[#allocation46_spill] sm:$0xff]  ;;  %7521 = vmatpush1.bf16.msra.mxu1 %v10695_v61 }
 0x467   :  { %16595 = vst [vmem:[#allocation9_spill] sm:$0xff] %v15397_v52 }
 0x468   :  { %6636 = vmatmul.mubr.bf16.gmra.mxu1 %v16596_v42  ;;  %v9373_v54 = vpop.f32.mrf.mxu0 }
 0x469   :  { %6643 = vmatprep.mubr.bf16.mxu1 %v16597_v43  ;;  %v15401_v12 = vadd.f32 %v9373_v54, %v9372_v37 }
 0x46a   :  { %v9375_v15 = vpop.f32.mrf.mxu0 }
 0x46b   :  { %16598 = vst [vmem:[#allocation78_spill] sm:$0xff] %v15401_v12 }
 0x46c   :  { %v9376_v11 = vpop.f32.mrf.mxu0 }
 0x46d   :  { %v15403_v21 = vadd.f32 %v9376_v11, %v9375_v15 }
 0x46e   :  { %v9378_v50 = vpop.f32.mrf.mxu0 }
 0x46f   :  { %16599 = vst [vmem:[#allocation12_spill] sm:$0xff] %v15403_v21 }
 0x470   :  { %v6227_v14 = vpop.f32.mrf.mxu1  ;;  %6644 = vmatmul.mubr.bf16.gmra.mxu1 %v16600_v57  ;;  %v9379_v0 = vpop.f32.mrf.mxu0 }
 0x471   :  { %6651 = vmatprep.mubr.bf16.mxu1 %v16601_v28  ;;  %v15413_v37 = vadd.f32 %v9379_v0, %v9378_v50  ;;  %v6228_v54 = vadd.f32 %v6227_v14, %v15008_v16 }
 0x472   :  { %v6229_v42 = vpop.f32.mrf.mxu1  ;;  %v9381_v43 = vpop.f32.mrf.mxu0 }
 0x473   :  { %16602 = vst [vmem:[#allocation76_spill] sm:$0xff] %v15413_v37  ;;  %v6230_v57 = vadd.f32 %v6229_v42, %v15011_v20  ;;  %v6869_v52 = vmax.f32 %v6228_v54, 0.0 }
 0x474   :  { %v6231_v15 = vpop.f32.mrf.mxu1  ;;  %v9382_v28 = vpop.f32.mrf.mxu0 }
 0x475   :  { %v6232_v11 = vadd.f32 %v6231_v15, %v15016_v6  ;;  %v15418_v21 = vadd.f32 %v9382_v28, %v9381_v43  ;;  %v6870_v16 = vmax.f32 %v6230_v57, 0.0 }
 0x476   :  { %v6233_v12 = vpop.f32.mrf.mxu1  ;;  %v9384_v0 = vpop.f32.mrf.mxu0 }
 0x477   :  { %v6872_v60 = vmax.f32 %v6232_v11, 0.0  ;;  %v6234_v50 = vadd.f32 %v6233_v12, %v15022_v40 }
 0x478   :  { %v6237_v37 = vpop.f32.mrf.mxu1  ;;  %6652 = vmatmul.mubr.bf16.gmra.mxu1 %v16603_v55  ;;  %v9385_v61 = vpop.f32.mrf.mxu0 }
 0x479   :  { %v6965_v14 = vpack.c.bf16 %v6872_v60, %v6869_v52  ;;  %v6873_v56 = vmax.f32 %v6234_v50, 0.0  ;;  %6659 = vmatprep.mubr.bf16.mxu1 %v16604_v49  ;;  %v15423_v20 = vadd.f32 %v9385_v61, %v9384_v0  ;;  %v6238_v42 = vadd.f32 %v6237_v37, %v15026_v25  ;;  %v16605_v25 = vld [vmem:[#allocation57_spill] sm:$0xff] }
 0x47a   :  { %v6239_v6 = vpop.f32.mrf.mxu1  ;;  %v9387_v43 = vpop.f32.mrf.mxu0 }
 0x47b   :  { %v6966_v54 = vpack.c.bf16 %v6873_v56, %v6870_v16  ;;  %v6240_v40 = vadd.f32 %v6239_v6, %v15029_v62  ;;  %v6875_v52 = vmax.f32 %v6238_v42, 0.0  ;;  %v16606_v56 = vld [vmem:[#allocation60_spill] sm:$0xff] }
 0x47c   :  { %v6241_v15 = vpop.f32.mrf.mxu1  ;;  %v9388_v11 = vpop.f32.mrf.mxu0 }
 0x47d   :  { %v6242_v12 = vadd.f32 %v6241_v15, %v15034_v8  ;;  %7345 = vmatprep.mubr.bf16.mxu0 %v6966_v54  ;;  %v15428_v55 = vadd.f32 %v9388_v11, %v9387_v43  ;;  %v6876_v37 = vmax.f32 %v6240_v40, 0.0 }
 0x47e   :  { %v6243_v60 = vpop.f32.mrf.mxu1  ;;  %7346 = vmatmul.mubr.bf16.vlgmr.msra.gmra.mxu0 %v6965_v14  ;;  %v9390_v28 = vpop.f32.mrf.mxu0 }
 0x47f   :  { %v6878_v49 = vmax.f32 %v6242_v12, 0.0  ;;  %v6244_v57 = vadd.f32 %v6243_v60, %v15038_v30 }
 0x480   :  { %v6247_v50 = vpop.f32.mrf.mxu1  ;;  %6660 = vmatmul.mubr.bf16.gmra.mxu1 %v16605_v25  ;;  %v9391_v62 = vpop.f32.mrf.mxu0 }
 0x481   :  { %v6968_v0 = vpack.c.bf16 %v6878_v49, %v6875_v52  ;;  %v6879_v16 = vmax.f32 %v6244_v57, 0.0  ;;  %6667 = vmatprep.mubr.bf16.mxu1 %v16606_v56  ;;  %v15433_v8 = vadd.f32 %v9391_v62, %v9390_v28  ;;  %v6248_v6 = vadd.f32 %v6247_v50, %v15042_v2  ;;  %v16607_v2 = vld [vmem:[#allocation59_spill] sm:$0xff] }
 0x482   :  { %v6249_v61 = vpop.f32.mrf.mxu1  ;;  %v9393_v14 = vpop.f32.mrf.mxu0 }
 0x483   :  { %v6969_v42 = vpack.c.bf16 %v6879_v16, %v6876_v37  ;;  %v6250_v30 = vadd.f32 %v6249_v61, %v15045_v63  ;;  %v6881_v11 = vmax.f32 %v6248_v6, 0.0  ;;  %v16608_v37 = vld [vmem:[#allocation62_spill] sm:$0xff] }
 0x484   :  { %v6251_v43 = vpop.f32.mrf.mxu1  ;;  %v9394_v15 = vpop.f32.mrf.mxu0 }
 0x485   :  { %v6252_v54 = vadd.f32 %v6251_v43, %v15050_v3  ;;  %7355 = vmatprep.mubr.bf16.mxu0 %v6969_v42  ;;  %v15438_v40 = vadd.f32 %v9394_v15, %v9393_v14  ;;  %v6882_v28 = vmax.f32 %v6250_v30, 0.0 }
 0x486   :  { %v6253_v12 = vpop.f32.mrf.mxu1  ;;  %7356 = vmatmul.mubr.bf16.gmra.mxu0 %v6968_v0  ;;  %v9396_v49 = vpop.f32.mrf.mxu0 }
 0x487   :  { %v6884_v60 = vmax.f32 %v6252_v54, 0.0  ;;  %v6254_v52 = vadd.f32 %v6253_v12, %v15054_v13 }
 0x488   :  { %v6257_v57 = vpop.f32.mrf.mxu1  ;;  %6668 = vmatmul.mubr.bf16.gmra.mxu1 %v16607_v2  ;;  %v9397_v63 = vpop.f32.mrf.mxu0 }
 0x489   :  { %v6971_v50 = vpack.c.bf16 %v6884_v60, %v6881_v11  ;;  %v6885_v25 = vmax.f32 %v6254_v52, 0.0  ;;  %6675 = vmatprep.mubr.bf16.mxu1 %v16608_v37  ;;  %v15443_v3 = vadd.f32 %v9397_v63, %v9396_v49  ;;  %v6258_v62 = vadd.f32 %v6257_v57, %v15058_v47  ;;  %v16609_v47 = vld [vmem:[#allocation61_spill] sm:$0xff]  ;;  %v16610_v57 = vld [vmem:[#allocation64_spill] sm:$0xff] }
 0x48a   :  { %v6259_v16 = vpop.f32.mrf.mxu1  ;;  %v9399_v0 = vpop.f32.mrf.mxu0 }
 0x48b   :  { %v6972_v56 = vpack.c.bf16 %v6885_v25, %v6882_v28  ;;  %v6260_v13 = vadd.f32 %v6259_v16, %v15061_v10  ;;  %v6887_v30 = vmax.f32 %v6258_v62, 0.0 }
 0x48c   :  { %v6261_v61 = vpop.f32.mrf.mxu1  ;;  %v9400_v14 = vpop.f32.mrf.mxu0 }
 0x48d   :  { %v6262_v6 = vadd.f32 %v6261_v61, %v15066_v53  ;;  %7365 = vmatprep.mubr.bf16.mxu0 %v6972_v56  ;;  %v15448_v42 = vadd.f32 %v9400_v14, %v9399_v0  ;;  %v6888_v60 = vmax.f32 %v6260_v13, 0.0 }
 0x48e   :  { %v6263_v43 = vpop.f32.mrf.mxu1  ;;  %7366 = vmatmul.mubr.bf16.gmra.mxu0 %v6971_v50  ;;  %v9402_v12 = vpop.f32.mrf.mxu0 }
 0x48f   :  { %v6890_v54 = vmax.f32 %v6262_v6, 0.0  ;;  %v6264_v15 = vadd.f32 %v6263_v43, %v15070_v35 }
 0x490   :  { %v6267_v11 = vpop.f32.mrf.mxu1  ;;  %6676 = vmatmul.mubr.bf16.gmra.mxu1 %v16609_v47  ;;  %v9403_v10 = vpop.f32.mrf.mxu0 }
 0x491   :  { %v6974_v52 = vpack.c.bf16 %v6890_v54, %v6887_v30  ;;  %v6891_v49 = vmax.f32 %v6264_v15, 0.0  ;;  %6683 = vmatprep.mubr.bf16.mxu1 %v16610_v57  ;;  %v15453_v53 = vadd.f32 %v9403_v10, %v9402_v12  ;;  %v6268_v28 = vadd.f32 %v6267_v11, %v15077_v1  ;;  %v16611_v1 = vld [vmem:[#allocation63_spill] sm:$0xff]  ;;  %v16612_v15 = vld [vmem:[#allocation20_spill] sm:$0xff] }
 0x492   :  { %v6269_v2 = vpop.f32.mrf.mxu1  ;;  %v9405_v50 = vpop.f32.mrf.mxu0 }
 0x493   :  { %v6975_v25 = vpack.c.bf16 %v6891_v49, %v6888_v60  ;;  %v6270_v35 = vadd.f32 %v6269_v2, %v15080_v4  ;;  %v6893_v56 = vmax.f32 %v6268_v28, 0.0 }
 0x494   :  { %v6271_v63 = vpop.f32.mrf.mxu1  ;;  %v9406_v16 = vpop.f32.mrf.mxu0 }
 0x495   :  { %v6272_v37 = vadd.f32 %v6271_v63, %v15085_v38  ;;  %7375 = vmatprep.mubr.bf16.mxu0 %v6975_v25  ;;  %v15458_v62 = vadd.f32 %v9406_v16, %v9405_v50  ;;  %v6894_v43 = vmax.f32 %v6270_v35, 0.0 }
 0x496   :  { %v6273_v0 = vpop.f32.mrf.mxu1  ;;  %7376 = vmatmul.mubr.bf16.gmra.mxu0 %v6974_v52  ;;  %v9408_v6 = vpop.f32.mrf.mxu0 }
 0x497   :  { %v6896_v61 = vmax.f32 %v6272_v37, 0.0  ;;  %v6274_v13 = vadd.f32 %v6273_v0, %v15089_v27 }
 0x498   :  { %v6277_v14 = vpop.f32.mrf.mxu1  ;;  %6684 = vmatmul.mubr.bf16.gmra.mxu1 %v16611_v1  ;;  %v9409_v4 = vpop.f32.mrf.mxu0 }
 0x499   :  { %v6977_v30 = vpack.c.bf16 %v6896_v61, %v6893_v56  ;;  %v6897_v54 = vmax.f32 %v6274_v13, 0.0  ;;  %6691 = vmatprep.mubr.bf16.mxu1 %v16612_v15  ;;  %v15463_v38 = vadd.f32 %v9409_v4, %v9408_v6  ;;  %v6278_v11 = vadd.f32 %v6277_v14, %v15093_v46  ;;  %v16613_v46 = vld [vmem:[#allocation65_spill] sm:$0xff]  ;;  %v16614_v56 = vld [vmem:[#allocation67_spill] sm:$0xff] }
 0x49a   :  { %v6279_v12 = vpop.f32.mrf.mxu1  ;;  %v9411_v47 = vpop.f32.mrf.mxu0 }
 0x49b   :  { %v6978_v60 = vpack.c.bf16 %v6897_v54, %v6894_v43  ;;  %v6280_v27 = vadd.f32 %v6279_v12, %v15096_v22  ;;  %v6899_v28 = vmax.f32 %v6278_v11, 0.0 }
 0x49c   :  { %v6281_v52 = vpop.f32.mrf.mxu1  ;;  %v9412_v10 = vpop.f32.mrf.mxu0 }
 0x49d   :  { %v6282_v49 = vadd.f32 %v6281_v52, %v15101_v33  ;;  %7385 = vmatprep.mubr.bf16.mxu0 %v6978_v60  ;;  %v15468_v57 = vadd.f32 %v9412_v10, %v9411_v47  ;;  %v6900_v37 = vmax.f32 %v6280_v27, 0.0 }
 0x49e   :  { %v6283_v2 = vpop.f32.mrf.mxu1  ;;  %7386 = vmatmul.mubr.bf16.gmra.mxu0 %v6977_v30  ;;  %v9414_v63 = vpop.f32.mrf.mxu0 }
 0x49f   :  { %v6902_v50 = vmax.f32 %v6282_v49, 0.0  ;;  %v6284_v25 = vadd.f32 %v6283_v2, %v15105_v41 }
 0x4a0   :  { %v6287_v35 = vpop.f32.mrf.mxu1  ;;  %6692 = vmatmul.mubr.bf16.gmra.mxu1 %v16613_v46  ;;  %v9415_v22 = vpop.f32.mrf.mxu0 }
 0x4a1   :  { %v6980_v16 = vpack.c.bf16 %v6902_v50, %v6899_v28  ;;  %v6903_v0 = vmax.f32 %v6284_v25, 0.0  ;;  %6699 = vmatprep.mubr.bf16.mxu1 %v16614_v56  ;;  %v15473_v33 = vadd.f32 %v9415_v22, %v9414_v63  ;;  %v6288_v13 = vadd.f32 %v6287_v35, %v15109_v39  ;;  %v16615_v39 = vld [vmem:[#allocation66_spill] sm:$0xff] }
 0x4a2   :  { %v6289_v61 = vpop.f32.mrf.mxu1  ;;  %v9417_v6 = vpop.f32.mrf.mxu0 }
 0x4a3   :  { %v6981_v14 = vpack.c.bf16 %v6903_v0, %v6900_v37  ;;  %v6290_v41 = vadd.f32 %v6289_v61, %v15112_v31  ;;  %v6905_v15 = vmax.f32 %v6288_v13, 0.0 }
 0x4a4   :  { %v6291_v1 = vpop.f32.mrf.mxu1  ;;  %v9418_v30 = vpop.f32.mrf.mxu0 }
 0x4a5   :  { %v6292_v43 = vadd.f32 %v6291_v1, %v15117_v51  ;;  %7395 = vmatprep.mubr.bf16.mxu0 %v6981_v14  ;;  %v15478_v54 = vadd.f32 %v9418_v30, %v9417_v6  ;;  %v6906_v52 = vmax.f32 %v6290_v41, 0.0 }
 0x4a6   :  { %v6293_v4 = vpop.f32.mrf.mxu1  ;;  %7396 = vmatmul.mubr.bf16.gmra.mxu0 %v6980_v16  ;;  %v9420_v47 = vpop.f32.mrf.mxu0 }
 0x4a7   :  { %v6908_v12 = vmax.f32 %v6292_v43, 0.0  ;;  %v6294_v11 = vadd.f32 %v6293_v4, %v15121_v5 }
 0x4a8   :  { %v6297_v60 = vpop.f32.mrf.mxu1  ;;  %6700 = vmatmul.mubr.bf16.gmra.mxu1 %v16615_v39  ;;  %v9421_v31 = vpop.f32.mrf.mxu0 }
 0x4a9   :  { %v6983_v27 = vpack.c.bf16 %v6908_v12, %v6905_v15  ;;  %v6909_v49 = vmax.f32 %v6294_v11, 0.0  ;;  %7538 = vmatprep.mubr.bf16.mxu1 %v16510_v29  ;;  %v15483_v51 = vadd.f32 %v9421_v31, %v9420_v47  ;;  %v6298_v2 = vadd.f32 %v6297_v60, %v15125_v36  ;;  %v16616_v15 = vld [vmem:[#allocation19_spill] sm:$0xff] }
 0x4aa   :  { %v6299_v10 = vpop.f32.mrf.mxu1  ;;  %v9423_v28 = vpop.f32.mrf.mxu0 }
 0x4ab   :  { %v6984_v50 = vpack.c.bf16 %v6909_v49, %v6906_v52  ;;  %v6300_v5 = vadd.f32 %v6299_v10, %v15128_v18  ;;  %v6911_v16 = vmax.f32 %v6298_v2, 0.0  ;;  %v16617_v52 = vld [vmem:[#allocation22_spill] sm:$0xff] }
 0x4ac   :  { %v6301_v25 = vpop.f32.mrf.mxu1  ;;  %v9424_v35 = vpop.f32.mrf.mxu0 }
 0x4ad   :  { %v6302_v63 = vadd.f32 %v6301_v25, %v15139_v26  ;;  %7405 = vmatprep.mubr.bf16.mxu0 %v6984_v50  ;;  %v15488_v46 = vadd.f32 %v9424_v35, %v9423_v28  ;;  %v6912_v36 = vmax.f32 %v6300_v5, 0.0  ;;  %v16618_v25 = vld [vmem:[#allocation21_spill] sm:$0xff] }
 0x4ae   :  { %v6303_v37 = vpop.f32.mrf.mxu1  ;;  %7406 = vmatmul.mubr.bf16.gmra.mxu0 %v6983_v27  ;;  %v9426_v56 = vpop.f32.mrf.mxu0 }
 0x4af   :  { %v6914_v0 = vmax.f32 %v6302_v63, 0.0  ;;  %v6304_v22 = vadd.f32 %v6303_v37, %v15143_v59 }
 0x4b0   :  { %v6307_v61 = vpop.f32.mrf.mxu1  ;;  %v9427_v14 = vpop.f32.mrf.mxu0 }
 0x4b1   :  { %v6986_v13 = vpack.c.bf16 %v6914_v0, %v6911_v16  ;;  %v6915_v6 = vmax.f32 %v6304_v22, 0.0  ;;  %v15491_v1 = vadd.f32 %v9427_v14, %v9426_v56  ;;  %v6308_v26 = vadd.f32 %v6307_v61, %v15153_v32 }
 0x4b2   :  { %v6309_v18 = vpop.f32.mrf.mxu1  ;;  %v9429_v41 = vpop.f32.mrf.mxu0 }
 0x4b3   :  { %v6987_v43 = vpack.c.bf16 %v6915_v6, %v6912_v36  ;;  %v6310_v4 = vadd.f32 %v6309_v18, %v15156_v48  ;;  %v6917_v60 = vmax.f32 %v6308_v26, 0.0  ;;  %v16619_v6 = vld [vmem:[#allocation24_spill] sm:$0xff] }
 0x4b4   :  { %v6311_v30 = vpop.f32.mrf.mxu1  ;;  %v9430_v11 = vpop.f32.mrf.mxu0 }
 0x4b5   :  { %v6312_v12 = vadd.f32 %v6311_v30, %v16616_v15  ;;  %7415 = vmatprep.mubr.bf16.mxu0 %v6987_v43  ;;  %v15496_v59 = vadd.f32 %v9430_v11, %v9429_v41  ;;  %v6918_v32 = vmax.f32 %v6310_v4, 0.0 }
 0x4b6   :  { %v6313_v47 = vpop.f32.mrf.mxu1  ;;  %7416 = vmatmul.mubr.bf16.gmra.mxu0 %v6986_v13  ;;  %v9432_v49 = vpop.f32.mrf.mxu0 }
 0x4b7   :  { %v6920_v39 = vmax.f32 %v6312_v12, 0.0  ;;  %v6314_v27 = vadd.f32 %v6313_v47, %v16617_v52  ;;  %v16621_v52 = vld [vmem:[#allocation23_spill] sm:$0xff] }
 0x4b8   :  { %v6317_v31 = vpop.f32.mrf.mxu1  ;;  %v9433_v28 = vpop.f32.mrf.mxu0 }
 0x4b9   :  { %v6989_v10 = vpack.c.bf16 %v6920_v39, %v6917_v60  ;;  %v6921_v2 = vmax.f32 %v6314_v27, 0.0  ;;  %v15499_v50 = vadd.f32 %v9433_v28, %v9432_v49  ;;  %v6318_v5 = vadd.f32 %v6317_v31, %v16618_v25  ;;  %v16622_v28 = vld [vmem:[#allocation26_spill] sm:$0xff] }
 0x4ba   :  { %v6319_v48 = vpop.f32.mrf.mxu1  ;;  %v9435_v63 = vpop.f32.mrf.mxu0 }
 0x4bb   :  { %v6990_v35 = vpack.c.bf16 %v6921_v2, %v6918_v32  ;;  %v6320_v16 = vadd.f32 %v6319_v48, %v15190_v23  ;;  %v6923_v36 = vmax.f32 %v6318_v5, 0.0 }
 0x4bc   :  { %v6321_v37 = vpop.f32.mrf.mxu1  ;;  %v9436_v22 = vpop.f32.mrf.mxu0 }
 0x4bd   :  { %v6322_v0 = vadd.f32 %v6321_v37, %v15201_v24  ;;  %7425 = vmatprep.mubr.bf16.mxu0 %v6990_v35  ;;  %v15504_v56 = vadd.f32 %v9436_v22, %v9435_v63  ;;  %v6924_v41 = vmax.f32 %v6320_v16, 0.0  ;;  %v16620_v24 = vld [vmem:[#allocation68_spill] sm:$0xff] }
 0x4be   :  { %v6323_v61 = vpop.f32.mrf.mxu1  ;;  %7426 = vmatmul.mubr.bf16.gmra.mxu0 %v6989_v10  ;;  %v9438_v18 = vpop.f32.mrf.mxu0 }
 0x4bf   :  { %v6926_v13 = vmax.f32 %v6322_v0, 0.0  ;;  %v6324_v14 = vadd.f32 %v6323_v61, %v16619_v6  ;;  %v16623_v6 = vld [vmem:[#allocation25_spill] sm:$0xff] }
 0x4c0   :  { %v6327_v26 = vpop.f32.mrf.mxu1  ;;  %v9439_v4 = vpop.f32.mrf.mxu0 }
 0x4c1   :  { %v6992_v43 = vpack.c.bf16 %v6926_v13, %v6923_v36  ;;  %v6927_v30 = vmax.f32 %v6324_v14, 0.0  ;;  %v15507_v15 = vadd.f32 %v9439_v4, %v9438_v18  ;;  %v6328_v12 = vadd.f32 %v6327_v26, %v16620_v24  ;;  %v16624_v4 = vld [vmem:[#allocation6_spill] sm:$0xff] }
 0x4c2   :  { %v6329_v23 = vpop.f32.mrf.mxu1  ;;  %v9441_v11 = vpop.f32.mrf.mxu0 }
 0x4c3   :  { %v6993_v47 = vpack.c.bf16 %v6927_v30, %v6924_v41  ;;  %v6330_v39 = vadd.f32 %v6329_v23, %v15230_v44  ;;  %v6929_v10 = vmax.f32 %v6328_v12, 0.0 }
 0x4c4   :  { %v6331_v60 = vpop.f32.mrf.mxu1  ;;  %v9442_v49 = vpop.f32.mrf.mxu0 }
 0x4c5   :  { %v6332_v27 = vadd.f32 %v6331_v60, %v16621_v52  ;;  %7435 = vmatprep.mubr.bf16.mxu0 %v6993_v47  ;;  %v15512_v31 = vadd.f32 %v9442_v49, %v9441_v11  ;;  %v6930_v63 = vmax.f32 %v6330_v39, 0.0 }
 0x4c6   :  { %v6333_v32 = vpop.f32.mrf.mxu1  ;;  %7436 = vmatmul.mubr.bf16.gmra.mxu0 %v6992_v43  ;;  %v15515_v25 = vpop.f32.mrf.mxu0 }
 0x4c7   :  { %v6932_v2 = vmax.f32 %v6332_v27, 0.0  ;;  %v6334_v48 = vadd.f32 %v6333_v32, %v16622_v28 }
 0x4c8   :  { %v6337_v5 = vpop.f32.mrf.mxu1  ;;  %v15517_v16 = vpop.f32.mrf.mxu0 }
 0x4c9   :  { %v6995_v35 = vpack.c.bf16 %v6932_v2, %v6929_v10  ;;  %v6933_v37 = vmax.f32 %v6334_v48, 0.0  ;;  %v6338_v0 = vadd.f32 %v6337_v5, %v15258_v9  ;;  %v16625_v10 = vld [vmem:[#allocation5_spill] sm:$0xff] }
 0x4ca   :  { %v6339_v44 = vpop.f32.mrf.mxu1  ;;  %v9447_v22 = vpop.f32.mrf.mxu0 }
 0x4cb   :  { %v6996_v61 = vpack.c.bf16 %v6933_v37, %v6930_v63  ;;  %v6340_v13 = vadd.f32 %v6339_v44, %v15261_v7  ;;  %v6935_v43 = vmax.f32 %v6338_v0, 0.0  ;;  %v16626_v37 = vld [vmem:[#allocation8_spill] sm:$0xff] }
 0x4cc   :  { %v6341_v36 = vpop.f32.mrf.mxu1  ;;  %v9448_v18 = vpop.f32.mrf.mxu0 }
 0x4cd   :  { %v6342_v14 = vadd.f32 %v6341_v36, %v16623_v6  ;;  %7445 = vmatprep.mubr.bf16.mxu0 %v6996_v61  ;;  %v15522_v26 = vadd.f32 %v9448_v18, %v9447_v22  ;;  %v6936_v12 = vmax.f32 %v6340_v13, 0.0 }
 0x4ce   :  { %v6343_v41 = vpop.f32.mrf.mxu1  ;;  %7446 = vmatmul.mubr.bf16.gmra.mxu0 %v6995_v35  ;;  %v15525_v24 = vpop.f32.mrf.mxu0  ;;  %v10698_v35 = vld [vmem:[%s16226_s7 + $0x78] sm:$0xff]  }
 0x4cf   :  { %v6938_v30 = vmax.f32 %v6342_v14, 0.0  ;;  %v6344_v23 = vadd.f32 %v6343_v41, %v16624_v4  ;;  %9601 = vmatprep.subr.bf16.mxu0 %v10698_v35 }
 0x4d0   :  { %v6347_v9 = vpop.f32.mrf.mxu1  ;;  %v15527_v60 = vpop.f32.mrf.mxu0 }
 0x4d1   :  { %v6998_v11 = vpack.c.bf16 %v6938_v30, %v6935_v43  ;;  %v6939_v47 = vmax.f32 %v6344_v23, 0.0  ;;  %v6348_v7 = vadd.f32 %v6347_v9, %v15292_v45  ;;  %v16627_v23 = vld [vmem:[#allocation69_spill] sm:$0xff] }
 0x4d2   :  { %v6349_v39 = vpop.f32.mrf.mxu1  ;;  %v9453_v52 = vpop.f32.mrf.mxu0 }
 0x4d3   :  { %v6999_v27 = vpack.c.bf16 %v6939_v47, %v6936_v12  ;;  %v6350_v32 = vadd.f32 %v6349_v39, %v15295_v17  ;;  %v6941_v48 = vmax.f32 %v6348_v7, 0.0  ;;  %v10699_v17 = vld [vmem:[%s16226_s7 + $0x38] sm:$0xff]  }
 0x4d4   :  { %v6351_v49 = vpop.f32.mrf.mxu1  ;;  %v9454_v28 = vpop.f32.mrf.mxu0  ;;  %9602 = vmatpush3.bf16.msra.mxu0 %v10699_v17  ;;  %v16632_v17 = vld [vmem:[#allocation7_spill] sm:$0xff] }
 0x4d5   :  { %v6352_v2 = vadd.f32 %v6351_v49, %v16625_v10  ;;  %7455 = vmatprep.mubr.bf16.mxu0 %v6999_v27  ;;  %v15532_v5 = vadd.f32 %v9454_v28, %v9453_v52  ;;  %v6942_v61 = vmax.f32 %v6350_v32, 0.0  ;;  %v16628_v52 = vld [vmem:[#allocation71_spill] sm:$0xff] }
 0x4d6   :  { %v6353_v63 = vpop.f32.mrf.mxu1  ;;  %7456 = vmatmul.mubr.bf16.gmra.mxu0 %v6998_v11  ;;  %v15538_v0 = vpop.f32.mrf.mxu0 }
 0x4d7   :  { %v6944_v45 = vmax.f32 %v6352_v2, 0.0  ;;  %v6354_v44 = vadd.f32 %v6353_v63, %v16626_v37  ;;  %v16631_v37 = vld [vmem:[#allocation70_spill] sm:$0xff] }
 0x4d8   :  { %v6357_v22 = vpop.f32.mrf.mxu1  ;;  %v15543_v6 = vpop.f32.mrf.mxu0 }
 0x4d9   :  { %v7001_v36 = vpack.c.bf16 %v6944_v45, %v6941_v48  ;;  %v6945_v13 = vmax.f32 %v6354_v44, 0.0  ;;  %v6358_v18 = vadd.f32 %v6357_v22, %v15320_v19 }
 0x4da   :  { %v6359_v14 = vpop.f32.mrf.mxu1  ;;  %v9459_v41 = vpop.f32.mrf.mxu0 }
 0x4db   :  { %v7002_v43 = vpack.c.bf16 %v6945_v13, %v6942_v61  ;;  %v6360_v4 = vadd.f32 %v6359_v14, %v15323_v34  ;;  %v6947_v7 = vmax.f32 %v6358_v18, 0.0  ;;  %v16633_v18 = vld [vmem:[#allocation74_spill] sm:$0xff] }
 0x4dc   :  { %v6361_v30 = vpop.f32.mrf.mxu1  ;;  %v9460_v12 = vpop.f32.mrf.mxu0 }
 0x4dd   :  { %v6362_v9 = vadd.f32 %v6361_v30, %v16627_v23  ;;  %7465 = vmatprep.mubr.bf16.mxu0 %v7002_v43  ;;  %v15548_v11 = vadd.f32 %v9460_v12, %v9459_v41  ;;  %v6948_v32 = vmax.f32 %v6360_v4, 0.0  ;;  %v10701_v30 = vld [vmem:[%s16226_s7 + $0x30] sm:$0xff]  }
 0x4de   :  { %v6363_v47 = vpop.f32.mrf.mxu1  ;;  %7466 = vmatmul.mubr.bf16.gmra.mxu0 %v7001_v36  ;;  %v15551_v49 = vpop.f32.mrf.mxu0 }
 0x4df   :  { %v6950_v39 = vmax.f32 %v6362_v9, 0.0  ;;  %v6364_v27 = vadd.f32 %v6363_v47, %v16628_v52  ;;  %16629 = vst [vmem:[#allocation79_spill] sm:$0xff] %v15551_v49 }
 0x4e0   :  { %v6367_v19 = vpop.f32.mrf.mxu1  ;;  %v15553_v28 = vpop.f32.mrf.mxu0 }
 0x4e1   :  { %v7004_v10 = vpack.c.bf16 %v6950_v39, %v6947_v7  ;;  %v6951_v2 = vmax.f32 %v6364_v27, 0.0  ;;  %16630 = vst [vmem:[#allocation77_spill] sm:$0xff] %v15553_v28  ;;  %v6368_v48 = vadd.f32 %v6367_v19, %v15354_v58  ;;  %v10700_v58 = vld [vmem:[%s16226_s7 + $0x70] sm:$0xff]   ;;  %v16634_v39 = vld [vmem:[#allocation10_spill] sm:$0xff] }
 0x4e2   :  { %v6369_v34 = vpop.f32.mrf.mxu1  ;;  %v15556_v63 = vpop.f32.mrf.mxu0  ;;  %9603 = vmatprep.subr.bf16.mxu0 %v10700_v58 }
 0x4e3   :  { %v7005_v35 = vpack.c.bf16 %v6951_v2, %v6948_v32  ;;  %v6370_v44 = vadd.f32 %v6369_v34, %v16631_v37  ;;  %v6953_v13 = vmax.f32 %v6368_v48, 0.0  ;;  %9604 = vmatpush3.bf16.msra.mxu0 %v10701_v30  ;;  %v16636_v34 = vld [vmem:[#allocation75_spill] sm:$0xff]  ;;  %v10948_v37 = vld [vmem:[%s16225_s4] sm:$0x7] }
 0x4e4   :  { %v6371_v45 = vpop.f32.mrf.mxu1  ;;  %v6742_v61 = vpop.f32.mrf.mxu0 }
 0x4e5   :  { %v6372_v22 = vadd.f32 %v6371_v45, %v16632_v17  ;;  %7475 = vmatprep.mubr.bf16.mxu0 %v7005_v35  ;;  %v6954_v23 = vmax.f32 %v6370_v44, 0.0  ;;  %v16637_v44 = vld [vmem:[#allocation2_spill] sm:$0xff] }
 0x4e6   :  { %v6373_v36 = vpop.f32.mrf.mxu1  ;;  %7476 = vmatmul.mubr.bf16.gmra.mxu0 %v7004_v10  ;;  %v15561_v43 = vpop.f32.mrf.mxu0  ;;  %v16635_v10 = vld [vmem:[#allocation72_spill] sm:$0xff]  ;;  %v16638_v17 = vsub.s32 2, %v16637_v44 }
 0x4e7   :  { %v6956_v14 = vmax.f32 %v6372_v22, 0.0  ;;  %v6374_v41 = vadd.f32 %v6373_v36, %v16633_v18 }
 0x4e8   :  { %v6377_v4 = vpop.f32.mrf.mxu1  ;;  %v6745_v47 = vpop.f32.mrf.mxu0  ;;  %v15581_v22 = vrot.slane %v10948_v37, %v16638_v17 }
 0x4e9   :  { %v7007_v9 = vpack.c.bf16 %v6956_v14, %v6953_v13  ;;  %v6957_v12 = vmax.f32 %v6374_v41, 0.0  ;;  %v6378_v52 = vadd.f32 %v6377_v4, %v16634_v39  ;;  %v16639_v14 = vld [vmem:[#allocation73_spill] sm:$0xff] }
 0x4ea   :  { %v6379_v7 = vpop.f32.mrf.mxu1  ;;  %v15570_v27 = vpop.f32.mrf.mxu0 }
 0x4eb   :  { %v7008_v19 = vpack.c.bf16 %v6957_v12, %v6954_v23  ;;  %v6380_v2 = vadd.f32 %v6379_v7, %v16635_v10  ;;  %v6959_v36 = vmax.f32 %v6378_v52, 0.0  ;;  %v16640_v7 = vld [vmem:[#allocation9_spill] sm:$0xff] }
 0x4ec   :  { %v6381_v32 = vpop.f32.mrf.mxu1  ;;  %v15574_v35 = vpop.f32.mrf.mxu0  ;;  %v6421_v39 = vadd.f32 %v16640_v7, %v15581_v22 }
 0x4ed   :  { %v6382_v48 = vadd.f32 %v6381_v32, %v16636_v34  ;;  %7485 = vmatprep.mubr.bf16.mxu0 %v7008_v19  ;;  %v6960_v30 = vmax.f32 %v6380_v2, 0.0  ;;  %v16641_v2 = vld [vmem:[#allocation78_spill] sm:$0xff] }
 0x4ee   :  { %v6383_v45 = vpop.f32.mrf.mxu1  ;;  %7486 = vmatmul.mubr.bf16.gmra.mxu0 %v7007_v9  ;;  %v15584_v41 = vpop.f32.mrf.mxu0  ;;  %v6424_v37 = vadd.f32 %v16641_v2, %v15581_v22 }
 0x4ef   :  { %v6962_v13 = vmax.f32 %v6382_v48, 0.0  ;;  %v6384_v18 = vadd.f32 %v6383_v45, %v16639_v14 }
 0x4f0   :  { %v9481_v58 = vpop.f32.mrf.mxu1  ;;  %v15586_v12 = vpop.f32.mrf.mxu0 }
 0x4f1   :  { %v7010_v4 = vpack.c.bf16 %v6962_v13, %v6959_v36  ;;  %v6963_v23 = vmax.f32 %v6384_v18, 0.0  ;;  %v10702_v36 = vld [vmem:[%s16226_s7 + $0x68] sm:$0xff]  }
 0x4f2   :  { %v9482_v9 = vpop.f32.mrf.mxu1  ;;  %v15590_v32 = vpop.f32.mrf.mxu0  ;;  %v10703_v13 = vld [vmem:[%s16226_s7 + $0x28] sm:$0xff]   ;;  %9605 = vmatprep.subr.bf16.mxu0 %v10702_v36 }
 0x4f3   :  { %v9483_v19 = vadd.f32 %v9482_v9, %v9481_v58  ;;  %v7011_v10 = vpack.c.bf16 %v6963_v23, %v6960_v30  ;;  %9606 = vmatpush3.bf16.msra.mxu0 %v10703_v13  ;;  %v16642_v23 = vld [vmem:[#allocation12_spill] sm:$0xff] }
 0x4f4   :  { %v9484_v52 = vpop.f32.mrf.mxu1  ;;  %v15592_v48 = vpop.f32.mrf.mxu0  ;;  %v6429_v9 = vadd.f32 %v16642_v23, %v15581_v22  ;;  %v10705_v23 = vld [vmem:[%s16226_s7 + $0x20] sm:$0xff]  }
 0x4f5   :  { %v6582_v34 = vadd.f32 %v9483_v19, %v6421_v39  ;;  %7495 = vmatprep.mubr.bf16.mxu0 %v7011_v10 }
 0x4f6   :  { %v9485_v45 = vpop.f32.mrf.mxu1  ;;  %7496 = vmatmul.mubr.bf16.gmra.mxu0 %v7010_v4  ;;  %v15596_v17 = vpop.f32.mrf.mxu0 }
 0x4f7   :  { %v9486_v44 = vadd.f32 %v9485_v45, %v9484_v52  ;;  %v6743_v18 = vadd.f32 %v6742_v61, %v6582_v34  ;;  %v16643_v34 = vld [vmem:[#allocation76_spill] sm:$0xff] }
 0x4f8   :  { %v9487_v14 = vpop.f32.mrf.mxu1  ;;  %v15604_v30 = vpop.f32.mrf.mxu0 }
 0x4f9   :  { %v6585_v58 = vadd.f32 %v9486_v44, %v6424_v37  ;;  %v6871_v52 = vmax.f32 %v6743_v18, 0.0  ;;  %v6432_v37 = vadd.f32 %v16643_v34, %v15581_v22 }
 0x4fa   :  { %v9488_v4 = vpop.f32.mrf.mxu1  ;;  %v15608_v19 = vpop.f32.mrf.mxu0 }
 0x4fb   :  { %v6746_v7 = vadd.f32 %v6745_v47, %v6585_v58  ;;  %v9489_v39 = vadd.f32 %v9488_v4, %v9487_v14  ;;  %v10704_v47 = vld [vmem:[%s16226_s7 + $0x60] sm:$0xff]  }
 0x4fc   :  { %v9490_v10 = vpop.f32.mrf.mxu1  ;;  %v15610_v28 = vpop.f32.mrf.mxu0  ;;  %9607 = vmatprep.subr.bf16.mxu0 %v10704_v47 }
 0x4fd   :  { %v6874_v45 = vmax.f32 %v6746_v7, 0.0  ;;  %v6590_v2 = vadd.f32 %v9489_v39, %v6429_v9  ;;  %v6437_v7 = vadd.f32 %v15418_v21, %v15581_v22  ;;  %9608 = vmatpush3.bf16.msra.mxu0 %v10705_v23 }
 0x4fe   :  { %v9491_v61 = vpop.f32.mrf.mxu1  ;;  %v15614_v13 = vpop.f32.mrf.mxu0 }
 0x4ff   :  { %v6967_v44 = vpack.c.bf16 %v6874_v45, %v6871_v52  ;;  %v9492_v36 = vadd.f32 %v9491_v61, %v9490_v10  ;;  %v6751_v58 = vadd.f32 %v15556_v63, %v6590_v2 }
 0x500   :  { %v9493_v14 = vpop.f32.mrf.mxu1  ;;  %v15620_v4 = vpop.f32.mrf.mxu0 }
 0x501   :  { %v6593_v18 = vadd.f32 %v9492_v36, %v6432_v37  ;;  %7539 = vmatmul.mubr.bf16.vlgmr.msra.gmra.mxu1 %v6967_v44  ;;  %v6877_v45 = vmax.f32 %v6751_v58, 0.0  ;;  %v6440_v44 = vadd.f32 %v15423_v20, %v15581_v22  ;;  %v6445_v58 = vadd.f32 %v15428_v55, %v15581_v22 }
 0x502   :  { %v9494_v9 = vpop.f32.mrf.mxu1  ;;  %7548 = vmatprep.mubr.bf16.mxu1 %v16510_v29  ;;  %v15629_v52 = vpop.f32.mrf.mxu0 }
 0x503   :  { %v6754_v39 = vadd.f32 %v15561_v43, %v6593_v18  ;;  %v9495_v10 = vadd.f32 %v9494_v9, %v9493_v14 }
 0x504   :  { %v9496_v63 = vpop.f32.mrf.mxu1  ;;  %v15631_v34 = vpop.f32.mrf.mxu0 }
 0x505   :  { %v6880_v2 = vmax.f32 %v6754_v39, 0.0  ;;  %v6598_v61 = vadd.f32 %v9495_v10, %v6437_v7 }
 0x506   :  { %v9497_v37 = vpop.f32.mrf.mxu1  ;;  %v15636_v14 = vpop.f32.mrf.mxu0 }
 0x507   :  { %v9498_v36 = vadd.f32 %v9497_v37, %v9496_v63  ;;  %v6970_v47 = vpack.c.bf16 %v6880_v2, %v6877_v45  ;;  %v6759_v21 = vadd.f32 %v15574_v35, %v6598_v61  ;;  %v6448_v45 = vadd.f32 %v15433_v8, %v15581_v22  ;;  %v10706_v37 = vld [vmem:[%s16226_s7 + $0x58] sm:$0xff]  }
 0x508   :  { %v9499_v49 = vpop.f32.mrf.mxu1  ;;  %v15642_v10 = vpop.f32.mrf.mxu0  ;;  %9609 = vmatprep.subr.bf16.mxu0 %v10706_v37  ;;  %v6453_v8 = vadd.f32 %v15438_v40, %v15581_v22 }
 0x509   :  { %v6601_v43 = vadd.f32 %v9498_v36, %v6440_v44  ;;  %7549 = vmatmul.mubr.bf16.gmra.mxu1 %v6970_v47  ;;  %v6883_v20 = vmax.f32 %v6759_v21, 0.0  ;;  %v10707_v36 = vld [vmem:[%s16226_s7 + $0x18] sm:$0xff]  }
 0x50a   :  { %v9500_v18 = vpop.f32.mrf.mxu1  ;;  %7558 = vmatprep.mubr.bf16.mxu1 %v16510_v29  ;;  %9610 = vmatpush3.bf16.msra.mxu0 %v10707_v36 }
 0x50b   :  { %v6762_v23 = vadd.f32 %v15586_v12, %v6601_v43  ;;  %v9501_v9 = vadd.f32 %v9500_v18, %v9499_v49  ;;  %v15650_v49 = vpop.f32.mrf.mxu0 }
 0x50c   :  { %v9502_v7 = vpop.f32.mrf.mxu1 }
 0x50d   :  { %v6886_v39 = vmax.f32 %v6762_v23, 0.0  ;;  %v6606_v63 = vadd.f32 %v9501_v9, %v6445_v58  ;;  %v15659_v58 = vpop.f32.mrf.mxu0 }
 0x50e   :  { %v9503_v35 = vpop.f32.mrf.mxu1 }
 0x50f   :  { %v9504_v2 = vadd.f32 %v9503_v35, %v9502_v7  ;;  %v6973_v61 = vpack.c.bf16 %v6886_v39, %v6883_v20  ;;  %v6767_v12 = vadd.f32 %v15570_v27, %v6606_v63  ;;  %v6456_v20 = vadd.f32 %v15443_v3, %v15581_v22 }
 0x510   :  { %v9505_v55 = vpop.f32.mrf.mxu1 }
 0x511   :  { %v6609_v44 = vadd.f32 %v9504_v2, %v6448_v45  ;;  %7559 = vmatmul.mubr.bf16.gmra.mxu1 %v6973_v61  ;;  %v6889_v18 = vmax.f32 %v6767_v12, 0.0  ;;  %v15663_v45 = vpop.f32.mrf.mxu0  ;;  %v6461_v61 = vadd.f32 %v15448_v42, %v15581_v22 }
 0x512   :  { %v9506_v47 = vpop.f32.mrf.mxu1  ;;  %7568 = vmatprep.mubr.bf16.mxu1 %v16510_v29 }
 0x513   :  { %v6770_v21 = vadd.f32 %v15584_v41, %v6609_v44  ;;  %v9507_v43 = vadd.f32 %v9506_v47, %v9505_v55  ;;  %v15670_v3 = vpop.f32.mrf.mxu0 }
 0x514   :  { %v9508_v27 = vpop.f32.mrf.mxu1 }
 0x515   :  { %v6892_v23 = vmax.f32 %v6770_v21, 0.0  ;;  %v6614_v9 = vadd.f32 %v9507_v43, %v6453_v8 }
 0x516   :  { %v9509_v7 = vpop.f32.mrf.mxu1 }
 0x517   :  { %v9510_v39 = vadd.f32 %v9509_v7, %v9508_v27  ;;  %v6976_v63 = vpack.c.bf16 %v6892_v23, %v6889_v18  ;;  %v6775_v40 = vadd.f32 %v15592_v48, %v6614_v9  ;;  %v6464_v48 = vadd.f32 %v15453_v53, %v15581_v22  ;;  %v10708_v27 = vld [vmem:[%s16226_s7 + $0x50] sm:$0xff]   ;;  %v15677_v18 = vpop.f32.mrf.mxu0 }
 0x518   :  { %v9511_v35 = vpop.f32.mrf.mxu1  ;;  %9611 = vmatprep.subr.bf16.mxu0 %v10708_v27  ;;  %v10709_v9 = vld [vmem:[%s16226_s7 + $0x10] sm:$0xff]   ;;  %v6469_v53 = vadd.f32 %v15458_v62, %v15581_v22 }
 0x519   :  { %v6617_v41 = vadd.f32 %v9510_v39, %v6456_v20  ;;  %7569 = vmatmul.mubr.bf16.gmra.mxu1 %v6976_v63  ;;  %v6895_v44 = vmax.f32 %v6775_v40, 0.0  ;;  %9612 = vmatpush3.bf16.msra.mxu0 %v10709_v9 }
 0x51a   :  { %v9512_v2 = vpop.f32.mrf.mxu1  ;;  %7578 = vmatprep.mubr.bf16.mxu1 %v16510_v29 }
 0x51b   :  { %v6778_v37 = vadd.f32 %v15604_v30, %v6617_v41  ;;  %v9513_v55 = vadd.f32 %v9512_v2, %v9511_v35  ;;  %v15687_v35 = vpop.f32.mrf.mxu0 }
 0x51c   :  { %v9514_v12 = vpop.f32.mrf.mxu1 }
 0x51d   :  { %v6898_v36 = vmax.f32 %v6778_v37, 0.0  ;;  %v6622_v47 = vadd.f32 %v9513_v55, %v6461_v61  ;;  %v6472_v61 = vadd.f32 %v15463_v38, %v15581_v22 }
 0x51e   :  { %v9515_v8 = vpop.f32.mrf.mxu1 }
 0x51f   :  { %v9516_v21 = vadd.f32 %v9515_v8, %v9514_v12  ;;  %v6979_v43 = vpack.c.bf16 %v6898_v36, %v6895_v44  ;;  %v6783_v30 = vadd.f32 %v15590_v32, %v6622_v47  ;;  %v15691_v44 = vpop.f32.mrf.mxu0  ;;  %v6477_v47 = vadd.f32 %v15468_v57, %v15581_v22 }
 0x520   :  { %v9517_v42 = vpop.f32.mrf.mxu1 }
 0x521   :  { %v6625_v23 = vadd.f32 %v9516_v21, %v6464_v48  ;;  %7579 = vmatmul.mubr.bf16.gmra.mxu1 %v6979_v43  ;;  %v6901_v32 = vmax.f32 %v6783_v30, 0.0  ;;  %v15698_v38 = vpop.f32.mrf.mxu0 }
 0x522   :  { %v9518_v7 = vpop.f32.mrf.mxu1  ;;  %7588 = vmatprep.mubr.bf16.mxu1 %v16510_v29 }
 0x523   :  { %v6786_v20 = vadd.f32 %v15596_v17, %v6625_v23  ;;  %v9519_v39 = vadd.f32 %v9518_v7, %v9517_v42  ;;  %v10710_v7 = vld [vmem:[%s16226_s7 + $0x48] sm:$0xff]  }
 0x524   :  { %v9520_v63 = vpop.f32.mrf.mxu1  ;;  %9613 = vmatprep.subr.bf16.mxu0 %v10710_v7 }
 0x525   :  { %v6904_v40 = vmax.f32 %v6786_v20, 0.0  ;;  %v6630_v41 = vadd.f32 %v9519_v39, %v6469_v53  ;;  %v15705_v53 = vpop.f32.mrf.mxu0  ;;  %v10711_v39 = vld [vmem:[%s16226_s7 + $0x8] sm:$0xff]  }
 0x526   :  { %v9521_v2 = vpop.f32.mrf.mxu1  ;;  %9614 = vmatpush3.bf16.msra.mxu0 %v10711_v39 }
 0x527   :  { %v9522_v37 = vadd.f32 %v9521_v2, %v9520_v63  ;;  %v6982_v55 = vpack.c.bf16 %v6904_v40, %v6901_v32  ;;  %v6791_v62 = vadd.f32 %v15610_v28, %v6630_v41  ;;  %v6480_v28 = vadd.f32 %v15473_v33, %v15581_v22  ;;  %v15715_v2 = vpop.f32.mrf.mxu0 }
 0x528   :  { %v9523_v12 = vpop.f32.mrf.mxu1  ;;  %v6485_v33 = vadd.f32 %v15478_v54, %v15581_v22 }
 0x529   :  { %v6633_v17 = vadd.f32 %v9522_v37, %v6472_v61  ;;  %7589 = vmatmul.mubr.bf16.gmra.mxu1 %v6982_v55  ;;  %v6907_v43 = vmax.f32 %v6791_v62, 0.0 }
 0x52a   :  { %v9524_v36 = vpop.f32.mrf.mxu1  ;;  %7598 = vmatprep.mubr.bf16.mxu1 %v16510_v29 }
 0x52b   :  { %v6794_v8 = vadd.f32 %v15620_v4, %v6633_v17  ;;  %v9525_v48 = vadd.f32 %v9524_v36, %v9523_v12  ;;  %v6488_v12 = vadd.f32 %v15483_v51, %v15581_v22 }
 0x52c   :  { %v9526_v21 = vpop.f32.mrf.mxu1 }
 0x52d   :  { %v6910_v27 = vmax.f32 %v6794_v8, 0.0  ;;  %v6638_v42 = vadd.f32 %v9525_v48, %v6477_v47  ;;  %v15719_v47 = vpop.f32.mrf.mxu0  ;;  %v6493_v48 = vadd.f32 %v15488_v46, %v15581_v22  ;;  %v6496_v46 = vadd.f32 %v15491_v1, %v15581_v22 }
 0x52e   :  { %v9527_v30 = vpop.f32.mrf.mxu1 }
 0x52f   :  { %v9528_v23 = vadd.f32 %v9527_v30, %v9526_v21  ;;  %v6985_v9 = vpack.c.bf16 %v6910_v27, %v6907_v43  ;;  %v6799_v4 = vadd.f32 %v15608_v19, %v6638_v42  ;;  %v15726_v51 = vpop.f32.mrf.mxu0 }
 0x530   :  { %v9529_v57 = vpop.f32.mrf.mxu1 }
 0x531   :  { %v6641_v20 = vadd.f32 %v9528_v23, %v6480_v28  ;;  %7599 = vmatmul.mubr.bf16.gmra.mxu1 %v6985_v9  ;;  %v6913_v19 = vmax.f32 %v6799_v4, 0.0  ;;  %v10713_v23 = vld [vmem:[%s16226_s7] sm:$0xff]  }
 0x532   :  { %v9530_v63 = vpop.f32.mrf.mxu1  ;;  %7608 = vmatprep.mubr.bf16.mxu1 %v16510_v29 }
 0x533   :  { %v6802_v32 = vadd.f32 %v15614_v13, %v6641_v20  ;;  %v9531_v40 = vadd.f32 %v9530_v63, %v9529_v57 }
 0x534   :  { %v9532_v41 = vpop.f32.mrf.mxu1 }
 0x535   :  { %v6916_v61 = vmax.f32 %v6802_v32, 0.0  ;;  %v6646_v37 = vadd.f32 %v9531_v40, %v6485_v33  ;;  %v6501_v33 = vadd.f32 %v15496_v59, %v15581_v22 }
 0x536   :  { %v9533_v55 = vpop.f32.mrf.mxu1 }
 0x537   :  { %v9534_v62 = vadd.f32 %v9533_v55, %v9532_v41  ;;  %v6988_v17 = vpack.c.bf16 %v6916_v61, %v6913_v19  ;;  %v6807_v54 = vadd.f32 %v15631_v34, %v6646_v37  ;;  %v10712_v34 = vld [vmem:[%s16226_s7 + $0x40] sm:$0xff]  }
 0x538   :  { %v9535_v36 = vpop.f32.mrf.mxu1  ;;  %9615 = vmatprep.subr.bf16.mxu0 %v10712_v34 }
 0x539   :  { %v6649_v13 = vadd.f32 %v9534_v62, %v6488_v12  ;;  %7609 = vmatmul.mubr.bf16.gmra.mxu1 %v6988_v17  ;;  %v6919_v42 = vmax.f32 %v6807_v54, 0.0  ;;  %9616 = vmatpush3.bf16.msra.mxu0 %v10713_v23 }
 0x53a   :  { %v9536_v8 = vpop.f32.mrf.mxu1  ;;  %7618 = vmatprep.mubr.bf16.mxu1 %v16510_v29 }
 0x53b   :  { %v6810_v21 = vadd.f32 %v15642_v10, %v6649_v13  ;;  %v9537_v43 = vadd.f32 %v9536_v8, %v9535_v36  ;;  %v6509_v13 = vadd.f32 %v15504_v56, %v15581_v22 }
 0x53c   :  { %v9538_v27 = vpop.f32.mrf.mxu1 }
 0x53d   :  { %v6922_v30 = vmax.f32 %v6810_v21, 0.0  ;;  %v6654_v28 = vadd.f32 %v9537_v43, %v6493_v48 }
 0x53e   :  { %v9539_v9 = vpop.f32.mrf.mxu1  ;;  %v15736_v7 = vpop.f32.mrf.mxu0 }
 0x53f   :  { %v9540_v10 = vadd.f32 %v9539_v9, %v9538_v27  ;;  %v6991_v57 = vpack.c.bf16 %v6922_v30, %v6919_v42  ;;  %v6815_v20 = vadd.f32 %v15629_v52, %v6654_v28  ;;  %v6504_v52 = vadd.f32 %v15499_v50, %v15581_v22 }
 0x540   :  { %v9541_v4 = vpop.f32.mrf.mxu1  ;;  %v15743_v1 = vpop.f32.mrf.mxu0 }
 0x541   :  { %v6657_v39 = vadd.f32 %v9540_v10, %v6496_v46  ;;  %7619 = vmatmul.mubr.bf16.gmra.mxu1 %v6991_v57  ;;  %v6925_v19 = vmax.f32 %v6815_v20, 0.0  ;;  %v9446_v57 = vadd.f32 %v15517_v16, %v15515_v25 }
 0x542   :  { %v9542_v63 = vpop.f32.mrf.mxu1  ;;  %7628 = vmatprep.mubr.bf16.mxu1 %v16510_v29  ;;  %v15747_v12 = vpop.f32.mrf.mxu0 }
 0x543   :  { %v6818_v32 = vadd.f32 %v15636_v14, %v6657_v39  ;;  %v9543_v40 = vadd.f32 %v9542_v63, %v9541_v4 }
 0x544   :  { %v9544_v41 = vpop.f32.mrf.mxu1  ;;  %v15753_v8 = vpop.f32.mrf.mxu0 }
 0x545   :  { %v6928_v61 = vmax.f32 %v6818_v32, 0.0  ;;  %v6662_v37 = vadd.f32 %v9543_v40, %v6501_v33  ;;  %v6520_v40 = vadd.f32 %v9446_v57, %v15581_v22 }
 0x546   :  { %v9545_v55 = vpop.f32.mrf.mxu1  ;;  %v15758_v28 = vpop.f32.mrf.mxu0 }
 0x547   :  { %v9546_v62 = vadd.f32 %v9545_v55, %v9544_v41  ;;  %v6994_v17 = vpack.c.bf16 %v6928_v61, %v6925_v19  ;;  %v6823_v59 = vadd.f32 %v15659_v58, %v6662_v37  ;;  %v6512_v58 = vadd.f32 %v15507_v15, %v15581_v22 }
 0x548   :  { %v9547_v36 = vpop.f32.mrf.mxu1  ;;  %v15766_v4 = vpop.f32.mrf.mxu0  ;;  %v9452_v55 = vadd.f32 %v15527_v60, %v15525_v24 }
 0x549   :  { %v6665_v54 = vadd.f32 %v9546_v62, %v6504_v52  ;;  %7629 = vmatmul.mubr.bf16.gmra.mxu1 %v6994_v17  ;;  %v6931_v43 = vmax.f32 %v6823_v59, 0.0 }
 0x54a   :  { %v9548_v14 = vpop.f32.mrf.mxu1  ;;  %7638 = vmatprep.mubr.bf16.mxu1 %v16510_v29  ;;  %v15770_v41 = vpop.f32.mrf.mxu0 }
 0x54b   :  { %v6826_v48 = vadd.f32 %v15670_v3, %v6665_v54  ;;  %v9549_v50 = vadd.f32 %v9548_v14, %v9547_v36  ;;  %v6517_v3 = vadd.f32 %v15512_v31, %v15581_v22 }
 0x54c   :  { %v9550_v21 = vpop.f32.mrf.mxu1  ;;  %v15778_v52 = vpop.f32.mrf.mxu0 }
 0x54d   :  { %v6934_v27 = vmax.f32 %v6826_v48, 0.0  ;;  %v6670_v42 = vadd.f32 %v9549_v50, %v6509_v13  ;;  %v6528_v13 = vadd.f32 %v9452_v55, %v15581_v22 }
 0x54e   :  { %v9551_v30 = vpop.f32.mrf.mxu1  ;;  %v15782_v48 = vpop.f32.mrf.mxu0 }
 0x54f   :  { %v9552_v34 = vadd.f32 %v9551_v30, %v9550_v21  ;;  %v6997_v23 = vpack.c.bf16 %v6934_v27, %v6931_v43  ;;  %v6831_v56 = vadd.f32 %v15650_v49, %v6670_v42  ;;  %v9458_v27 = vadd.f32 %v15543_v6, %v15538_v0 }
 0x550   :  { %v9553_v9 = vpop.f32.mrf.mxu1  ;;  %v15790_v42 = vpop.f32.mrf.mxu0 }
 0x551   :  { %v6673_v46 = vadd.f32 %v9552_v34, %v6512_v58  ;;  %7639 = vmatmul.mubr.bf16.gmra.mxu1 %v6997_v23  ;;  %v6937_v63 = vmax.f32 %v6831_v56, 0.0 }
 0x552   :  { %v9554_v10 = vpop.f32.mrf.mxu1  ;;  %7648 = vmatprep.mubr.bf16.mxu1 %v16510_v29 }
 0x553   :  { %v6834_v15 = vadd.f32 %v15663_v45, %v6673_v46  ;;  %v9555_v20 = vadd.f32 %v9554_v10, %v9553_v9  ;;  %v6525_v45 = vadd.f32 %v15522_v26, %v15581_v22  ;;  %v6536_v46 = vadd.f32 %v9458_v27, %v15581_v22  ;;  %v15794_v10 = vpop.f32.mrf.mxu0 }
 0x554   :  { %v9556_v39 = vpop.f32.mrf.mxu1 }
 0x555   :  { %v6940_v33 = vmax.f32 %v6834_v15, 0.0  ;;  %v6678_v49 = vadd.f32 %v9555_v20, %v6517_v3  ;;  %v16644_v20 = vld [vmem:[#allocation79_spill] sm:$0xff] }
 0x556   :  { %v9557_v32 = vpop.f32.mrf.mxu1 }
 0x557   :  { %v9558_v19 = vadd.f32 %v9557_v32, %v9556_v39  ;;  %v7000_v61 = vpack.c.bf16 %v6940_v33, %v6937_v63  ;;  %v6839_v37 = vadd.f32 %v15687_v35, %v6678_v49  ;;  %v16645_v39 = vld [vmem:[#allocation77_spill] sm:$0xff]  ;;  %v15802_v33 = vpop.f32.mrf.mxu0 }
 0x558   :  { %v9559_v31 = vpop.f32.mrf.mxu1  ;;  %v9464_v63 = vadd.f32 %v16645_v39, %v16644_v20 }
 0x559   :  { %v6681_v25 = vadd.f32 %v9558_v19, %v6520_v40  ;;  %7649 = vmatmul.mubr.bf16.gmra.mxu1 %v7000_v61  ;;  %v6943_v59 = vmax.f32 %v6839_v37, 0.0 }
 0x55a   :  { %v9560_v16 = vpop.f32.mrf.mxu1  ;;  %7658 = vmatprep.mubr.bf16.mxu1 %v16510_v29  ;;  %v6544_v37 = vadd.f32 %v9464_v63, %v15581_v22 }
 0x55b   :  { %v6842_v62 = vadd.f32 %v15698_v38, %v6681_v25  ;;  %v9561_v17 = vadd.f32 %v9560_v16, %v9559_v31  ;;  %v6533_v38 = vadd.f32 %v15532_v5, %v15581_v22  ;;  %v15806_v25 = vpop.f32.mrf.mxu0 }
 0x55c   :  { %v9562_v36 = vpop.f32.mrf.mxu1 }
 0x55d   :  { %v6946_v54 = vmax.f32 %v6842_v62, 0.0  ;;  %v6686_v35 = vadd.f32 %v9561_v17, %v6525_v45  ;;  %v15810_v62 = vpop.f32.mrf.mxu0 }
 0x55e   :  { %v9563_v14 = vpop.f32.mrf.mxu1 }
 0x55f   :  { %v7003_v50 = vpack.c.bf16 %v6946_v54, %v6943_v59  ;;  %v9564_v21 = vadd.f32 %v9563_v14, %v9562_v36  ;;  %v6847_v43 = vadd.f32 %v15677_v18, %v6686_v35  ;;  %v15813_v59 = vpop.f32.mrf.mxu0 }
 0x560   :  { %v9565_v26 = vpop.f32.mrf.mxu1 }
 0x561   :  { %v6689_v24 = vadd.f32 %v9564_v21, %v6528_v13  ;;  %7659 = vmatmul.mubr.bf16.gmra.mxu1 %v7003_v50  ;;  %v6949_v23 = vmax.f32 %v6847_v43, 0.0 }
 0x562   :  { %v9566_v60 = vpop.f32.mrf.mxu1  ;;  %7668 = vmatprep.mubr.bf16.mxu1 %v16510_v29 }
 0x563   :  { %v6850_v30 = vadd.f32 %v15691_v44, %v6689_v24  ;;  %v9567_v58 = vadd.f32 %v9566_v60, %v9565_v26  ;;  %v6541_v44 = vadd.f32 %v15548_v11, %v15581_v22  ;;  %v15815_v22 = vpop.f32.mrf.mxu0 }
 0x564   :  { %v9568_v34 = vpop.f32.mrf.mxu1 }
 0x565   :  { %v6952_v9 = vmax.f32 %v6850_v30, 0.0  ;;  %v6694_v18 = vadd.f32 %v9567_v58, %v6533_v38  ;;  %v15817_v35 = vpop.f32.mrf.mxu0 }
 0x566   :  { %v9569_v56 = vpop.f32.mrf.mxu1 }
 0x567   :  { %v7006_v3 = vpack.c.bf16 %v6952_v9, %v6949_v23  ;;  %v9570_v57 = vadd.f32 %v9569_v56, %v9568_v34  ;;  %v6855_v15 = vadd.f32 %v15715_v2, %v6694_v18  ;;  %v15819_v14 = vpop.f32.mrf.mxu0  ;;  %v7061_v34 = vld [vmem:[%s16227_s6] sm:$0x3]  ;;  %v16646_v9 = vld [vmem:[#allocation4_spill] sm:$0xff]  ;;  %v16647_v56 = vld [vmem:[#allocation3_spill] sm:$0xff] }
 0x568   :  { %v9571_v5 = vpop.f32.mrf.mxu1  ;;  %v15855_v18 = vrot.slane %v7061_v34, %v16646_v9 }
 0x569   :  { %v6697_v0 = vadd.f32 %v9570_v57, %v6536_v46  ;;  %7669 = vmatmul.mubr.bf16.gmra.mxu1 %v7006_v3  ;;  %v6955_v19 = vmax.f32 %v6855_v15, 0.0  ;;  %v15858_v46 = vrot.slane %v7061_v34, %v16647_v56 }
 0x56a   :  { %v9572_v6 = vpop.f32.mrf.mxu1  ;;  %7678 = vmatprep.mubr.bf16.mxu1 %v16510_v29  ;;  %v7350_v15 = vadd.f32 %v15743_v1, %v15855_v18  ;;  %v7354_v20 = vadd.f32 %v15753_v8, %v15855_v18  ;;  %v10714_v1 = vld [vmem:[%s16228_s9 + $0x38] sm:$0xff]   ;;  %v7364_v34 = vadd.f32 %v15778_v52, %v15855_v18 }
 0x56b   :  { %v6858_v49 = vadd.f32 %v15726_v51, %v6697_v0  ;;  %v9573_v32 = vadd.f32 %v9572_v6, %v9571_v5  ;;  %v7352_v0 = vadd.f32 %v15747_v12, %v15858_v46  ;;  %v7348_v6 = vadd.f32 %v15736_v7, %v15858_v46  ;;  %v10715_v7 = vld [vmem:[%s16228_s9 + $0x30] sm:$0xff]   ;;  %9833 = vmatprep.subr.bf16.mxu1 %v10714_v1 }
 0x56c   :  { %v9574_v40 = vpop.f32.mrf.mxu1  ;;  %9834 = vmatpush3.bf16.msra.mxu1 %v10714_v1 }
 0x56d   :  { %v6958_v61 = vmax.f32 %v6858_v49, 0.0  ;;  %v6702_v2 = vadd.f32 %v9573_v32, %v6541_v44  ;;  %9835 = vmatprep.subr.bf16.mxu1 %v10715_v7 }
 0x56e   :  { %v9575_v31 = vpop.f32.mrf.mxu1 }
 0x56f   :  { %v7009_v16 = vpack.c.bf16 %v6958_v61, %v6955_v19  ;;  %v9576_v45 = vadd.f32 %v9575_v31, %v9574_v40  ;;  %v6863_v11 = vadd.f32 %v15705_v53, %v6702_v2  ;;  %v15821_v53 = vpop.f32.mrf.mxu0 }
 0x570   :  { %9836 = vmatpush3.bf16.msra.mxu1 %v10715_v7 }
 0x571   :  { %v6705_v55 = vadd.f32 %v9576_v45, %v6544_v37  ;;  %7679 = vmatmul.mubr.bf16.gmra.mxu1 %v7009_v16  ;;  %v6961_v17 = vmax.f32 %v6863_v11, 0.0  ;;  %v15823_v13 = vpop.f32.mrf.mxu0  ;;  %v7360_v45 = vadd.f32 %v15766_v4, %v15855_v18  ;;  %v7362_v11 = vadd.f32 %v15770_v41, %v15858_v46 }
 0x572   :  { %7688 = vmatprep.mubr.bf16.mxu1 %v16510_v29 }
 0x573   :  { %v6866_v51 = vadd.f32 %v15719_v47, %v6705_v55  ;;  %v15825_v29 = vpop.f32.mrf.mxu0 }
 0x575   :  { %v6964_v36 = vmax.f32 %v6866_v51, 0.0  ;;  %v15827_v50 = vpop.f32.mrf.mxu0  ;;  %v10716_v51 = vld [vmem:[%s16228_s9 + $0x28] sm:$0xff]  }
 0x576   :  { %9837 = vmatprep.subr.bf16.mxu1 %v10716_v51 }
 0x577   :  { %v7012_v54 = vpack.c.bf16 %v6964_v36, %v6961_v17  ;;  %v15829_v47 = vpop.f32.mrf.mxu0  ;;  %v7358_v17 = vadd.f32 %v15758_v28, %v15858_v46  ;;  %v10717_v28 = vld [vmem:[%s16228_s9 + $0x20] sm:$0xff]   ;;  %9838 = vmatpush3.bf16.msra.mxu1 %v10716_v51 }
 0x578   :  { %9839 = vmatprep.subr.bf16.mxu1 %v10717_v28 }
 0x579   :  { %7689 = vmatmul.mubr.bf16.gmra.mxu1 %v7012_v54  ;;  %v15831_v21 = vpop.f32.mrf.mxu0 }
 0x57b   :  { %v15833_v26 = vpop.f32.mrf.mxu0  ;;  %9840 = vmatpush3.bf16.msra.mxu1 %v10717_v28 }
 0x57d   :  { %v15835_v43 = vpop.f32.mrf.mxu0 }
 0x57f   :  { %v15837_v24 = vpop.f32.mrf.mxu0 }
 0x581   :  { %v15839_v60 = vpop.f32.mrf.mxu0 }
 0x583   :  { %v15841_v38 = vpop.f32.mrf.mxu0 }
 0x585   :  { %v15843_v27 = vpop.f32.mrf.mxu0 }
 0x587   :  { %v15845_v30 = vpop.f32.mrf.mxu0 }
 0x589   :  { %v15847_v58 = vpop.f32.mrf.mxu0 }
 0x58b   :  { %v15852_v23 = vpop.f32.mrf.mxu0 }
 0x58d   :  { %v15860_v57 = vpop.f32.mrf.mxu0 }
 0x58f   :  { %v15870_v49 = vpop.f32.mrf.mxu0 }
 0x591   :  { %v15878_v8 = vpop.f32.mrf.mxu0 }
 0x593   :  { %v15891_v4 = vpop.f32.mrf.mxu0 }
 0x595   :  { %v15896_v52 = vpop.f32.mrf.mxu0 }
 0x5c1   :  { %v7540_v3 = vpop.f32.mrf.mxu1 }
 0x5c2   :  { %v7541_v32 = vadd.f32 %v7540_v3, %v7348_v6 }
 0x5c3   :  { %v7542_v5 = vpop.f32.mrf.mxu1 }
 0x5c4   :  { %v7543_v39 = vadd.f32 %v7542_v5, %v7350_v15  ;;  %v7699_v37 = vmax.f32 %v7541_v32, 0.0  ;;  %v7372_v32 = vadd.f32 %v15794_v10, %v15858_v46 }
 0x5c5   :  { %v7544_v44 = vpop.f32.mrf.mxu1 }
 0x5c6   :  { %v7545_v63 = vadd.f32 %v7544_v44, %v7352_v0  ;;  %v7700_v2 = vmax.f32 %v7543_v39, 0.0 }
 0x5c7   :  { %v7546_v40 = vpop.f32.mrf.mxu1 }
 0x5c8   :  { %v7547_v19 = vadd.f32 %v7546_v40, %v7354_v20  ;;  %v7701_v61 = vmax.f32 %v7545_v63, 0.0  ;;  %v7370_v63 = vadd.f32 %v15790_v42, %v15855_v18 }
 0x5c9   :  { %v7550_v12 = vpop.f32.mrf.mxu1 }
 0x5ca   :  { %v7702_v31 = vmax.f32 %v7547_v19, 0.0  ;;  %v7763_v36 = vpack.c.bf16 %v7701_v61, %v7699_v37  ;;  %v7551_v41 = vadd.f32 %v7550_v12, %v7358_v17  ;;  %v7368_v19 = vadd.f32 %v15782_v48, %v15858_v46 }
 0x5cb   :  { %v7552_v16 = vpop.f32.mrf.mxu1  ;;  %v7374_v12 = vadd.f32 %v15802_v33, %v15855_v18  ;;  %v7380_v33 = vadd.f32 %v15810_v62, %v15855_v18 }
 0x5cc   :  { %v7764_v55 = vpack.c.bf16 %v7702_v31, %v7700_v2  ;;  %v7553_v9 = vadd.f32 %v7552_v16, %v7360_v45  ;;  %v7703_v20 = vmax.f32 %v7551_v41, 0.0  ;;  %v15906_v31 = vpop.f32.mrf.mxu0  ;;  %v7384_v41 = vadd.f32 %v15815_v22, %v15855_v18 }
 0x5cd   :  { %v7554_v54 = vpop.f32.mrf.mxu1  ;;  %v7390_v22 = vadd.f32 %v15819_v14, %v15855_v18 }
 0x5ce   :  { %v7555_v56 = vadd.f32 %v7554_v54, %v7362_v11  ;;  %7962 = vmatprep.mubr.bf16.mxu0 %v7764_v55  ;;  %v7704_v6 = vmax.f32 %v7553_v9, 0.0  ;;  %v15908_v48 = vpop.f32.mrf.mxu0 }
 0x5cf   :  { %v7556_v3 = vpop.f32.mrf.mxu1  ;;  %7963 = vmatmul.mubr.bf16.vlgmr.msra.gmra.mxu0 %v7763_v36  ;;  %v7382_v36 = vadd.f32 %v15813_v59, %v15858_v46 }
 0x5d0   :  { %v7557_v5 = vadd.f32 %v7556_v3, %v7364_v34  ;;  %v7705_v15 = vmax.f32 %v7555_v56, 0.0  ;;  %v7378_v34 = vadd.f32 %v15806_v25, %v15858_v46  ;;  %v15918_v28 = vpop.f32.mrf.mxu0 }
 0x5d1   :  { %v7560_v0 = vpop.f32.mrf.mxu1 }
 0x5d2   :  { %v7706_v44 = vmax.f32 %v7557_v5, 0.0  ;;  %v7765_v1 = vpack.c.bf16 %v7705_v15, %v7703_v20  ;;  %v7561_v37 = vadd.f32 %v7560_v0, %v7368_v19  ;;  %v7388_v19 = vadd.f32 %v15817_v35, %v15858_v46 }
 0x5d3   :  { %v7562_v39 = vpop.f32.mrf.mxu1 }
 0x5d4   :  { %v7766_v40 = vpack.c.bf16 %v7706_v44, %v7704_v6  ;;  %v7563_v7 = vadd.f32 %v7562_v39, %v7370_v63  ;;  %v7707_v51 = vmax.f32 %v7561_v37, 0.0  ;;  %v15920_v39 = vpop.f32.mrf.mxu0 }
 0x5d5   :  { %v7564_v61 = vpop.f32.mrf.mxu1 }
 0x5d6   :  { %v7565_v2 = vadd.f32 %v7564_v61, %v7372_v32  ;;  %7970 = vmatprep.mubr.bf16.mxu0 %v7766_v40  ;;  %v7708_v11 = vmax.f32 %v7563_v7, 0.0  ;;  %v7392_v32 = vadd.f32 %v15821_v53, %v15858_v46  ;;  %v15930_v37 = vpop.f32.mrf.mxu0 }
 0x5d7   :  { %v7566_v42 = vpop.f32.mrf.mxu1  ;;  %7971 = vmatmul.mubr.bf16.gmra.mxu0 %v7765_v1 }
 0x5d8   :  { %v7567_v10 = vadd.f32 %v7566_v42, %v7374_v12  ;;  %v7709_v16 = vmax.f32 %v7565_v2, 0.0  ;;  %v7394_v12 = vadd.f32 %v15823_v13, %v15855_v18  ;;  %v7400_v13 = vadd.f32 %v15827_v50, %v15855_v18 }
 0x5d9   :  { %v7570_v45 = vpop.f32.mrf.mxu1 }
 0x5da   :  { %v7710_v55 = vmax.f32 %v7567_v10, 0.0  ;;  %v7767_v9 = vpack.c.bf16 %v7709_v16, %v7707_v51  ;;  %v7571_v15 = vadd.f32 %v7570_v45, %v7378_v34 }
 0x5db   :  { %v7572_v17 = vpop.f32.mrf.mxu1 }
 0x5dc   :  { %v7768_v54 = vpack.c.bf16 %v7710_v55, %v7708_v11  ;;  %v7573_v3 = vadd.f32 %v7572_v17, %v7380_v33  ;;  %v7711_v25 = vmax.f32 %v7571_v15, 0.0  ;;  %v15932_v55 = vpop.f32.mrf.mxu0  ;;  %v7402_v17 = vadd.f32 %v15829_v47, %v15858_v46 }
 0x5dd   :  { %v7574_v56 = vpop.f32.mrf.mxu1 }
 0x5de   :  { %v7575_v5 = vadd.f32 %v7574_v56, %v7382_v36  ;;  %7978 = vmatprep.mubr.bf16.mxu0 %v7768_v54  ;;  %v7712_v44 = vmax.f32 %v7573_v3, 0.0  ;;  %v7398_v36 = vadd.f32 %v15825_v29, %v15858_v46  ;;  %v15942_v3 = vpop.f32.mrf.mxu0 }
 0x5df   :  { %v7576_v0 = vpop.f32.mrf.mxu1  ;;  %7979 = vmatmul.mubr.bf16.gmra.mxu0 %v7767_v9  ;;  %v7404_v9 = vadd.f32 %v15831_v21, %v15855_v18  ;;  %v7410_v21 = vadd.f32 %v15835_v43, %v15855_v18 }
 0x5e0   :  { %v7577_v62 = vadd.f32 %v7576_v0, %v7384_v41  ;;  %v7713_v6 = vmax.f32 %v7575_v5, 0.0 }
 0x5e1   :  { %v7580_v59 = vpop.f32.mrf.mxu1 }
 0x5e2   :  { %v7714_v20 = vmax.f32 %v7577_v62, 0.0  ;;  %v7769_v1 = vpack.c.bf16 %v7713_v6, %v7711_v25  ;;  %v7581_v42 = vadd.f32 %v7580_v59, %v7388_v19  ;;  %v15944_v59 = vpop.f32.mrf.mxu0 }
 0x5e3   :  { %v7582_v63 = vpop.f32.mrf.mxu1 }
 0x5e4   :  { %v7770_v40 = vpack.c.bf16 %v7714_v20, %v7712_v44  ;;  %v7583_v7 = vadd.f32 %v7582_v63, %v7390_v22  ;;  %v7715_v35 = vmax.f32 %v7581_v42, 0.0  ;;  %v7412_v20 = vadd.f32 %v15837_v24, %v15858_v46 }
 0x5e5   :  { %v7584_v61 = vpop.f32.mrf.mxu1  ;;  %v7408_v63 = vadd.f32 %v15833_v26, %v15858_v46 }
 0x5e6   :  { %v7585_v2 = vadd.f32 %v7584_v61, %v7392_v32  ;;  %7986 = vmatprep.mubr.bf16.mxu0 %v7770_v40  ;;  %v7716_v45 = vmax.f32 %v7583_v7, 0.0  ;;  %v7414_v40 = vadd.f32 %v15839_v60, %v15855_v18  ;;  %v15954_v61 = vpop.f32.mrf.mxu0  ;;  %v7420_v60 = vadd.f32 %v15843_v27, %v15855_v18 }
 0x5e7   :  { %v7586_v10 = vpop.f32.mrf.mxu1  ;;  %7987 = vmatmul.mubr.bf16.gmra.mxu0 %v7769_v1 }
 0x5e8   :  { %v7587_v14 = vadd.f32 %v7586_v10, %v7394_v12  ;;  %v7717_v16 = vmax.f32 %v7585_v2, 0.0 }
 0x5e9   :  { %v7590_v53 = vpop.f32.mrf.mxu1 }
 0x5ea   :  { %v7718_v11 = vmax.f32 %v7587_v14, 0.0  ;;  %v7771_v54 = vpack.c.bf16 %v7717_v16, %v7715_v35  ;;  %v7591_v5 = vadd.f32 %v7590_v53, %v7398_v36  ;;  %v15956_v14 = vpop.f32.mrf.mxu0  ;;  %v7422_v53 = vadd.f32 %v15845_v30, %v15858_v46 }
 0x5eb   :  { %v7592_v51 = vpop.f32.mrf.mxu1 }
 0x5ec   :  { %v7772_v33 = vpack.c.bf16 %v7718_v11, %v7716_v45  ;;  %v7593_v56 = vadd.f32 %v7592_v51, %v7400_v13  ;;  %v7719_v29 = vmax.f32 %v7591_v5, 0.0  ;;  %v7418_v11 = vadd.f32 %v15841_v38, %v15858_v46  ;;  %v15966_v36 = vpop.f32.mrf.mxu0 }
 0x5ed   :  { %v7594_v34 = vpop.f32.mrf.mxu1  ;;  %v7424_v13 = vadd.f32 %v15847_v58, %v15855_v18  ;;  %v7430_v58 = vadd.f32 %v15860_v57, %v15855_v18 }
 0x5ee   :  { %v7595_v41 = vadd.f32 %v7594_v34, %v7402_v17  ;;  %7994 = vmatprep.mubr.bf16.mxu0 %v7772_v33  ;;  %v7720_v62 = vmax.f32 %v7593_v56, 0.0  ;;  %v15968_v5 = vpop.f32.mrf.mxu0 }
 0x5ef   :  { %v7596_v15 = vpop.f32.mrf.mxu1  ;;  %7995 = vmatmul.mubr.bf16.gmra.mxu0 %v7771_v54 }
 0x5f0   :  { %v7597_v50 = vadd.f32 %v7596_v15, %v7404_v9  ;;  %v7721_v0 = vmax.f32 %v7595_v41, 0.0 }
 0x5f1   :  { %v7600_v47 = vpop.f32.mrf.mxu1 }
 0x5f2   :  { %v7722_v6 = vmax.f32 %v7597_v50, 0.0  ;;  %v7773_v22 = vpack.c.bf16 %v7721_v0, %v7719_v29  ;;  %v7601_v12 = vadd.f32 %v7600_v47, %v7408_v63  ;;  %v7432_v50 = vadd.f32 %v15870_v49, %v15858_v46 }
 0x5f3   :  { %v7602_v44 = vpop.f32.mrf.mxu1  ;;  %v7428_v47 = vadd.f32 %v15852_v23, %v15858_v46  ;;  %v7434_v29 = vadd.f32 %v15878_v8, %v15855_v18  ;;  %v7440_v8 = vadd.f32 %v15896_v52, %v15855_v18 }
 0x5f4   :  { %v7774_v25 = vpack.c.bf16 %v7722_v6, %v7720_v62  ;;  %v7603_v19 = vadd.f32 %v7602_v44, %v7410_v21  ;;  %v7723_v26 = vmax.f32 %v7601_v12, 0.0  ;;  %v7442_v12 = vadd.f32 %v15906_v31, %v15858_v46 }
 0x5f5   :  { %v7604_v32 = vpop.f32.mrf.mxu1 }
 0x5f6   :  { %v7605_v1 = vadd.f32 %v7604_v32, %v7412_v20  ;;  %8002 = vmatprep.mubr.bf16.mxu0 %v7774_v25  ;;  %v7724_v42 = vmax.f32 %v7603_v19, 0.0  ;;  %v15978_v20 = vpop.f32.mrf.mxu0 }
 0x5f7   :  { %v7606_v7 = vpop.f32.mrf.mxu1  ;;  %8003 = vmatmul.mubr.bf16.gmra.mxu0 %v7773_v22 }
 0x5f8   :  { %v7607_v43 = vadd.f32 %v7606_v7, %v7414_v40  ;;  %v7725_v2 = vmax.f32 %v7605_v1, 0.0  ;;  %v15980_v19 = vpop.f32.mrf.mxu0 }
 0x5f9   :  { %v7610_v24 = vpop.f32.mrf.mxu1 }
 0x5fa   :  { %v7726_v10 = vmax.f32 %v7607_v43, 0.0  ;;  %v7775_v35 = vpack.c.bf16 %v7725_v2, %v7723_v26  ;;  %v7611_v54 = vadd.f32 %v7610_v24, %v7418_v11  ;;  %v7438_v43 = vadd.f32 %v15891_v4, %v15858_v46 }
 0x5fb   :  { %v7612_v16 = vpop.f32.mrf.mxu1 }
 0x5fc   :  { %v7776_v45 = vpack.c.bf16 %v7726_v10, %v7724_v42  ;;  %v7613_v17 = vadd.f32 %v7612_v16, %v7420_v60  ;;  %v7727_v38 = vmax.f32 %v7611_v54, 0.0  ;;  %v7444_v42 = vadd.f32 %v15908_v48, %v15855_v18  ;;  %v15990_v16 = vpop.f32.mrf.mxu0 }
 0x5fd   :  { %v7614_v51 = vpop.f32.mrf.mxu1  ;;  %v7450_v48 = vadd.f32 %v15920_v39, %v15855_v18  ;;  %v7448_v54 = vadd.f32 %v15918_v28, %v15858_v46 }
 0x5fe   :  { %v7615_v33 = vadd.f32 %v7614_v51, %v7422_v53  ;;  %8010 = vmatprep.mubr.bf16.mxu0 %v7776_v45  ;;  %v7728_v56 = vmax.f32 %v7613_v17, 0.0  ;;  %v15992_v51 = vpop.f32.mrf.mxu0  ;;  %v7452_v17 = vadd.f32 %v15930_v37, %v15858_v46 }
 0x5ff   :  { %v7616_v34 = vpop.f32.mrf.mxu1  ;;  %8011 = vmatmul.mubr.bf16.gmra.mxu0 %v7775_v35 }
 0x600   :  { %v7617_v27 = vadd.f32 %v7616_v34, %v7424_v13  ;;  %v7729_v9 = vmax.f32 %v7615_v33, 0.0  ;;  %v16005_v39 = vpop.f32.mrf.mxu0 }
 0x601   :  { %v7620_v30 = vpop.f32.mrf.mxu1 }
 0x602   :  { %v7730_v41 = vmax.f32 %v7617_v27, 0.0  ;;  %v7777_v62 = vpack.c.bf16 %v7729_v9, %v7727_v38  ;;  %v7621_v25 = vadd.f32 %v7620_v30, %v7428_v47  ;;  %v10718_v9 = vld [vmem:[%s16228_s9 + $0x18] sm:$0xff]   ;;  %v7454_v30 = vadd.f32 %v15932_v55, %v15855_v18  ;;  %v7483_v55 = vpop.f32.mrf.mxu0 }
 0x603   :  { %v7622_v15 = vpop.f32.mrf.mxu1  ;;  %9841 = vmatprep.subr.bf16.mxu1 %v10718_v9 }
 0x604   :  { %v7778_v0 = vpack.c.bf16 %v7730_v41, %v7728_v56  ;;  %v7623_v44 = vadd.f32 %v7622_v15, %v7430_v58  ;;  %v7731_v23 = vmax.f32 %v7621_v25, 0.0  ;;  %9842 = vmatpush3.bf16.msra.mxu1 %v10718_v9  ;;  %v7458_v25 = vadd.f32 %v15942_v3, %v15858_v46 }
 0x605   :  { %v7624_v6 = vpop.f32.mrf.mxu1 }
 0x606   :  { %v7625_v21 = vadd.f32 %v7624_v6, %v7432_v50  ;;  %8018 = vmatprep.mubr.bf16.mxu0 %v7778_v0  ;;  %v7732_v32 = vmax.f32 %v7623_v44, 0.0  ;;  %v10719_v50 = vld [vmem:[%s16228_s9 + $0x10] sm:$0xff]   ;;  %v7462_v44 = vadd.f32 %v15954_v61, %v15858_v46 }
 0x607   :  { %v7626_v63 = vpop.f32.mrf.mxu1  ;;  %8019 = vmatmul.mubr.bf16.gmra.mxu0 %v7777_v62  ;;  %9843 = vmatprep.subr.bf16.mxu1 %v10719_v50 }
 0x608   :  { %v7627_v57 = vadd.f32 %v7626_v63, %v7434_v29  ;;  %v7733_v22 = vmax.f32 %v7625_v21, 0.0  ;;  %v7460_v29 = vadd.f32 %v15944_v59, %v15855_v18  ;;  %9844 = vmatpush3.bf16.msra.mxu1 %v10719_v50  ;;  %v16021_v59 = vpop.f32.mrf.mxu0 }
 0x609   :  { %v7630_v49 = vpop.f32.mrf.mxu1 }
 0x60a   :  { %v7734_v40 = vmax.f32 %v7627_v57, 0.0  ;;  %v7779_v2 = vpack.c.bf16 %v7733_v22, %v7731_v23  ;;  %v7631_v60 = vadd.f32 %v7630_v49, %v7438_v43  ;;  %v10720_v22 = vld [vmem:[%s16228_s9 + $0x8] sm:$0xff]   ;;  %v7464_v49 = vadd.f32 %v15956_v14, %v15855_v18  ;;  %v7489_v14 = vpop.f32.mrf.mxu0 }
 0x60b   :  { %v7632_v1 = vpop.f32.mrf.mxu1  ;;  %9845 = vmatprep.subr.bf16.mxu1 %v10720_v22 }
 0x60c   :  { %v7780_v7 = vpack.c.bf16 %v7734_v40, %v7732_v32  ;;  %v7633_v10 = vadd.f32 %v7632_v1, %v7440_v8  ;;  %v7735_v4 = vmax.f32 %v7631_v60, 0.0  ;;  %9846 = vmatpush3.bf16.msra.mxu1 %v10720_v22  ;;  %v7468_v60 = vadd.f32 %v15966_v36, %v15858_v46 }
 0x60d   :  { %v7634_v24 = vpop.f32.mrf.mxu1 }
 0x60e   :  { %v7635_v26 = vadd.f32 %v7634_v24, %v7442_v12  ;;  %8026 = vmatprep.mubr.bf16.mxu0 %v7780_v7  ;;  %v7736_v11 = vmax.f32 %v7633_v10, 0.0  ;;  %v10721_v12 = vld [vmem:[%s16228_s9] sm:$0xff]   ;;  %v7472_v10 = vadd.f32 %v15978_v20, %v15858_v46 }
 0x60f   :  { %v7636_v53 = vpop.f32.mrf.mxu1  ;;  %8027 = vmatmul.mubr.bf16.gmra.mxu0 %v7779_v2  ;;  %9847 = vmatprep.subr.bf16.mxu1 %v10721_v12 }
 0x610   :  { %v7637_v52 = vadd.f32 %v7636_v53, %v7444_v42  ;;  %v7737_v45 = vmax.f32 %v7635_v26, 0.0  ;;  %v7470_v42 = vadd.f32 %v15968_v5, %v15855_v18  ;;  %9848 = vmatpush3.bf16.msra.mxu1 %v10721_v12 }
 0x611   :  { %v7640_v31 = vpop.f32.mrf.mxu1 }
 0x612   :  { %v7738_v35 = vmax.f32 %v7637_v52, 0.0  ;;  %v7781_v34 = vpack.c.bf16 %v7737_v45, %v7735_v4  ;;  %v7641_v38 = vadd.f32 %v7640_v31, %v7448_v54  ;;  %v7474_v45 = vadd.f32 %v15980_v19, %v15855_v18 }
 0x613   :  { %v7642_v13 = vpop.f32.mrf.mxu1  ;;  %v7482_v19 = vadd.f32 %v16005_v39, %v15858_v46 }
 0x614   :  { %v7782_v33 = vpack.c.bf16 %v7738_v35, %v7736_v11  ;;  %v7643_v56 = vadd.f32 %v7642_v13, %v7450_v48  ;;  %v7739_v62 = vmax.f32 %v7641_v38, 0.0  ;;  %v7491_v35 = vpop.f32.mrf.mxu0  ;;  %v7484_v38 = vadd.f32 %v7483_v55, %v15855_v18 }
 0x615   :  { %v7644_v27 = vpop.f32.mrf.mxu1 }
 0x616   :  { %v7645_v41 = vadd.f32 %v7644_v27, %v7452_v17  ;;  %8034 = vmatprep.mubr.bf16.mxu0 %v7782_v33  ;;  %v7740_v0 = vmax.f32 %v7643_v56, 0.0  ;;  %v7493_v54 = vpop.f32.mrf.mxu0  ;;  %v7480_v27 = vadd.f32 %v15992_v51, %v15855_v18 }
 0x617   :  { %v7646_v37 = vpop.f32.mrf.mxu1  ;;  %8035 = vmatmul.mubr.bf16.gmra.mxu0 %v7781_v34  ;;  %v7494_v22 = vadd.f32 %v7493_v54, %v15855_v18 }
 0x618   :  { %v7647_v15 = vadd.f32 %v7646_v37, %v7454_v30  ;;  %v7741_v28 = vmax.f32 %v7645_v41, 0.0  ;;  %v7478_v30 = vadd.f32 %v15990_v16, %v15858_v46  ;;  %v7490_v16 = vadd.f32 %v7489_v14, %v15855_v18 }
 0x619   :  { %v7650_v58 = vpop.f32.mrf.mxu1 }
 0x61a   :  { %v7742_v47 = vmax.f32 %v7647_v15, 0.0  ;;  %v7783_v63 = vpack.c.bf16 %v7741_v28, %v7739_v62  ;;  %v7651_v61 = vadd.f32 %v7650_v58, %v7458_v25  ;;  %v7497_v28 = vpop.f32.mrf.mxu0  ;;  %v7488_v25 = vadd.f32 %v16021_v59, %v15858_v46 }
 0x61b   :  { %v7652_v6 = vpop.f32.mrf.mxu1 }
 0x61c   :  { %v7784_v21 = vpack.c.bf16 %v7742_v47, %v7740_v0  ;;  %v7653_v32 = vadd.f32 %v7652_v6, %v7460_v29  ;;  %v7743_v2 = vmax.f32 %v7651_v61, 0.0  ;;  %v7499_v6 = vpop.f32.mrf.mxu0 }
 0x61d   :  { %v7654_v57 = vpop.f32.mrf.mxu1  ;;  %v7500_v59 = vadd.f32 %v7499_v6, %v15855_v18 }
 0x61e   :  { %v7655_v40 = vadd.f32 %v7654_v57, %v7462_v44  ;;  %8042 = vmatprep.mubr.bf16.mxu0 %v7784_v21  ;;  %v7744_v7 = vmax.f32 %v7653_v32, 0.0  ;;  %v7492_v21 = vadd.f32 %v7491_v35, %v15858_v46 }
 0x61f   :  { %v7656_v23 = vpop.f32.mrf.mxu1  ;;  %8043 = vmatmul.mubr.bf16.gmra.mxu0 %v7783_v63 }
 0x620   :  { %v7657_v1 = vadd.f32 %v7656_v23, %v7464_v49  ;;  %v7745_v3 = vmax.f32 %v7655_v40, 0.0  ;;  %v7501_v40 = vpop.f32.mrf.mxu0 }
 0x621   :  { %v7660_v8 = vpop.f32.mrf.mxu1 }
 0x622   :  { %v7746_v43 = vmax.f32 %v7657_v1, 0.0  ;;  %v7785_v53 = vpack.c.bf16 %v7745_v3, %v7743_v2  ;;  %v7661_v4 = vadd.f32 %v7660_v8, %v7468_v60 }
 0x623   :  { %v7662_v24 = vpop.f32.mrf.mxu1 }
 0x624   :  { %v7786_v26 = vpack.c.bf16 %v7746_v43, %v7744_v7  ;;  %v7663_v31 = vadd.f32 %v7662_v24, %v7470_v42  ;;  %v7747_v34 = vmax.f32 %v7661_v4, 0.0  ;;  %v7503_v43 = vpop.f32.mrf.mxu0  ;;  %v7502_v24 = vadd.f32 %v7501_v40, %v15858_v46 }
 0x625   :  { %v7664_v52 = vpop.f32.mrf.mxu1 }
 0x626   :  { %v7665_v11 = vadd.f32 %v7664_v52, %v7472_v10  ;;  %8050 = vmatprep.mubr.bf16.mxu0 %v7786_v26  ;;  %v7748_v17 = vmax.f32 %v7663_v31, 0.0  ;;  %v7498_v10 = vadd.f32 %v7497_v28, %v15858_v46 }
 0x627   :  { %v7666_v13 = vpop.f32.mrf.mxu1  ;;  %8051 = vmatmul.mubr.bf16.gmra.mxu0 %v7785_v53  ;;  %v7504_v53 = vadd.f32 %v7503_v43, %v15855_v18  ;;  %v16053_v18 = vld [vmem:[%s16229_s8] ss:$0 sm:$0xff] }
 0x628   :  { %v7667_v5 = vadd.f32 %v7666_v13, %v7474_v45  ;;  %v7749_v48 = vmax.f32 %v7665_v11, 0.0 }
 0x629   :  { %v7670_v20 = vpop.f32.mrf.mxu1 }
 0x62a   :  { %v7750_v33 = vmax.f32 %v7667_v5, 0.0  ;;  %v7787_v56 = vpack.c.bf16 %v7749_v48, %v7747_v34  ;;  %v7671_v58 = vadd.f32 %v7670_v20, %v7478_v30 }
 0x62b   :  { %v7672_v36 = vpop.f32.mrf.mxu1 }
 0x62c   :  { %v7788_v9 = vpack.c.bf16 %v7750_v33, %v7748_v17  ;;  %v7673_v37 = vadd.f32 %v7672_v36, %v7480_v27  ;;  %v7751_v29 = vmax.f32 %v7671_v58, 0.0 }
 0x62d   :  { %v7674_v41 = vpop.f32.mrf.mxu1 }
 0x62e   :  { %v7675_v15 = vadd.f32 %v7674_v41, %v7482_v19  ;;  %8058 = vmatprep.mubr.bf16.mxu0 %v7788_v9  ;;  %v7752_v62 = vmax.f32 %v7673_v37, 0.0 }
 0x62f   :  { %v7676_v50 = vpop.f32.mrf.mxu1  ;;  %8059 = vmatmul.mubr.bf16.gmra.mxu0 %v7787_v56 }
 0x630   :  { %v7677_v0 = vadd.f32 %v7676_v50, %v7484_v38  ;;  %v7753_v51 = vmax.f32 %v7675_v15, 0.0 }
 0x631   :  { %v7680_v47 = vpop.f32.mrf.mxu1 }
 0x632   :  { %v7754_v39 = vmax.f32 %v7677_v0, 0.0  ;;  %v7789_v63 = vpack.c.bf16 %v7753_v51, %v7751_v29  ;;  %v7681_v61 = vadd.f32 %v7680_v47, %v7488_v25 }
 0x633   :  { %v7682_v44 = vpop.f32.mrf.mxu1 }
 0x634   :  { %v7790_v55 = vpack.c.bf16 %v7754_v39, %v7752_v62  ;;  %v7683_v49 = vadd.f32 %v7682_v44, %v7490_v16  ;;  %v7755_v14 = vmax.f32 %v7681_v61, 0.0 }
 0x635   :  { %v7684_v57 = vpop.f32.mrf.mxu1 }
 0x636   :  { %v7685_v32 = vadd.f32 %v7684_v57, %v7492_v21  ;;  %8066 = vmatprep.mubr.bf16.mxu0 %v7790_v55  ;;  %v7756_v12 = vmax.f32 %v7683_v49, 0.0 }
 0x637   :  { %v7686_v23 = vpop.f32.mrf.mxu1  ;;  %8067 = vmatmul.mubr.bf16.gmra.mxu0 %v7789_v63 }
 0x638   :  { %v7687_v1 = vadd.f32 %v7686_v23, %v7494_v22  ;;  %v7757_v3 = vmax.f32 %v7685_v32, 0.0 }
 0x639   :  { %v7690_v8 = vpop.f32.mrf.mxu1 }
 0x63a   :  { %v7758_v7 = vmax.f32 %v7687_v1, 0.0  ;;  %v7791_v26 = vpack.c.bf16 %v7757_v3, %v7755_v14  ;;  %v7691_v31 = vadd.f32 %v7690_v8, %v7498_v10 }
 0x63b   :  { %v7692_v2 = vpop.f32.mrf.mxu1 }
 0x63c   :  { %v7792_v42 = vpack.c.bf16 %v7758_v7, %v7756_v12  ;;  %v7693_v52 = vadd.f32 %v7692_v2, %v7500_v59  ;;  %v7759_v48 = vmax.f32 %v7691_v31, 0.0 }
 0x63d   :  { %v7694_v60 = vpop.f32.mrf.mxu1 }
 0x63e   :  { %v7695_v45 = vadd.f32 %v7694_v60, %v7502_v24  ;;  %8074 = vmatprep.mubr.bf16.mxu0 %v7792_v42  ;;  %v7760_v13 = vmax.f32 %v7693_v52, 0.0 }
 0x63f   :  { %v7696_v11 = vpop.f32.mrf.mxu1  ;;  %8075 = vmatmul.mubr.bf16.gmra.mxu0 %v7791_v26 }
 0x640   :  { %v7697_v35 = vadd.f32 %v7696_v11, %v7504_v53  ;;  %v7761_v4 = vmax.f32 %v7695_v45, 0.0 }
 0x642   :  { %v7762_v5 = vmax.f32 %v7697_v35, 0.0  ;;  %v7793_v17 = vpack.c.bf16 %v7761_v4, %v7759_v48 }
 0x644   :  { %v7794_v20 = vpack.c.bf16 %v7762_v5, %v7760_v13 }
 0x646   :  { %8082 = vmatprep.mubr.bf16.mxu0 %v7794_v20 }
 0x647   :  { %8083 = vmatmul.mubr.bf16.gmra.mxu0 %v7793_v17 }
 0x68f   :  { %v9617_v46 = vpop.f32.mrf.mxu0 }
 0x691   :  { %v9618_v33 = vpop.f32.mrf.mxu0 }
 0x692   :  { %v9619_v54 = vadd.f32 %v9618_v33, %v9617_v46 }
 0x693   :  { %v9620_v34 = vpop.f32.mrf.mxu0 }
 0x694   :  { %v7965_v27 = vadd.f32 %v9619_v54, %v16053_v18 }
 0x695   :  { %v9621_v36 = vpop.f32.mrf.mxu0 }
 0x696   :  { %v9622_v19 = vadd.f32 %v9621_v36, %v9620_v34  ;;  %v8091_v41 = vmax.f32 %v7965_v27, 0.0 }
 0x697   :  { %v9623_v9 = vpop.f32.mrf.mxu0 }
 0x698   :  { %v7968_v30 = vadd.f32 %v9622_v19, %v16053_v18 }
 0x699   :  { %v9624_v56 = vpop.f32.mrf.mxu0 }
 0x69a   :  { %v8092_v38 = vmax.f32 %v7968_v30, 0.0  ;;  %v9625_v37 = vadd.f32 %v9624_v56, %v9623_v9 }
 0x69b   :  { %v9626_v15 = vpop.f32.mrf.mxu0 }
 0x69c   :  { %v8123_v28 = vpack.c.bf16 %v8092_v38, %v8091_v41  ;;  %v7973_v50 = vadd.f32 %v9625_v37, %v16053_v18 }
 0x69d   :  { %v9627_v58 = vpop.f32.mrf.mxu0 }
 0x69e   :  { %v9628_v0 = vadd.f32 %v9627_v58, %v9626_v15  ;;  %9849 = vmatprep.mubr.bf16.mxu1 %v8123_v28  ;;  %v8093_v39 = vmax.f32 %v7973_v50, 0.0 }
 0x69f   :  { %v9629_v51 = vpop.f32.mrf.mxu0 }
 0x6a0   :  { %v7976_v47 = vadd.f32 %v9628_v0, %v16053_v18 }
 0x6a1   :  { %v9630_v62 = vpop.f32.mrf.mxu0 }
 0x6a2   :  { %v8094_v6 = vmax.f32 %v7976_v47, 0.0  ;;  %v9631_v29 = vadd.f32 %v9630_v62, %v9629_v51 }
 0x6a3   :  { %v9632_v44 = vpop.f32.mrf.mxu0 }
 0x6a4   :  { %v8124_v16 = vpack.c.bf16 %v8094_v6, %v8093_v39  ;;  %v7981_v55 = vadd.f32 %v9631_v29, %v16053_v18 }
 0x6a5   :  { %v9633_v21 = vpop.f32.mrf.mxu0 }
 0x6a6   :  { %v9634_v25 = vadd.f32 %v9633_v21, %v9632_v44  ;;  %9850 = vmatmul.mubr.bf16.vlgmr.msra.gmra.mxu1 %v8124_v16  ;;  %v8095_v49 = vmax.f32 %v7981_v55, 0.0 }
 0x6a7   :  { %v9635_v63 = vpop.f32.mrf.mxu0 }
 0x6a8   :  { %v7984_v57 = vadd.f32 %v9634_v25, %v16053_v18 }
 0x6a9   :  { %v9636_v22 = vpop.f32.mrf.mxu0 }
 0x6aa   :  { %v8096_v32 = vmax.f32 %v7984_v57, 0.0  ;;  %v9637_v40 = vadd.f32 %v9636_v22, %v9635_v63 }
 0x6ab   :  { %v9638_v61 = vpop.f32.mrf.mxu0 }
 0x6ac   :  { %v8125_v23 = vpack.c.bf16 %v8096_v32, %v8095_v49  ;;  %v7989_v3 = vadd.f32 %v9637_v40, %v16053_v18 }
 0x6ad   :  { %v9639_v1 = vpop.f32.mrf.mxu0 }
 0x6ae   :  { %v9640_v8 = vadd.f32 %v9639_v1, %v9638_v61  ;;  %9853 = vmatprep.mubr.bf16.mxu1 %v8125_v23  ;;  %v8097_v14 = vmax.f32 %v7989_v3, 0.0 }
 0x6af   :  { %v9641_v12 = vpop.f32.mrf.mxu0 }
 0x6b0   :  { %v7992_v7 = vadd.f32 %v9640_v8, %v16053_v18 }
 0x6b1   :  { %v9642_v43 = vpop.f32.mrf.mxu0 }
 0x6b2   :  { %v8098_v2 = vmax.f32 %v7992_v7, 0.0  ;;  %v9643_v59 = vadd.f32 %v9642_v43, %v9641_v12 }
 0x6b3   :  { %v9644_v24 = vpop.f32.mrf.mxu0 }
 0x6b4   :  { %v8126_v42 = vpack.c.bf16 %v8098_v2, %v8097_v14  ;;  %v7997_v26 = vadd.f32 %v9643_v59, %v16053_v18 }
 0x6b5   :  { %v9645_v10 = vpop.f32.mrf.mxu0 }
 0x6b6   :  { %v9646_v60 = vadd.f32 %v9645_v10, %v9644_v24  ;;  %9854 = vmatmul.mubr.bf16.gmra.mxu1 %v8126_v42  ;;  %v8099_v31 = vmax.f32 %v7997_v26, 0.0 }
 0x6b7   :  { %v9647_v53 = vpop.f32.mrf.mxu0 }
 0x6b8   :  { %v8000_v52 = vadd.f32 %v9646_v60, %v16053_v18 }
 0x6b9   :  { %v9648_v45 = vpop.f32.mrf.mxu0 }
 0x6ba   :  { %v8100_v11 = vmax.f32 %v8000_v52, 0.0  ;;  %v9649_v35 = vadd.f32 %v9648_v45, %v9647_v53 }
 0x6bb   :  { %v9650_v4 = vpop.f32.mrf.mxu0 }
 0x6bc   :  { %v8127_v13 = vpack.c.bf16 %v8100_v11, %v8099_v31  ;;  %v8005_v48 = vadd.f32 %v9649_v35, %v16053_v18 }
 0x6bd   :  { %v9651_v5 = vpop.f32.mrf.mxu0 }
 0x6be   :  { %v9652_v20 = vadd.f32 %v9651_v5, %v9650_v4  ;;  %9857 = vmatprep.mubr.bf16.mxu1 %v8127_v13  ;;  %v8101_v54 = vmax.f32 %v8005_v48, 0.0 }
 0x6bf   :  { %v9653_v17 = vpop.f32.mrf.mxu0 }
 0x6c0   :  { %v8008_v46 = vadd.f32 %v9652_v20, %v16053_v18 }
 0x6c1   :  { %v9654_v33 = vpop.f32.mrf.mxu0 }
 0x6c2   :  { %v8102_v34 = vmax.f32 %v8008_v46, 0.0  ;;  %v9655_v36 = vadd.f32 %v9654_v33, %v9653_v17 }
 0x6c3   :  { %v9656_v27 = vpop.f32.mrf.mxu0 }
 0x6c4   :  { %v8128_v19 = vpack.c.bf16 %v8102_v34, %v8101_v54  ;;  %v8013_v30 = vadd.f32 %v9655_v36, %v16053_v18 }
 0x6c5   :  { %v9657_v9 = vpop.f32.mrf.mxu0 }
 0x6c6   :  { %v9658_v56 = vadd.f32 %v9657_v9, %v9656_v27  ;;  %9858 = vmatmul.mubr.bf16.gmra.mxu1 %v8128_v19  ;;  %v8103_v15 = vmax.f32 %v8013_v30, 0.0 }
 0x6c7   :  { %v9659_v41 = vpop.f32.mrf.mxu0 }
 0x6c8   :  { %v8016_v38 = vadd.f32 %v9658_v56, %v16053_v18 }
 0x6c9   :  { %v9660_v37 = vpop.f32.mrf.mxu0 }
 0x6ca   :  { %v8104_v28 = vmax.f32 %v8016_v38, 0.0  ;;  %v9661_v58 = vadd.f32 %v9660_v37, %v9659_v41 }
 0x6cb   :  { %v9662_v50 = vpop.f32.mrf.mxu0 }
 0x6cc   :  { %v8129_v0 = vpack.c.bf16 %v8104_v28, %v8103_v15  ;;  %v8021_v47 = vadd.f32 %v9661_v58, %v16053_v18 }
 0x6cd   :  { %v9663_v51 = vpop.f32.mrf.mxu0 }
 0x6ce   :  { %v9664_v62 = vadd.f32 %v9663_v51, %v9662_v50  ;;  %9861 = vmatprep.mubr.bf16.mxu1 %v8129_v0  ;;  %v8105_v44 = vmax.f32 %v8021_v47, 0.0 }
 0x6cf   :  { %v9665_v39 = vpop.f32.mrf.mxu0 }
 0x6d0   :  { %v8024_v6 = vadd.f32 %v9664_v62, %v16053_v18 }
 0x6d1   :  { %v9666_v29 = vpop.f32.mrf.mxu0 }
 0x6d2   :  { %v8106_v16 = vmax.f32 %v8024_v6, 0.0  ;;  %v9667_v21 = vadd.f32 %v9666_v29, %v9665_v39 }
 0x6d3   :  { %v9668_v55 = vpop.f32.mrf.mxu0 }
 0x6d4   :  { %v8130_v25 = vpack.c.bf16 %v8106_v16, %v8105_v44  ;;  %v8029_v57 = vadd.f32 %v9667_v21, %v16053_v18 }
 0x6d5   :  { %v9669_v63 = vpop.f32.mrf.mxu0 }
 0x6d6   :  { %v9670_v22 = vadd.f32 %v9669_v63, %v9668_v55  ;;  %9862 = vmatmul.mubr.bf16.gmra.mxu1 %v8130_v25  ;;  %v8107_v61 = vmax.f32 %v8029_v57, 0.0 }
 0x6d7   :  { %v9671_v49 = vpop.f32.mrf.mxu0 }
 0x6d8   :  { %v8032_v32 = vadd.f32 %v9670_v22, %v16053_v18 }
 0x6d9   :  { %v9672_v40 = vpop.f32.mrf.mxu0 }
 0x6da   :  { %v8108_v23 = vmax.f32 %v8032_v32, 0.0  ;;  %v9673_v1 = vadd.f32 %v9672_v40, %v9671_v49 }
 0x6db   :  { %v9674_v3 = vpop.f32.mrf.mxu0 }
 0x6dc   :  { %v8131_v8 = vpack.c.bf16 %v8108_v23, %v8107_v61  ;;  %v8037_v7 = vadd.f32 %v9673_v1, %v16053_v18 }
 0x6dd   :  { %v9675_v12 = vpop.f32.mrf.mxu0 }
 0x6de   :  { %v9676_v43 = vadd.f32 %v9675_v12, %v9674_v3  ;;  %9865 = vmatprep.mubr.bf16.mxu1 %v8131_v8  ;;  %v8109_v24 = vmax.f32 %v8037_v7, 0.0 }
 0x6df   :  { %v9677_v14 = vpop.f32.mrf.mxu0 }
 0x6e0   :  { %v8040_v2 = vadd.f32 %v9676_v43, %v16053_v18 }
 0x6e1   :  { %v9678_v59 = vpop.f32.mrf.mxu0 }
 0x6e2   :  { %v8110_v42 = vmax.f32 %v8040_v2, 0.0  ;;  %v9679_v10 = vadd.f32 %v9678_v59, %v9677_v14 }
 0x6e3   :  { %v9680_v26 = vpop.f32.mrf.mxu0 }
 0x6e4   :  { %v8132_v60 = vpack.c.bf16 %v8110_v42, %v8109_v24  ;;  %v8045_v52 = vadd.f32 %v9679_v10, %v16053_v18 }
 0x6e5   :  { %v9681_v53 = vpop.f32.mrf.mxu0 }
 0x6e6   :  { %v9682_v45 = vadd.f32 %v9681_v53, %v9680_v26  ;;  %9866 = vmatmul.mubr.bf16.gmra.mxu1 %v8132_v60  ;;  %v8111_v4 = vmax.f32 %v8045_v52, 0.0  ;;  %v16090_v60 = vld [vmem:[%s16230_s10] ss:$0 sm:$0xff] }
 0x6e7   :  { %v9683_v31 = vpop.f32.mrf.mxu0 }
 0x6e8   :  { %v8048_v11 = vadd.f32 %v9682_v45, %v16053_v18 }
 0x6e9   :  { %v9684_v35 = vpop.f32.mrf.mxu0 }
 0x6ea   :  { %v8112_v13 = vmax.f32 %v8048_v11, 0.0  ;;  %v9685_v5 = vadd.f32 %v9684_v35, %v9683_v31 }
 0x6eb   :  { %v9686_v48 = vpop.f32.mrf.mxu0 }
 0x6ec   :  { %v8133_v20 = vpack.c.bf16 %v8112_v13, %v8111_v4  ;;  %v8053_v46 = vadd.f32 %v9685_v5, %v16053_v18 }
 0x6ed   :  { %v9687_v17 = vpop.f32.mrf.mxu0 }
 0x6ee   :  { %v9688_v33 = vadd.f32 %v9687_v17, %v9686_v48  ;;  %9869 = vmatprep.mubr.bf16.mxu1 %v8133_v20  ;;  %v8113_v27 = vmax.f32 %v8053_v46, 0.0 }
 0x6ef   :  { %v9689_v54 = vpop.f32.mrf.mxu0 }
 0x6f0   :  { %v8056_v34 = vadd.f32 %v9688_v33, %v16053_v18 }
 0x6f1   :  { %v9690_v36 = vpop.f32.mrf.mxu0 }
 0x6f2   :  { %v8114_v19 = vmax.f32 %v8056_v34, 0.0  ;;  %v9691_v9 = vadd.f32 %v9690_v36, %v9689_v54 }
 0x6f3   :  { %v9692_v30 = vpop.f32.mrf.mxu0 }
 0x6f4   :  { %v8134_v56 = vpack.c.bf16 %v8114_v19, %v8113_v27  ;;  %v8061_v38 = vadd.f32 %v9691_v9, %v16053_v18 }
 0x6f5   :  { %v9693_v41 = vpop.f32.mrf.mxu0 }
 0x6f6   :  { %v9694_v37 = vadd.f32 %v9693_v41, %v9692_v30  ;;  %9870 = vmatmul.mubr.bf16.gmra.mxu1 %v8134_v56  ;;  %v8115_v50 = vmax.f32 %v8061_v38, 0.0 }
 0x6f7   :  { %v9695_v15 = vpop.f32.mrf.mxu0 }
 0x6f8   :  { %v8064_v28 = vadd.f32 %v9694_v37, %v16053_v18 }
 0x6f9   :  { %v9696_v58 = vpop.f32.mrf.mxu0 }
 0x6fa   :  { %v8116_v0 = vmax.f32 %v8064_v28, 0.0  ;;  %v9697_v51 = vadd.f32 %v9696_v58, %v9695_v15 }
 0x6fb   :  { %v9698_v47 = vpop.f32.mrf.mxu0 }
 0x6fc   :  { %v8135_v62 = vpack.c.bf16 %v8116_v0, %v8115_v50  ;;  %v8069_v6 = vadd.f32 %v9697_v51, %v16053_v18 }
 0x6fd   :  { %v9699_v39 = vpop.f32.mrf.mxu0 }
 0x6fe   :  { %v9700_v29 = vadd.f32 %v9699_v39, %v9698_v47  ;;  %9873 = vmatprep.mubr.bf16.mxu1 %v8135_v62  ;;  %v8117_v55 = vmax.f32 %v8069_v6, 0.0 }
 0x6ff   :  { %v9701_v44 = vpop.f32.mrf.mxu0 }
 0x700   :  { %v8072_v16 = vadd.f32 %v9700_v29, %v16053_v18 }
 0x701   :  { %v9702_v21 = vpop.f32.mrf.mxu0 }
 0x702   :  { %v8118_v25 = vmax.f32 %v8072_v16, 0.0  ;;  %v9703_v63 = vadd.f32 %v9702_v21, %v9701_v44 }
 0x703   :  { %v9704_v57 = vpop.f32.mrf.mxu0 }
 0x704   :  { %v8136_v22 = vpack.c.bf16 %v8118_v25, %v8117_v55  ;;  %v8077_v32 = vadd.f32 %v9703_v63, %v16053_v18 }
 0x705   :  { %v9705_v49 = vpop.f32.mrf.mxu0 }
 0x706   :  { %v9706_v40 = vadd.f32 %v9705_v49, %v9704_v57  ;;  %9874 = vmatmul.mubr.bf16.gmra.mxu1 %v8136_v22  ;;  %v8119_v3 = vmax.f32 %v8077_v32, 0.0 }
 0x707   :  { %v9707_v61 = vpop.f32.mrf.mxu0 }
 0x708   :  { %v8080_v23 = vadd.f32 %v9706_v40, %v16053_v18 }
 0x709   :  { %v9708_v1 = vpop.f32.mrf.mxu0 }
 0x70a   :  { %v8120_v8 = vmax.f32 %v8080_v23, 0.0  ;;  %v9709_v12 = vadd.f32 %v9708_v1, %v9707_v61 }
 0x70b   :  { %v9710_v7 = vpop.f32.mrf.mxu0 }
 0x70c   :  { %v8137_v43 = vpack.c.bf16 %v8120_v8, %v8119_v3  ;;  %v8085_v2 = vadd.f32 %v9709_v12, %v16053_v18 }
 0x70d   :  { %v9711_v14 = vpop.f32.mrf.mxu0 }
 0x70e   :  { %v9712_v59 = vadd.f32 %v9711_v14, %v9710_v7  ;;  %9877 = vmatprep.mubr.bf16.mxu1 %v8137_v43  ;;  %v8121_v42 = vmax.f32 %v8085_v2, 0.0 }
 0x710   :  { %v8088_v24 = vadd.f32 %v9712_v59, %v16053_v18 }
 0x712   :  { %v8122_v10 = vmax.f32 %v8088_v24, 0.0 }
 0x714   :  { %v8138_v26 = vpack.c.bf16 %v8122_v10, %v8121_v42 }
 0x716   :  { %9878 = vmatmul.mubr.bf16.gmra.mxu1 %v8138_v26 }
 0x766   :  { %v9851_v53 = vpop.f32.mrf.mxu1 }
 0x767   :  { %v8253_v52 = vadd.f32 %v9851_v53, %v16090_v60 }
 0x768   :  { %v8244_v45 = vpop.f32.mrf.mxu1 }
 0x769   :  { %8373 = vst [vmem:[%s16231_s11 + $0x10] sm:$0xff] %v8253_v52  ;;  %v8245_v31 = vadd.f32 %v16090_v60, %v8244_v45 }
 0x76a   :  { %v9852_v18 = vpop.f32.mrf.mxu1 }
 0x76b   :  { %8371 = vst [vmem:[%s16231_s11] sm:$0xff] %v8245_v31  ;;  %v8256_v11 = vadd.f32 %v9852_v18, %v16090_v60 }
 0x76c   :  { %v8247_v35 = vpop.f32.mrf.mxu1 }
 0x76d   :  { %8374 = vst [vmem:[%s16231_s11 + $0x18] sm:$0xff] %v8256_v11  ;;  %v8248_v4 = vadd.f32 %v16090_v60, %v8247_v35 }
 0x76f   :  { %8372 = vst [vmem:[%s16231_s11 + $0x8] sm:$0xff] %v8248_v4 }
 0x776   :  { %v9855_v13 = vpop.f32.mrf.mxu1 }
 0x777   :  { %v8269_v5 = vadd.f32 %v9855_v13, %v16090_v60 }
 0x778   :  { %v8260_v48 = vpop.f32.mrf.mxu1 }
 0x779   :  { %8377 = vst [vmem:[%s16231_s11 + $0x30] sm:$0xff] %v8269_v5  ;;  %v8261_v20 = vadd.f32 %v16090_v60, %v8260_v48 }
 0x77a   :  { %v9856_v17 = vpop.f32.mrf.mxu1 }
 0x77b   :  { %8375 = vst [vmem:[%s16231_s11 + $0x20] sm:$0xff] %v8261_v20  ;;  %v8272_v46 = vadd.f32 %v9856_v17, %v16090_v60 }
 0x77c   :  { %v8263_v33 = vpop.f32.mrf.mxu1 }
 0x77d   :  { %8378 = vst [vmem:[%s16231_s11 + $0x38] sm:$0xff] %v8272_v46  ;;  %v8264_v54 = vadd.f32 %v16090_v60, %v8263_v33 }
 0x77f   :  { %8376 = vst [vmem:[%s16231_s11 + $0x28] sm:$0xff] %v8264_v54 }
 0x786   :  { %v9859_v34 = vpop.f32.mrf.mxu1 }
 0x787   :  { %v8285_v36 = vadd.f32 %v9859_v34, %v16090_v60 }
 0x788   :  { %v8276_v27 = vpop.f32.mrf.mxu1 }
 0x789   :  { %8381 = vst [vmem:[%s16231_s11 + $0x50] sm:$0xff] %v8285_v36  ;;  %v8277_v19 = vadd.f32 %v16090_v60, %v8276_v27 }
 0x78a   :  { %v9860_v9 = vpop.f32.mrf.mxu1 }
 0x78b   :  { %8379 = vst [vmem:[%s16231_s11 + $0x40] sm:$0xff] %v8277_v19  ;;  %v8288_v30 = vadd.f32 %v9860_v9, %v16090_v60 }
 0x78c   :  { %v8279_v56 = vpop.f32.mrf.mxu1 }
 0x78d   :  { %8382 = vst [vmem:[%s16231_s11 + $0x58] sm:$0xff] %v8288_v30  ;;  %v8280_v41 = vadd.f32 %v16090_v60, %v8279_v56 }
 0x78f   :  { %8380 = vst [vmem:[%s16231_s11 + $0x48] sm:$0xff] %v8280_v41 }
 0x796   :  { %v9863_v38 = vpop.f32.mrf.mxu1 }
 0x797   :  { %v8301_v37 = vadd.f32 %v9863_v38, %v16090_v60 }
 0x798   :  { %v8292_v15 = vpop.f32.mrf.mxu1 }
 0x799   :  { %8385 = vst [vmem:[%s16231_s11 + $0x70] sm:$0xff] %v8301_v37  ;;  %v8293_v28 = vadd.f32 %v16090_v60, %v8292_v15 }
 0x79a   :  { %v9864_v58 = vpop.f32.mrf.mxu1 }
 0x79b   :  { %8383 = vst [vmem:[%s16231_s11 + $0x60] sm:$0xff] %v8293_v28  ;;  %v8304_v50 = vadd.f32 %v9864_v58, %v16090_v60 }
 0x79c   :  { %v8295_v0 = vpop.f32.mrf.mxu1 }
 0x79d   :  { %8386 = vst [vmem:[%s16231_s11 + $0x78] sm:$0xff] %v8304_v50  ;;  %v8296_v51 = vadd.f32 %v16090_v60, %v8295_v0 }
 0x79f   :  { %8384 = vst [vmem:[%s16231_s11 + $0x68] sm:$0xff] %v8296_v51 }
 0x7a6   :  { %v9867_v47 = vpop.f32.mrf.mxu1 }
 0x7a7   :  { %v8317_v62 = vadd.f32 %v9867_v47, %v16090_v60 }
 0x7a8   :  { %v8308_v39 = vpop.f32.mrf.mxu1 }
 0x7a9   :  { %8389 = vst [vmem:[%s16231_s11 + $0x90] sm:$0xff] %v8317_v62  ;;  %v8309_v6 = vadd.f32 %v16090_v60, %v8308_v39 }
 0x7aa   :  { %v9868_v29 = vpop.f32.mrf.mxu1 }
 0x7ab   :  { %8387 = vst [vmem:[%s16231_s11 + $0x80] sm:$0xff] %v8309_v6  ;;  %v8320_v44 = vadd.f32 %v9868_v29, %v16090_v60 }
 0x7ac   :  { %v8311_v16 = vpop.f32.mrf.mxu1 }
 0x7ad   :  { %8390 = vst [vmem:[%s16231_s11 + $0x98] sm:$0xff] %v8320_v44  ;;  %v8312_v21 = vadd.f32 %v16090_v60, %v8311_v16 }
 0x7af   :  { %8388 = vst [vmem:[%s16231_s11 + $0x88] sm:$0xff] %v8312_v21 }
 0x7b6   :  { %v9871_v55 = vpop.f32.mrf.mxu1 }
 0x7b7   :  { %v8333_v25 = vadd.f32 %v9871_v55, %v16090_v60 }
 0x7b8   :  { %v8324_v63 = vpop.f32.mrf.mxu1 }
 0x7b9   :  { %8393 = vst [vmem:[%s16231_s11 + $0xb0] sm:$0xff] %v8333_v25  ;;  %v8325_v57 = vadd.f32 %v16090_v60, %v8324_v63 }
 0x7ba   :  { %v9872_v22 = vpop.f32.mrf.mxu1 }
 0x7bb   :  { %8391 = vst [vmem:[%s16231_s11 + $0xa0] sm:$0xff] %v8325_v57  ;;  %v8336_v49 = vadd.f32 %v9872_v22, %v16090_v60 }
 0x7bc   :  { %v8327_v32 = vpop.f32.mrf.mxu1 }
 0x7bd   :  { %8394 = vst [vmem:[%s16231_s11 + $0xb8] sm:$0xff] %v8336_v49  ;;  %v8328_v40 = vadd.f32 %v16090_v60, %v8327_v32 }
 0x7bf   :  { %8392 = vst [vmem:[%s16231_s11 + $0xa8] sm:$0xff] %v8328_v40 }
 0x7c6   :  { %v9875_v61 = vpop.f32.mrf.mxu1 }
 0x7c7   :  { %v8349_v23 = vadd.f32 %v9875_v61, %v16090_v60 }
 0x7c8   :  { %v8340_v1 = vpop.f32.mrf.mxu1 }
 0x7c9   :  { %8397 = vst [vmem:[%s16231_s11 + $0xd0] sm:$0xff] %v8349_v23  ;;  %v8341_v3 = vadd.f32 %v16090_v60, %v8340_v1 }
 0x7ca   :  { %v9876_v8 = vpop.f32.mrf.mxu1 }
 0x7cb   :  { %8395 = vst [vmem:[%s16231_s11 + $0xc0] sm:$0xff] %v8341_v3  ;;  %v8352_v12 = vadd.f32 %v9876_v8, %v16090_v60 }
 0x7cc   :  { %v8343_v7 = vpop.f32.mrf.mxu1 }
 0x7cd   :  { %8398 = vst [vmem:[%s16231_s11 + $0xd8] sm:$0xff] %v8352_v12  ;;  %v8344_v43 = vadd.f32 %v16090_v60, %v8343_v7 }
 0x7cf   :  { %8396 = vst [vmem:[%s16231_s11 + $0xc8] sm:$0xff] %v8344_v43 }
 0x7d6   :  { %v9879_v14 = vpop.f32.mrf.mxu1 }
 0x7d7   :  { %v8365_v2 = vadd.f32 %v9879_v14, %v16090_v60 }
 0x7d8   :  { %v8356_v59 = vpop.f32.mrf.mxu1 }
 0x7d9   :  { %8401 = vst [vmem:[%s16231_s11 + $0xf0] sm:$0xff] %v8365_v2  ;;  %v8357_v24 = vadd.f32 %v16090_v60, %v8356_v59 }
 0x7da   :  { %v9880_v42 = vpop.f32.mrf.mxu1 }
 0x7db   :  { %8399 = vst [vmem:[%s16231_s11 + $0xe0] sm:$0xff] %v8357_v24  ;;  %v8368_v10 = vadd.f32 %v9880_v42, %v16090_v60 }
 0x7dc   :  { %v8359_v26 = vpop.f32.mrf.mxu1 }
 0x7dd   :  { %8402 = vst [vmem:[%s16231_s11 + $0xf8] sm:$0xff] %v8368_v10  ;;  %v8360_v53 = vadd.f32 %v16090_v60, %v8359_v26 }
 0x7df   :  { %8400 = vst [vmem:[%s16231_s11 + $0xe8] sm:$0xff] %v8360_v53 }

</bundles_post_ra>
